<compile_context>
chip_gen: v6e
topology: v6e:2x2x1
jax: 0.10.0
libtpu: 0.0.40
codegen_flags: <defaults>
</compile_context>

<pallas_src>
import functools

import jax
import jax.numpy as jnp
from jax import lax
from jax.experimental import pallas as pl
from jax.experimental.pallas import tpu as pltpu

K = 9        # 1x9 kernel taps
PAD = 4      # conv padding=(0, 4)
LPAD = 16    # scratch halo; multiple of 16 -> bf16 sublane-aligned interior stores
EPS = 1e-5

# Flipped to False at runtime if this jax build rejects single-buffered specs.
_WEIGHT_SINGLE_BUFFER = True


# ----------------------------- kernel body -----------------------------
def _conv1x9(xpad_ref, w_ref):
    """1x9 conv on a zero-haloed (TM, W + 2*LPAD, Cin) bf16 scratch -> f32.

    Per-tap accumulation: 9 MXU matmuls of contraction depth Cin, summed in
    f32.  No im2col materialization (the shifted windows are read, never
    stored), so the vector-store slot and VMEM stay quiet.
    """
    TM, Wp, Cin = xpad_ref.shape
    W = Wp - 2 * LPAD
    base = LPAD - PAD
    dn = (((2,), (0,)), ((), ()))      # contract channel axis with weight-in axis
    acc = lax.dot_general(xpad_ref[:, base:base + W, :], w_ref[0], dn,
                          preferred_element_type=jnp.float32)
    for k in range(1, K):
        acc = acc + lax.dot_general(xpad_ref[:, base + k:base + k + W, :],
                                    w_ref[k], dn,
                                    preferred_element_type=jnp.float32)
    return acc


def _basic_block_kernel(x_ref, w1_ref, s1_ref, b1_ref, w2_ref, s2_ref, b2_ref,
                        out_ref, xpad_ref, hpad_ref):
    """conv1x9 -> bn -> relu -> conv1x9 -> bn -> relu -> +x -> relu.

    x_ref:     (TM, W, Cin)  bf16, unpadded rows
    w*_ref:    (K, Cin, Cout) bf16, tap-major weights
    s*/b*:     (1, Cout) f32, folded BN scale / bias
    out_ref:   (TM, W, Cout) out_dtype
    xpad/hpad: (TM, W+2*LPAD, C) bf16 VMEM scratch with zero halos
    """
    TM, W, Cout = out_ref.shape
    Cin = x_ref.shape[-1]

    # Zero only the PAD halo columns the convs actually read.  Re-done every
    # step (a few masked columns, cheap) so the grid stays correct under
    # "parallel" semantics, where each TensorCore starts at its own id.
    xpad_ref[:, LPAD - PAD:LPAD, :] = jnp.zeros((TM, PAD, Cin), xpad_ref.dtype)
    xpad_ref[:, LPAD + W:LPAD + W + PAD, :] = jnp.zeros((TM, PAD, Cin),
                                                        xpad_ref.dtype)
    hpad_ref[:, LPAD - PAD:LPAD, :] = jnp.zeros((TM, PAD, Cout), hpad_ref.dtype)
    hpad_ref[:, LPAD + W:LPAD + W + PAD, :] = jnp.zeros((TM, PAD, Cout),
                                                        hpad_ref.dtype)

    # Interior store at sublane offset LPAD=16 -> aligned for bf16 (16/vreg).
    xpad_ref[:, LPAD:LPAD + W, :] = x_ref[...]

    s1 = s1_ref[...].reshape(1, 1, Cout)
    b1 = b1_ref[...].reshape(1, 1, Cout)
    s2 = s2_ref[...].reshape(1, 1, Cout)
    b2 = b2_ref[...].reshape(1, 1, Cout)

    # conv1 -> bn1 -> relu (f32), bf16 back into the padded scratch.
    h = jnp.maximum(_conv1x9(xpad_ref, w1_ref) * s1 + b1, 0.0)
    hpad_ref[:, LPAD:LPAD + W, :] = h.astype(hpad_ref.dtype)

    # conv2 -> bn2 -> relu, residual add (identity, unpadded block), relu.
    o = jnp.maximum(_conv1x9(hpad_ref, w2_ref) * s2 + b2, 0.0)
    out_ref[...] = jnp.maximum(
        o + x_ref[...].astype(jnp.float32), 0.0).astype(out_ref.dtype)


# ------------------------ tiling / VMEM policy -------------------------
def _vmem_caps():
    """(vmem_limit_bytes, working-set budget) per TPU generation."""
    phys = 0
    try:
        phys = int(pltpu.get_tpu_info().vmem_capacity_bytes)
    except Exception:        # noqa: BLE001 - unknown chip: be conservative
        pass
    if phys >= 100 * 1024 * 1024:                 # v5e / v6e: 128 MiB VMEM
        return 96 * 1024 * 1024, 64 * 1024 * 1024
    return 48 * 1024 * 1024, 24 * 1024 * 1024     # v7x (64 MiB / TC) or unknown


def _pick_tm(M, W, Cin, Cout, budget_bytes, out_bytes):
    """Largest row tile (multiple of 8) fitting the VMEM budget, capped so the
    grid has >= 4 steps when M allows (pipelining + both v7x TensorCores)."""
    Wp = W + 2 * LPAD
    weights = (K * Cin * Cout + K * Cout * Cout) * 2 + 4 * Cout * 4  # single-buffered

    def need(tm):
        blk_in = 2 * tm * W * Cin * 2                 # bf16 input block, double-buffered
        blk_out = 2 * tm * W * Cout * out_bytes       # output block, double-buffered
        scratch = tm * Wp * (Cin + Cout) * 2          # padded bf16 scratches
        temps = tm * W * (4 * Cout * 4 + Cin * 2)     # f32 accumulators / bf16 window temps
        return weights + blk_in + blk_out + scratch + temps

    cap = min(1024, max(8, -(-M // 4)))               # >= 4 grid steps when possible
    cap = -(-cap // 8) * 8
    tm = 8
    for cand in range(16, cap + 1, 8):
        if need(cand) <= budget_bytes:
            tm = cand
    return tm


def _fold_bn(gamma, beta, mean, var):
    s = gamma / jnp.sqrt(var + EPS)
    return s, beta - mean * s


# ------------------------------ launcher -------------------------------
def _basic_block_mwc(x, w1_kio, s1, b1, w2_kio, s2, b2, *,
                     out_dtype=jnp.float32, single_buffer_weights=True):
    """Fused BasicBlock on (M, W, C) activations. Returns (M, W, C)."""
    M, W, Cin = x.shape
    Cout = w1_kio.shape[-1]
    assert Cin == Cout, "identity residual requires inplanes == planes"
    assert w1_kio.shape == (K, Cin, Cout) and w2_kio.shape == (K, Cout, Cout)

    xb = x.astype(jnp.bfloat16)
    w1b = w1_kio.astype(jnp.bfloat16)
    w2b = w2_kio.astype(jnp.bfloat16)

    out_bytes = jnp.dtype(out_dtype).itemsize
    vmem_limit, vmem_budget = _vmem_caps()
    tm = _pick_tm(M, W, Cin, Cout, vmem_budget, out_bytes)
    grid = -(-M // tm)
    Mp = grid * tm
    if Mp != M:              # non-divisor row tiles: pad rows, slice them off
        xb = jnp.pad(xb, ((0, Mp - M), (0, 0), (0, 0)))

    Wp = W + 2 * LPAD

    def _const_spec(shape):
        # Grid-invariant block: single-buffer it (second pipeline buffer is
        # pure VMEM waste); fall back to the default if pipeline_mode is
        # unsupported by this jax build.
        idx = lambda i: (0,) * len(shape)
        if single_buffer_weights:
            return pl.BlockSpec(shape, idx,
                                pipeline_mode=pl.Buffered(buffer_count=1))
        return pl.BlockSpec(shape, idx)

    cost = pl.CostEstimate(
        flops=4 * Mp * W * K * Cin * Cout,     # two 1x9 convs, 2 flops / MAC
        transcendentals=0,
        bytes_accessed=(Mp * W * Cin * 2 + Mp * W * Cout * out_bytes
                        + (K * Cin * Cout + K * Cout * Cout) * 2
                        + 4 * Cout * 4))

    out = pl.pallas_call(
        _basic_block_kernel,
        out_shape=jax.ShapeDtypeStruct((Mp, W, Cout), out_dtype),
        grid_spec=pltpu.PrefetchScalarGridSpec(
            num_scalar_prefetch=0,
            grid=(grid,),
            in_specs=[
                pl.BlockSpec((tm, W, Cin), lambda i: (i, 0, 0)),
                _const_spec((K, Cin, Cout)),
                _const_spec((1, Cout)), _const_spec((1, Cout)),
                _const_spec((K, Cout, Cout)),
                _const_spec((1, Cout)), _const_spec((1, Cout)),
            ],
            out_specs=pl.BlockSpec((tm, W, Cout), lambda i: (i, 0, 0)),
            scratch_shapes=[
                pltpu.VMEM((tm, Wp, Cin), jnp.bfloat16),
                pltpu.VMEM((tm, Wp, Cout), jnp.bfloat16),
            ],
        ),
        compiler_params=pltpu.CompilerParams(
            dimension_semantics=("parallel",),
            vmem_limit_bytes=vmem_limit),
        cost_estimate=cost,
    )(xb,
      w1b, s1.reshape(1, Cout).astype(jnp.float32),
      b1.reshape(1, Cout).astype(jnp.float32),
      w2b, s2.reshape(1, Cout).astype(jnp.float32),
      b2.reshape(1, Cout).astype(jnp.float32))

    return out[:M] if Mp != M else out


@functools.partial(jax.jit, static_argnames=("single_buffer_weights", "out_dtype"))
def _basic_block_nchw(x_nchw, w1, g1, be1, rm1, rv1, w2, g2, be2, rm2, rv2,
                      *, single_buffer_weights=True, out_dtype=jnp.float32):
    """NCHW module wrapper.  Weights are tap-major (K, Cin, Cout), i.e.
    w[k, i, o] == torch_weight[o, i, 0, k]."""
    N, Cin, H, W = x_nchw.shape
    Cout = w1.shape[-1]
    x = jnp.transpose(x_nchw, (0, 2, 3, 1)).reshape(N * H, W, Cin)
    s1, b1 = _fold_bn(g1, be1, rm1, rv1)
    s2, b2 = _fold_bn(g2, be2, rm2, rv2)
    out = _basic_block_mwc(x, w1, s1, b1, w2, s2, b2,
                           out_dtype=out_dtype,
                           single_buffer_weights=single_buffer_weights)
    return jnp.transpose(out.reshape(N, H, W, Cout), (0, 3, 1, 2))


def basic_block_pallas(x_nchw, w1, g1, be1, rm1, rv1, w2, g2, be2, rm2, rv2):
    """Public entry point matching the PyTorch module (f32 NCHW in/out)."""
    global _WEIGHT_SINGLE_BUFFER
    args = (x_nchw, w1, g1, be1, rm1, rv1, w2, g2, be2, rm2, rv2)
    if _WEIGHT_SINGLE_BUFFER:
        try:
            return _basic_block_nchw(*args, single_buffer_weights=True)
        except Exception:     # noqa: BLE001 - jax rejected Buffered(1): fall back
            _WEIGHT_SINGLE_BUFFER = False
    return _basic_block_nchw(*args, single_buffer_weights=False)


# ---------------- pure-JAX reference (same semantics) ----------------
def _conv1x9_ref(x_nhwc, w_kio):
    return lax.conv_general_dilated(
        x_nhwc, w_kio[None], window_strides=(1, 1),
        padding=((0, 0), (PAD, PAD)),
        dimension_numbers=("NHWC", "HWIO", "NHWC"),
        preferred_element_type=jnp.float32)


def basic_block_ref(x_nchw, w1, g1, be1, rm1, rv1, w2, g2, be2, rm2, rv2,
                    compute_dtype=jnp.float32):
    """Module math; compute_dtype=bf16 mirrors the kernel's matmul precision."""
    x = jnp.transpose(x_nchw, (0, 2, 3, 1)).astype(compute_dtype)
    h = _conv1x9_ref(x, w1.astype(compute_dtype))
    h = (h - rm1) / jnp.sqrt(rv1 + EPS) * g1 + be1
    h = jnp.maximum(h, 0.0)
    h = _conv1x9_ref(h.astype(compute_dtype), w2.astype(compute_dtype))
    h = (h - rm2) / jnp.sqrt(rv2 + EPS) * g2 + be2
    h = jnp.maximum(h, 0.0)
    h = jnp.maximum(h + x.astype(jnp.float32), 0.0)
    return jnp.transpose(h, (0, 3, 1, 2))


if __name__ == "__main__":
    def run_case(N, C, H, W, key):
        ks = jax.random.split(key, 11)
        x = jax.random.normal(ks[0], (N, C, H, W), jnp.float32)
        w1 = 0.1 * jax.random.normal(ks[1], (K, C, C), jnp.float32)
        w2 = 0.1 * jax.random.normal(ks[2], (K, C, C), jnp.float32)
        g1 = jax.random.uniform(ks[3], (C,), jnp.float32, 0.5, 1.5)
        be1 = 0.1 * jax.random.normal(ks[4], (C,), jnp.float32)
        rm1 = 0.1 * jax.random.normal(ks[5], (C,), jnp.float32)
        rv1 = jax.random.uniform(ks[6], (C,), jnp.float32, 0.5, 1.5)
        g2 = jax.random.uniform(ks[7], (C,), jnp.float32, 0.5, 1.5)
        be2 = 0.1 * jax.random.normal(ks[8], (C,), jnp.float32)
        rm2 = 0.1 * jax.random.normal(ks[9], (C,), jnp.float32)
        rv2 = jax.random.uniform(ks[10], (C,), jnp.float32, 0.5, 1.5)

        args = (x, w1, g1, be1, rm1, rv1, w2, g2, be2, rm2, rv2)
        out = jax.block_until_ready(basic_block_pallas(*args))
        assert out.shape == (N, C, H, W)

        # Tight check vs reference at matched (bf16 matmul, f32 accum) precision.
        ref_m = basic_block_ref(*args, compute_dtype=jnp.bfloat16)
        err_m = float(jnp.max(jnp.abs(out - ref_m)))
        assert jnp.allclose(out, ref_m, atol=5e-3, rtol=5e-3), err_m

        # Loose sanity check vs exact fp32 module math (bf16 rounding slack).
        ref_f = basic_block_ref(*args, compute_dtype=jnp.float32)
        err_f = float(jnp.max(jnp.abs(out - ref_f)))
        assert jnp.allclose(out, ref_f, atol=0.15, rtol=0.05), err_f

    root = jax.random.PRNGKey(0)
    # Small module-consistent shapes (C=4, lane-sparse) -> tm=8, 4-step grid.
    run_case(2, 4, 16, 16, jax.random.fold_in(root, 0))
    # Lane-dense channels (production DAVEnet-like); exercises non-divisor
    # row tiling (M=4 padded to 8).
    run_case(2, 128, 2, 16, jax.random.fold_in(root, 1))
    print("KERNEL_OK")
</pallas_src>

<mosaic_0001>
module attributes {stable_mosaic.version = 11 : i64} {
  func.func @_basic_block_kernel(%arg0: i32, %arg1: memref<8x16x4xbf16, #tpu.memory_space<vmem>>, %arg2: memref<9x4x4xbf16, #tpu.memory_space<vmem>>, %arg3: memref<1x4xf32, #tpu.memory_space<vmem>>, %arg4: memref<1x4xf32, #tpu.memory_space<vmem>>, %arg5: memref<9x4x4xbf16, #tpu.memory_space<vmem>>, %arg6: memref<1x4xf32, #tpu.memory_space<vmem>>, %arg7: memref<1x4xf32, #tpu.memory_space<vmem>>, %arg8: memref<8x16x4xf32, #tpu.memory_space<vmem>>, %arg9: memref<8x48x4xbf16, #tpu.memory_space<vmem>>, %arg10: memref<8x48x4xbf16, #tpu.memory_space<vmem>>) attributes {dimension_semantics = [#tpu.dimension_semantics<parallel>], iteration_bounds = array<i64: 4>, scalar_prefetch = 0 : i64, scratch_operands = 2 : i64, tpu.core_type = #tpu.core_type<tc>, window_params = [{transform_indices = @transform_0, window_bounds = array<i64: 8, 16, 4>}, {pipeline_mode = #tpu.pipeline_mode<synchronous>, transform_indices = @transform_1, window_bounds = array<i64: 9, 4, 4>}, {pipeline_mode = #tpu.pipeline_mode<synchronous>, transform_indices = @transform_2, window_bounds = array<i64: 1, 4>}, {pipeline_mode = #tpu.pipeline_mode<synchronous>, transform_indices = @transform_3, window_bounds = array<i64: 1, 4>}, {pipeline_mode = #tpu.pipeline_mode<synchronous>, transform_indices = @transform_4, window_bounds = array<i64: 9, 4, 4>}, {pipeline_mode = #tpu.pipeline_mode<synchronous>, transform_indices = @transform_5, window_bounds = array<i64: 1, 4>}, {pipeline_mode = #tpu.pipeline_mode<synchronous>, transform_indices = @transform_6, window_bounds = array<i64: 1, 4>}, {transform_indices = @transform_7, window_bounds = array<i64: 8, 16, 4>}]} {
    %cst = arith.constant 0.000000e+00 : bf16
    %0 = vector.broadcast %cst : bf16 to vector<8x4x4xbf16>
    %c0 = arith.constant 0 : index
    %c12 = arith.constant 12 : index
    %c0_0 = arith.constant 0 : index
    %1 = vector.load %arg9[%c0, %c12, %c0_0] : memref<8x48x4xbf16, #tpu.memory_space<vmem>>, vector<8x4x4xbf16>
    tpu.vector_store %arg9[%c0, %c12, %c0_0], %0 {strides = array<i32>} : memref<8x48x4xbf16, #tpu.memory_space<vmem>>, vector<8x4x4xbf16>,
    %cst_1 = arith.constant 0.000000e+00 : bf16
    %2 = vector.broadcast %cst_1 : bf16 to vector<8x4x4xbf16>
    %c0_2 = arith.constant 0 : index
    %c32 = arith.constant 32 : index
    %c0_3 = arith.constant 0 : index
    %3 = vector.load %arg9[%c0_2, %c32, %c0_3] : memref<8x48x4xbf16, #tpu.memory_space<vmem>>, vector<8x4x4xbf16>
    tpu.vector_store %arg9[%c0_2, %c32, %c0_3], %2 {strides = array<i32>} : memref<8x48x4xbf16, #tpu.memory_space<vmem>>, vector<8x4x4xbf16>,
    %cst_4 = arith.constant 0.000000e+00 : bf16
    %4 = vector.broadcast %cst_4 : bf16 to vector<8x4x4xbf16>
    %c0_5 = arith.constant 0 : index
    %c12_6 = arith.constant 12 : index
    %c0_7 = arith.constant 0 : index
    %5 = vector.load %arg10[%c0_5, %c12_6, %c0_7] : memref<8x48x4xbf16, #tpu.memory_space<vmem>>, vector<8x4x4xbf16>
    tpu.vector_store %arg10[%c0_5, %c12_6, %c0_7], %4 {strides = array<i32>} : memref<8x48x4xbf16, #tpu.memory_space<vmem>>, vector<8x4x4xbf16>,
    %cst_8 = arith.constant 0.000000e+00 : bf16
    %6 = vector.broadcast %cst_8 : bf16 to vector<8x4x4xbf16>
    %c0_9 = arith.constant 0 : index
    %c32_10 = arith.constant 32 : index
    %c0_11 = arith.constant 0 : index
    %7 = vector.load %arg10[%c0_9, %c32_10, %c0_11] : memref<8x48x4xbf16, #tpu.memory_space<vmem>>, vector<8x4x4xbf16>
    tpu.vector_store %arg10[%c0_9, %c32_10, %c0_11], %6 {strides = array<i32>} : memref<8x48x4xbf16, #tpu.memory_space<vmem>>, vector<8x4x4xbf16>,
    %c0_12 = arith.constant 0 : index
    %c0_13 = arith.constant 0 : index
    %c0_14 = arith.constant 0 : index
    %8 = vector.load %arg1[%c0_12, %c0_13, %c0_14] : memref<8x16x4xbf16, #tpu.memory_space<vmem>>, vector<8x16x4xbf16>
    %c0_15 = arith.constant 0 : index
    %c16 = arith.constant 16 : index
    %c0_16 = arith.constant 0 : index
    %9 = vector.load %arg9[%c0_15, %c16, %c0_16] : memref<8x48x4xbf16, #tpu.memory_space<vmem>>, vector<8x16x4xbf16>
    tpu.vector_store %arg9[%c0_15, %c16, %c0_16], %8 {strides = array<i32>} : memref<8x48x4xbf16, #tpu.memory_space<vmem>>, vector<8x16x4xbf16>,
    %c0_17 = arith.constant 0 : index
    %c0_18 = arith.constant 0 : index
    %10 = vector.load %arg3[%c0_17, %c0_18] : memref<1x4xf32, #tpu.memory_space<vmem>>, vector<1x4xf32>
    %11 = vector.shape_cast %10 : vector<1x4xf32> to vector<1x1x4xf32>
    %c0_19 = arith.constant 0 : index
    %c0_20 = arith.constant 0 : index
    %12 = vector.load %arg4[%c0_19, %c0_20] : memref<1x4xf32, #tpu.memory_space<vmem>>, vector<1x4xf32>
    %13 = vector.shape_cast %12 : vector<1x4xf32> to vector<1x1x4xf32>
    %c0_21 = arith.constant 0 : index
    %c0_22 = arith.constant 0 : index
    %14 = vector.load %arg6[%c0_21, %c0_22] : memref<1x4xf32, #tpu.memory_space<vmem>>, vector<1x4xf32>
    %15 = vector.shape_cast %14 : vector<1x4xf32> to vector<1x1x4xf32>
    %c0_23 = arith.constant 0 : index
    %c0_24 = arith.constant 0 : index
    %16 = vector.load %arg7[%c0_23, %c0_24] : memref<1x4xf32, #tpu.memory_space<vmem>>, vector<1x4xf32>
    %17 = vector.shape_cast %16 : vector<1x4xf32> to vector<1x1x4xf32>
    %c0_25 = arith.constant 0 : index
    %c12_26 = arith.constant 12 : index
    %c0_27 = arith.constant 0 : index
    %18 = vector.load %arg9[%c0_25, %c12_26, %c0_27] : memref<8x48x4xbf16, #tpu.memory_space<vmem>>, vector<8x16x4xbf16>
    %c0_28 = arith.constant 0 : index
    %c0_29 = arith.constant 0 : index
    %c0_30 = arith.constant 0 : index
    %19 = vector.load %arg2[%c0_28, %c0_29, %c0_30] : memref<9x4x4xbf16, #tpu.memory_space<vmem>>, vector<1x4x4xbf16>
    %20 = vector.shape_cast %19 : vector<1x4x4xbf16> to vector<4x4xbf16>
    %cst_31 = arith.constant dense<0.000000e+00> : vector<8x16x4xf32>
    %21 = tpu.matmul %18, %20, %cst_31 {dimension_numbers = #tpu.dot_dimension_numbers<[2], [0], [0, 1], [1], [0, 0, 0, 1, 1, 1], [], []>} : vector<8x16x4xbf16>, vector<4x4xbf16>, vector<8x16x4xf32> -> vector<8x16x4xf32>
    %c0_32 = arith.constant 0 : index
    %c13 = arith.constant 13 : index
    %c0_33 = arith.constant 0 : index
    %22 = vector.load %arg9[%c0_32, %c13, %c0_33] : memref<8x48x4xbf16, #tpu.memory_space<vmem>>, vector<8x16x4xbf16>
    %c1 = arith.constant 1 : index
    %c0_34 = arith.constant 0 : index
    %c0_35 = arith.constant 0 : index
    %23 = vector.load %arg2[%c1, %c0_34, %c0_35] : memref<9x4x4xbf16, #tpu.memory_space<vmem>>, vector<1x4x4xbf16>
    %24 = vector.shape_cast %23 : vector<1x4x4xbf16> to vector<4x4xbf16>
    %cst_36 = arith.constant dense<0.000000e+00> : vector<8x16x4xf32>
    %25 = tpu.matmul %22, %24, %cst_36 {dimension_numbers = #tpu.dot_dimension_numbers<[2], [0], [0, 1], [1], [0, 0, 0, 1, 1, 1], [], []>} : vector<8x16x4xbf16>, vector<4x4xbf16>, vector<8x16x4xf32> -> vector<8x16x4xf32>
    %26 = arith.addf %21, %25 : vector<8x16x4xf32>
    %c0_37 = arith.constant 0 : index
    %c14 = arith.constant 14 : index
    %c0_38 = arith.constant 0 : index
    %27 = vector.load %arg9[%c0_37, %c14, %c0_38] : memref<8x48x4xbf16, #tpu.memory_space<vmem>>, vector<8x16x4xbf16>
    %c2 = arith.constant 2 : index
    %c0_39 = arith.constant 0 : index
    %c0_40 = arith.constant 0 : index
    %28 = vector.load %arg2[%c2, %c0_39, %c0_40] : memref<9x4x4xbf16, #tpu.memory_space<vmem>>, vector<1x4x4xbf16>
    %29 = vector.shape_cast %28 : vector<1x4x4xbf16> to vector<4x4xbf16>
    %cst_41 = arith.constant dense<0.000000e+00> : vector<8x16x4xf32>
    %30 = tpu.matmul %27, %29, %cst_41 {dimension_numbers = #tpu.dot_dimension_numbers<[2], [0], [0, 1], [1], [0, 0, 0, 1, 1, 1], [], []>} : vector<8x16x4xbf16>, vector<4x4xbf16>, vector<8x16x4xf32> -> vector<8x16x4xf32>
    %31 = arith.addf %26, %30 : vector<8x16x4xf32>
    %c0_42 = arith.constant 0 : index
    %c15 = arith.constant 15 : index
    %c0_43 = arith.constant 0 : index
    %32 = vector.load %arg9[%c0_42, %c15, %c0_43] : memref<8x48x4xbf16, #tpu.memory_space<vmem>>, vector<8x16x4xbf16>
    %c3 = arith.constant 3 : index
    %c0_44 = arith.constant 0 : index
    %c0_45 = arith.constant 0 : index
    %33 = vector.load %arg2[%c3, %c0_44, %c0_45] : memref<9x4x4xbf16, #tpu.memory_space<vmem>>, vector<1x4x4xbf16>
    %34 = vector.shape_cast %33 : vector<1x4x4xbf16> to vector<4x4xbf16>
    %cst_46 = arith.constant dense<0.000000e+00> : vector<8x16x4xf32>
    %35 = tpu.matmul %32, %34, %cst_46 {dimension_numbers = #tpu.dot_dimension_numbers<[2], [0], [0, 1], [1], [0, 0, 0, 1, 1, 1], [], []>} : vector<8x16x4xbf16>, vector<4x4xbf16>, vector<8x16x4xf32> -> vector<8x16x4xf32>
    %36 = arith.addf %31, %35 : vector<8x16x4xf32>
    %c0_47 = arith.constant 0 : index
    %c16_48 = arith.constant 16 : index
    %c0_49 = arith.constant 0 : index
    %37 = vector.load %arg9[%c0_47, %c16_48, %c0_49] : memref<8x48x4xbf16, #tpu.memory_space<vmem>>, vector<8x16x4xbf16>
    %c4 = arith.constant 4 : index
    %c0_50 = arith.constant 0 : index
    %c0_51 = arith.constant 0 : index
    %38 = vector.load %arg2[%c4, %c0_50, %c0_51] : memref<9x4x4xbf16, #tpu.memory_space<vmem>>, vector<1x4x4xbf16>
    %39 = vector.shape_cast %38 : vector<1x4x4xbf16> to vector<4x4xbf16>
    %cst_52 = arith.constant dense<0.000000e+00> : vector<8x16x4xf32>
    %40 = tpu.matmul %37, %39, %cst_52 {dimension_numbers = #tpu.dot_dimension_numbers<[2], [0], [0, 1], [1], [0, 0, 0, 1, 1, 1], [], []>} : vector<8x16x4xbf16>, vector<4x4xbf16>, vector<8x16x4xf32> -> vector<8x16x4xf32>
    %41 = arith.addf %36, %40 : vector<8x16x4xf32>
    %c0_53 = arith.constant 0 : index
    %c17 = arith.constant 17 : index
    %c0_54 = arith.constant 0 : index
    %42 = vector.load %arg9[%c0_53, %c17, %c0_54] : memref<8x48x4xbf16, #tpu.memory_space<vmem>>, vector<8x16x4xbf16>
    %c5 = arith.constant 5 : index
    %c0_55 = arith.constant 0 : index
    %c0_56 = arith.constant 0 : index
    %43 = vector.load %arg2[%c5, %c0_55, %c0_56] : memref<9x4x4xbf16, #tpu.memory_space<vmem>>, vector<1x4x4xbf16>
    %44 = vector.shape_cast %43 : vector<1x4x4xbf16> to vector<4x4xbf16>
    %cst_57 = arith.constant dense<0.000000e+00> : vector<8x16x4xf32>
    %45 = tpu.matmul %42, %44, %cst_57 {dimension_numbers = #tpu.dot_dimension_numbers<[2], [0], [0, 1], [1], [0, 0, 0, 1, 1, 1], [], []>} : vector<8x16x4xbf16>, vector<4x4xbf16>, vector<8x16x4xf32> -> vector<8x16x4xf32>
    %46 = arith.addf %41, %45 : vector<8x16x4xf32>
    %c0_58 = arith.constant 0 : index
    %c18 = arith.constant 18 : index
    %c0_59 = arith.constant 0 : index
    %47 = vector.load %arg9[%c0_58, %c18, %c0_59] : memref<8x48x4xbf16, #tpu.memory_space<vmem>>, vector<8x16x4xbf16>
    %c6 = arith.constant 6 : index
    %c0_60 = arith.constant 0 : index
    %c0_61 = arith.constant 0 : index
    %48 = vector.load %arg2[%c6, %c0_60, %c0_61] : memref<9x4x4xbf16, #tpu.memory_space<vmem>>, vector<1x4x4xbf16>
    %49 = vector.shape_cast %48 : vector<1x4x4xbf16> to vector<4x4xbf16>
    %cst_62 = arith.constant dense<0.000000e+00> : vector<8x16x4xf32>
    %50 = tpu.matmul %47, %49, %cst_62 {dimension_numbers = #tpu.dot_dimension_numbers<[2], [0], [0, 1], [1], [0, 0, 0, 1, 1, 1], [], []>} : vector<8x16x4xbf16>, vector<4x4xbf16>, vector<8x16x4xf32> -> vector<8x16x4xf32>
    %51 = arith.addf %46, %50 : vector<8x16x4xf32>
    %c0_63 = arith.constant 0 : index
    %c19 = arith.constant 19 : index
    %c0_64 = arith.constant 0 : index
    %52 = vector.load %arg9[%c0_63, %c19, %c0_64] : memref<8x48x4xbf16, #tpu.memory_space<vmem>>, vector<8x16x4xbf16>
    %c7 = arith.constant 7 : index
    %c0_65 = arith.constant 0 : index
    %c0_66 = arith.constant 0 : index
    %53 = vector.load %arg2[%c7, %c0_65, %c0_66] : memref<9x4x4xbf16, #tpu.memory_space<vmem>>, vector<1x4x4xbf16>
    %54 = vector.shape_cast %53 : vector<1x4x4xbf16> to vector<4x4xbf16>
    %cst_67 = arith.constant dense<0.000000e+00> : vector<8x16x4xf32>
    %55 = tpu.matmul %52, %54, %cst_67 {dimension_numbers = #tpu.dot_dimension_numbers<[2], [0], [0, 1], [1], [0, 0, 0, 1, 1, 1], [], []>} : vector<8x16x4xbf16>, vector<4x4xbf16>, vector<8x16x4xf32> -> vector<8x16x4xf32>
    %56 = arith.addf %51, %55 : vector<8x16x4xf32>
    %c0_68 = arith.constant 0 : index
    %c20 = arith.constant 20 : index
    %c0_69 = arith.constant 0 : index
    %57 = vector.load %arg9[%c0_68, %c20, %c0_69] : memref<8x48x4xbf16, #tpu.memory_space<vmem>>, vector<8x16x4xbf16>
    %c8 = arith.constant 8 : index
    %c0_70 = arith.constant 0 : index
    %c0_71 = arith.constant 0 : index
    %58 = vector.load %arg2[%c8, %c0_70, %c0_71] : memref<9x4x4xbf16, #tpu.memory_space<vmem>>, vector<1x4x4xbf16>
    %59 = vector.shape_cast %58 : vector<1x4x4xbf16> to vector<4x4xbf16>
    %cst_72 = arith.constant dense<0.000000e+00> : vector<8x16x4xf32>
    %60 = tpu.matmul %57, %59, %cst_72 {dimension_numbers = #tpu.dot_dimension_numbers<[2], [0], [0, 1], [1], [0, 0, 0, 1, 1, 1], [], []>} : vector<8x16x4xbf16>, vector<4x4xbf16>, vector<8x16x4xf32> -> vector<8x16x4xf32>
    %61 = arith.addf %56, %60 : vector<8x16x4xf32>
    %62 = vector.broadcast %11 : vector<1x1x4xf32> to vector<8x16x4xf32>
    %63 = arith.mulf %61, %62 : vector<8x16x4xf32>
    %64 = vector.broadcast %13 : vector<1x1x4xf32> to vector<8x16x4xf32>
    %65 = arith.addf %63, %64 : vector<8x16x4xf32>
    %cst_73 = arith.constant 0.000000e+00 : f32
    %66 = vector.broadcast %cst_73 : f32 to vector<8x16x4xf32>
    %67 = arith.maximumf %65, %66 : vector<8x16x4xf32>
    %68 = arith.truncf %67 : vector<8x16x4xf32> to vector<8x16x4xbf16>
    %c0_74 = arith.constant 0 : index
    %c16_75 = arith.constant 16 : index
    %c0_76 = arith.constant 0 : index
    %69 = vector.load %arg10[%c0_74, %c16_75, %c0_76] : memref<8x48x4xbf16, #tpu.memory_space<vmem>>, vector<8x16x4xbf16>
    tpu.vector_store %arg10[%c0_74, %c16_75, %c0_76], %68 {strides = array<i32>} : memref<8x48x4xbf16, #tpu.memory_space<vmem>>, vector<8x16x4xbf16>,
    %c0_77 = arith.constant 0 : index
    %c12_78 = arith.constant 12 : index
    %c0_79 = arith.constant 0 : index
    %70 = vector.load %arg10[%c0_77, %c12_78, %c0_79] : memref<8x48x4xbf16, #tpu.memory_space<vmem>>, vector<8x16x4xbf16>
    %c0_80 = arith.constant 0 : index
    %c0_81 = arith.constant 0 : index
    %c0_82 = arith.constant 0 : index
    %71 = vector.load %arg5[%c0_80, %c0_81, %c0_82] : memref<9x4x4xbf16, #tpu.memory_space<vmem>>, vector<1x4x4xbf16>
    %72 = vector.shape_cast %71 : vector<1x4x4xbf16> to vector<4x4xbf16>
    %cst_83 = arith.constant dense<0.000000e+00> : vector<8x16x4xf32>
    %73 = tpu.matmul %70, %72, %cst_83 {dimension_numbers = #tpu.dot_dimension_numbers<[2], [0], [0, 1], [1], [0, 0, 0, 1, 1, 1], [], []>} : vector<8x16x4xbf16>, vector<4x4xbf16>, vector<8x16x4xf32> -> vector<8x16x4xf32>
    %c0_84 = arith.constant 0 : index
    %c13_85 = arith.constant 13 : index
    %c0_86 = arith.constant 0 : index
    %74 = vector.load %arg10[%c0_84, %c13_85, %c0_86] : memref<8x48x4xbf16, #tpu.memory_space<vmem>>, vector<8x16x4xbf16>
    %c1_87 = arith.constant 1 : index
    %c0_88 = arith.constant 0 : index
    %c0_89 = arith.constant 0 : index
    %75 = vector.load %arg5[%c1_87, %c0_88, %c0_89] : memref<9x4x4xbf16, #tpu.memory_space<vmem>>, vector<1x4x4xbf16>
    %76 = vector.shape_cast %75 : vector<1x4x4xbf16> to vector<4x4xbf16>
    %cst_90 = arith.constant dense<0.000000e+00> : vector<8x16x4xf32>
    %77 = tpu.matmul %74, %76, %cst_90 {dimension_numbers = #tpu.dot_dimension_numbers<[2], [0], [0, 1], [1], [0, 0, 0, 1, 1, 1], [], []>} : vector<8x16x4xbf16>, vector<4x4xbf16>, vector<8x16x4xf32> -> vector<8x16x4xf32>
    %78 = arith.addf %73, %77 : vector<8x16x4xf32>
    %c0_91 = arith.constant 0 : index
    %c14_92 = arith.constant 14 : index
    %c0_93 = arith.constant 0 : index
    %79 = vector.load %arg10[%c0_91, %c14_92, %c0_93] : memref<8x48x4xbf16, #tpu.memory_space<vmem>>, vector<8x16x4xbf16>
    %c2_94 = arith.constant 2 : index
    %c0_95 = arith.constant 0 : index
    %c0_96 = arith.constant 0 : index
    %80 = vector.load %arg5[%c2_94, %c0_95, %c0_96] : memref<9x4x4xbf16, #tpu.memory_space<vmem>>, vector<1x4x4xbf16>
    %81 = vector.shape_cast %80 : vector<1x4x4xbf16> to vector<4x4xbf16>
    %cst_97 = arith.constant dense<0.000000e+00> : vector<8x16x4xf32>
    %82 = tpu.matmul %79, %81, %cst_97 {dimension_numbers = #tpu.dot_dimension_numbers<[2], [0], [0, 1], [1], [0, 0, 0, 1, 1, 1], [], []>} : vector<8x16x4xbf16>, vector<4x4xbf16>, vector<8x16x4xf32> -> vector<8x16x4xf32>
    %83 = arith.addf %78, %82 : vector<8x16x4xf32>
    %c0_98 = arith.constant 0 : index
    %c15_99 = arith.constant 15 : index
    %c0_100 = arith.constant 0 : index
    %84 = vector.load %arg10[%c0_98, %c15_99, %c0_100] : memref<8x48x4xbf16, #tpu.memory_space<vmem>>, vector<8x16x4xbf16>
    %c3_101 = arith.constant 3 : index
    %c0_102 = arith.constant 0 : index
    %c0_103 = arith.constant 0 : index
    %85 = vector.load %arg5[%c3_101, %c0_102, %c0_103] : memref<9x4x4xbf16, #tpu.memory_space<vmem>>, vector<1x4x4xbf16>
    %86 = vector.shape_cast %85 : vector<1x4x4xbf16> to vector<4x4xbf16>
    %cst_104 = arith.constant dense<0.000000e+00> : vector<8x16x4xf32>
    %87 = tpu.matmul %84, %86, %cst_104 {dimension_numbers = #tpu.dot_dimension_numbers<[2], [0], [0, 1], [1], [0, 0, 0, 1, 1, 1], [], []>} : vector<8x16x4xbf16>, vector<4x4xbf16>, vector<8x16x4xf32> -> vector<8x16x4xf32>
    %88 = arith.addf %83, %87 : vector<8x16x4xf32>
    %c0_105 = arith.constant 0 : index
    %c16_106 = arith.constant 16 : index
    %c0_107 = arith.constant 0 : index
    %89 = vector.load %arg10[%c0_105, %c16_106, %c0_107] : memref<8x48x4xbf16, #tpu.memory_space<vmem>>, vector<8x16x4xbf16>
    %c4_108 = arith.constant 4 : index
    %c0_109 = arith.constant 0 : index
    %c0_110 = arith.constant 0 : index
    %90 = vector.load %arg5[%c4_108, %c0_109, %c0_110] : memref<9x4x4xbf16, #tpu.memory_space<vmem>>, vector<1x4x4xbf16>
    %91 = vector.shape_cast %90 : vector<1x4x4xbf16> to vector<4x4xbf16>
    %cst_111 = arith.constant dense<0.000000e+00> : vector<8x16x4xf32>
    %92 = tpu.matmul %89, %91, %cst_111 {dimension_numbers = #tpu.dot_dimension_numbers<[2], [0], [0, 1], [1], [0, 0, 0, 1, 1, 1], [], []>} : vector<8x16x4xbf16>, vector<4x4xbf16>, vector<8x16x4xf32> -> vector<8x16x4xf32>
    %93 = arith.addf %88, %92 : vector<8x16x4xf32>
    %c0_112 = arith.constant 0 : index
    %c17_113 = arith.constant 17 : index
    %c0_114 = arith.constant 0 : index
    %94 = vector.load %arg10[%c0_112, %c17_113, %c0_114] : memref<8x48x4xbf16, #tpu.memory_space<vmem>>, vector<8x16x4xbf16>
    %c5_115 = arith.constant 5 : index
    %c0_116 = arith.constant 0 : index
    %c0_117 = arith.constant 0 : index
    %95 = vector.load %arg5[%c5_115, %c0_116, %c0_117] : memref<9x4x4xbf16, #tpu.memory_space<vmem>>, vector<1x4x4xbf16>
    %96 = vector.shape_cast %95 : vector<1x4x4xbf16> to vector<4x4xbf16>
    %cst_118 = arith.constant dense<0.000000e+00> : vector<8x16x4xf32>
    %97 = tpu.matmul %94, %96, %cst_118 {dimension_numbers = #tpu.dot_dimension_numbers<[2], [0], [0, 1], [1], [0, 0, 0, 1, 1, 1], [], []>} : vector<8x16x4xbf16>, vector<4x4xbf16>, vector<8x16x4xf32> -> vector<8x16x4xf32>
    %98 = arith.addf %93, %97 : vector<8x16x4xf32>
    %c0_119 = arith.constant 0 : index
    %c18_120 = arith.constant 18 : index
    %c0_121 = arith.constant 0 : index
    %99 = vector.load %arg10[%c0_119, %c18_120, %c0_121] : memref<8x48x4xbf16, #tpu.memory_space<vmem>>, vector<8x16x4xbf16>
    %c6_122 = arith.constant 6 : index
    %c0_123 = arith.constant 0 : index
    %c0_124 = arith.constant 0 : index
    %100 = vector.load %arg5[%c6_122, %c0_123, %c0_124] : memref<9x4x4xbf16, #tpu.memory_space<vmem>>, vector<1x4x4xbf16>
    %101 = vector.shape_cast %100 : vector<1x4x4xbf16> to vector<4x4xbf16>
    %cst_125 = arith.constant dense<0.000000e+00> : vector<8x16x4xf32>
    %102 = tpu.matmul %99, %101, %cst_125 {dimension_numbers = #tpu.dot_dimension_numbers<[2], [0], [0, 1], [1], [0, 0, 0, 1, 1, 1], [], []>} : vector<8x16x4xbf16>, vector<4x4xbf16>, vector<8x16x4xf32> -> vector<8x16x4xf32>
    %103 = arith.addf %98, %102 : vector<8x16x4xf32>
    %c0_126 = arith.constant 0 : index
    %c19_127 = arith.constant 19 : index
    %c0_128 = arith.constant 0 : index
    %104 = vector.load %arg10[%c0_126, %c19_127, %c0_128] : memref<8x48x4xbf16, #tpu.memory_space<vmem>>, vector<8x16x4xbf16>
    %c7_129 = arith.constant 7 : index
    %c0_130 = arith.constant 0 : index
    %c0_131 = arith.constant 0 : index
    %105 = vector.load %arg5[%c7_129, %c0_130, %c0_131] : memref<9x4x4xbf16, #tpu.memory_space<vmem>>, vector<1x4x4xbf16>
    %106 = vector.shape_cast %105 : vector<1x4x4xbf16> to vector<4x4xbf16>
    %cst_132 = arith.constant dense<0.000000e+00> : vector<8x16x4xf32>
    %107 = tpu.matmul %104, %106, %cst_132 {dimension_numbers = #tpu.dot_dimension_numbers<[2], [0], [0, 1], [1], [0, 0, 0, 1, 1, 1], [], []>} : vector<8x16x4xbf16>, vector<4x4xbf16>, vector<8x16x4xf32> -> vector<8x16x4xf32>
    %108 = arith.addf %103, %107 : vector<8x16x4xf32>
    %c0_133 = arith.constant 0 : index
    %c20_134 = arith.constant 20 : index
    %c0_135 = arith.constant 0 : index
    %109 = vector.load %arg10[%c0_133, %c20_134, %c0_135] : memref<8x48x4xbf16, #tpu.memory_space<vmem>>, vector<8x16x4xbf16>
    %c8_136 = arith.constant 8 : index
    %c0_137 = arith.constant 0 : index
    %c0_138 = arith.constant 0 : index
    %110 = vector.load %arg5[%c8_136, %c0_137, %c0_138] : memref<9x4x4xbf16, #tpu.memory_space<vmem>>, vector<1x4x4xbf16>
    %111 = vector.shape_cast %110 : vector<1x4x4xbf16> to vector<4x4xbf16>
    %cst_139 = arith.constant dense<0.000000e+00> : vector<8x16x4xf32>
    %112 = tpu.matmul %109, %111, %cst_139 {dimension_numbers = #tpu.dot_dimension_numbers<[2], [0], [0, 1], [1], [0, 0, 0, 1, 1, 1], [], []>} : vector<8x16x4xbf16>, vector<4x4xbf16>, vector<8x16x4xf32> -> vector<8x16x4xf32>
    %113 = arith.addf %108, %112 : vector<8x16x4xf32>
    %114 = vector.broadcast %15 : vector<1x1x4xf32> to vector<8x16x4xf32>
    %115 = arith.mulf %113, %114 : vector<8x16x4xf32>
    %116 = vector.broadcast %17 : vector<1x1x4xf32> to vector<8x16x4xf32>
    %117 = arith.addf %115, %116 : vector<8x16x4xf32>
    %cst_140 = arith.constant 0.000000e+00 : f32
    %118 = vector.broadcast %cst_140 : f32 to vector<8x16x4xf32>
    %119 = arith.maximumf %117, %118 : vector<8x16x4xf32>
    %c0_141 = arith.constant 0 : index
    %c0_142 = arith.constant 0 : index
    %c0_143 = arith.constant 0 : index
    %120 = vector.load %arg1[%c0_141, %c0_142, %c0_143] : memref<8x16x4xbf16, #tpu.memory_space<vmem>>, vector<8x16x4xbf16>
    %121 = arith.extf %120 : vector<8x16x4xbf16> to vector<8x16x4xf32>
    %122 = arith.addf %119, %121 : vector<8x16x4xf32>
    %cst_144 = arith.constant 0.000000e+00 : f32
    %123 = vector.broadcast %cst_144 : f32 to vector<8x16x4xf32>
    %124 = arith.maximumf %122, %123 : vector<8x16x4xf32>
    %c0_145 = arith.constant 0 : index
    %c0_146 = arith.constant 0 : index
    %c0_147 = arith.constant 0 : index
    %125 = vector.load %arg8[%c0_145, %c0_146, %c0_147] : memref<8x16x4xf32, #tpu.memory_space<vmem>>, vector<8x16x4xf32>
    tpu.vector_store %arg8[%c0_145, %c0_146, %c0_147], %124 {strides = array<i32>} : memref<8x16x4xf32, #tpu.memory_space<vmem>>, vector<8x16x4xf32>,
    return
  }
  func.func @transform_0(%arg0: i32) -> (i32, i32, i32) {
    %c0_i32 = arith.constant 0 : i32
    %c0_i32_0 = arith.constant 0 : i32
    %c0_i32_1 = arith.constant 0 : i32
    return %arg0, %c0_i32, %c0_i32_0 : i32, i32, i32
  }
  func.func @transform_1(%arg0: i32) -> (i32, i32, i32) {
    %c0_i32 = arith.constant 0 : i32
    %c0_i32_0 = arith.constant 0 : i32
    %c0_i32_1 = arith.constant 0 : i32
    %c0_i32_2 = arith.constant 0 : i32
    return %c0_i32, %c0_i32_0, %c0_i32_1 : i32, i32, i32
  }
  func.func @transform_2(%arg0: i32) -> (i32, i32) {
    %c0_i32 = arith.constant 0 : i32
    %c0_i32_0 = arith.constant 0 : i32
    %c0_i32_1 = arith.constant 0 : i32
    return %c0_i32, %c0_i32_0 : i32, i32
  }
  func.func @transform_3(%arg0: i32) -> (i32, i32) {
    %c0_i32 = arith.constant 0 : i32
    %c0_i32_0 = arith.constant 0 : i32
    %c0_i32_1 = arith.constant 0 : i32
    return %c0_i32, %c0_i32_0 : i32, i32
  }
  func.func @transform_4(%arg0: i32) -> (i32, i32, i32) {
    %c0_i32 = arith.constant 0 : i32
    %c0_i32_0 = arith.constant 0 : i32
    %c0_i32_1 = arith.constant 0 : i32
    %c0_i32_2 = arith.constant 0 : i32
    return %c0_i32, %c0_i32_0, %c0_i32_1 : i32, i32, i32
  }
  func.func @transform_5(%arg0: i32) -> (i32, i32) {
    %c0_i32 = arith.constant 0 : i32
    %c0_i32_0 = arith.constant 0 : i32
    %c0_i32_1 = arith.constant 0 : i32
    return %c0_i32, %c0_i32_0 : i32, i32
  }
  func.func @transform_6(%arg0: i32) -> (i32, i32) {
    %c0_i32 = arith.constant 0 : i32
    %c0_i32_0 = arith.constant 0 : i32
    %c0_i32_1 = arith.constant 0 : i32
    return %c0_i32, %c0_i32_0 : i32, i32
  }
  func.func @transform_7(%arg0: i32) -> (i32, i32, i32) {
    %c0_i32 = arith.constant 0 : i32
    %c0_i32_0 = arith.constant 0 : i32
    %c0_i32_1 = arith.constant 0 : i32
    return %arg0, %c0_i32, %c0_i32_0 : i32, i32, i32
  }
}

module attributes {stable_mosaic.version = 11 : i64} {
  func.func @_basic_block_kernel(%arg0: i32, %arg1: memref<8x16x4xbf16, #tpu.memory_space<vmem>>, %arg2: memref<9x4x4xbf16, #tpu.memory_space<vmem>>, %arg3: memref<1x4xf32, #tpu.memory_space<vmem>>, %arg4: memref<1x4xf32, #tpu.memory_space<vmem>>, %arg5: memref<9x4x4xbf16, #tpu.memory_space<vmem>>, %arg6: memref<1x4xf32, #tpu.memory_space<vmem>>, %arg7: memref<1x4xf32, #tpu.memory_space<vmem>>, %arg8: memref<8x16x4xf32, #tpu.memory_space<vmem>>, %arg9: memref<8x48x4xbf16, #tpu.memory_space<vmem>>, %arg10: memref<8x48x4xbf16, #tpu.memory_space<vmem>>) attributes {dimension_semantics = [#tpu.dimension_semantics<parallel>], iteration_bounds = array<i64: 4>, scalar_prefetch = 0 : i64, scratch_operands = 2 : i64, tpu.core_type = #tpu.core_type<tc>, window_params = [{transform_indices = @transform_0, window_bounds = array<i64: 8, 16, 4>}, {pipeline_mode = #tpu.pipeline_mode<synchronous>, transform_indices = @transform_1, window_bounds = array<i64: 9, 4, 4>}, {pipeline_mode = #tpu.pipeline_mode<synchronous>, transform_indices = @transform_2, window_bounds = array<i64: 1, 4>}, {pipeline_mode = #tpu.pipeline_mode<synchronous>, transform_indices = @transform_3, window_bounds = array<i64: 1, 4>}, {pipeline_mode = #tpu.pipeline_mode<synchronous>, transform_indices = @transform_4, window_bounds = array<i64: 9, 4, 4>}, {pipeline_mode = #tpu.pipeline_mode<synchronous>, transform_indices = @transform_5, window_bounds = array<i64: 1, 4>}, {pipeline_mode = #tpu.pipeline_mode<synchronous>, transform_indices = @transform_6, window_bounds = array<i64: 1, 4>}, {transform_indices = @transform_7, window_bounds = array<i64: 8, 16, 4>}]} {
    %cst = arith.constant 0.000000e+00 : bf16
    %0 = vector.broadcast %cst : bf16 to vector<8x4x4xbf16>
    %c0 = arith.constant 0 : index
    %c12 = arith.constant 12 : index
    %c0_0 = arith.constant 0 : index
    %1 = vector.load %arg9[%c0, %c12, %c0_0] : memref<8x48x4xbf16, #tpu.memory_space<vmem>>, vector<8x4x4xbf16>
    tpu.vector_store %arg9[%c0, %c12, %c0_0], %0 {strides = array<i32>} : memref<8x48x4xbf16, #tpu.memory_space<vmem>>, vector<8x4x4xbf16>,
    %cst_1 = arith.constant 0.000000e+00 : bf16
    %2 = vector.broadcast %cst_1 : bf16 to vector<8x4x4xbf16>
    %c0_2 = arith.constant 0 : index
    %c32 = arith.constant 32 : index
    %c0_3 = arith.constant 0 : index
    %3 = vector.load %arg9[%c0_2, %c32, %c0_3] : memref<8x48x4xbf16, #tpu.memory_space<vmem>>, vector<8x4x4xbf16>
    tpu.vector_store %arg9[%c0_2, %c32, %c0_3], %2 {strides = array<i32>} : memref<8x48x4xbf16, #tpu.memory_space<vmem>>, vector<8x4x4xbf16>,
    %cst_4 = arith.constant 0.000000e+00 : bf16
    %4 = vector.broadcast %cst_4 : bf16 to vector<8x4x4xbf16>
    %c0_5 = arith.constant 0 : index
    %c12_6 = arith.constant 12 : index
    %c0_7 = arith.constant 0 : index
    %5 = vector.load %arg10[%c0_5, %c12_6, %c0_7] : memref<8x48x4xbf16, #tpu.memory_space<vmem>>, vector<8x4x4xbf16>
    tpu.vector_store %arg10[%c0_5, %c12_6, %c0_7], %4 {strides = array<i32>} : memref<8x48x4xbf16, #tpu.memory_space<vmem>>, vector<8x4x4xbf16>,
    %cst_8 = arith.constant 0.000000e+00 : bf16
    %6 = vector.broadcast %cst_8 : bf16 to vector<8x4x4xbf16>
    %c0_9 = arith.constant 0 : index
    %c32_10 = arith.constant 32 : index
    %c0_11 = arith.constant 0 : index
    %7 = vector.load %arg10[%c0_9, %c32_10, %c0_11] : memref<8x48x4xbf16, #tpu.memory_space<vmem>>, vector<8x4x4xbf16>
    tpu.vector_store %arg10[%c0_9, %c32_10, %c0_11], %6 {strides = array<i32>} : memref<8x48x4xbf16, #tpu.memory_space<vmem>>, vector<8x4x4xbf16>,
    %c0_12 = arith.constant 0 : index
    %c0_13 = arith.constant 0 : index
    %c0_14 = arith.constant 0 : index
    %8 = vector.load %arg1[%c0_12, %c0_13, %c0_14] : memref<8x16x4xbf16, #tpu.memory_space<vmem>>, vector<8x16x4xbf16>
    %c0_15 = arith.constant 0 : index
    %c16 = arith.constant 16 : index
    %c0_16 = arith.constant 0 : index
    %9 = vector.load %arg9[%c0_15, %c16, %c0_16] : memref<8x48x4xbf16, #tpu.memory_space<vmem>>, vector<8x16x4xbf16>
    tpu.vector_store %arg9[%c0_15, %c16, %c0_16], %8 {strides = array<i32>} : memref<8x48x4xbf16, #tpu.memory_space<vmem>>, vector<8x16x4xbf16>,
    %c0_17 = arith.constant 0 : index
    %c0_18 = arith.constant 0 : index
    %10 = vector.load %arg3[%c0_17, %c0_18] : memref<1x4xf32, #tpu.memory_space<vmem>>, vector<1x4xf32>
    %11 = vector.shape_cast %10 : vector<1x4xf32> to vector<1x1x4xf32>
    %c0_19 = arith.constant 0 : index
    %c0_20 = arith.constant 0 : index
    %12 = vector.load %arg4[%c0_19, %c0_20] : memref<1x4xf32, #tpu.memory_space<vmem>>, vector<1x4xf32>
    %13 = vector.shape_cast %12 : vector<1x4xf32> to vector<1x1x4xf32>
    %c0_21 = arith.constant 0 : index
    %c0_22 = arith.constant 0 : index
    %14 = vector.load %arg6[%c0_21, %c0_22] : memref<1x4xf32, #tpu.memory_space<vmem>>, vector<1x4xf32>
    %15 = vector.shape_cast %14 : vector<1x4xf32> to vector<1x1x4xf32>
    %c0_23 = arith.constant 0 : index
    %c0_24 = arith.constant 0 : index
    %16 = vector.load %arg7[%c0_23, %c0_24] : memref<1x4xf32, #tpu.memory_space<vmem>>, vector<1x4xf32>
    %17 = vector.shape_cast %16 : vector<1x4xf32> to vector<1x1x4xf32>
    %c0_25 = arith.constant 0 : index
    %c12_26 = arith.constant 12 : index
    %c0_27 = arith.constant 0 : index
    %18 = vector.load %arg9[%c0_25, %c12_26, %c0_27] : memref<8x48x4xbf16, #tpu.memory_space<vmem>>, vector<8x16x4xbf16>
    %c0_28 = arith.constant 0 : index
    %c0_29 = arith.constant 0 : index
    %c0_30 = arith.constant 0 : index
    %19 = vector.load %arg2[%c0_28, %c0_29, %c0_30] : memref<9x4x4xbf16, #tpu.memory_space<vmem>>, vector<1x4x4xbf16>
    %20 = vector.shape_cast %19 : vector<1x4x4xbf16> to vector<4x4xbf16>
    %cst_31 = arith.constant dense<0.000000e+00> : vector<8x16x4xf32>
    %21 = tpu.matmul %18, %20, %cst_31 {dimension_numbers = #tpu.dot_dimension_numbers<[2], [0], [0, 1], [1], [0, 0, 0, 1, 1, 1], [], []>} : vector<8x16x4xbf16>, vector<4x4xbf16>, vector<8x16x4xf32> -> vector<8x16x4xf32>
    %c0_32 = arith.constant 0 : index
    %c13 = arith.constant 13 : index
    %c0_33 = arith.constant 0 : index
    %22 = vector.load %arg9[%c0_32, %c13, %c0_33] : memref<8x48x4xbf16, #tpu.memory_space<vmem>>, vector<8x16x4xbf16>
    %c1 = arith.constant 1 : index
    %c0_34 = arith.constant 0 : index
    %c0_35 = arith.constant 0 : index
    %23 = vector.load %arg2[%c1, %c0_34, %c0_35] : memref<9x4x4xbf16, #tpu.memory_space<vmem>>, vector<1x4x4xbf16>
    %24 = vector.shape_cast %23 : vector<1x4x4xbf16> to vector<4x4xbf16>
    %cst_36 = arith.constant dense<0.000000e+00> : vector<8x16x4xf32>
    %25 = tpu.matmul %22, %24, %cst_36 {dimension_numbers = #tpu.dot_dimension_numbers<[2], [0], [0, 1], [1], [0, 0, 0, 1, 1, 1], [], []>} : vector<8x16x4xbf16>, vector<4x4xbf16>, vector<8x16x4xf32> -> vector<8x16x4xf32>
    %26 = arith.addf %21, %25 : vector<8x16x4xf32>
    %c0_37 = arith.constant 0 : index
    %c14 = arith.constant 14 : index
    %c0_38 = arith.constant 0 : index
    %27 = vector.load %arg9[%c0_37, %c14, %c0_38] : memref<8x48x4xbf16, #tpu.memory_space<vmem>>, vector<8x16x4xbf16>
    %c2 = arith.constant 2 : index
    %c0_39 = arith.constant 0 : index
    %c0_40 = arith.constant 0 : index
    %28 = vector.load %arg2[%c2, %c0_39, %c0_40] : memref<9x4x4xbf16, #tpu.memory_space<vmem>>, vector<1x4x4xbf16>
    %29 = vector.shape_cast %28 : vector<1x4x4xbf16> to vector<4x4xbf16>
    %cst_41 = arith.constant dense<0.000000e+00> : vector<8x16x4xf32>
    %30 = tpu.matmul %27, %29, %cst_41 {dimension_numbers = #tpu.dot_dimension_numbers<[2], [0], [0, 1], [1], [0, 0, 0, 1, 1, 1], [], []>} : vector<8x16x4xbf16>, vector<4x4xbf16>, vector<8x16x4xf32> -> vector<8x16x4xf32>
    %31 = arith.addf %26, %30 : vector<8x16x4xf32>
    %c0_42 = arith.constant 0 : index
    %c15 = arith.constant 15 : index
    %c0_43 = arith.constant 0 : index
    %32 = vector.load %arg9[%c0_42, %c15, %c0_43] : memref<8x48x4xbf16, #tpu.memory_space<vmem>>, vector<8x16x4xbf16>
    %c3 = arith.constant 3 : index
    %c0_44 = arith.constant 0 : index
    %c0_45 = arith.constant 0 : index
    %33 = vector.load %arg2[%c3, %c0_44, %c0_45] : memref<9x4x4xbf16, #tpu.memory_space<vmem>>, vector<1x4x4xbf16>
    %34 = vector.shape_cast %33 : vector<1x4x4xbf16> to vector<4x4xbf16>
    %cst_46 = arith.constant dense<0.000000e+00> : vector<8x16x4xf32>
    %35 = tpu.matmul %32, %34, %cst_46 {dimension_numbers = #tpu.dot_dimension_numbers<[2], [0], [0, 1], [1], [0, 0, 0, 1, 1, 1], [], []>} : vector<8x16x4xbf16>, vector<4x4xbf16>, vector<8x16x4xf32> -> vector<8x16x4xf32>
    %36 = arith.addf %31, %35 : vector<8x16x4xf32>
    %c0_47 = arith.constant 0 : index
    %c16_48 = arith.constant 16 : index
    %c0_49 = arith.constant 0 : index
    %37 = vector.load %arg9[%c0_47, %c16_48, %c0_49] : memref<8x48x4xbf16, #tpu.memory_space<vmem>>, vector<8x16x4xbf16>
    %c4 = arith.constant 4 : index
    %c0_50 = arith.constant 0 : index
    %c0_51 = arith.constant 0 : index
    %38 = vector.load %arg2[%c4, %c0_50, %c0_51] : memref<9x4x4xbf16, #tpu.memory_space<vmem>>, vector<1x4x4xbf16>
    %39 = vector.shape_cast %38 : vector<1x4x4xbf16> to vector<4x4xbf16>
    %cst_52 = arith.constant dense<0.000000e+00> : vector<8x16x4xf32>
    %40 = tpu.matmul %37, %39, %cst_52 {dimension_numbers = #tpu.dot_dimension_numbers<[2], [0], [0, 1], [1], [0, 0, 0, 1, 1, 1], [], []>} : vector<8x16x4xbf16>, vector<4x4xbf16>, vector<8x16x4xf32> -> vector<8x16x4xf32>
    %41 = arith.addf %36, %40 : vector<8x16x4xf32>
    %c0_53 = arith.constant 0 : index
    %c17 = arith.constant 17 : index
    %c0_54 = arith.constant 0 : index
    %42 = vector.load %arg9[%c0_53, %c17, %c0_54] : memref<8x48x4xbf16, #tpu.memory_space<vmem>>, vector<8x16x4xbf16>
    %c5 = arith.constant 5 : index
    %c0_55 = arith.constant 0 : index
    %c0_56 = arith.constant 0 : index
    %43 = vector.load %arg2[%c5, %c0_55, %c0_56] : memref<9x4x4xbf16, #tpu.memory_space<vmem>>, vector<1x4x4xbf16>
    %44 = vector.shape_cast %43 : vector<1x4x4xbf16> to vector<4x4xbf16>
    %cst_57 = arith.constant dense<0.000000e+00> : vector<8x16x4xf32>
    %45 = tpu.matmul %42, %44, %cst_57 {dimension_numbers = #tpu.dot_dimension_numbers<[2], [0], [0, 1], [1], [0, 0, 0, 1, 1, 1], [], []>} : vector<8x16x4xbf16>, vector<4x4xbf16>, vector<8x16x4xf32> -> vector<8x16x4xf32>
    %46 = arith.addf %41, %45 : vector<8x16x4xf32>
    %c0_58 = arith.constant 0 : index
    %c18 = arith.constant 18 : index
    %c0_59 = arith.constant 0 : index
    %47 = vector.load %arg9[%c0_58, %c18, %c0_59] : memref<8x48x4xbf16, #tpu.memory_space<vmem>>, vector<8x16x4xbf16>
    %c6 = arith.constant 6 : index
    %c0_60 = arith.constant 0 : index
    %c0_61 = arith.constant 0 : index
    %48 = vector.load %arg2[%c6, %c0_60, %c0_61] : memref<9x4x4xbf16, #tpu.memory_space<vmem>>, vector<1x4x4xbf16>
    %49 = vector.shape_cast %48 : vector<1x4x4xbf16> to vector<4x4xbf16>
    %cst_62 = arith.constant dense<0.000000e+00> : vector<8x16x4xf32>
    %50 = tpu.matmul %47, %49, %cst_62 {dimension_numbers = #tpu.dot_dimension_numbers<[2], [0], [0, 1], [1], [0, 0, 0, 1, 1, 1], [], []>} : vector<8x16x4xbf16>, vector<4x4xbf16>, vector<8x16x4xf32> -> vector<8x16x4xf32>
    %51 = arith.addf %46, %50 : vector<8x16x4xf32>
    %c0_63 = arith.constant 0 : index
    %c19 = arith.constant 19 : index
    %c0_64 = arith.constant 0 : index
    %52 = vector.load %arg9[%c0_63, %c19, %c0_64] : memref<8x48x4xbf16, #tpu.memory_space<vmem>>, vector<8x16x4xbf16>
    %c7 = arith.constant 7 : index
    %c0_65 = arith.constant 0 : index
    %c0_66 = arith.constant 0 : index
    %53 = vector.load %arg2[%c7, %c0_65, %c0_66] : memref<9x4x4xbf16, #tpu.memory_space<vmem>>, vector<1x4x4xbf16>
    %54 = vector.shape_cast %53 : vector<1x4x4xbf16> to vector<4x4xbf16>
    %cst_67 = arith.constant dense<0.000000e+00> : vector<8x16x4xf32>
    %55 = tpu.matmul %52, %54, %cst_67 {dimension_numbers = #tpu.dot_dimension_numbers<[2], [0], [0, 1], [1], [0, 0, 0, 1, 1, 1], [], []>} : vector<8x16x4xbf16>, vector<4x4xbf16>, vector<8x16x4xf32> -> vector<8x16x4xf32>
    %56 = arith.addf %51, %55 : vector<8x16x4xf32>
    %c0_68 = arith.constant 0 : index
    %c20 = arith.constant 20 : index
    %c0_69 = arith.constant 0 : index
    %57 = vector.load %arg9[%c0_68, %c20, %c0_69] : memref<8x48x4xbf16, #tpu.memory_space<vmem>>, vector<8x16x4xbf16>
    %c8 = arith.constant 8 : index
    %c0_70 = arith.constant 0 : index
    %c0_71 = arith.constant 0 : index
    %58 = vector.load %arg2[%c8, %c0_70, %c0_71] : memref<9x4x4xbf16, #tpu.memory_space<vmem>>, vector<1x4x4xbf16>
    %59 = vector.shape_cast %58 : vector<1x4x4xbf16> to vector<4x4xbf16>
    %cst_72 = arith.constant dense<0.000000e+00> : vector<8x16x4xf32>
    %60 = tpu.matmul %57, %59, %cst_72 {dimension_numbers = #tpu.dot_dimension_numbers<[2], [0], [0, 1], [1], [0, 0, 0, 1, 1, 1], [], []>} : vector<8x16x4xbf16>, vector<4x4xbf16>, vector<8x16x4xf32> -> vector<8x16x4xf32>
    %61 = arith.addf %56, %60 : vector<8x16x4xf32>
    %62 = vector.broadcast %11 : vector<1x1x4xf32> to vector<8x16x4xf32>
    %63 = arith.mulf %61, %62 : vector<8x16x4xf32>
    %64 = vector.broadcast %13 : vector<1x1x4xf32> to vector<8x16x4xf32>
    %65 = arith.addf %63, %64 : vector<8x16x4xf32>
    %cst_73 = arith.constant 0.000000e+00 : f32
    %66 = vector.broadcast %cst_73 : f32 to vector<8x16x4xf32>
    %67 = arith.maximumf %65, %66 : vector<8x16x4xf32>
    %68 = arith.truncf %67 : vector<8x16x4xf32> to vector<8x16x4xbf16>
    %c0_74 = arith.constant 0 : index
    %c16_75 = arith.constant 16 : index
    %c0_76 = arith.constant 0 : index
    %69 = vector.load %arg10[%c0_74, %c16_75, %c0_76] : memref<8x48x4xbf16, #tpu.memory_space<vmem>>, vector<8x16x4xbf16>
    tpu.vector_store %arg10[%c0_74, %c16_75, %c0_76], %68 {strides = array<i32>} : memref<8x48x4xbf16, #tpu.memory_space<vmem>>, vector<8x16x4xbf16>,
    %c0_77 = arith.constant 0 : index
    %c12_78 = arith.constant 12 : index
    %c0_79 = arith.constant 0 : index
    %70 = vector.load %arg10[%c0_77, %c12_78, %c0_79] : memref<8x48x4xbf16, #tpu.memory_space<vmem>>, vector<8x16x4xbf16>
    %c0_80 = arith.constant 0 : index
    %c0_81 = arith.constant 0 : index
    %c0_82 = arith.constant 0 : index
    %71 = vector.load %arg5[%c0_80, %c0_81, %c0_82] : memref<9x4x4xbf16, #tpu.memory_space<vmem>>, vector<1x4x4xbf16>
    %72 = vector.shape_cast %71 : vector<1x4x4xbf16> to vector<4x4xbf16>
    %cst_83 = arith.constant dense<0.000000e+00> : vector<8x16x4xf32>
    %73 = tpu.matmul %70, %72, %cst_83 {dimension_numbers = #tpu.dot_dimension_numbers<[2], [0], [0, 1], [1], [0, 0, 0, 1, 1, 1], [], []>} : vector<8x16x4xbf16>, vector<4x4xbf16>, vector<8x16x4xf32> -> vector<8x16x4xf32>
    %c0_84 = arith.constant 0 : index
    %c13_85 = arith.constant 13 : index
    %c0_86 = arith.constant 0 : index
    %74 = vector.load %arg10[%c0_84, %c13_85, %c0_86] : memref<8x48x4xbf16, #tpu.memory_space<vmem>>, vector<8x16x4xbf16>
    %c1_87 = arith.constant 1 : index
    %c0_88 = arith.constant 0 : index
    %c0_89 = arith.constant 0 : index
    %75 = vector.load %arg5[%c1_87, %c0_88, %c0_89] : memref<9x4x4xbf16, #tpu.memory_space<vmem>>, vector<1x4x4xbf16>
    %76 = vector.shape_cast %75 : vector<1x4x4xbf16> to vector<4x4xbf16>
    %cst_90 = arith.constant dense<0.000000e+00> : vector<8x16x4xf32>
    %77 = tpu.matmul %74, %76, %cst_90 {dimension_numbers = #tpu.dot_dimension_numbers<[2], [0], [0, 1], [1], [0, 0, 0, 1, 1, 1], [], []>} : vector<8x16x4xbf16>, vector<4x4xbf16>, vector<8x16x4xf32> -> vector<8x16x4xf32>
    %78 = arith.addf %73, %77 : vector<8x16x4xf32>
    %c0_91 = arith.constant 0 : index
    %c14_92 = arith.constant 14 : index
    %c0_93 = arith.constant 0 : index
    %79 = vector.load %arg10[%c0_91, %c14_92, %c0_93] : memref<8x48x4xbf16, #tpu.memory_space<vmem>>, vector<8x16x4xbf16>
    %c2_94 = arith.constant 2 : index
    %c0_95 = arith.constant 0 : index
    %c0_96 = arith.constant 0 : index
    %80 = vector.load %arg5[%c2_94, %c0_95, %c0_96] : memref<9x4x4xbf16, #tpu.memory_space<vmem>>, vector<1x4x4xbf16>
    %81 = vector.shape_cast %80 : vector<1x4x4xbf16> to vector<4x4xbf16>
    %cst_97 = arith.constant dense<0.000000e+00> : vector<8x16x4xf32>
    %82 = tpu.matmul %79, %81, %cst_97 {dimension_numbers = #tpu.dot_dimension_numbers<[2], [0], [0, 1], [1], [0, 0, 0, 1, 1, 1], [], []>} : vector<8x16x4xbf16>, vector<4x4xbf16>, vector<8x16x4xf32> -> vector<8x16x4xf32>
    %83 = arith.addf %78, %82 : vector<8x16x4xf32>
    %c0_98 = arith.constant 0 : index
    %c15_99 = arith.constant 15 : index
    %c0_100 = arith.constant 0 : index
    %84 = vector.load %arg10[%c0_98, %c15_99, %c0_100] : memref<8x48x4xbf16, #tpu.memory_space<vmem>>, vector<8x16x4xbf16>
    %c3_101 = arith.constant 3 : index
    %c0_102 = arith.constant 0 : index
    %c0_103 = arith.constant 0 : index
    %85 = vector.load %arg5[%c3_101, %c0_102, %c0_103] : memref<9x4x4xbf16, #tpu.memory_space<vmem>>, vector<1x4x4xbf16>
    %86 = vector.shape_cast %85 : vector<1x4x4xbf16> to vector<4x4xbf16>
    %cst_104 = arith.constant dense<0.000000e+00> : vector<8x16x4xf32>
    %87 = tpu.matmul %84, %86, %cst_104 {dimension_numbers = #tpu.dot_dimension_numbers<[2], [0], [0, 1], [1], [0, 0, 0, 1, 1, 1], [], []>} : vector<8x16x4xbf16>, vector<4x4xbf16>, vector<8x16x4xf32> -> vector<8x16x4xf32>
    %88 = arith.addf %83, %87 : vector<8x16x4xf32>
    %c0_105 = arith.constant 0 : index
    %c16_106 = arith.constant 16 : index
    %c0_107 = arith.constant 0 : index
    %89 = vector.load %arg10[%c0_105, %c16_106, %c0_107] : memref<8x48x4xbf16, #tpu.memory_space<vmem>>, vector<8x16x4xbf16>
    %c4_108 = arith.constant 4 : index
    %c0_109 = arith.constant 0 : index
    %c0_110 = arith.constant 0 : index
    %90 = vector.load %arg5[%c4_108, %c0_109, %c0_110] : memref<9x4x4xbf16, #tpu.memory_space<vmem>>, vector<1x4x4xbf16>
    %91 = vector.shape_cast %90 : vector<1x4x4xbf16> to vector<4x4xbf16>
    %cst_111 = arith.constant dense<0.000000e+00> : vector<8x16x4xf32>
    %92 = tpu.matmul %89, %91, %cst_111 {dimension_numbers = #tpu.dot_dimension_numbers<[2], [0], [0, 1], [1], [0, 0, 0, 1, 1, 1], [], []>} : vector<8x16x4xbf16>, vector<4x4xbf16>, vector<8x16x4xf32> -> vector<8x16x4xf32>
    %93 = arith.addf %88, %92 : vector<8x16x4xf32>
    %c0_112 = arith.constant 0 : index
    %c17_113 = arith.constant 17 : index
    %c0_114 = arith.constant 0 : index
    %94 = vector.load %arg10[%c0_112, %c17_113, %c0_114] : memref<8x48x4xbf16, #tpu.memory_space<vmem>>, vector<8x16x4xbf16>
    %c5_115 = arith.constant 5 : index
    %c0_116 = arith.constant 0 : index
    %c0_117 = arith.constant 0 : index
    %95 = vector.load %arg5[%c5_115, %c0_116, %c0_117] : memref<9x4x4xbf16, #tpu.memory_space<vmem>>, vector<1x4x4xbf16>
    %96 = vector.shape_cast %95 : vector<1x4x4xbf16> to vector<4x4xbf16>
    %cst_118 = arith.constant dense<0.000000e+00> : vector<8x16x4xf32>
    %97 = tpu.matmul %94, %96, %cst_118 {dimension_numbers = #tpu.dot_dimension_numbers<[2], [0], [0, 1], [1], [0, 0, 0, 1, 1, 1], [], []>} : vector<8x16x4xbf16>, vector<4x4xbf16>, vector<8x16x4xf32> -> vector<8x16x4xf32>
    %98 = arith.addf %93, %97 : vector<8x16x4xf32>
    %c0_119 = arith.constant 0 : index
    %c18_120 = arith.constant 18 : index
    %c0_121 = arith.constant 0 : index
    %99 = vector.load %arg10[%c0_119, %c18_120, %c0_121] : memref<8x48x4xbf16, #tpu.memory_space<vmem>>, vector<8x16x4xbf16>
    %c6_122 = arith.constant 6 : index
    %c0_123 = arith.constant 0 : index
    %c0_124 = arith.constant 0 : index
    %100 = vector.load %arg5[%c6_122, %c0_123, %c0_124] : memref<9x4x4xbf16, #tpu.memory_space<vmem>>, vector<1x4x4xbf16>
    %101 = vector.shape_cast %100 : vector<1x4x4xbf16> to vector<4x4xbf16>
    %cst_125 = arith.constant dense<0.000000e+00> : vector<8x16x4xf32>
    %102 = tpu.matmul %99, %101, %cst_125 {dimension_numbers = #tpu.dot_dimension_numbers<[2], [0], [0, 1], [1], [0, 0, 0, 1, 1, 1], [], []>} : vector<8x16x4xbf16>, vector<4x4xbf16>, vector<8x16x4xf32> -> vector<8x16x4xf32>
    %103 = arith.addf %98, %102 : vector<8x16x4xf32>
    %c0_126 = arith.constant 0 : index
    %c19_127 = arith.constant 19 : index
    %c0_128 = arith.constant 0 : index
    %104 = vector.load %arg10[%c0_126, %c19_127, %c0_128] : memref<8x48x4xbf16, #tpu.memory_space<vmem>>, vector<8x16x4xbf16>
    %c7_129 = arith.constant 7 : index
    %c0_130 = arith.constant 0 : index
    %c0_131 = arith.constant 0 : index
    %105 = vector.load %arg5[%c7_129, %c0_130, %c0_131] : memref<9x4x4xbf16, #tpu.memory_space<vmem>>, vector<1x4x4xbf16>
    %106 = vector.shape_cast %105 : vector<1x4x4xbf16> to vector<4x4xbf16>
    %cst_132 = arith.constant dense<0.000000e+00> : vector<8x16x4xf32>
    %107 = tpu.matmul %104, %106, %cst_132 {dimension_numbers = #tpu.dot_dimension_numbers<[2], [0], [0, 1], [1], [0, 0, 0, 1, 1, 1], [], []>} : vector<8x16x4xbf16>, vector<4x4xbf16>, vector<8x16x4xf32> -> vector<8x16x4xf32>
    %108 = arith.addf %103, %107 : vector<8x16x4xf32>
    %c0_133 = arith.constant 0 : index
    %c20_134 = arith.constant 20 : index
    %c0_135 = arith.constant 0 : index
    %109 = vector.load %arg10[%c0_133, %c20_134, %c0_135] : memref<8x48x4xbf16, #tpu.memory_space<vmem>>, vector<8x16x4xbf16>
    %c8_136 = arith.constant 8 : index
    %c0_137 = arith.constant 0 : index
    %c0_138 = arith.constant 0 : index
    %110 = vector.load %arg5[%c8_136, %c0_137, %c0_138] : memref<9x4x4xbf16, #tpu.memory_space<vmem>>, vector<1x4x4xbf16>
    %111 = vector.shape_cast %110 : vector<1x4x4xbf16> to vector<4x4xbf16>
    %cst_139 = arith.constant dense<0.000000e+00> : vector<8x16x4xf32>
    %112 = tpu.matmul %109, %111, %cst_139 {dimension_numbers = #tpu.dot_dimension_numbers<[2], [0], [0, 1], [1], [0, 0, 0, 1, 1, 1], [], []>} : vector<8x16x4xbf16>, vector<4x4xbf16>, vector<8x16x4xf32> -> vector<8x16x4xf32>
    %113 = arith.addf %108, %112 : vector<8x16x4xf32>
    %114 = vector.broadcast %15 : vector<1x1x4xf32> to vector<8x16x4xf32>
    %115 = arith.mulf %113, %114 : vector<8x16x4xf32>
    %116 = vector.broadcast %17 : vector<1x1x4xf32> to vector<8x16x4xf32>
    %117 = arith.addf %115, %116 : vector<8x16x4xf32>
    %cst_140 = arith.constant 0.000000e+00 : f32
    %118 = vector.broadcast %cst_140 : f32 to vector<8x16x4xf32>
    %119 = arith.maximumf %117, %118 : vector<8x16x4xf32>
    %c0_141 = arith.constant 0 : index
    %c0_142 = arith.constant 0 : index
    %c0_143 = arith.constant 0 : index
    %120 = vector.load %arg1[%c0_141, %c0_142, %c0_143] : memref<8x16x4xbf16, #tpu.memory_space<vmem>>, vector<8x16x4xbf16>
    %121 = arith.extf %120 : vector<8x16x4xbf16> to vector<8x16x4xf32>
    %122 = arith.addf %119, %121 : vector<8x16x4xf32>
    %cst_144 = arith.constant 0.000000e+00 : f32
    %123 = vector.broadcast %cst_144 : f32 to vector<8x16x4xf32>
    %124 = arith.maximumf %122, %123 : vector<8x16x4xf32>
    %c0_145 = arith.constant 0 : index
    %c0_146 = arith.constant 0 : index
    %c0_147 = arith.constant 0 : index
    %125 = vector.load %arg8[%c0_145, %c0_146, %c0_147] : memref<8x16x4xf32, #tpu.memory_space<vmem>>, vector<8x16x4xf32>
    tpu.vector_store %arg8[%c0_145, %c0_146, %c0_147], %124 {strides = array<i32>} : memref<8x16x4xf32, #tpu.memory_space<vmem>>, vector<8x16x4xf32>,
    return
  }
  func.func @transform_0(%arg0: i32) -> (i32, i32, i32) {
    %c0_i32 = arith.constant 0 : i32
    %c0_i32_0 = arith.constant 0 : i32
    %c0_i32_1 = arith.constant 0 : i32
    return %arg0, %c0_i32, %c0_i32_0 : i32, i32, i32
  }
  func.func @transform_1(%arg0: i32) -> (i32, i32, i32) {
    %c0_i32 = arith.constant 0 : i32
    %c0_i32_0 = arith.constant 0 : i32
    %c0_i32_1 = arith.constant 0 : i32
    %c0_i32_2 = arith.constant 0 : i32
    return %c0_i32, %c0_i32_0, %c0_i32_1 : i32, i32, i32
  }
  func.func @transform_2(%arg0: i32) -> (i32, i32) {
    %c0_i32 = arith.constant 0 : i32
    %c0_i32_0 = arith.constant 0 : i32
    %c0_i32_1 = arith.constant 0 : i32
    return %c0_i32, %c0_i32_0 : i32, i32
  }
  func.func @transform_3(%arg0: i32) -> (i32, i32) {
    %c0_i32 = arith.constant 0 : i32
    %c0_i32_0 = arith.constant 0 : i32
    %c0_i32_1 = arith.constant 0 : i32
    return %c0_i32, %c0_i32_0 : i32, i32
  }
  func.func @transform_4(%arg0: i32) -> (i32, i32, i32) {
    %c0_i32 = arith.constant 0 : i32
    %c0_i32_0 = arith.constant 0 : i32
    %c0_i32_1 = arith.constant 0 : i32
    %c0_i32_2 = arith.constant 0 : i32
    return %c0_i32, %c0_i32_0, %c0_i32_1 : i32, i32, i32
  }
  func.func @transform_5(%arg0: i32) -> (i32, i32) {
    %c0_i32 = arith.constant 0 : i32
    %c0_i32_0 = arith.constant 0 : i32
    %c0_i32_1 = arith.constant 0 : i32
    return %c0_i32, %c0_i32_0 : i32, i32
  }
  func.func @transform_6(%arg0: i32) -> (i32, i32) {
    %c0_i32 = arith.constant 0 : i32
    %c0_i32_0 = arith.constant 0 : i32
    %c0_i32_1 = arith.constant 0 : i32
    return %c0_i32, %c0_i32_0 : i32, i32
  }
  func.func @transform_7(%arg0: i32) -> (i32, i32, i32) {
    %c0_i32 = arith.constant 0 : i32
    %c0_i32_0 = arith.constant 0 : i32
    %c0_i32_1 = arith.constant 0 : i32
    return %arg0, %c0_i32, %c0_i32_0 : i32, i32, i32
  }
}

</mosaic_0001>

<bundles_post_ra>
// kernel: _basic_block_nchw.1
= control target key start
LH: loop header
LB: loop body
LE: loop exit
PB: predicated region body
PF: predicated region fallthrough
CT: control target
= control target key end

     0   :  { %s6983_s24 = smov 0   ;;  %s9750_s0 = inlined_call_operand.vmem [shape: bf16[32,16,4], index: 0, kind: input, shape index: {}]   ;;  %s9751_s1 = inlined_call_operand.vmem [shape: bf16[9,4,4], index: 1, kind: input, shape index: {}]   ;;  %s9752_s2 = inlined_call_operand.vmem [shape: f32[1,4], index: 2, kind: input, shape index: {}]   ;;  %s9753_s3 = inlined_call_operand.vmem [shape: f32[1,4], index: 3, kind: input, shape index: {}]   ;;  %s9754_s4 = inlined_call_operand.vmem [shape: bf16[9,4,4], index: 4, kind: input, shape index: {}]   ;;  %s9755_s5 = inlined_call_operand.vmem [shape: f32[1,4], index: 5, kind: input, shape index: {}]   ;;  %s9756_s6 = inlined_call_operand.vmem [shape: f32[1,4], index: 6, kind: input, shape index: {}]   ;;  %s9757_s7 = inlined_call_operand.vmem [shape: f32[32,16,4], index: 7, kind: output, shape index: {}]  }
   0x1 LB: > { %s5930_s25 = sadd.s32 4294967295, %s6940_s24   ;;  %p5934_p0 = scmp.ge.s32.totalorder %s6940_s24, 1  ;;  %s6940_s24 = sphi %s6983_s24, %s17_s24  }
   0x2   : > { %p239_p1 = scmp.lt.s32.totalorder %s6940_s24, 5 }
   0x4   : > { %p240_p2 = pnand %p5934_p0, %p239_p1 }
   0x6   : > { %243 = sbr.rel (%p240_p2) target bundleno = 856 (0x358), region = 48 }
   0xb   : > { %v5941_v0 = vld [vmem:[%s9751_s1 + $0x2] sm:$0x3]  ;;  %vm670_vm0 = vcmask 1041408   ;;  %v383_v1 = vld [vmem:[%s9751_s1] sm:$0x3]  ;;  %s5935_s30 = sshll.u32 %s5930_s25, 3 }
   0xc   : > { %6890 = vmatprep.subr.msk.bf16.mxu0 %vm670_vm0, %v5941_v0  ;;  %v672_v2 = vsel %vm670_vm0, %v5941_v0, 0  ;;  %6891 = vmatprep.subr.msk.bf16.mxu1 %vm670_vm0, %v383_v1  ;;  %v903_v3 = vsel %vm670_vm0, %v383_v1, 0  ;;  %p274_p3 = scmp.lt.s32.totalorder %s5935_s30, 31  ;;  %vm288_vm1 = vcmask 27650   ;;  %v6942_v4 = vmov 0  }
   0xd   : > { %6567 = vmatpush3.bf16.msra.mxu0 %v672_v2  ;;  %6585 = vmatpush3.bf16.msra.mxu1 %v903_v3  ;;  %289 = vst.msk [vmem:[#allocation2 + $0x4] sm:$0xc] %vm288_vm1, %v6942_v4  ;;  %290 = vst.msk [vmem:[#allocation2 + $0x1c] sm:$0xc] %vm288_vm1, %v6942_v4  ;;  %v5982_v5 = vld [vmem:[%s9751_s1 + $0x4] sm:$0x3] }
   0xe   : > { %291 = vst.msk [vmem:[#allocation2 + $0x34] sm:$0xc] %vm288_vm1, %v6942_v4  ;;  %292 = vst.msk [vmem:[#allocation2 + $0x4c] sm:$0xc] %vm288_vm1, %v6942_v4  ;;  %s10038_s30 = smov (!%p274_p3, %s5935_s30), 31  ;;  %6892 = vmatprep.subr.msk.bf16.mxu0 %vm670_vm0, %v5982_v5  ;;  %vm338_vm2 = vcmask 27648  }
   0xf   : > { %293 = vst.msk [vmem:[#allocation2 + $0x64] sm:$0xc] %vm288_vm1, %v6942_v4  ;;  %294 = vst.msk [vmem:[#allocation2 + $0x7c] sm:$0xc] %vm288_vm1, %v6942_v4  ;;  %v6007_v6 = vld [vmem:[%s9751_s1 + $0x6] sm:$0x3] }
  0x10   : > { %295 = vst.msk [vmem:[#allocation2 + $0x94] sm:$0xc] %vm288_vm1, %v6942_v4  ;;  %296 = vst.msk [vmem:[#allocation2 + $0xac] sm:$0xc] %vm288_vm1, %v6942_v4  ;;  %6893 = vmatprep.subr.msk.bf16.mxu1 %vm670_vm0, %v6007_v6  ;;  %s6347_s12 = sshll.u32 %s10038_s30, 3  ;;  %vm796_vm3 = vcmask 1045508  }
  0x11   : > { %306 = vst.msk [vmem:[#allocation3 + $0x4] sm:$0xc] %vm288_vm1, %v6942_v4  ;;  %307 = vst.msk [vmem:[#allocation3 + $0x1c] sm:$0xc] %vm288_vm1, %v6942_v4  ;;  %s7032_s15 = scalar_lea.vmem %s9750_s0, %s6347_s12  ;;  %v7035_v7 = vsel %vm670_vm0, %v5982_v5, 0  ;;  %v7038_v8 = vsel %vm670_vm0, %v6007_v6, 0 }
  0x12   : > { %308 = vst.msk [vmem:[#allocation3 + $0x34] sm:$0xc] %vm288_vm1, %v6942_v4  ;;  %309 = vst.msk [vmem:[#allocation3 + $0x4c] sm:$0xc] %vm288_vm1, %v6942_v4  ;;  %v7043_v9 = vld [vmem:[%s9751_s1 + $0x8] sm:$0x3] }
  0x13   : > { %310 = vst.msk [vmem:[#allocation3 + $0x64] sm:$0xc] %vm288_vm1, %v6942_v4  ;;  %311 = vst.msk [vmem:[#allocation3 + $0x7c] sm:$0xc] %vm288_vm1, %v6942_v4  ;;  %vm297_vm4 = vcmask 25600   ;;  %v7081_v23 = vsel %vm670_vm0, %v7043_v9, 0 }
  0x14   : > { %312 = vst.msk [vmem:[#allocation3 + $0x94] sm:$0xc] %vm288_vm1, %v6942_v4  ;;  %313 = vst.msk [vmem:[#allocation3 + $0xac] sm:$0xc] %vm288_vm1, %v6942_v4  ;;  %v322_v10 = vld [vmem:[%s7032_s15] sm:$0xf] }
  0x15   : > { %v323_v11 = vld [vmem:[%s7032_s15 + $0x4] sm:$0xf]  ;;  %v324_v12 = vld [vmem:[%s7032_s15 + $0x8] sm:$0xf]  ;;  %298 = vst.msk [vmem:[#allocation2 + $0x10] sm:$0x3] %vm297_vm4, %v6942_v4  ;;  %vm7109_vm8 = vmor %vm670_vm0, %vm796_vm3 }
  0x16   : > { %299 = vst.msk [vmem:[#allocation2 + $0x28] sm:$0x3] %vm297_vm4, %v6942_v4  ;;  %300 = vst.msk [vmem:[#allocation2 + $0x40] sm:$0x3] %vm297_vm4, %v6942_v4  ;;  %vm394_vm5 = vsmask.f32 1280 }
  0x17   : > { %301 = vst.msk [vmem:[#allocation2 + $0x58] sm:$0x3] %vm297_vm4, %v6942_v4  ;;  %302 = vst.msk [vmem:[#allocation2 + $0x70] sm:$0x3] %vm297_vm4, %v6942_v4  ;;  %vm395_vm6 = vsmask.f32 5392 }
  0x18   : > { %303 = vst.msk [vmem:[#allocation2 + $0x88] sm:$0x3] %vm297_vm4, %v6942_v4  ;;  %304 = vst.msk [vmem:[#allocation2 + $0xa0] sm:$0x3] %vm297_vm4, %v6942_v4  ;;  %v325_v13 = vld [vmem:[%s7032_s15 + $0xc] sm:$0xf] }
  0x19   : > { %305 = vst.msk [vmem:[#allocation2 + $0xb8] sm:$0x3] %vm297_vm4, %v6942_v4  ;;  %314 = vst.msk [vmem:[#allocation3 + $0x10] sm:$0x3] %vm297_vm4, %v6942_v4  ;;  %v326_v14 = vld [vmem:[%s7032_s15 + $0x10] sm:$0xf] }
  0x1a   : > { %315 = vst.msk [vmem:[#allocation3 + $0x28] sm:$0x3] %vm297_vm4, %v6942_v4  ;;  %316 = vst.msk [vmem:[#allocation3 + $0x40] sm:$0x3] %vm297_vm4, %v6942_v4  ;;  %v327_v15 = vld [vmem:[%s7032_s15 + $0x14] sm:$0xf] }
  0x1b   : > { %317 = vst.msk [vmem:[#allocation3 + $0x58] sm:$0x3] %vm297_vm4, %v6942_v4  ;;  %318 = vst.msk [vmem:[#allocation3 + $0x70] sm:$0x3] %vm297_vm4, %v6942_v4  ;;  %v359_v16 = vld [vmem:[#allocation2 + $0x4] sm:$0xc] }
  0x1c   : > { %319 = vst.msk [vmem:[#allocation3 + $0x88] sm:$0x3] %vm297_vm4, %v6942_v4  ;;  %320 = vst.msk [vmem:[#allocation3 + $0xa0] sm:$0x3] %vm297_vm4, %v6942_v4  ;;  %v7071_v17 = vld [vmem:[#allocation2 + $0x1c] sm:$0xc] }
  0x1d   : > { %321 = vst.msk [vmem:[#allocation3 + $0xb8] sm:$0x3] %vm297_vm4, %v6942_v4  ;;  %v7075_v18 = vld [vmem:[#allocation2 + $0x34] sm:$0xc]  ;;  %v398_v19 = vshrl.u32 %v359_v16, 16  ;;  %v401_v20 = vshll.u32 %v359_v16, 16  ;;  %vm7127_vm9 = vmor %vm394_vm5, %vm395_vm6 }
  0x1e   : > { %339 = vst.msk [vmem:[#allocation2 + $0x8] sm:$0xf] %vm338_vm2, %v322_v10  ;;  %340 = vst.msk [vmem:[#allocation2 + $0xc] sm:$0xf] %vm338_vm2, %v323_v11  ;;  %v426_v21 = vshrl.u32 %v7071_v17, 16  ;;  %v5958_v24 = vrot.slane %v359_v16, 10 }
  0x1f   : > { %341 = vst.msk [vmem:[#allocation2 + $0x20] sm:$0xf] %vm338_vm2, %v324_v12  ;;  %342 = vst.msk [vmem:[#allocation2 + $0x24] sm:$0xf] %vm338_vm2, %v325_v13  ;;  %v328_v22 = vld [vmem:[%s7032_s15 + $0x18] sm:$0xf] }
  0x20   : > { %343 = vst.msk [vmem:[#allocation2 + $0x38] sm:$0xf] %vm338_vm2, %v326_v14  ;;  %344 = vst.msk [vmem:[#allocation2 + $0x3c] sm:$0xf] %vm338_vm2, %v327_v15  ;;  %v429_v25 = vshll.u32 %v7071_v17, 16  ;;  %v454_v26 = vshrl.u32 %v7075_v18, 16 }
  0x21   : > { %v457_v27 = vshll.u32 %v7075_v18, 16  ;;  %v329_v28 = vld [vmem:[%s7032_s15 + $0x1c] sm:$0xf]  ;;  %345 = vst.msk [vmem:[#allocation2 + $0x50] sm:$0xf] %vm338_vm2, %v328_v22  ;;  %v400_v29 = vrot.slane %v398_v19, 6 }
  0x22   : > { %v403_v30 = vrot.slane %v401_v20, 7  ;;  %v428_v31 = vrot.slane %v426_v21, 6  ;;  %v5959_v32 = vrot.slane %v7071_v17, 10  ;;  %346 = vst.msk [vmem:[#allocation2 + $0x54] sm:$0xf] %vm338_vm2, %v329_v28  ;;  %vm645_vm7 = vcmask 31744  }
  0x23   : > { %v7090_v33 = vld [vmem:[#allocation2 + $0x4c] sm:$0xc]  ;;  %v431_v34 = vrot.slane %v429_v25, 7  ;;  %v456_v35 = vrot.slane %v454_v26, 6  ;;  %v459_v36 = vrot.slane %v457_v27, 7  ;;  %v5960_v37 = vrot.slane %v7075_v18, 10 }
  0x24   : > { %v330_v38 = vld [vmem:[%s7032_s15 + $0x20] sm:$0xf]  ;;  %v404_v39 = vor.u32 %v403_v30, %v400_v29  ;;  %v482_v40 = vshrl.u32 %v7090_v33, 16  ;;  %v485_v41 = vshll.u32 %v7090_v33, 16  ;;  %v5961_v42 = vrot.slane %v7090_v33, 10  ;;  %s6348_s11 = sshll.u32 %s10038_s30, 4 }
  0x25   : > { %v331_v43 = vld [vmem:[%s7032_s15 + $0x24] sm:$0xf]  ;;  %347 = vst.msk [vmem:[#allocation2 + $0x68] sm:$0xf] %vm338_vm2, %v330_v38  ;;  %v7099_v44 = vld [vmem:[#allocation2 + $0x8] sm:$0xf]  ;;  %v432_v47 = vor.u32 %v431_v34, %v428_v31  ;;  %v460_v48 = vor.u32 %v459_v36, %v456_v35  ;;  %s9650_s13 = scalar_lea.vmem %s9757_s7, %s6348_s11 }
  0x26   : > { %v7101_v45 = vld [vmem:[#allocation2 + $0xc] sm:$0x7]  ;;  %348 = vst.msk [vmem:[#allocation2 + $0x6c] sm:$0xf] %vm338_vm2, %v331_v43  ;;  %v405_v49 = vrot.slane %v404_v39, 4  ;;  %v407_v50 = vshrl.u32 %v7099_v44, 16 }
  0x27   : > { %v361_v46 = vld [vmem:[#allocation2 + $0xc] sm:$0x3]  ;;  %v410_v51 = vshll.u32 %v7099_v44, 16  ;;  %v417_v52 = vshrl.u32 %v7101_v45, 16  ;;  %v9796_v53 = vmov 0  ;;  %v420_v55 = vshll.u32 %v7101_v45, 16 }
  0x28   : > { %v9797_v53 = vsel %vm7109_vm8, 4294967295, %v9796_v53  ;;  %v7113_v54 = vld [vmem:[#allocation2 + $0x20] sm:$0xf]  ;;  %v800_v56 = vrot.slane %v7099_v44, 6  ;;  %v803_v57 = vrot.slane %v361_v46, 6  ;;  %v7119_v59 = vrot.slane %v432_v47, 4 }
  0x29   : > { %9798 = vst [vmem:[#allocation4_spill] sm:$0xff] %v9797_v53  ;;  %v7117_v58 = vld [vmem:[#allocation2 + $0x24] sm:$0x7]  ;;  %v409_v60 = vrot.slane %v407_v50, 6  ;;  %v412_v61 = vrot.slane %v410_v51, 7  ;;  %v419_v62 = vrot.slane %v417_v52, 6 }
  0x2a   : > { %v7123_v63 = vrot.slane %v407_v50, 7  ;;  %v9799_v0 = vmov 0  ;;  %v422_v1 = vrot.slane %v420_v55, 7  ;;  %v801_v2 = vsel %vm7109_vm8, %v5958_v24, %v800_v56  ;;  %v364_v16 = vld [vmem:[#allocation2 + $0x24] sm:$0x3] }
  0x2b   : > { %v9800_v0 = vsel %vm7127_vm9, 4294967295, %v9799_v0  ;;  %v802_v3 = vrot.slane %v800_v56, 4  ;;  %v435_v4 = vshrl.u32 %v7113_v54, 16  ;;  %v413_v5 = vor.u32 %v412_v61, %v409_v60  ;;  %v7145_v28 = vld [vmem:[#allocation2 + $0x38] sm:$0xf] }
  0x2c   : > { %9801 = vst [vmem:[#allocation5_spill] sm:$0xff] %v9800_v0  ;;  %v438_v6 = vshll.u32 %v7113_v54, 16  ;;  %v445_v10 = vshrl.u32 %v7117_v58, 16  ;;  %v448_v11 = vshll.u32 %v7117_v58, 16  ;;  %v423_v12 = vor.u32 %v422_v1, %v419_v62  ;;  %v7150_v34 = vld [vmem:[#allocation2 + $0x3c] sm:$0x7] }
  0x2d   : > { %v804_v13 = vsel %vm7109_vm8, %v802_v3, %v803_v57  ;;  %v437_v14 = vrot.slane %v435_v4, 6  ;;  %v1043_v15 = vrot.slane %v7117_v58, 7  ;;  %v414_v19 = vsel %vm7127_vm9, %v405_v49, %v413_v5  ;;  %v367_v36 = vld [vmem:[#allocation2 + $0x3c] sm:$0x3]  ;;  %v332_v47 = vld [vmem:[%s7032_s15 + $0x28] sm:$0xf] }
  0x2e   : > { %v415_v20 = vrot.slane %v413_v5, 4  ;;  %v5966_v21 = vcombine.low %v801_v2, %v804_v13  ;;  %v440_v22 = vrot.slane %v438_v6, 7  ;;  %v447_v24 = vrot.slane %v445_v10, 6  ;;  %v333_v49 = vld [vmem:[%s7032_s15 + $0x2c] sm:$0xf] }
  0x2f   : > { %v450_v25 = vrot.slane %v448_v11, 7  ;;  %v7142_v26 = vrot.slane %v435_v4, 7  ;;  %v807_v27 = vrot.slane %v7113_v54, 6  ;;  %v810_v31 = vrot.slane %v364_v16, 6  ;;  %349 = vst.msk [vmem:[#allocation2 + $0x80] sm:$0xf] %vm338_vm2, %v332_v47 }
  0x30   : > { %v424_v29 = vsel %vm7127_vm9, %v415_v20, %v423_v12  ;;  %6586 = vmatprep.mubr.msk.bf16.mxu1 %vm645_vm7, %v5966_v21  ;;  %v441_v30 = vor.u32 %v440_v22, %v437_v14  ;;  %v7152_v35 = vrot.slane %v460_v48, 4  ;;  %350 = vst.msk [vmem:[#allocation2 + $0x84] sm:$0xf] %vm338_vm2, %v333_v49  ;;  %v334_v56 = vld [vmem:[%s7032_s15 + $0x30] sm:$0xf]  ;;  %v463_v57 = vshrl.u32 %v7145_v28, 16 }
  0x31   : > { %v5942_v38 = vcombine.low %v414_v19, %v424_v29  ;;  %v451_v39 = vor.u32 %v450_v25, %v447_v24  ;;  %v7155_v43 = vor.u32 %v7142_v26, %v438_v6  ;;  %v1289_v46 = vrot.slane %v7142_v26, 4  ;;  %v335_v61 = vld [vmem:[%s7032_s15 + $0x34] sm:$0xf]  ;;  %351 = vst.msk [vmem:[#allocation2 + $0x98] sm:$0xf] %vm338_vm2, %v334_v56 }
  0x32   : > { %v442_v50 = vsel %vm7127_vm9, %v7119_v59, %v441_v30  ;;  %v443_v52 = vrot.slane %v441_v30, 4  ;;  %v808_v48 = vsel %vm7109_vm8, %v5959_v32, %v807_v27  ;;  %v809_v55 = vrot.slane %v807_v27, 4  ;;  %v7182_v3 = vld [vmem:[#allocation2 + $0x50] sm:$0xf]  ;;  %352 = vst.msk [vmem:[#allocation2 + $0x9c] sm:$0xf] %vm338_vm2, %v335_v61 }
  0x33   : > { %6568 = vmatprep.mubr.msk.bf16.mxu0 %vm645_vm7, %v5942_v38  ;;  %v466_v60 = vshll.u32 %v7145_v28, 16  ;;  %v473_v59 = vshrl.u32 %v7150_v34, 16  ;;  %v476_v17 = vshll.u32 %v7150_v34, 16  ;;  %v814_v1 = vrot.slane %v7145_v28, 6  ;;  %v336_v4 = vld [vmem:[%s7032_s15 + $0x38] sm:$0xf] }
  0x34   : > { %v452_v32 = vsel %vm7127_vm9, %v443_v52, %v451_v39  ;;  %v811_v62 = vsel %vm7109_vm8, %v809_v55, %v810_v31  ;;  %v817_v2 = vrot.slane %v367_v36, 6  ;;  %v465_v10 = vrot.slane %v463_v57, 6  ;;  %v7190_v12 = vld [vmem:[#allocation2 + $0x54] sm:$0x7]  ;;  %v337_v13 = vld [vmem:[%s7032_s15 + $0x3c] sm:$0xf] }
  0x35   : > { %v5943_v5 = vcombine.low %v442_v50, %v452_v32  ;;  %v5967_v6 = vcombine.low %v808_v48, %v811_v62  ;;  %v468_v11 = vrot.slane %v466_v60, 7  ;;  %353 = vst.msk [vmem:[#allocation2 + $0xb0] sm:$0xf] %vm338_vm2, %v336_v4  ;;  %v475_v14 = vrot.slane %v473_v59, 6  ;;  %354 = vst.msk [vmem:[#allocation2 + $0xb4] sm:$0xf] %vm338_vm2, %v337_v13 }
  0x36   : > { %v478_v16 = vrot.slane %v476_v17, 7  ;;  %v815_v19 = vsel %vm7109_vm8, %v5960_v37, %v814_v1  ;;  %v816_v20 = vrot.slane %v814_v1, 4  ;;  %v7202_v21 = vld [vmem:[%s9751_s1 + $0xa] sm:$0x3]  ;;  %v484_v24 = vrot.slane %v482_v40, 6 }
  0x37   : > { %6569 = vmatmul.mubr.msk.bf16.vlgmr.msra.gmra.mxu0 %vm645_vm7, %v5943_v5  ;;  %6587 = vmatmul.mubr.msk.bf16.vlgmr.msra.gmra.mxu1 %vm645_vm7, %v5967_v6  ;;  %v469_v22 = vor.u32 %v468_v11, %v465_v10  ;;  %v487_v18 = vrot.slane %v485_v41, 7  ;;  %v491_v37 = vshrl.u32 %v7182_v3, 16  ;;  %v494_v29 = vshll.u32 %v7182_v3, 16  ;;  %v370_v31 = vld [vmem:[#allocation2 + $0x54] sm:$0x3] }
  0x38   : > { %6603 = vmatpush3.bf16.msra.mxu0 %v7035_v7  ;;  %v479_v25 = vor.u32 %v478_v16, %v475_v14  ;;  %v818_v27 = vsel %vm7109_vm8, %v816_v20, %v817_v2  ;;  %v501_v30 = vshrl.u32 %v7190_v12, 16  ;;  %6621 = vmatpush3.bf16.msra.mxu1 %v7038_v8  ;;  %v371_v39 = vld [vmem:[#allocation2 + $0x64] sm:$0xc]  ;;  %v504_v49 = vshll.u32 %v7190_v12, 16  ;;  %v7239_v62 = vld [vmem:[#allocation2 + $0x6c] sm:$0x7] }
  0x39   : > { %v470_v40 = vsel %vm7127_vm9, %v7152_v35, %v469_v22  ;;  %v471_v41 = vrot.slane %v469_v22, 4  ;;  %v5968_v36 = vcombine.low %v815_v19, %v818_v27  ;;  %v488_v38 = vor.u32 %v487_v18, %v484_v24  ;;  %6894 = vmatprep.subr.msk.bf16.mxu0 %vm670_vm0, %v7043_v9  ;;  %6895 = vmatprep.subr.msk.bf16.mxu1 %vm670_vm0, %v7202_v21  ;;  %v7229_v35 = vld [vmem:[#allocation2 + $0x68] sm:$0xf]  ;;  %v373_v14 = vld [vmem:[#allocation2 + $0x6c] sm:$0x3] }
  0x3a   : > { %v493_v7 = vrot.slane %v491_v37, 6  ;;  %v496_v8 = vrot.slane %v494_v29, 7  ;;  %v503_v47 = vrot.slane %v501_v30, 6  ;;  %v821_v52 = vrot.slane %v7182_v3, 6  ;;  %v374_v24 = vld [vmem:[#allocation2 + $0x7c] sm:$0xc] }
  0x3b   : > { %v480_v50 = vsel %vm7127_vm9, %v471_v41, %v479_v25  ;;  %6590 = vmatprep.mubr.msk.bf16.mxu1 %vm645_vm7, %v5968_v36  ;;  %v489_v9 = vrot.slane %v488_v38, 4  ;;  %v824_v48 = vrot.slane %v370_v31, 6  ;;  %v506_v59 = vrot.slane %v504_v49, 7  ;;  %v7256_v31 = vld [vmem:[#allocation2 + $0x80] sm:$0xf] }
  0x3c   : > { %v5944_v55 = vcombine.low %v470_v40, %v480_v50  ;;  %v497_v56 = vor.u32 %v496_v8, %v493_v7  ;;  %v510_v17 = vshrl.u32 %v371_v39, 16  ;;  %v822_v61 = vsel %vm7109_vm8, %v5961_v42, %v821_v52 }
  0x3d   : > { %v823_v32 = vrot.slane %v821_v52, 4  ;;  %v513_v1 = vshll.u32 %v371_v39, 16  ;;  %v519_v2 = vshrl.u32 %v7229_v35, 16  ;;  %v507_v6 = vor.u32 %v506_v59, %v503_v47  ;;  %v7261_v47 = vld [vmem:[#allocation2 + $0x84] sm:$0x7] }
  0x3e   : > { %6572 = vmatprep.mubr.msk.bf16.mxu0 %vm645_vm7, %v5944_v55  ;;  %v498_v4 = vsel %vm7127_vm9, %v489_v9, %v497_v56  ;;  %v499_v5 = vrot.slane %v497_v56, 4  ;;  %v512_v10 = vrot.slane %v510_v17, 6  ;;  %v522_v13 = vshll.u32 %v7229_v35, 16 }
  0x3f   : > { %v825_v33 = vsel %vm7109_vm8, %v823_v32, %v824_v48  ;;  %v515_v11 = vrot.slane %v513_v1, 7  ;;  %v521_v42 = vrot.slane %v519_v2, 6  ;;  %v529_v20 = vshrl.u32 %v7239_v62, 16 }
  0x40   : > { %v508_v16 = vsel %vm7127_vm9, %v499_v5, %v507_v6  ;;  %v5969_v19 = vcombine.low %v822_v61, %v825_v33  ;;  %v532_v22 = vshll.u32 %v7239_v62, 16  ;;  %v524_v27 = vrot.slane %v522_v13, 7  ;;  %v376_v5 = vld [vmem:[#allocation2 + $0x84] sm:$0x3] }
  0x41   : > { %v5945_v18 = vcombine.low %v498_v4, %v508_v16  ;;  %v516_v25 = vor.u32 %v515_v11, %v512_v10  ;;  %v5962_v30 = vrot.slane %v371_v39, 10  ;;  %v531_v40 = vrot.slane %v529_v20, 6 }
  0x42   : > { %6591 = vmatmul.mubr.msk.bf16.gmra.mxu1 %vm645_vm7, %v5969_v19  ;;  %v534_v41 = vrot.slane %v532_v22, 7  ;;  %v828_v36 = vrot.slane %v7229_v35, 6  ;;  %v831_v38 = vrot.slane %v373_v14, 6  ;;  %v525_v8 = vor.u32 %v524_v27, %v521_v42  ;;  %v377_v42 = vld [vmem:[#allocation2 + $0x94] sm:$0xc] }
  0x43   : > { %6573 = vmatmul.mubr.msk.bf16.gmra.mxu0 %vm645_vm7, %v5945_v18  ;;  %v517_v7 = vrot.slane %v516_v25, 4  ;;  %v538_v49 = vshrl.u32 %v374_v24, 16  ;;  %v541_v50 = vshll.u32 %v374_v24, 16  ;;  %v547_v48 = vshrl.u32 %v7256_v31, 16  ;;  %v7277_v14 = vld [vmem:[#allocation2 + $0x98] sm:$0xf] }
  0x44   : > { %v535_v9 = vor.u32 %v534_v41, %v531_v40  ;;  %v829_v39 = vsel %vm7109_vm8, %v5962_v30, %v828_v36  ;;  %v830_v52 = vrot.slane %v828_v36, 4  ;;  %v527_v56 = vrot.slane %v525_v8, 4  ;;  %v7284_v41 = vld [vmem:[#allocation2 + $0x9c] sm:$0x7] }
  0x45   : > { %v526_v55 = vsel %vm7127_vm9, %v517_v7, %v525_v8  ;;  %v540_v59 = vrot.slane %v538_v49, 6  ;;  %v543_v17 = vrot.slane %v541_v50, 7  ;;  %v549_v32 = vrot.slane %v547_v48, 6 }
  0x46   : > { %v832_v61 = vsel %vm7109_vm8, %v830_v52, %v831_v38  ;;  %v550_v1 = vshll.u32 %v7256_v31, 16  ;;  %v557_v4 = vshrl.u32 %v7261_v47, 16  ;;  %v536_v6 = vsel %vm7127_vm9, %v527_v56, %v535_v9 }
  0x47   : > { %v5970_v10 = vcombine.low %v829_v39, %v832_v61  ;;  %v544_v33 = vor.u32 %v543_v17, %v540_v59  ;;  %v560_v11 = vshll.u32 %v7261_v47, 16  ;;  %v5946_v16 = vcombine.low %v526_v55, %v536_v6 }
  0x48   : > { %v552_v19 = vrot.slane %v550_v1, 7  ;;  %v559_v20 = vrot.slane %v557_v4, 6  ;;  %v5963_v22 = vrot.slane %v374_v24, 10  ;;  %v835_v27 = vrot.slane %v7256_v31, 6 }
  0x49   : > { %6594 = vmatprep.mubr.msk.bf16.mxu1 %vm645_vm7, %v5970_v10  ;;  %v545_v18 = vrot.slane %v544_v33, 4  ;;  %v562_v25 = vrot.slane %v560_v11, 7  ;;  %v838_v30 = vrot.slane %v376_v5, 6  ;;  %6576 = vmatprep.mubr.msk.bf16.mxu0 %vm645_vm7, %v5946_v16  ;;  %v566_v36 = vshrl.u32 %v377_v42, 16  ;;  %v380_v33 = vld [vmem:[#allocation2 + $0xac] sm:$0xc] }
  0x4a   : > { %v553_v40 = vor.u32 %v552_v19, %v549_v32  ;;  %v569_v38 = vshll.u32 %v377_v42, 16  ;;  %v575_v7 = vshrl.u32 %v7277_v14, 16  ;;  %v836_v24 = vsel %vm7109_vm8, %v5963_v22, %v835_v27  ;;  %v379_v32 = vld [vmem:[#allocation2 + $0x9c] sm:$0x3]  ;;  %v7302_v11 = vld [vmem:[#allocation2 + $0xb0] sm:$0xf] }
  0x4b   : > { %v563_v8 = vor.u32 %v562_v25, %v559_v20  ;;  %v837_v49 = vrot.slane %v835_v27, 4  ;;  %v578_v50 = vshll.u32 %v7277_v14, 16  ;;  %v568_v52 = vrot.slane %v566_v36, 6  ;;  %v7307_v36 = vld [vmem:[#allocation2 + $0xb4] sm:$0x7] }
  0x4c   : > { %v554_v9 = vsel %vm7127_vm9, %v545_v18, %v553_v40  ;;  %v555_v39 = vrot.slane %v553_v40, 4  ;;  %v571_v55 = vrot.slane %v569_v38, 7  ;;  %vm1028_vm10 = vcmask 1040384  }
  0x4d   : > { %vm1029_vm11 = vcmask 1044484   ;;  %v839_v56 = vsel %vm7109_vm8, %v837_v49, %v838_v30  ;;  %v577_v59 = vrot.slane %v575_v7, 6  ;;  %v580_v17 = vrot.slane %v578_v50, 7 }
  0x4e   : > { %v585_v61 = vshrl.u32 %v7284_v41, 16  ;;  %v564_v4 = vsel %vm7127_vm9, %v555_v39, %v563_v8  ;;  %v5971_v5 = vcombine.low %v836_v24, %v839_v56  ;;  %v572_v6 = vor.u32 %v571_v55, %v568_v52  ;;  %vm7330_vm14 = vmor %vm1028_vm10, %vm1029_vm11 }
  0x4f   : > { %v588_v10 = vshll.u32 %v7284_v41, 16  ;;  %v5947_v16 = vcombine.low %v554_v9, %v564_v4  ;;  %v581_v19 = vor.u32 %v580_v17, %v577_v59  ;;  %v5964_v22 = vrot.slane %v377_v42, 10 }
  0x50   : > { %v587_v20 = vrot.slane %v585_v61, 6  ;;  %6595 = vmatmul.mubr.msk.bf16.gmra.mxu1 %vm645_vm7, %v5971_v5  ;;  %v573_v18 = vrot.slane %v572_v6, 4  ;;  %v842_v27 = vrot.slane %v7277_v14, 6  ;;  %v845_v30 = vrot.slane %v379_v32, 6  ;;  %v382_v5 = vld [vmem:[#allocation2 + $0xb4] sm:$0x3] }
  0x51   : > { %v590_v25 = vrot.slane %v588_v10, 7  ;;  %6577 = vmatmul.mubr.msk.bf16.gmra.mxu0 %vm645_vm7, %v5947_v16  ;;  %v583_v40 = vrot.slane %v581_v19, 4  ;;  %v594_v38 = vshrl.u32 %v380_v33, 16  ;;  %v597_v8 = vshll.u32 %v380_v33, 16  ;;  %v1002_v6 = vld [vmem:[#allocation2 + $0x4] sm:$0x8] }
  0x52   : > { %v603_v24 = vshrl.u32 %v7302_v11, 16  ;;  %vm1261_vm12 = vsmask.f32 256  ;;  %vm1262_vm13 = vsmask.f32 4368  ;;  %v582_v42 = vsel %vm7127_vm9, %v573_v18, %v581_v19 }
  0x53   : > { %v591_v49 = vor.u32 %v590_v25, %v587_v20  ;;  %v843_v9 = vsel %vm7109_vm8, %v5964_v22, %v842_v27  ;;  %v844_v39 = vrot.slane %v842_v27, 4  ;;  %v596_v52 = vrot.slane %v594_v38, 6  ;;  %vm7360_vm15 = vmor %vm1261_vm12, %vm1262_vm13 }
  0x54   : > { %v599_v55 = vrot.slane %v597_v8, 7  ;;  %v605_v56 = vrot.slane %v603_v24, 6  ;;  %v606_v59 = vshll.u32 %v7302_v11, 16  ;;  %v613_v32 = vshrl.u32 %v7307_v36, 16 }
  0x55   : > { %v592_v17 = vsel %vm7127_vm9, %v583_v40, %v591_v49  ;;  %v846_v61 = vsel %vm7109_vm8, %v844_v39, %v845_v30  ;;  %v616_v4 = vshll.u32 %v7307_v36, 16  ;;  %v5965_v25 = vrot.slane %v380_v33, 10  ;;  %v1003_v40 = vld [vmem:[#allocation2 + $0x1c] sm:$0x8] }
  0x56   : > { %v5948_v10 = vcombine.low %v582_v42, %v592_v17  ;;  %v5972_v16 = vcombine.low %v843_v9, %v846_v61  ;;  %v600_v19 = vor.u32 %v599_v55, %v596_v52  ;;  %v608_v20 = vrot.slane %v606_v59, 7 }
  0x57   : > { %v615_v22 = vrot.slane %v613_v32, 6  ;;  %v618_v18 = vrot.slane %v616_v4, 7  ;;  %v849_v27 = vrot.slane %v7302_v11, 6  ;;  %v852_v8 = vrot.slane %v382_v5, 6 }
  0x58   : > { %6580 = vmatprep.mubr.msk.bf16.mxu0 %vm645_vm7, %v5948_v10  ;;  %6598 = vmatprep.mubr.msk.bf16.mxu1 %vm645_vm7, %v5972_v16  ;;  %v601_v30 = vrot.slane %v600_v19, 4  ;;  %v609_v38 = vor.u32 %v608_v20, %v605_v56  ;;  %v9802_v42 = vmov 0  ;;  %v5983_v49 = vrot.slane %v1002_v6, 11  ;;  %v7345_v16 = vld [vmem:[#allocation2 + $0xc] sm:$0xf] }
  0x59   : > { %v9803_v42 = vsel %vm7330_vm14, 4294967295, %v9802_v42  ;;  %v619_v9 = vor.u32 %v618_v18, %v615_v22  ;;  %v850_v33 = vsel %vm7109_vm8, %v5965_v25, %v849_v27  ;;  %v851_v39 = vrot.slane %v849_v27, 4  ;;  %v7352_v18 = vld [vmem:[#allocation2 + $0x24] sm:$0xf] }
  0x5a   : > { %9804 = vst [vmem:[#allocation6_spill] sm:$0xff] %v9803_v42  ;;  %v1033_v52 = vrot.slane %v7099_v44, 7  ;;  %v610_v55 = vsel %vm7127_vm9, %v601_v30, %v609_v38  ;;  %v611_v17 = vrot.slane %v609_v38, 4  ;;  %v1036_v56 = vrot.slane %v7101_v45, 7 }
  0x5b   : > { %v5984_v61 = vrot.slane %v1003_v40, 11  ;;  %v853_v32 = vsel %vm7109_vm8, %v851_v39, %v852_v8  ;;  %v1040_v10 = vrot.slane %v7113_v54, 7  ;;  %v1265_v22 = vshrl.u32 %v1002_v6, 16 }
  0x5c   : > { %v1034_v4 = vsel %vm7330_vm14, %v5983_v49, %v1033_v52  ;;  %v1035_v5 = vrot.slane %v1033_v52, 4  ;;  %v620_v19 = vsel %vm7127_vm9, %v611_v17, %v619_v9  ;;  %v5973_v20 = vcombine.low %v850_v33, %v853_v32  ;;  %v1004_v33 = vld [vmem:[#allocation2 + $0x34] sm:$0x8] }
  0x5d   : > { %v1270_v45 = vor.u32 %v7123_v63, %v410_v51  ;;  %v5949_v25 = vcombine.low %v610_v55, %v620_v19  ;;  %v1041_v30 = vsel %vm7330_vm14, %v5984_v61, %v1040_v10  ;;  %v1042_v38 = vrot.slane %v1040_v10, 4 }
  0x5e   : > { %v1037_v27 = vsel %vm7330_vm14, %v1035_v5, %v1036_v56  ;;  %v9805_v8 = vmov 0  ;;  %6599 = vmatmul.mubr.msk.bf16.gmra.mxu1 %vm645_vm7, %v5973_v20  ;;  %v6008_v51 = vrot.slane %v1265_v22, 11  ;;  %v1272_v49 = vrot.slane %v7123_v63, 4  ;;  %v1005_v56 = vld [vmem:[#allocation2 + $0x4c] sm:$0x8] }
  0x5f   : > { %v9806_v8 = vsel %vm7360_vm15, 4294967295, %v9805_v8  ;;  %v5991_v6 = vcombine.low %v1034_v4, %v1037_v27  ;;  %v1274_v9 = vshrl.u32 %v7345_v16, 16  ;;  %6581 = vmatmul.mubr.msk.bf16.gmra.mxu0 %vm645_vm7, %v5949_v25  ;;  %v1044_v39 = vsel %vm7330_vm14, %v1042_v38, %v1043_v15 }
  0x60   : > { %9807 = vst [vmem:[#allocation7_spill] sm:$0xff] %v9806_v8  ;;  %v1277_v52 = vshll.u32 %v7345_v16, 16  ;;  %v1282_v55 = vshrl.u32 %v1003_v40, 16  ;;  %v1291_v17 = vshrl.u32 %v7352_v18, 16  ;;  %v5992_v61 = vcombine.low %v1041_v30, %v1044_v39 }
  0x61   : > { %6604 = vmatprep.mubr.msk.bf16.mxu0 %vm645_vm7, %v5991_v6  ;;  %v1271_v63 = vsel %vm7360_vm15, %v6008_v51, %v1270_v45  ;;  %v1276_v32 = vrot.slane %v1274_v9, 7  ;;  %v1294_v4 = vshll.u32 %v7352_v18, 16  ;;  %v5985_v10 = vrot.slane %v1004_v33, 11  ;;  %v7391_v9 = vld [vmem:[#allocation2 + $0x3c] sm:$0xf] }
  0x62   : > { %v6009_v5 = vrot.slane %v1282_v55, 11  ;;  %v1293_v58 = vrot.slane %v1291_v17, 7  ;;  %v1047_v15 = vrot.slane %v7145_v28, 7  ;;  %v1050_v40 = vrot.slane %v7150_v34, 7 }
  0x63   : > { %v1279_v19 = vor.u32 %v1277_v52, %v1276_v32  ;;  %v5986_v20 = vrot.slane %v1005_v56, 11  ;;  %v1054_v22 = vrot.slane %v7182_v3, 7  ;;  %v1057_v34 = vrot.slane %v7190_v12, 7 }
  0x64   : > { %v1288_v25 = vsel %vm7360_vm15, %v6009_v5, %v7155_v43  ;;  %v1296_v27 = vor.u32 %v1294_v4, %v1293_v58  ;;  %v1048_v45 = vsel %vm7330_vm14, %v5985_v10, %v1047_v15  ;;  %v1049_v30 = vrot.slane %v1047_v15, 4 }
  0x65   : > { %v1280_v38 = vsel %vm7360_vm15, %v1272_v49, %v1279_v19  ;;  %v1055_v6 = vsel %vm7330_vm14, %v5986_v20, %v1054_v22  ;;  %v1056_v51 = vrot.slane %v1054_v22, 4  ;;  %v1299_v55 = vshrl.u32 %v1004_v33, 16  ;;  %v7402_v49 = vld [vmem:[%s9751_s1 + $0xc] sm:$0x3] }
  0x66   : > { %v6016_v39 = vcombine.low %v1271_v63, %v1280_v38  ;;  %v1297_v43 = vsel %vm7360_vm15, %v1289_v46, %v1296_v27  ;;  %v1051_v52 = vsel %vm7330_vm14, %v1049_v30, %v1050_v40  ;;  %v1303_v26 = vrot.slane %v463_v57, 7  ;;  %v7408_v63 = vld [vmem:[#allocation2 + $0x54] sm:$0xf]  ;;  %v1006_v46 = vld [vmem:[#allocation2 + $0x64] sm:$0x8] }
  0x67   : > { %v6017_v17 = vcombine.low %v1288_v25, %v1297_v43  ;;  %v5993_v32 = vcombine.low %v1048_v45, %v1051_v52  ;;  %v1058_v12 = vsel %vm7330_vm14, %v1056_v51, %v1057_v34  ;;  %6605 = vmatmul.mubr.msk.bf16.vlgmr.msra.gmra.mxu0 %vm645_vm7, %v5992_v61  ;;  %v6010_v4 = vrot.slane %v1299_v55, 11  ;;  %v1007_v25 = vld [vmem:[#allocation2 + $0x7c] sm:$0x8]  ;;  %v7435_v43 = vld [vmem:[#allocation2 + $0x6c] sm:$0xf] }
  0x68   : > { %6622 = vmatprep.mubr.msk.bf16.mxu1 %vm645_vm7, %v6016_v39  ;;  %v5994_v33 = vcombine.low %v1055_v6, %v1058_v12  ;;  %v1308_v5 = vshrl.u32 %v7391_v9, 16  ;;  %v1311_v58 = vshll.u32 %v7391_v9, 16  ;;  %6639 = vmatpush3.bf16.msra.mxu0 %v7081_v23  ;;  %v1304_v57 = vor.u32 %v1303_v26, %v466_v60 }
  0x69   : > { %6623 = vmatmul.mubr.msk.bf16.vlgmr.msra.gmra.mxu1 %vm645_vm7, %v6017_v17  ;;  %v1306_v10 = vrot.slane %v1303_v26, 4  ;;  %v1316_v15 = vshrl.u32 %v1005_v56, 16  ;;  %v1320_v61 = vrot.slane %v491_v37, 7  ;;  %6608 = vmatprep.mubr.msk.bf16.mxu0 %vm645_vm7, %v5993_v32  ;;  %v1325_v40 = vshrl.u32 %v7408_v63, 16 }
  0x6a   : > { %v1310_v19 = vrot.slane %v1308_v5, 7  ;;  %v1328_v20 = vshll.u32 %v7408_v63, 16  ;;  %v5987_v22 = vrot.slane %v1006_v46, 11  ;;  %6896 = vmatprep.subr.msk.bf16.mxu0 %vm670_vm0, %v7402_v49  ;;  %v1305_v23 = vsel %vm7360_vm15, %v6010_v4, %v1304_v57  ;;  %v7451_v57 = vld [vmem:[#allocation2 + $0x84] sm:$0xf] }
  0x6b   : > { %v6011_v60 = vrot.slane %v1316_v15, 11  ;;  %v1321_v56 = vor.u32 %v1320_v61, %v494_v29  ;;  %v1323_v37 = vrot.slane %v1320_v61, 4  ;;  %v1327_v45 = vrot.slane %v1325_v40, 7  ;;  %v1008_v61 = vld [vmem:[#allocation2 + $0x94] sm:$0x8] }
  0x6c   : > { %v1313_v27 = vor.u32 %v1311_v58, %v1310_v19  ;;  %v1061_v30 = vrot.slane %v7229_v35, 7  ;;  %v1064_v38 = vrot.slane %v7239_v62, 7  ;;  %v5988_v51 = vrot.slane %v1007_v25, 11 }
  0x6d   : > { %v1322_v6 = vsel %vm7360_vm15, %v6011_v60, %v1321_v56  ;;  %v1068_v34 = vrot.slane %v7256_v31, 7  ;;  %v1071_v39 = vrot.slane %v7261_v47, 7  ;;  %v1330_v52 = vor.u32 %v1328_v20, %v1327_v45 }
  0x6e   : > { %v1314_v29 = vsel %vm7360_vm15, %v1306_v10, %v1313_v27  ;;  %v1062_v55 = vsel %vm7330_vm14, %v5987_v22, %v1061_v30  ;;  %v1063_v17 = vrot.slane %v1061_v30, 4  ;;  %v1333_v26 = vshrl.u32 %v1006_v46, 16  ;;  %v1009_v30 = vld [vmem:[#allocation2 + $0xac] sm:$0x8] }
  0x6f   : > { %v6018_v32 = vcombine.low %v1305_v23, %v1314_v29  ;;  %v1069_v62 = vsel %vm7330_vm14, %v5988_v51, %v1068_v34  ;;  %v1070_v12 = vrot.slane %v1068_v34, 4  ;;  %6609 = vmatmul.mubr.msk.bf16.gmra.mxu0 %vm645_vm7, %v5994_v33  ;;  %v1331_v47 = vsel %vm7360_vm15, %v1323_v37, %v1330_v52 }
  0x70   : > { %v1065_v4 = vsel %vm7330_vm14, %v1063_v17, %v1064_v38  ;;  %v1337_v5 = vrot.slane %v519_v2, 7  ;;  %v1342_v58 = vshrl.u32 %v7435_v43, 16  ;;  %v6019_v10 = vcombine.low %v1322_v6, %v1331_v47 }
  0x71   : > { %6626 = vmatprep.mubr.msk.bf16.mxu1 %vm645_vm7, %v6018_v32  ;;  %v5995_v15 = vcombine.low %v1062_v55, %v1065_v4  ;;  %v1072_v46 = vsel %vm7330_vm14, %v1070_v12, %v1071_v39  ;;  %v6012_v33 = vrot.slane %v1333_v26, 11  ;;  %v1345_v2 = vshll.u32 %v7435_v43, 16 }
  0x72   : > { %v5996_v19 = vcombine.low %v1069_v62, %v1072_v46  ;;  %v1338_v40 = vor.u32 %v1337_v5, %v522_v13  ;;  %v1340_v20 = vrot.slane %v1337_v5, 4  ;;  %v1344_v22 = vrot.slane %v1342_v58, 7  ;;  %6627 = vmatmul.mubr.msk.bf16.gmra.mxu1 %vm645_vm7, %v6019_v10  ;;  %v7478_v62 = vld [vmem:[#allocation2 + $0x9c] sm:$0xf] }
  0x73   : > { %6612 = vmatprep.mubr.msk.bf16.mxu0 %vm645_vm7, %v5995_v15  ;;  %v1350_v23 = vshrl.u32 %v1007_v25, 16  ;;  %v1354_v60 = vrot.slane %v547_v48, 7  ;;  %v1359_v56 = vshrl.u32 %v7451_v57, 16  ;;  %v1362_v27 = vshll.u32 %v7451_v57, 16 }
  0x74   : > { %v1339_v37 = vsel %vm7360_vm15, %v6012_v33, %v1338_v40  ;;  %v5989_v13 = vrot.slane %v1008_v61, 11  ;;  %v1075_v45 = vrot.slane %v7277_v14, 7  ;;  %v1347_v38 = vor.u32 %v1345_v2, %v1344_v22 }
  0x75   : > { %v6013_v6 = vrot.slane %v1350_v23, 11  ;;  %v1355_v51 = vor.u32 %v1354_v60, %v550_v1  ;;  %v1357_v25 = vrot.slane %v1354_v60, 4  ;;  %v1361_v34 = vrot.slane %v1359_v56, 7 }
  0x76   : > { %v1076_v48 = vsel %vm7330_vm14, %v5989_v13, %v1075_v45  ;;  %v1077_v39 = vrot.slane %v1075_v45, 4  ;;  %v1078_v29 = vrot.slane %v7284_v41, 7  ;;  %v1348_v52 = vsel %vm7360_vm15, %v1340_v20, %v1347_v38  ;;  %v7508_v13 = vld [vmem:[%s9751_s1 + $0xe] sm:$0x3] }
  0x77   : > { %v1356_v55 = vsel %vm7360_vm15, %v6013_v6, %v1355_v51  ;;  %v5990_v17 = vrot.slane %v1009_v30, 11  ;;  %v1082_v32 = vrot.slane %v7302_v11, 7  ;;  %6613 = vmatmul.mubr.msk.bf16.gmra.mxu0 %vm645_vm7, %v5996_v19  ;;  %v6020_v1 = vcombine.low %v1339_v37, %v1348_v52  ;;  %v7493_v19 = vld [vmem:[#allocation2 + $0xb4] sm:$0xf]  ;;  %v7516_v6 = vld [vmem:[#allocation2 + $0xc] sm:$0xf] }
  0x78   : > { %v1364_v12 = vor.u32 %v1362_v27, %v1361_v34  ;;  %v1079_v26 = vsel %vm7330_vm14, %v1077_v39, %v1078_v29  ;;  %v1085_v41 = vrot.slane %v7307_v36, 7  ;;  %v1367_v58 = vshrl.u32 %v1008_v61, 16  ;;  %v7522_v39 = vld [vmem:[#allocation2 + $0x10] sm:$0x1]  ;;  %v1741_v29 = vld [vmem:[#allocation2 + $0x20] sm:$0xf] }
  0x79   : > { %v5997_v47 = vcombine.low %v1076_v48, %v1079_v26  ;;  %v1083_v4 = vsel %vm7330_vm14, %v5990_v17, %v1082_v32  ;;  %v1084_v5 = vrot.slane %v1082_v32, 4  ;;  %6630 = vmatprep.mubr.msk.bf16.mxu1 %vm645_vm7, %v6020_v1  ;;  %v1371_v15 = vrot.slane %v575_v7, 7  ;;  %v7537_v32 = vld [vmem:[#allocation2 + $0x24] sm:$0xf]  ;;  %v7542_v26 = vld [vmem:[#allocation2 + $0x28] sm:$0x1] }
  0x7a   : > { %v1365_v10 = vsel %vm7360_vm15, %v1357_v25, %v1364_v12  ;;  %v1376_v46 = vshrl.u32 %v7478_v62, 16  ;;  %v1379_v33 = vshll.u32 %v7478_v62, 16  ;;  %v6014_v40 = vrot.slane %v1367_v58, 11 }
  0x7b   : > { %v6021_v36 = vcombine.low %v1356_v55, %v1365_v10  ;;  %6616 = vmatprep.mubr.msk.bf16.mxu0 %vm645_vm7, %v5997_v47  ;;  %v1086_v61 = vsel %vm7330_vm14, %v1084_v5, %v1085_v41  ;;  %v1384_v20 = vshrl.u32 %v1009_v30, 16  ;;  %v1372_v2 = vor.u32 %v1371_v15, %v578_v50 }
  0x7c   : > { %v5998_v22 = vcombine.low %v1083_v4, %v1086_v61  ;;  %v1374_v23 = vrot.slane %v1371_v15, 4  ;;  %v1378_v7 = vrot.slane %v1376_v46, 7  ;;  %v1388_v56 = vrot.slane %v603_v24, 7  ;;  %v1738_v24 = vld [vmem:[#allocation2 + $0x8] sm:$0xf] }
  0x7d   : > { %6631 = vmatmul.mubr.msk.bf16.gmra.mxu1 %vm645_vm7, %v6021_v36  ;;  %v6015_v60 = vrot.slane %v1384_v20, 11  ;;  %v1393_v37 = vshrl.u32 %v7493_v19, 16  ;;  %v1396_v27 = vshll.u32 %v7493_v19, 16  ;;  %v1373_v50 = vsel %vm7360_vm15, %v6014_v40, %v1372_v2  ;;  %v1744_v2 = vld [vmem:[#allocation2 + $0x38] sm:$0xf] }
  0x7e   : > { %v1381_v45 = vor.u32 %v1379_v33, %v1378_v7  ;;  %v2008_v30 = vsel %vm670_vm0, %v7202_v21, 0  ;;  %v6033_v38 = vcombine.low %v7099_v44, %v7345_v16  ;;  %v1389_v51 = vor.u32 %v1388_v56, %v606_v59 }
  0x7f   : > { %v1391_v25 = vrot.slane %v1388_v56, 4  ;;  %v1395_v34 = vrot.slane %v1393_v37, 7  ;;  %6657 = vmatpush3.bf16.msra.mxu1 %v2008_v30  ;;  %v6034_v48 = vcombine.low %v7113_v54, %v7352_v18  ;;  %6617 = vmatmul.mubr.msk.bf16.gmra.mxu0 %vm645_vm7, %v5998_v22  ;;  %v2265_v21 = vsel %vm670_vm0, %v7402_v49, 0 }
  0x80   : > { %v1382_v44 = vsel %vm7360_vm15, %v1374_v23, %v1381_v45  ;;  %vm1764_vm1 = vsmask.f32 3328  ;;  %vm1765_vm3 = vsmask.f32 7440  ;;  %6897 = vmatprep.subr.msk.bf16.mxu1 %vm670_vm0, %v7508_v13  ;;  %v1390_v54 = vsel %vm7360_vm15, %v6015_v60, %v1389_v51  ;;  %6640 = vmatprep.mubr.msk.bf16.mxu0 %vm645_vm7, %v6033_v38  ;;  %v7552_v23 = vld [vmem:[#allocation2 + $0x3c] sm:$0xf] }
  0x81   : > { %v6022_v59 = vcombine.low %v1373_v50, %v1382_v44  ;;  %v1398_v16 = vor.u32 %v1396_v27, %v1395_v34  ;;  %v1768_v18 = vshrl.u32 %v1738_v24, 16  ;;  %v1771_v52 = vshll.u32 %v1738_v24, 16  ;;  %vm7556_vm4 = vmor %vm1764_vm1, %vm1765_vm3  ;;  %v7569_v50 = vld [vmem:[%s9751_s1 + $0x10] sm:$0x3] }
  0x82   : > { %v1777_v55 = vshll.u32 %v7516_v6, 16  ;;  %v1781_v17 = vshrl.u32 %v7516_v6, 16  ;;  %v1787_v49 = vshll.u32 %v7522_v39, 16  ;;  %v1792_v41 = vshrl.u32 %v1741_v29, 16  ;;  %v1747_v44 = vld [vmem:[#allocation2 + $0x50] sm:$0xf] }
  0x83   : > { %6634 = vmatprep.mubr.msk.bf16.mxu1 %vm645_vm7, %v6022_v59  ;;  %v1399_v1 = vsel %vm7360_vm15, %v1391_v25, %v1398_v16  ;;  %v1770_v12 = vrot.slane %v1768_v18, 4  ;;  %v1795_v47 = vshll.u32 %v1741_v29, 16  ;;  %v1773_v5 = vrot.slane %v1771_v52, 5 }
  0x84   : > { %v6023_v4 = vcombine.low %v1390_v54, %v1399_v1  ;;  %v1779_v58 = vrot.slane %v1777_v55, 5  ;;  %v1783_v10 = vrot.slane %v1781_v17, 4  ;;  %v1789_v15 = vrot.slane %v1787_v49, 5 }
  0x85   : > { %v1794_v46 = vrot.slane %v1792_v41, 4  ;;  %v1797_v33 = vrot.slane %v1795_v47, 5  ;;  %v1801_v36 = vshll.u32 %v7537_v32, 16  ;;  %v1774_v61 = vor.u32 %v1773_v5, %v1770_v12  ;;  %v7595_v47 = vld [vmem:[#allocation2 + $0x58] sm:$0x1] }
  0x86   : > { %6635 = vmatmul.mubr.msk.bf16.gmra.mxu1 %vm645_vm7, %v6023_v4  ;;  %v1784_v40 = vor.u32 %v1783_v10, %v1779_v58  ;;  %v1805_v20 = vshrl.u32 %v7537_v32, 16  ;;  %v1811_v22 = vshll.u32 %v7542_v26, 16  ;;  %v9808_v7 = vmov 0 }
  0x87   : > { %v9809_v7 = vsel %vm7556_vm4, 4294967295, %v9808_v7  ;;  %v1798_v60 = vor.u32 %v1797_v33, %v1794_v46  ;;  %v1803_v56 = vrot.slane %v1801_v36, 5  ;;  %v6035_v37 = vcombine.low %v7145_v28, %v7391_v9  ;;  %6641 = vmatmul.mubr.msk.bf16.vlgmr.msra.gmra.mxu0 %vm645_vm7, %v6034_v48  ;;  %v7575_v28 = vld [vmem:[#allocation2 + $0x40] sm:$0x1] }
  0x88   : > { %9810 = vst [vmem:[#allocation8_spill] sm:$0xff] %v9809_v7  ;;  %v6036_v27 = vcombine.low %v7182_v3, %v7408_v63  ;;  %v1775_v45 = vrot.slane %v1774_v61, 4  ;;  %v1785_v30 = vrot.slane %v1784_v40, 4  ;;  %v1807_v38 = vrot.slane %v1805_v20, 4  ;;  %6675 = vmatpush3.bf16.msra.mxu0 %v2265_v21  ;;  %v7583_v21 = vld [vmem:[#allocation2 + $0x54] sm:$0xf] }
  0x89   : > { %v1813_v24 = vrot.slane %v1811_v22, 5  ;;  %v1799_v51 = vrot.slane %v1798_v60, 4  ;;  %6644 = vmatprep.mubr.msk.bf16.mxu0 %vm645_vm7, %v6035_v37  ;;  %v1816_v3 = vshrl.u32 %v1744_v2, 16  ;;  %v1819_v9 = vshll.u32 %v1744_v2, 16  ;;  %6898 = vmatprep.subr.msk.bf16.mxu0 %vm670_vm0, %v7569_v50  ;;  %v1750_v60 = vld [vmem:[#allocation2 + $0x68] sm:$0xf] }
  0x8a   : > { %v1825_v63 = vshll.u32 %v7552_v23, 16  ;;  %v1780_v25 = vsel %vm7556_vm4, %v1775_v45, %v1779_v58  ;;  %v1790_v34 = vsel %vm7556_vm4, %v1785_v30, %v1789_v15  ;;  %v1808_v48 = vor.u32 %v1807_v38, %v1803_v56  ;;  %v7607_v38 = vld [vmem:[#allocation2 + $0x6c] sm:$0xf] }
  0x8b   : > { %v1829_v29 = vshrl.u32 %v7552_v23, 16  ;;  %v6050_v59 = vcombine.low %v1780_v25, %v1790_v34  ;;  %v1804_v54 = vsel %vm7556_vm4, %v1799_v51, %v1803_v56  ;;  %v1818_v16 = vrot.slane %v1816_v3, 4 }
  0x8c   : > { %v1821_v18 = vrot.slane %v1819_v9, 5  ;;  %v1809_v52 = vrot.slane %v1808_v48, 4  ;;  %v1827_v49 = vrot.slane %v1825_v63, 5  ;;  %v1835_v12 = vshll.u32 %v7575_v28, 16  ;;  %v7616_v9 = vld [vmem:[#allocation2 + $0x70] sm:$0x1] }
  0x8d   : > { %v1831_v1 = vrot.slane %v1829_v29, 4  ;;  %6658 = vmatprep.mubr.msk.bf16.mxu1 %vm645_vm7, %v6050_v59  ;;  %v1840_v4 = vshrl.u32 %v1747_v44, 16  ;;  %v1843_v5 = vshll.u32 %v1747_v44, 16  ;;  %v1849_v58 = vshll.u32 %v7583_v21, 16  ;;  %v1753_v59 = vld [vmem:[#allocation2 + $0x80] sm:$0xf] }
  0x8e   : > { %v1822_v41 = vor.u32 %v1821_v18, %v1818_v16  ;;  %v1814_v10 = vsel %vm7556_vm4, %v1809_v52, %v1813_v24  ;;  %v1837_v46 = vrot.slane %v1835_v12, 5  ;;  %v1853_v33 = vshrl.u32 %v7583_v21, 16 }
  0x8f   : > { %v1832_v15 = vor.u32 %v1831_v1, %v1827_v49  ;;  %v6051_v61 = vcombine.low %v1804_v54, %v1814_v10  ;;  %v1842_v22 = vrot.slane %v1840_v4, 4  ;;  %v1845_v2 = vrot.slane %v1843_v5, 5  ;;  %6645 = vmatmul.mubr.msk.bf16.gmra.mxu0 %vm645_vm7, %v6036_v27  ;;  %v7631_v4 = vld [vmem:[#allocation2 + $0x88] sm:$0x1] }
  0x90   : > { %v1823_v40 = vrot.slane %v1822_v41, 4  ;;  %v1851_v37 = vrot.slane %v1849_v58, 5  ;;  %v1855_v45 = vrot.slane %v1853_v33, 4  ;;  %v1859_v30 = vshll.u32 %v7595_v47, 16 }
  0x91   : > { %v1833_v56 = vrot.slane %v1832_v15, 4  ;;  %6659 = vmatmul.mubr.msk.bf16.vlgmr.msra.gmra.mxu1 %vm645_vm7, %v6051_v61  ;;  %v1846_v51 = vor.u32 %v1845_v2, %v1842_v22  ;;  %v6037_v27 = vcombine.low %v7229_v35, %v7435_v43  ;;  %v6038_v3 = vcombine.low %v7256_v31, %v7451_v57 }
  0x92   : > { %v1828_v24 = vsel %vm7556_vm4, %v1823_v40, %v1827_v49  ;;  %v1856_v34 = vor.u32 %v1855_v45, %v1851_v37  ;;  %v1861_v48 = vrot.slane %v1859_v30, 5  ;;  %v1864_v44 = vshrl.u32 %v1750_v60, 16  ;;  %v7624_v49 = vld [vmem:[#allocation2 + $0x84] sm:$0xf] }
  0x93   : > { %v1838_v25 = vsel %vm7556_vm4, %v1833_v56, %v1837_v46  ;;  %v1847_v16 = vrot.slane %v1846_v51, 4  ;;  %6648 = vmatprep.mubr.msk.bf16.mxu0 %vm645_vm7, %v6037_v27  ;;  %v1867_v18 = vshll.u32 %v1750_v60, 16  ;;  %v1873_v52 = vshll.u32 %v7607_v38, 16  ;;  %v1756_v56 = vld [vmem:[#allocation2 + $0x98] sm:$0xf] }
  0x94   : > { %v6052_v54 = vcombine.low %v1828_v24, %v1838_v25  ;;  %v1857_v35 = vrot.slane %v1856_v34, 4  ;;  %v1866_v43 = vrot.slane %v1864_v44, 4  ;;  %v1877_v31 = vshrl.u32 %v7607_v38, 16  ;;  %v7641_v51 = vld [vmem:[#allocation2 + $0x9c] sm:$0xf] }
  0x95   : > { %v1883_v57 = vshll.u32 %v7616_v9, 16  ;;  %v1852_v1 = vsel %vm7556_vm4, %v1847_v16, %v1851_v37  ;;  %v1869_v12 = vrot.slane %v1867_v18, 5  ;;  %v1875_v41 = vrot.slane %v1873_v52, 5  ;;  %v7655_v18 = vld [vmem:[#allocation2 + $0xa0] sm:$0x1] }
  0x96   : > { %6662 = vmatprep.mubr.msk.bf16.mxu1 %vm645_vm7, %v6052_v54  ;;  %v1888_v5 = vshrl.u32 %v1753_v59, 16  ;;  %v1862_v10 = vsel %vm7556_vm4, %v1857_v35, %v1861_v48  ;;  %v1879_v15 = vrot.slane %v1877_v31, 4  ;;  %v1891_v61 = vshll.u32 %v1753_v59, 16 }
  0x97   : > { %v1885_v46 = vrot.slane %v1883_v57, 5  ;;  %v6053_v40 = vcombine.low %v1852_v1, %v1862_v10  ;;  %v1870_v22 = vor.u32 %v1869_v12, %v1866_v43  ;;  %v1897_v60 = vshll.u32 %v7624_v49, 16  ;;  %6649 = vmatmul.mubr.msk.bf16.gmra.mxu0 %vm645_vm7, %v6038_v3  ;;  %v1759_v1 = vld [vmem:[#allocation2 + $0xb0] sm:$0xf]  ;;  %v7661_v12 = vld [vmem:[#allocation2 + $0xb4] sm:$0xf] }
  0x98   : > { %v1890_v2 = vrot.slane %v1888_v5, 4  ;;  %v1880_v37 = vor.u32 %v1879_v15, %v1875_v41  ;;  %v1893_v45 = vrot.slane %v1891_v61, 5  ;;  %v1901_v30 = vshrl.u32 %v7624_v49, 16 }
  0x99   : > { %v1907_v24 = vshll.u32 %v7631_v4, 16  ;;  %6663 = vmatmul.mubr.msk.bf16.gmra.mxu1 %vm645_vm7, %v6053_v40  ;;  %v1871_v27 = vrot.slane %v1870_v22, 4  ;;  %v1899_v25 = vrot.slane %v1897_v60, 5  ;;  %v6039_v34 = vcombine.low %v7277_v14, %v7478_v62 }
  0x9a   : > { %v6040_v3 = vcombine.low %v7302_v11, %v7493_v19  ;;  %v1881_v48 = vrot.slane %v1880_v37, 4  ;;  %v1894_v44 = vor.u32 %v1893_v45, %v1890_v2  ;;  %v1903_v59 = vrot.slane %v1901_v30, 4 }
  0x9b   : > { %v1909_v54 = vrot.slane %v1907_v24, 5  ;;  %v1876_v16 = vsel %vm7556_vm4, %v1871_v27, %v1875_v41  ;;  %6652 = vmatprep.mubr.msk.bf16.mxu0 %vm645_vm7, %v6039_v34  ;;  %v1912_v35 = vshrl.u32 %v1756_v56, 16  ;;  %v1915_v43 = vshll.u32 %v1756_v56, 16  ;;  %v7671_v56 = vld [vmem:[#allocation2 + $0xb8] sm:$0x1] }
  0x9c   : > { %v1921_v14 = vshll.u32 %v7641_v51, 16  ;;  %v1886_v11 = vsel %vm7556_vm4, %v1881_v48, %v1885_v46  ;;  %v1895_v62 = vrot.slane %v1894_v44, 4  ;;  %v1904_v19 = vor.u32 %v1903_v59, %v1899_v25 }
  0x9d   : > { %v1925_v57 = vshrl.u32 %v7641_v51, 16  ;;  %v6054_v5 = vcombine.low %v1876_v16, %v1886_v11  ;;  %v1914_v41 = vrot.slane %v1912_v35, 4  ;;  %v1917_v10 = vrot.slane %v1915_v43, 5 }
  0x9e   : > { %v1923_v15 = vrot.slane %v1921_v14, 5  ;;  %v1900_v61 = vsel %vm7556_vm4, %v1895_v62, %v1899_v25  ;;  %v1905_v40 = vrot.slane %v1904_v19, 4  ;;  %v1931_v22 = vshll.u32 %v7655_v18, 16 }
  0x9f   : > { %v1927_v46 = vrot.slane %v1925_v57, 4  ;;  %6666 = vmatprep.mubr.msk.bf16.mxu1 %vm645_vm7, %v6054_v5  ;;  %v1918_v2 = vor.u32 %v1917_v10, %v1914_v41  ;;  %v1936_v37 = vshrl.u32 %v1759_v1, 16  ;;  %v1939_v45 = vshll.u32 %v1759_v1, 16  ;;  %6653 = vmatmul.mubr.msk.bf16.gmra.mxu0 %vm645_vm7, %v6040_v3 }
  0xa0   : > { %v1945_v24 = vshll.u32 %v7661_v12, 16  ;;  %v1910_v27 = vsel %vm7556_vm4, %v1905_v40, %v1909_v54  ;;  %v1933_v34 = vrot.slane %v1931_v22, 5  ;;  %v1949_v48 = vshrl.u32 %v7661_v12, 16 }
  0xa1   : > { %v1928_v25 = vor.u32 %v1927_v46, %v1923_v15  ;;  %v6055_v44 = vcombine.low %v1900_v61, %v1910_v27  ;;  %v1919_v59 = vrot.slane %v1918_v2, 4  ;;  %v1938_v16 = vrot.slane %v1936_v37, 4  ;;  %v2123_v61 = vld [vmem:[#allocation2 + $0x8] sm:$0xe]  ;;  %v2124_v37 = vld [vmem:[#allocation2 + $0x20] sm:$0xe] }
  0xa2   : > { %v1941_v35 = vrot.slane %v1939_v45, 5  ;;  %v1947_v11 = vrot.slane %v1945_v24, 5  ;;  %v1951_v62 = vrot.slane %v1949_v48, 4  ;;  %v1955_v19 = vshll.u32 %v7671_v56, 16 }
  0xa3   : > { %v1929_v43 = vrot.slane %v1928_v25, 4  ;;  %6667 = vmatmul.mubr.msk.bf16.gmra.mxu1 %vm645_vm7, %v6055_v44  ;;  %v1924_v3 = vsel %vm7556_vm4, %v1919_v59, %v1923_v15  ;;  %v2626_v1 = vsel %vm670_vm0, %v7508_v13, 0  ;;  %vm2157_vm5 = vcmask 1042432  }
  0xa4   : > { %v1942_v54 = vor.u32 %v1941_v35, %v1938_v16  ;;  %v1952_v41 = vor.u32 %v1951_v62, %v1947_v11  ;;  %v1957_v10 = vrot.slane %v1955_v19, 5  ;;  %6693 = vmatpush3.bf16.msra.mxu1 %v2626_v1  ;;  %vm2158_vm6 = vcmask 1046532   ;;  %v7709_v19 = vld [vmem:[#allocation2 + $0x10] sm:$0x3] }
  0xa5   : > { %v1934_v5 = vsel %vm7556_vm4, %v1929_v43, %v1933_v34  ;;  %vm7690_vm10 = vmor %vm2157_vm5, %vm2158_vm6  ;;  %v9811_v22 = vmov 0  ;;  %v6067_v15 = vrot.slane %v2123_v61, 9  ;;  %v2162_v2 = vrot.slane %v7516_v6, 5 }
  0xa6   : > { %v6056_v40 = vcombine.low %v1924_v3, %v1934_v5  ;;  %v1943_v46 = vrot.slane %v1942_v54, 4  ;;  %v9812_v22 = vsel %vm7690_vm10, 4294967295, %v9811_v22  ;;  %v1953_v13 = vrot.slane %v1952_v41, 4 }
  0xa7   : > { %9813 = vst [vmem:[#allocation9_spill] sm:$0xff] %v9812_v22  ;;  %v2165_v45 = vrot.slane %v7522_v39, 5  ;;  %v6068_v27 = vrot.slane %v2124_v37, 9  ;;  %v2169_v25 = vrot.slane %v7537_v32, 5  ;;  %v2163_v44 = vsel %vm7690_vm10, %v6067_v15, %v2162_v2 }
  0xa8   : > { %6670 = vmatprep.mubr.msk.bf16.mxu1 %vm645_vm7, %v6056_v40  ;;  %v1948_v34 = vsel %vm7556_vm4, %v1943_v46, %v1947_v11  ;;  %v2164_v59 = vrot.slane %v2162_v2, 4  ;;  %v2172_v16 = vrot.slane %v7542_v26, 5  ;;  %v1958_v35 = vsel %vm7556_vm4, %v1953_v13, %v1957_v10  ;;  %v7723_v13 = vld [vmem:[#allocation2 + $0x28] sm:$0x3] }
  0xa9   : > { %v2170_v39 = vsel %vm7690_vm10, %v6068_v27, %v2169_v25  ;;  %v2171_v43 = vrot.slane %v2169_v25, 4  ;;  %v2872_v62 = vsel %vm670_vm0, %v7569_v50, 0  ;;  %v6057_v3 = vcombine.low %v1948_v34, %v1958_v35 }
  0xaa   : > { %v2166_v11 = vsel %vm7690_vm10, %v2164_v59, %v2165_v45  ;;  %vm2390_vm11 = vsmask.f32 2304  ;;  %vm2391_vm12 = vsmask.f32 6416  ;;  %v2394_v1 = vshrl.u32 %v2123_v61, 16 }
  0xab   : > { %v6075_v54 = vcombine.low %v2163_v44, %v2166_v11  ;;  %v2173_v26 = vsel %vm7690_vm10, %v2171_v43, %v2172_v16  ;;  %v2397_v5 = vshll.u32 %v2123_v61, 16  ;;  %6671 = vmatmul.mubr.msk.bf16.gmra.mxu1 %vm645_vm7, %v6057_v3  ;;  %v2402_v50 = vrot.slane %v1781_v17, 5  ;;  %vm7732_vm13 = vmor %vm2390_vm11, %vm2391_vm12 }
  0xac   : > { %v6076_v41 = vcombine.low %v2170_v39, %v2173_v26  ;;  %v2403_v10 = vrot.slane %v1777_v55, 6  ;;  %v2408_v40 = vshrl.u32 %v7709_v19, 16  ;;  %v2396_v46 = vrot.slane %v2394_v1, 5 }
  0xad   : > { %6676 = vmatprep.mubr.msk.bf16.mxu0 %vm645_vm7, %v6075_v54  ;;  %v2399_v15 = vrot.slane %v2397_v5, 6  ;;  %v2411_v2 = vshll.u32 %v7709_v19, 16  ;;  %v2417_v61 = vshrl.u32 %v2124_v37, 16  ;;  %v2420_v25 = vshll.u32 %v2124_v37, 16 }
  0xae   : > { %6677 = vmatmul.mubr.msk.bf16.vlgmr.msra.gmra.mxu0 %vm645_vm7, %v6076_v41  ;;  %v2404_v45 = vor.u32 %v2403_v10, %v2402_v50  ;;  %v2410_v27 = vrot.slane %v2408_v40, 5  ;;  %v2425_v17 = vrot.slane %v1805_v20, 5  ;;  %v2426_v59 = vrot.slane %v1801_v36, 6  ;;  %v2125_v20 = vld [vmem:[#allocation2 + $0x38] sm:$0xe] }
  0xaf   : > { %6711 = vmatpush3.bf16.msra.mxu0 %v2872_v62  ;;  %v2400_v55 = vor.u32 %v2399_v15, %v2396_v46  ;;  %v2413_v34 = vrot.slane %v2411_v2, 6  ;;  %v2419_v44 = vrot.slane %v2417_v61, 5  ;;  %v9814_v16 = vmov 0 }
  0xb0   : > { %v9815_v16 = vsel %vm7732_vm13, 4294967295, %v9814_v16  ;;  %v2406_v35 = vrot.slane %v2404_v45, 4  ;;  %v2422_v39 = vrot.slane %v2420_v25, 6  ;;  %v2431_v37 = vshrl.u32 %v7723_v13, 16 }
  0xb1   : > { %9816 = vst [vmem:[#allocation10_spill] sm:$0xff] %v9815_v16  ;;  %v2434_v43 = vshll.u32 %v7723_v13, 16  ;;  %v2401_v62 = vrot.slane %v2400_v55, 4  ;;  %v2414_v3 = vor.u32 %v2413_v34, %v2410_v27  ;;  %v2427_v11 = vor.u32 %v2426_v59, %v2425_v17  ;;  %v2126_v27 = vld [vmem:[#allocation2 + $0x50] sm:$0xe] }
  0xb2   : > { %v6069_v54 = vrot.slane %v2125_v20, 9  ;;  %v2423_v26 = vor.u32 %v2422_v39, %v2419_v44  ;;  %v2433_v1 = vrot.slane %v2431_v37, 5  ;;  %v2176_v5 = vrot.slane %v7552_v23, 5  ;;  %v7753_v44 = vld [vmem:[#allocation2 + $0x40] sm:$0x3] }
  0xb3   : > { %v2436_v36 = vrot.slane %v2434_v43, 6  ;;  %v2405_v41 = vsel %vm7732_vm13, %v2401_v62, %v2404_v45  ;;  %v2415_v50 = vsel %vm7732_vm13, %v2406_v35, %v2414_v3  ;;  %v2429_v10 = vrot.slane %v2427_v11, 4 }
  0xb4   : > { %v2179_v40 = vrot.slane %v7575_v28, 5  ;;  %v6092_v46 = vcombine.low %v2405_v41, %v2415_v50  ;;  %v2424_v15 = vrot.slane %v2423_v26, 4  ;;  %v2177_v61 = vsel %vm7690_vm10, %v6069_v54, %v2176_v5  ;;  %v7769_v50 = vld [vmem:[#allocation2 + $0x58] sm:$0x3] }
  0xb5   : > { %v2437_v2 = vor.u32 %v2436_v36, %v2433_v1  ;;  %v2178_v25 = vrot.slane %v2176_v5, 4  ;;  %v6070_v17 = vrot.slane %v2126_v27, 9  ;;  %v2183_v55 = vrot.slane %v7583_v21, 5 }
  0xb6   : > { %v2186_v34 = vrot.slane %v7595_v47, 5  ;;  %6694 = vmatprep.mubr.msk.bf16.mxu1 %vm645_vm7, %v6092_v46  ;;  %v2428_v45 = vsel %vm7732_vm13, %v2424_v15, %v2427_v11  ;;  %v2440_v59 = vshrl.u32 %v2125_v20, 16  ;;  %v2443_v35 = vshll.u32 %v2125_v20, 16 }
  0xb7   : > { %v2438_v28 = vsel %vm7732_vm13, %v2429_v10, %v2437_v2  ;;  %v2180_v37 = vsel %vm7690_vm10, %v2178_v25, %v2179_v40  ;;  %v2184_v43 = vsel %vm7690_vm10, %v6070_v17, %v2183_v55  ;;  %v2185_v47 = vrot.slane %v2183_v55, 4 }
  0xb8   : > { %v6093_v39 = vcombine.low %v2428_v45, %v2438_v28  ;;  %v6077_v62 = vcombine.low %v2177_v61, %v2180_v37  ;;  %v2442_v3 = vrot.slane %v2440_v59, 5  ;;  %v2445_v54 = vrot.slane %v2443_v35, 6  ;;  %v2127_v28 = vld [vmem:[#allocation2 + $0x68] sm:$0xe] }
  0xb9   : > { %v2448_v11 = vrot.slane %v1829_v29, 5  ;;  %v2187_v26 = vsel %vm7690_vm10, %v2185_v47, %v2186_v34  ;;  %v2449_v20 = vrot.slane %v1825_v63, 6  ;;  %v2454_v1 = vshrl.u32 %v7753_v44, 16 }
  0xba   : > { %6695 = vmatmul.mubr.msk.bf16.vlgmr.msra.gmra.mxu1 %vm645_vm7, %v6093_v39  ;;  %v2457_v36 = vshll.u32 %v7753_v44, 16  ;;  %6680 = vmatprep.mubr.msk.bf16.mxu0 %vm645_vm7, %v6077_v62  ;;  %v6078_v5 = vcombine.low %v2184_v43, %v2187_v26  ;;  %v2446_v41 = vor.u32 %v2445_v54, %v2442_v3  ;;  %v2463_v10 = vshrl.u32 %v2126_v27, 16  ;;  %v2128_v26 = vld [vmem:[#allocation2 + $0x80] sm:$0xe] }
  0xbb   : > { %v2466_v29 = vshll.u32 %v2126_v27, 16  ;;  %v2450_v40 = vor.u32 %v2449_v20, %v2448_v11  ;;  %v2456_v46 = vrot.slane %v2454_v1, 5  ;;  %v2471_v2 = vrot.slane %v1853_v33, 5 }
  0xbc   : > { %v2459_v15 = vrot.slane %v2457_v36, 6  ;;  %6681 = vmatmul.mubr.msk.bf16.gmra.mxu0 %vm645_vm7, %v6078_v5  ;;  %v2447_v63 = vrot.slane %v2446_v41, 4  ;;  %v2465_v61 = vrot.slane %v2463_v10, 5  ;;  %v2472_v17 = vrot.slane %v1849_v58, 6 }
  0xbd   : > { %v2468_v25 = vrot.slane %v2466_v29, 6  ;;  %v2452_v55 = vrot.slane %v2450_v40, 4  ;;  %v2477_v45 = vshrl.u32 %v7769_v50, 16  ;;  %v2480_v27 = vshll.u32 %v7769_v50, 16 }
  0xbe   : > { %v2460_v34 = vor.u32 %v2459_v15, %v2456_v46  ;;  %v2451_v59 = vsel %vm7732_vm13, %v2447_v63, %v2450_v40  ;;  %v2473_v33 = vor.u32 %v2472_v17, %v2471_v2  ;;  %v6071_v39 = vrot.slane %v2127_v28, 9  ;;  %v7791_v40 = vld [vmem:[#allocation2 + $0x70] sm:$0x3] }
  0xbf   : > { %v2469_v35 = vor.u32 %v2468_v25, %v2465_v61  ;;  %v2479_v43 = vrot.slane %v2477_v45, 5  ;;  %v2482_v47 = vrot.slane %v2480_v27, 6  ;;  %v2190_v58 = vrot.slane %v7607_v38, 5 }
  0xc0   : > { %v2461_v37 = vsel %vm7732_vm13, %v2452_v55, %v2460_v34  ;;  %v2475_v54 = vrot.slane %v2473_v33, 4  ;;  %v2193_v11 = vrot.slane %v7616_v9, 5  ;;  %v6072_v5 = vrot.slane %v2128_v26, 9 }
  0xc1   : > { %v6094_v62 = vcombine.low %v2451_v59, %v2461_v37  ;;  %v2470_v3 = vrot.slane %v2469_v35, 4  ;;  %v2483_v20 = vor.u32 %v2482_v47, %v2479_v43  ;;  %v2191_v1 = vsel %vm7690_vm10, %v6071_v39, %v2190_v58  ;;  %v7809_v59 = vld [vmem:[#allocation2 + $0x88] sm:$0x3] }
  0xc2   : > { %v2192_v36 = vrot.slane %v2190_v58, 4  ;;  %v2197_v10 = vrot.slane %v7624_v49, 5  ;;  %v2200_v29 = vrot.slane %v7631_v4, 5  ;;  %v2486_v46 = vshrl.u32 %v2127_v28, 16 }
  0xc3   : > { %6698 = vmatprep.mubr.msk.bf16.mxu1 %vm645_vm7, %v6094_v62  ;;  %v2474_v41 = vsel %vm7732_vm13, %v2470_v3, %v2473_v33  ;;  %v2484_v9 = vsel %vm7732_vm13, %v2475_v54, %v2483_v20  ;;  %v2489_v2 = vshll.u32 %v2127_v28, 16  ;;  %v2494_v63 = vrot.slane %v1877_v31, 5 }
  0xc4   : > { %v2194_v15 = vsel %vm7690_vm10, %v2192_v36, %v2193_v11  ;;  %v6095_v61 = vcombine.low %v2474_v41, %v2484_v9  ;;  %v2198_v17 = vsel %vm7690_vm10, %v6072_v5, %v2197_v10  ;;  %v2199_v55 = vrot.slane %v2197_v10, 4 }
  0xc5   : > { %v6079_v25 = vcombine.low %v2191_v1, %v2194_v15  ;;  %v2488_v4 = vrot.slane %v2486_v46, 5  ;;  %v2491_v34 = vrot.slane %v2489_v2, 6  ;;  %v2495_v45 = vrot.slane %v1873_v52, 6 }
  0xc6   : > { %v2500_v27 = vshrl.u32 %v7791_v40, 16  ;;  %6699 = vmatmul.mubr.msk.bf16.gmra.mxu1 %vm645_vm7, %v6095_v61  ;;  %v2201_v31 = vsel %vm7690_vm10, %v2199_v55, %v2200_v29  ;;  %v2503_v28 = vshll.u32 %v7791_v40, 16  ;;  %v2509_v35 = vshrl.u32 %v2128_v26, 16 }
  0xc7   : > { %6684 = vmatprep.mubr.msk.bf16.mxu0 %vm645_vm7, %v6079_v25  ;;  %v2512_v33 = vshll.u32 %v2128_v26, 16  ;;  %v6080_v39 = vcombine.low %v2198_v17, %v2201_v31  ;;  %v2492_v37 = vor.u32 %v2491_v34, %v2488_v4  ;;  %v2496_v43 = vor.u32 %v2495_v45, %v2494_v63  ;;  %v2129_v26 = vld [vmem:[#allocation2 + $0x98] sm:$0xe]  ;;  %v2130_v4 = vld [vmem:[#allocation2 + $0xb0] sm:$0xe] }
  0xc8   : > { %v2502_v47 = vrot.slane %v2500_v27, 5  ;;  %v2505_v52 = vrot.slane %v2503_v28, 6  ;;  %v2511_v58 = vrot.slane %v2509_v35, 5  ;;  %v2517_v3 = vrot.slane %v1901_v30, 5  ;;  %v7833_v35 = vld [vmem:[#allocation2 + $0xa0] sm:$0x3] }
  0xc9   : > { %v2514_v62 = vrot.slane %v2512_v33, 6  ;;  %6685 = vmatmul.mubr.msk.bf16.gmra.mxu0 %vm645_vm7, %v6080_v39  ;;  %v2493_v54 = vrot.slane %v2492_v37, 4  ;;  %v2498_v11 = vrot.slane %v2496_v43, 4  ;;  %v2518_v20 = vrot.slane %v1897_v60, 6 }
  0xca   : > { %v2523_v1 = vshrl.u32 %v7809_v59, 16  ;;  %v2506_v36 = vor.u32 %v2505_v52, %v2502_v47  ;;  %v2526_v41 = vshll.u32 %v7809_v59, 16  ;;  %v6073_v10 = vrot.slane %v2129_v26, 9 }
  0xcb   : > { %v2515_v5 = vor.u32 %v2514_v62, %v2511_v58  ;;  %v2497_v29 = vsel %vm7732_vm13, %v2493_v54, %v2496_v43  ;;  %v2519_v46 = vor.u32 %v2518_v20, %v2517_v3  ;;  %v2204_v9 = vrot.slane %v7641_v51, 5 }
  0xcc   : > { %v2525_v30 = vrot.slane %v2523_v1, 5  ;;  %v2507_v15 = vsel %vm7732_vm13, %v2498_v11, %v2506_v36  ;;  %v2528_v60 = vrot.slane %v2526_v41, 6  ;;  %v2207_v63 = vrot.slane %v7655_v18, 5 }
  0xcd   : > { %v2516_v2 = vrot.slane %v2515_v5, 4  ;;  %v6096_v61 = vcombine.low %v2497_v29, %v2507_v15  ;;  %v2521_v25 = vrot.slane %v2519_v46, 4  ;;  %v2205_v17 = vsel %vm7690_vm10, %v6073_v10, %v2204_v9  ;;  %v7849_v5 = vld [vmem:[#allocation2 + $0xb8] sm:$0x3] }
  0xce   : > { %v2206_v55 = vrot.slane %v2204_v9, 4  ;;  %v2529_v45 = vor.u32 %v2528_v60, %v2525_v30  ;;  %v6074_v27 = vrot.slane %v2130_v4, 9  ;;  %v2211_v31 = vrot.slane %v7661_v12, 5  ;;  %v2741_v9 = vld [vmem:[#allocation2 + $0x8] sm:$0xc] }
  0xcf   : > { %v2520_v34 = vsel %vm7732_vm13, %v2516_v2, %v2519_v46  ;;  %6702 = vmatprep.mubr.msk.bf16.mxu1 %vm645_vm7, %v6096_v61  ;;  %v2214_v18 = vrot.slane %v7671_v56, 5  ;;  %v2532_v33 = vshrl.u32 %v2129_v26, 16  ;;  %v2535_v39 = vshll.u32 %v2129_v26, 16 }
  0xd0   : > { %v2208_v28 = vsel %vm7690_vm10, %v2206_v55, %v2207_v63  ;;  %v2530_v37 = vsel %vm7732_vm13, %v2521_v25, %v2529_v45  ;;  %v2212_v47 = vsel %vm7690_vm10, %v6074_v27, %v2211_v31  ;;  %v2213_v52 = vrot.slane %v2211_v31, 4  ;;  %v2742_v45 = vld [vmem:[#allocation2 + $0x20] sm:$0xc] }
  0xd1   : > { %v6081_v43 = vcombine.low %v2205_v17, %v2208_v28  ;;  %v6097_v58 = vcombine.low %v2520_v34, %v2530_v37  ;;  %v2534_v62 = vrot.slane %v2532_v33, 5  ;;  %v2537_v3 = vrot.slane %v2535_v39, 6 }
  0xd2   : > { %v2540_v54 = vrot.slane %v1925_v57, 5  ;;  %v2215_v56 = vsel %vm7690_vm10, %v2213_v52, %v2214_v18  ;;  %v2541_v11 = vrot.slane %v1921_v14, 6  ;;  %v2546_v20 = vshrl.u32 %v7833_v35, 16  ;;  %v2743_v18 = vld [vmem:[#allocation2 + $0x38] sm:$0xc] }
  0xd3   : > { %6688 = vmatprep.mubr.msk.bf16.mxu0 %vm645_vm7, %v6081_v43  ;;  %v2549_v1 = vshll.u32 %v7833_v35, 16  ;;  %6703 = vmatmul.mubr.msk.bf16.gmra.mxu1 %vm645_vm7, %v6097_v58  ;;  %v6082_v26 = vcombine.low %v2212_v47, %v2215_v56  ;;  %v2538_v36 = vor.u32 %v2537_v3, %v2534_v62  ;;  %v2555_v41 = vshrl.u32 %v2130_v4, 16 }
  0xd4   : > { %v2558_v57 = vshll.u32 %v2130_v4, 16  ;;  %v2542_v10 = vor.u32 %v2541_v11, %v2540_v54  ;;  %v2548_v29 = vrot.slane %v2546_v20, 5  ;;  %v2563_v30 = vrot.slane %v1949_v48, 5 }
  0xd5   : > { %v2551_v46 = vrot.slane %v2549_v1, 6  ;;  %6689 = vmatmul.mubr.msk.bf16.gmra.mxu0 %vm645_vm7, %v6082_v26  ;;  %v2539_v14 = vrot.slane %v2538_v36, 4  ;;  %v2557_v15 = vrot.slane %v2555_v41, 5  ;;  %v2564_v60 = vrot.slane %v1945_v24, 6  ;;  %v2744_v26 = vld [vmem:[#allocation2 + $0x50] sm:$0xc] }
  0xd6   : > { %v2560_v2 = vrot.slane %v2558_v57, 6  ;;  %v2544_v63 = vrot.slane %v2542_v10, 4  ;;  %v2569_v25 = vshrl.u32 %v7849_v5, 16  ;;  %v2572_v17 = vshll.u32 %v7849_v5, 16 }
  0xd7   : > { %v2552_v61 = vor.u32 %v2551_v46, %v2548_v29  ;;  %v2543_v55 = vsel %vm7732_vm13, %v2539_v14, %v2542_v10  ;;  %v2565_v48 = vor.u32 %v2564_v60, %v2563_v30  ;;  %v6109_v34 = vrot.slane %v2741_v9, 10  ;;  %v2745_v10 = vld [vmem:[#allocation2 + $0x68] sm:$0xc] }
  0xd8   : > { %v2561_v4 = vor.u32 %v2560_v2, %v2557_v15  ;;  %v2571_v31 = vrot.slane %v2569_v25, 5  ;;  %v2574_v28 = vrot.slane %v2572_v17, 6  ;;  %v2769_v24 = vrot.slane %v7516_v6, 6 }
  0xd9   : > { %v2553_v27 = vsel %vm7732_vm13, %v2544_v63, %v2552_v61  ;;  %v2567_v37 = vrot.slane %v2565_v48, 4  ;;  %v2772_v43 = vrot.slane %v7709_v19, 6  ;;  %v6110_v62 = vrot.slane %v2742_v45, 10 }
  0xda   : > { %v6098_v33 = vcombine.low %v2543_v55, %v2553_v27  ;;  %v2562_v39 = vrot.slane %v2561_v4, 4  ;;  %v2575_v47 = vor.u32 %v2574_v28, %v2571_v31  ;;  %v2770_v52 = vsel %vm7109_vm8, %v6109_v34, %v2769_v24  ;;  %v2746_v4 = vld [vmem:[#allocation2 + $0x80] sm:$0xc] }
  0xdb   : > { %v2771_v58 = vrot.slane %v2769_v24, 4  ;;  %v2776_v54 = vrot.slane %v7537_v32, 6  ;;  %v2779_v6 = vrot.slane %v7723_v13, 6  ;;  %v6111_v56 = vrot.slane %v2743_v18, 10 }
  0xdc   : > { %6706 = vmatprep.mubr.msk.bf16.mxu1 %vm645_vm7, %v6098_v33  ;;  %v2566_v3 = vsel %vm7732_vm13, %v2562_v39, %v2565_v48  ;;  %v2576_v11 = vsel %vm7732_vm13, %v2567_v37, %v2575_v47  ;;  %v2783_v20 = vrot.slane %v7552_v23, 6  ;;  %v2786_v1 = vrot.slane %v7753_v44, 6  ;;  %v2747_v48 = vld [vmem:[#allocation2 + $0x98] sm:$0xc] }
  0xdd   : > { %v2773_v19 = vsel %vm7109_vm8, %v2771_v58, %v2772_v43  ;;  %v6099_v36 = vcombine.low %v2566_v3, %v2576_v11  ;;  %v2777_v57 = vsel %vm7109_vm8, %v6110_v62, %v2776_v54  ;;  %v2778_v32 = vrot.slane %v2776_v54, 4  ;;  %v2748_v43 = vld [vmem:[#allocation2 + $0xb0] sm:$0xc] }
  0xde   : > { %v6117_v41 = vcombine.low %v2770_v52, %v2773_v19  ;;  %v2784_v13 = vsel %vm7109_vm8, %v6111_v56, %v2783_v20  ;;  %v2785_v29 = vrot.slane %v2783_v20, 4  ;;  %v2790_v46 = vrot.slane %v7583_v21, 6 }
  0xdf   : > { %6707 = vmatmul.mubr.msk.bf16.gmra.mxu1 %vm645_vm7, %v6099_v36  ;;  %v2780_v23 = vsel %vm7109_vm8, %v2778_v32, %v2779_v6  ;;  %v6112_v44 = vrot.slane %v2744_v26, 10  ;;  %v2793_v30 = vrot.slane %v7769_v50, 6  ;;  %v2797_v9 = vrot.slane %v7607_v38, 6 }
  0xe0   : > { %6712 = vmatprep.mubr.msk.bf16.mxu0 %vm645_vm7, %v6117_v41  ;;  %v6118_v14 = vcombine.low %v2777_v57, %v2780_v23  ;;  %v2787_v15 = vsel %vm7109_vm8, %v2785_v29, %v2786_v1  ;;  %v2792_v2 = vrot.slane %v2790_v46, 4  ;;  %v6113_v60 = vrot.slane %v2745_v10, 10 }
  0xe1   : > { %v6119_v63 = vcombine.low %v2784_v13, %v2787_v15  ;;  %v2799_v21 = vrot.slane %v2797_v9, 4  ;;  %v2800_v61 = vrot.slane %v7791_v40, 6  ;;  %v2791_v25 = vsel %vm7109_vm8, %v6112_v44, %v2790_v46 }
  0xe2   : > { %6713 = vmatmul.mubr.msk.bf16.vlgmr.msra.gmra.mxu0 %vm645_vm7, %v6118_v14  ;;  %v2794_v38 = vsel %vm7109_vm8, %v2792_v2, %v2793_v30  ;;  %v2804_v50 = vrot.slane %v7624_v49, 6  ;;  %v2798_v17 = vsel %vm7109_vm8, %v6113_v60, %v2797_v9  ;;  %v2811_v40 = vrot.slane %v7641_v51, 6 }
  0xe3   : > { %6716 = vmatprep.mubr.msk.bf16.mxu0 %vm645_vm7, %v6119_v63  ;;  %v2801_v55 = vsel %vm7109_vm8, %v2799_v21, %v2800_v61  ;;  %v6120_v34 = vcombine.low %v2791_v25, %v2794_v38  ;;  %v6114_v27 = vrot.slane %v2746_v4, 10  ;;  %v2807_v28 = vrot.slane %v7809_v59, 6 }
  0xe4   : > { %v6121_v45 = vcombine.low %v2798_v17, %v2801_v55  ;;  %v2806_v31 = vrot.slane %v2804_v50, 4  ;;  %v6115_v24 = vrot.slane %v2747_v48, 10  ;;  %v2813_v18 = vrot.slane %v2811_v40, 4 }
  0xe5   : > { %v2814_v49 = vrot.slane %v7833_v35, 6  ;;  %v2805_v33 = vsel %vm7109_vm8, %v6114_v27, %v2804_v50  ;;  %v2818_v39 = vrot.slane %v7661_v12, 6  ;;  %v6116_v52 = vrot.slane %v2748_v43, 10 }
  0xe6   : > { %v2808_v51 = vsel %vm7109_vm8, %v2806_v31, %v2807_v28  ;;  %v2812_v37 = vsel %vm7109_vm8, %v6115_v24, %v2811_v40  ;;  %v2821_v62 = vrot.slane %v7849_v5, 6 }
  0xe7   : > { %v2815_v59 = vsel %vm7109_vm8, %v2813_v18, %v2814_v49  ;;  %v6122_v35 = vcombine.low %v2805_v33, %v2808_v51  ;;  %v2820_v58 = vrot.slane %v2818_v39, 4  ;;  %v2819_v12 = vsel %vm7109_vm8, %v6116_v52, %v2818_v39 }
  0xe8   : > { %v6123_v47 = vcombine.low %v2812_v37, %v2815_v59 }
  0xe9   : > { %v2822_v3 = vsel %vm7109_vm8, %v2820_v58, %v2821_v62 }
  0xea   : > { %6717 = vmatmul.mubr.msk.bf16.gmra.mxu0 %vm645_vm7, %v6120_v34  ;;  %v6124_v54 = vcombine.low %v2819_v12, %v2822_v3  ;;  %v6151_v12 = vld [vmem:[%s9754_s4 + $0x2] sm:$0x3] }
  0xeb   : > { %6720 = vmatprep.mubr.msk.bf16.mxu0 %vm645_vm7, %v6121_v45  ;;  %6899 = vmatprep.subr.msk.bf16.mxu1 %vm670_vm0, %v6151_v12 }
  0xf2   : > { %6721 = vmatmul.mubr.msk.bf16.gmra.mxu0 %vm645_vm7, %v6122_v35 }
  0xf3   : > { %6724 = vmatprep.mubr.msk.bf16.mxu0 %vm645_vm7, %v6123_v47 }
  0xf7   : > { %v6570_v6 = vpop.f32.mrf.mxu0  ;;  %v6588_v56 = vpop.f32.mrf.mxu1 }
  0xf8   : > { %v948_v11 = vadd.f32 %v6588_v56, %v6570_v6 }
  0xf9   : > { %v708_v19 = vpop.f32.mrf.mxu0  ;;  %v939_v20 = vpop.f32.mrf.mxu1 }
  0xfa   : > { %6725 = vmatmul.mubr.msk.bf16.gmra.mxu0 %vm645_vm7, %v6124_v54  ;;  %v940_v1 = vadd.f32 %v939_v20, %v708_v19  ;;  %v3435_v54 = vsel %vm670_vm0, %v6151_v12, 0 }
  0xfb   : > { %v6571_v5 = vpop.f32.mrf.mxu0  ;;  %v6589_v26 = vpop.f32.mrf.mxu1  ;;  %6729 = vmatpush3.bf16.msra.mxu1 %v3435_v54 }
  0xfc   : > { %v951_v36 = vadd.f32 %v6589_v26, %v6571_v5 }
  0xfd   : > { %v7924_v41 = vpop.f32.mrf.mxu1  ;;  %v7926_v57 = vpop.f32.mrf.mxu0 }
 0x102   : > { %v6592_v32 = vpop.f32.mrf.mxu1 }
 0x103   : > { %v6574_v10 = vpop.f32.mrf.mxu0 }
 0x104   : > { %v964_v13 = vadd.f32 %v6592_v32, %v6574_v10  ;;  %v955_v29 = vpop.f32.mrf.mxu1 }
 0x105   : > { %v724_v46 = vpop.f32.mrf.mxu0 }
 0x106   : > { %v956_v23 = vadd.f32 %v955_v29, %v724_v46  ;;  %v6593_v44 = vpop.f32.mrf.mxu1 }
 0x107   : > { %v6575_v30 = vpop.f32.mrf.mxu0 }
 0x108   : > { %v967_v9 = vadd.f32 %v6593_v44, %v6575_v30  ;;  %v7928_v14 = vpop.f32.mrf.mxu1 }
 0x109   : > { %v7930_v15 = vpop.f32.mrf.mxu0 }
 0x110   : > { %v6596_v2 = vpop.f32.mrf.mxu1 }
 0x111   : > { %v6578_v60 = vpop.f32.mrf.mxu0 }
 0x112   : > { %v980_v63 = vadd.f32 %v6596_v2, %v6578_v60  ;;  %v971_v21 = vpop.f32.mrf.mxu1  ;;  %v3151_v60 = vld [vmem:[%s9754_s4] sm:$0x3] }
 0x113   : > { %v740_v61 = vpop.f32.mrf.mxu0  ;;  %6900 = vmatprep.subr.msk.bf16.mxu0 %vm670_vm0, %v3151_v60 }
 0x114   : > { %v972_v25 = vadd.f32 %v971_v21, %v740_v61  ;;  %v6597_v38 = vpop.f32.mrf.mxu1 }
 0x115   : > { %v6579_v50 = vpop.f32.mrf.mxu0 }
 0x116   : > { %v983_v17 = vadd.f32 %v6597_v38, %v6579_v50  ;;  %v7932_v55 = vpop.f32.mrf.mxu1 }
 0x117   : > { %v7934_v4 = vpop.f32.mrf.mxu0 }
 0x11e   : > { %v6600_v40 = vpop.f32.mrf.mxu1 }
 0x11f   : > { %v6582_v48 = vpop.f32.mrf.mxu0 }
 0x120   : > { %v996_v34 = vadd.f32 %v6600_v40, %v6582_v48  ;;  %v987_v45 = vpop.f32.mrf.mxu1 }
 0x121   : > { %v756_v27 = vpop.f32.mrf.mxu0 }
 0x122   : > { %v988_v31 = vadd.f32 %v987_v45, %v756_v27  ;;  %v6601_v28 = vpop.f32.mrf.mxu1 }
 0x123   : > { %v6583_v24 = vpop.f32.mrf.mxu0 }
 0x124   : > { %v999_v18 = vadd.f32 %v6601_v28, %v6583_v24  ;;  %v7938_v33 = vpop.f32.mrf.mxu1 }
 0x125   : > { %v7936_v49 = vpop.f32.mrf.mxu0 }
 0x127   : > { %v6606_v51 = vpop.f32.mrf.mxu0 }
 0x128   : > { %v7940_v39 = vadd.f32 %v6606_v51, %v948_v11 }
 0x129   : > { %v7942_v37 = vpop.f32.mrf.mxu1  ;;  %v1172_v59 = vpop.f32.mrf.mxu0 }
 0x12a   : > { %v7944_v43 = vadd.f32 %v1172_v59, %v940_v1 }
 0x12b   : > { %v7946_v35 = vpop.f32.mrf.mxu1  ;;  %v6607_v47 = vpop.f32.mrf.mxu0 }
 0x12c   : > { %v7948_v52 = vadd.f32 %v6607_v47, %v951_v36 }
 0x12d   : > { %v7950_v58 = vpop.f32.mrf.mxu1  ;;  %v7952_v62 = vpop.f32.mrf.mxu0 }
 0x12f   : > { %v7957_v3 = vpop.f32.mrf.mxu1  ;;  %v6610_v6 = vpop.f32.mrf.mxu0 }
 0x130   : > { %v7961_v56 = vadd.f32 %v6610_v6, %v964_v13 }
 0x131   : > { %v1188_v11 = vpop.f32.mrf.mxu0 }
 0x132   : > { %v7963_v19 = vadd.f32 %v1188_v11, %v956_v23  ;;  %v7965_v20 = vpop.f32.mrf.mxu1 }
 0x133   : > { %v6611_v1 = vpop.f32.mrf.mxu0 }
 0x134   : > { %v7967_v5 = vadd.f32 %v6611_v1, %v967_v9  ;;  %v7969_v26 = vpop.f32.mrf.mxu1 }
 0x135   : > { %v7971_v36 = vpop.f32.mrf.mxu0 }
 0x136   : > { %v7973_v32 = vpop.f32.mrf.mxu1 }
 0x137   : > { %v6614_v10 = vpop.f32.mrf.mxu0 }
 0x138   : > { %v7975_v29 = vadd.f32 %v6614_v10, %v980_v63  ;;  %v7977_v46 = vpop.f32.mrf.mxu1  ;;  %v3663_v63 = vsel %vm670_vm0, %v3151_v60, 0 }
 0x139   : > { %v1204_v13 = vpop.f32.mrf.mxu0  ;;  %6747 = vmatpush3.bf16.msra.mxu0 %v3663_v63 }
 0x13a   : > { %v7979_v44 = vadd.f32 %v1204_v13, %v972_v25 }
 0x13b   : > { %v6615_v23 = vpop.f32.mrf.mxu0 }
 0x13c   : > { %v7983_v2 = vadd.f32 %v6615_v23, %v983_v17 }
 0x13d   : > { %v7981_v30 = vpop.f32.mrf.mxu1  ;;  %v7985_v9 = vpop.f32.mrf.mxu0 }
 0x13f   : > { %v7990_v21 = vpop.f32.mrf.mxu1  ;;  %v6618_v61 = vpop.f32.mrf.mxu0 }
 0x140   : > { %v7996_v38 = vadd.f32 %v6618_v61, %v996_v34 }
 0x141   : > { %v7994_v25 = vpop.f32.mrf.mxu1  ;;  %v1220_v50 = vpop.f32.mrf.mxu0 }
 0x142   : > { %v8000_v40 = vadd.f32 %v1220_v50, %v988_v31  ;;  %v8019_v31 = vld [vmem:[%s9754_s4 + $0x4] sm:$0x3] }
 0x143   : > { %v7998_v17 = vpop.f32.mrf.mxu1  ;;  %v6619_v48 = vpop.f32.mrf.mxu0  ;;  %6901 = vmatprep.subr.msk.bf16.mxu1 %vm670_vm0, %v8019_v31 }
 0x144   : > { %v8002_v45 = vadd.f32 %v6619_v48, %v999_v18 }
 0x145   : > { %v8006_v28 = vpop.f32.mrf.mxu0 }
 0x146   : > { %v8004_v27 = vpop.f32.mrf.mxu1 }
 0x147   : > { %v8010_v51 = vpop.f32.mrf.mxu0 }
 0x148   : > { %v8008_v24 = vpop.f32.mrf.mxu1 }
 0x149   : > { %v8014_v34 = vpop.f32.mrf.mxu0 }
 0x14a   : > { %v8012_v59 = vpop.f32.mrf.mxu1 }
 0x14b   : > { %v8023_v18 = vpop.f32.mrf.mxu0 }
 0x14c   : > { %v8025_v47 = vpop.f32.mrf.mxu1 }
 0x14d   : > { %v8027_v12 = vpop.f32.mrf.mxu0 }
 0x14f   : > { %v8029_v54 = vpop.f32.mrf.mxu0 }
 0x151   : > { %v8031_v6 = vpop.f32.mrf.mxu1  ;;  %v8033_v11 = vpop.f32.mrf.mxu0 }
 0x152   : > { %9817 = vst [vmem:[#allocation11_spill] sm:$0xff] %v8031_v6  ;;  %9818 = vst [vmem:[#allocation12_spill] sm:$0xff] %v8033_v11  ;;  %v8121_v6 = vld [vmem:[#allocation3 + $0x34] sm:$0xc] }
 0x153   : > { %v8035_v1 = vpop.f32.mrf.mxu1  ;;  %v8037_v10 = vpop.f32.mrf.mxu0 }
 0x154   : > { %9819 = vst [vmem:[#allocation13_spill] sm:$0xff] %v8035_v1  ;;  %9820 = vst [vmem:[#allocation14_spill] sm:$0xff] %v8037_v10 }
 0x155   : > { %v8039_v13 = vpop.f32.mrf.mxu1  ;;  %v8041_v23 = vpop.f32.mrf.mxu0 }
 0x156   : > { %9821 = vst [vmem:[#allocation15_spill] sm:$0xff] %v8039_v13  ;;  %9822 = vst [vmem:[#allocation16_spill] sm:$0xff] %v8041_v23  ;;  %v959_v13 = vadd.f32 %v7928_v14, %v7930_v15 }
 0x157   : > { %v8043_v60 = vpop.f32.mrf.mxu1  ;;  %v8045_v63 = vpop.f32.mrf.mxu0 }
 0x158   : > { %9823 = vst [vmem:[#allocation17_spill] sm:$0xff] %v8043_v60  ;;  %9824 = vst [vmem:[#allocation18_spill] sm:$0xff] %v8045_v63  ;;  %v8114_v60 = vld [vmem:[#allocation3 + $0x4c] sm:$0xc] }
 0x159   : > { %v8047_v61 = vpop.f32.mrf.mxu1  ;;  %v8049_v50 = vpop.f32.mrf.mxu0 }
 0x15a   : > { %9825 = vst [vmem:[#allocation19_spill] sm:$0xff] %v8047_v61  ;;  %9826 = vst [vmem:[#allocation20_spill] sm:$0xff] %v8049_v50 }
 0x15b   : > { %v8051_v48 = vpop.f32.mrf.mxu1  ;;  %v8053_v16 = vpop.f32.mrf.mxu0 }
 0x15c   : > { %9827 = vst [vmem:[#allocation21_spill] sm:$0xff] %v8051_v48  ;;  %9828 = vst [vmem:[#allocation22_spill] sm:$0xff] %v8053_v16 }
 0x15d   : > { %v8055_v22 = vpop.f32.mrf.mxu1  ;;  %v8057_v7 = vpop.f32.mrf.mxu0 }
 0x15e   : > { %9829 = vst [vmem:[#allocation23_spill] sm:$0xff] %v8055_v22  ;;  %9830 = vst [vmem:[#allocation24_spill] sm:$0xff] %v8057_v7 }
 0x15f   : > { %v8059_v42 = vpop.f32.mrf.mxu1  ;;  %v8061_v8 = vpop.f32.mrf.mxu0 }
 0x160   : > { %9831 = vst [vmem:[#allocation25_spill] sm:$0xff] %v8059_v42  ;;  %9832 = vst [vmem:[#allocation26_spill] sm:$0xff] %v8061_v8 }
 0x161   : > { %v8063_v0 = vpop.f32.mrf.mxu0 }
 0x162   : > { %9833 = vst [vmem:[#allocation27_spill] sm:$0xff] %v8063_v0 }
 0x163   : > { %v8065_v53 = vpop.f32.mrf.mxu1  ;;  %v8069_v61 = vpop.f32.mrf.mxu0 }
 0x164   : > { %9834 = vst [vmem:[#allocation28_spill] sm:$0xff] %v8065_v53  ;;  %9836 = vst [vmem:[#allocation30_spill] sm:$0xff] %v8069_v61  ;;  %v8086_v53 = vld [vmem:[%s9754_s4 + $0x6] sm:$0x3] }
 0x165   : > { %v8067_v63 = vpop.f32.mrf.mxu1  ;;  %v8075_v16 = vpop.f32.mrf.mxu0  ;;  %9843 = vst [vmem:[#allocation37_spill] sm:$0xff] %v8086_v53  ;;  %6902 = vmatprep.subr.msk.bf16.mxu0 %vm670_vm0, %v8086_v53 }
 0x166   : > { %9835 = vst [vmem:[#allocation29_spill] sm:$0xff] %v8067_v63  ;;  %9839 = vst [vmem:[#allocation33_spill] sm:$0xff] %v8075_v16 }
 0x167   : > { %v8071_v50 = vpop.f32.mrf.mxu1 }
 0x168   : > { %9837 = vst [vmem:[#allocation31_spill] sm:$0xff] %v8071_v50 }
 0x169   : > { %v8073_v48 = vpop.f32.mrf.mxu1 }
 0x16a   : > { %9838 = vst [vmem:[#allocation32_spill] sm:$0xff] %v8073_v48  ;;  %v8094_v48 = vld [vmem:[#allocation3 + $0x4] sm:$0xc] }
 0x16b   : > { %v8077_v22 = vpop.f32.mrf.mxu1  ;;  %v3166_v61 = vshll.u32 %v8094_v48, 16 }
 0x16c   : > { %9840 = vst [vmem:[#allocation34_spill] sm:$0xff] %v8077_v22 }
 0x16d   : > { %v8079_v7 = vpop.f32.mrf.mxu1  ;;  %v3168_v23 = vrot.slane %v3166_v61, 7  ;;  %v1240_v61 = vadd.f32 %v7971_v36, %v959_v13  ;;  %v1555_v13 = vadd.f32 %v7973_v32, %v7967_v5  ;;  %v1558_v5 = vadd.f32 %v7981_v30, %v7975_v29 }
 0x16e   : > { %9841 = vst [vmem:[#allocation35_spill] sm:$0xff] %v8079_v7  ;;  %v8081_v42 = vpop.f32.mrf.mxu0  ;;  %v8100_v7 = vld [vmem:[#allocation3 + $0x1c] sm:$0xc]  ;;  %v8167_v32 = vadd.f32 %v7990_v21, %v7979_v44 }
 0x16f   : > { %9842 = vst [vmem:[#allocation36_spill] sm:$0xff] %v8081_v42  ;;  %v8092_v50 = vpop.f32.mrf.mxu1  ;;  %v3163_v42 = vshrl.u32 %v8094_v48, 16  ;;  %v3194_v53 = vshll.u32 %v8100_v7, 16 }
 0x170   : > { %v8088_v63 = vpop.f32.mrf.mxu0  ;;  %9845 = vst [vmem:[#allocation39_spill] sm:$0xff] %v8092_v50  ;;  %v943_v50 = vadd.f32 %v7924_v41, %v7926_v57  ;;  %v975_v41 = vadd.f32 %v7932_v55, %v7934_v4  ;;  %v1550_v57 = vadd.f32 %v7942_v37, %v7940_v39  ;;  %v1548_v55 = vadd.f32 %v7946_v35, %v7944_v43 }
 0x171   : > { %9844 = vst [vmem:[#allocation38_spill] sm:$0xff] %v8088_v63  ;;  %v8098_v22 = vpop.f32.mrf.mxu1  ;;  %v3191_v63 = vshrl.u32 %v8100_v7, 16  ;;  %v3196_v1 = vrot.slane %v3194_v53, 7  ;;  %v3247_v53 = vshrl.u32 %v8114_v60, 16  ;;  %v1551_v4 = vadd.f32 %v7950_v58, %v7948_v52  ;;  %v9860_v58 = vld [vmem:[#allocation15_spill] sm:$0xff] }
 0x172   : > { %v8096_v16 = vpop.f32.mrf.mxu0  ;;  %9847 = vst [vmem:[#allocation41_spill] sm:$0xff] %v8098_v22  ;;  %v1554_v37 = vadd.f32 %v7965_v20, %v7961_v56  ;;  %v1244_v43 = vadd.f32 %v7985_v9, %v975_v41 }
 0x173   : > { %9846 = vst [vmem:[#allocation40_spill] sm:$0xff] %v8096_v16  ;;  %v3165_v16 = vrot.slane %v3163_v42, 6  ;;  %v3193_v11 = vrot.slane %v3191_v63, 6  ;;  %v991_v42 = vadd.f32 %v7938_v33, %v7936_v49  ;;  %v3250_v63 = vshll.u32 %v8114_v60, 16 }
 0x174   : > { %v8104_v0 = vpop.f32.mrf.mxu0  ;;  %v3219_v49 = vshrl.u32 %v8121_v6, 16  ;;  %v3222_v33 = vshll.u32 %v8121_v6, 16 }
 0x175   : > { %9848 = vst [vmem:[#allocation42_spill] sm:$0xff] %v8104_v0  ;;  %v1236_v0 = vadd.f32 %v7952_v62, %v943_v50  ;;  %v3169_v62 = vor.u32 %v3168_v23, %v3165_v16  ;;  %v1552_v16 = vadd.f32 %v7969_v26, %v7963_v19  ;;  %v3197_v36 = vor.u32 %v3196_v1, %v3193_v11  ;;  %v8154_v23 = vld [vmem:[#allocation3 + $0x7c] sm:$0xc]  ;;  %v8161_v26 = vld [vmem:[#allocation3 + $0x64] sm:$0xc] }
 0x176   : > { %9849 = vst [vmem:[#allocation43_spill] sm:$0xff] %v8154_v23  ;;  %v3249_v19 = vrot.slane %v3247_v53, 6  ;;  %v3252_v20 = vrot.slane %v3250_v63, 7  ;;  %v3221_v9 = vrot.slane %v3219_v49, 6  ;;  %v3224_v11 = vrot.slane %v3222_v33, 7  ;;  %v9859_v49 = vld [vmem:[#allocation14_spill] sm:$0xff] }
 0x177   : > { %v1549_v39 = vadd.f32 %v7957_v3, %v1236_v0  ;;  %v1553_v0 = vadd.f32 %v7977_v46, %v1240_v61  ;;  %v8159_v56 = vrot.slane %v3169_v62, 4  ;;  %v8171_v46 = vadd.f32 %v7994_v25, %v7983_v2  ;;  %v8185_v62 = vld [vmem:[#allocation3 + $0x4] sm:$0x8] }
 0x178   : > { %v8173_v1 = vrot.slane %v3197_v36, 4  ;;  %v3303_v50 = vshrl.u32 %v8154_v23, 16  ;;  %v3306_v41 = vshll.u32 %v8154_v23, 16  ;;  %v8178_v61 = vadd.f32 %v7998_v17, %v1244_v43  ;;  %9850 = vst [vmem:[#allocation44_spill] sm:$0xff] %v8185_v62  ;;  %v8208_v43 = vld [vmem:[#allocation3 + $0x94] sm:$0xc] }
 0x179   : > { %v1248_v29 = vadd.f32 %v8006_v28, %v991_v42  ;;  %v3275_v44 = vshrl.u32 %v8161_v26, 16  ;;  %v3278_v21 = vshll.u32 %v8161_v26, 16  ;;  %v8189_v2 = vadd.f32 %v8004_v27, %v7996_v38 }
 0x17a   : > { %v8108_v8 = vpop.f32.mrf.mxu1  ;;  %v8193_v25 = vadd.f32 %v8008_v24, %v8000_v40  ;;  %v3253_v53 = vor.u32 %v3252_v20, %v3249_v19  ;;  %v4019_v28 = vshrl.u32 %v8185_v62, 16  ;;  %v8200_v42 = vadd.f32 %v8012_v59, %v8002_v45  ;;  %v9878_v62 = vld [vmem:[#allocation29_spill] sm:$0xff] }
 0x17b   : > { %v1724_v63 = vadd.f32 %v8010_v51, %v1550_v57  ;;  %v3225_v33 = vor.u32 %v3224_v11, %v3221_v9  ;;  %v1722_v38 = vadd.f32 %v8014_v34, %v1548_v55  ;;  %v3305_v24 = vrot.slane %v3303_v50, 6  ;;  %v8221_v9 = vld [vmem:[#allocation3 + $0xac] sm:$0xc] }
 0x17c   : > { %v8112_v22 = vpop.f32.mrf.mxu1  ;;  %v8119_v10 = vpop.f32.mrf.mxu0  ;;  %v3308_v36 = vrot.slane %v3306_v41, 7  ;;  %v1561_v19 = vadd.f32 %v8025_v47, %v1248_v29  ;;  %v1725_v45 = vadd.f32 %v8023_v18, %v1551_v4  ;;  %v3277_v51 = vrot.slane %v3275_v44, 6  ;;  %9853 = vst [vmem:[#allocation47_spill] sm:$0xff] %v8221_v9  ;;  %v9857_v29 = vld [vmem:[#allocation13_spill] sm:$0xff] }
 0x17d   : > { %v3280_v57 = vrot.slane %v3278_v21, 7  ;;  %v1723_v20 = vadd.f32 %v8027_v12, %v1549_v39  ;;  %v8217_v34 = vsel %vm670_vm0, %v8019_v31, 0  ;;  %v8219_v55 = vrot.slane %v3253_v53, 4  ;;  %v9856_v31 = vld [vmem:[#allocation11_spill] sm:$0xff]  ;;  %v9858_v21 = vld [vmem:[#allocation12_spill] sm:$0xff] }
 0x17e   : > { %v8130_v14 = vpop.f32.mrf.mxu1  ;;  %v8132_v15 = vpop.f32.mrf.mxu0  ;;  %9851 = vst [vmem:[#allocation45_spill] sm:$0xff] %v8217_v34  ;;  %v8223_v11 = vrot.slane %v4019_v28, 11  ;;  %v1728_v47 = vadd.f32 %v8029_v54, %v1554_v37  ;;  %v8230_v4 = vrot.slane %v3225_v33, 4  ;;  %v3331_v12 = vshrl.u32 %v8208_v43, 16  ;;  %v9862_v34 = vld [vmem:[#allocation16_spill] sm:$0xff] }
 0x17f   : > { %9852 = vst [vmem:[#allocation46_spill] sm:$0xff] %v8219_v55  ;;  %v3334_v39 = vshll.u32 %v8208_v43, 16  ;;  %v2109_v41 = vadd.f32 %v9856_v31, %v1724_v63  ;;  %v2107_v44 = vadd.f32 %v9857_v29, %v1722_v38  ;;  %v1726_v53 = vadd.f32 %v9858_v21, %v1552_v16  ;;  %v9861_v55 = vld [vmem:[#allocation17_spill] sm:$0xff]  ;;  %v9863_v31 = vld [vmem:[#allocation18_spill] sm:$0xff] }
 0x180   : > { %v8150_v35 = vpop.f32.mrf.mxu0  ;;  %v8157_v3 = vpop.f32.mrf.mxu1  ;;  %9854 = vst [vmem:[#allocation48_spill] sm:$0xff] %v8223_v11  ;;  %9855 = vst [vmem:[#allocation49_spill] sm:$0xff] %v8230_v4  ;;  %v3309_v28 = vor.u32 %v3308_v36, %v3305_v24  ;;  %v1729_v40 = vadd.f32 %v9859_v49, %v1555_v13  ;;  %v3281_v37 = vor.u32 %v3280_v57, %v3277_v51  ;;  %v3359_v52 = vshrl.u32 %v8221_v9, 16  ;;  %v9864_v51 = vld [vmem:[#allocation19_spill] sm:$0xff]  ;;  %v9865_v29 = vld [vmem:[#allocation21_spill] sm:$0xff] }
 0x181   : > { %v3362_v33 = vshll.u32 %v8221_v9, 16  ;;  %v2110_v11 = vadd.f32 %v9860_v58, %v1725_v45  ;;  %v2108_v4 = vadd.f32 %v9861_v55, %v1723_v20  ;;  %v1727_v63 = vadd.f32 %v9862_v34, %v1553_v0  ;;  %v9866_v58 = vld [vmem:[#allocation20_spill] sm:$0xff]  ;;  %v9868_v0 = vld [vmem:[#allocation22_spill] sm:$0xff]  ;;  %v9875_v13 = vld [vmem:[#allocation25_spill] sm:$0xff] }
 0x182   : > { %v8181_v30 = vpop.f32.mrf.mxu0  ;;  %v1732_v16 = vadd.f32 %v9863_v31, %v1558_v5  ;;  %v3333_v49 = vrot.slane %v3331_v12, 6  ;;  %v3336_v36 = vrot.slane %v3334_v39, 7  ;;  %v2113_v57 = vadd.f32 %v9864_v51, %v1728_v47  ;;  %v8264_v39 = vld [vmem:[#allocation3 + $0x1c] sm:$0x8] }
 0x183   : > { %v8252_v21 = vadd.f32 %v9865_v29, %v1726_v53  ;;  %v1730_v45 = vadd.f32 %v9866_v58, %v8167_v32  ;;  %v8256_v20 = vrot.slane %v3309_v28, 4  ;;  %v1733_v34 = vadd.f32 %v9868_v0, %v8171_v46  ;;  %9870 = vst [vmem:[#allocation12_spill] sm:$0xff] %v8264_v39  ;;  %v9871_v47 = vld [vmem:[#allocation23_spill] sm:$0xff]  ;;  %v9872_v53 = vld [vmem:[#allocation24_spill] sm:$0xff]  ;;  %v9873_v58 = vld [vmem:[#allocation26_spill] sm:$0xff] }
 0x184   : > { %v8262_v55 = vrot.slane %v3281_v37, 4  ;;  %v3361_v31 = vrot.slane %v3359_v52, 6  ;;  %v3364_v12 = vrot.slane %v3362_v33, 7  ;;  %v2114_v51 = vadd.f32 %v9871_v47, %v1729_v40  ;;  %v9874_v0 = vld [vmem:[#allocation27_spill] sm:$0xff]  ;;  %v9876_v47 = vld [vmem:[#allocation28_spill] sm:$0xff] }
 0x185   : > { %9867 = vst [vmem:[#allocation11_spill] sm:$0xff] %v8256_v20  ;;  %v1731_v29 = vadd.f32 %v9872_v53, %v8178_v61  ;;  %v4036_v28 = vshrl.u32 %v8264_v39, 16  ;;  %v1736_v46 = vadd.f32 %v9873_v58, %v8189_v2  ;;  %v1734_v37 = vadd.f32 %v9874_v0, %v8193_v25  ;;  %v9877_v61 = vld [vmem:[#allocation30_spill] sm:$0xff]  ;;  %v9879_v2 = vld [vmem:[#allocation33_spill] sm:$0xff] }
 0x186   : > { %v8195_v17 = vpop.f32.mrf.mxu1  ;;  %9869 = vst [vmem:[#allocation13_spill] sm:$0xff] %v8262_v55  ;;  %v3337_v33 = vor.u32 %v3336_v36, %v3333_v49  ;;  %v2112_v40 = vadd.f32 %v9875_v13, %v1727_v63  ;;  %v2117_v20 = vadd.f32 %v9876_v47, %v1732_v16  ;;  %v1737_v53 = vadd.f32 %v9877_v61, %v8200_v42  ;;  %v8289_v52 = vld [vmem:[#allocation3 + $0x34] sm:$0x8]  ;;  %v9881_v13 = vld [vmem:[#allocation31_spill] sm:$0xff]  ;;  %v9882_v49 = vld [vmem:[#allocation32_spill] sm:$0xff] }
 0x187   : > { %v2115_v55 = vadd.f32 %v9878_v62, %v1730_v45  ;;  %v1735_v58 = vadd.f32 %v9879_v2, %v1561_v19  ;;  %v3365_v0 = vor.u32 %v3364_v12, %v3361_v31  ;;  %9880 = vst [vmem:[#allocation14_spill] sm:$0xff] %v8289_v52  ;;  %v2118_v16 = vadd.f32 %v9881_v13, %v1733_v34  ;;  %v9884_v45 = vld [vmem:[#allocation34_spill] sm:$0xff]  ;;  %v9885_v47 = vld [vmem:[#allocation35_spill] sm:$0xff]  ;;  %v9886_v31 = vld [vmem:[#allocation36_spill] sm:$0xff] }
 0x188   : > { %v8205_v27 = vpop.f32.mrf.mxu1  ;;  %v8294_v36 = vadd.f32 %v9882_v49, %v1731_v29  ;;  %v8296_v42 = vrot.slane %v4036_v28, 11  ;;  %v4053_v62 = vshrl.u32 %v8289_v52, 16  ;;  %v8300_v19 = vadd.f32 %v9884_v45, %v1736_v46  ;;  %v8315_v29 = vld [vmem:[%s9754_s4 + $0x8] sm:$0x3]  ;;  %v8317_v28 = vld [vmem:[#allocation3 + $0x4c] sm:$0x8] }
 0x189   : > { %v8212_v59 = vpop.f32.mrf.mxu0  ;;  %v8303_v61 = vadd.f32 %v9885_v47, %v1734_v37  ;;  %v2366_v12 = vadd.f32 %v9886_v31, %v2109_v41  ;;  %v8310_v34 = vrot.slane %v3337_v33, 4  ;;  %9888 = vst [vmem:[#allocation16_spill] sm:$0xff] %v8317_v28  ;;  %v9889_v46 = vld [vmem:[#allocation38_spill] sm:$0xff]  ;;  %v9890_v49 = vld [vmem:[#allocation40_spill] sm:$0xff]  ;;  %v9891_v45 = vld [vmem:[#allocation37_spill] sm:$0xff]  ;;  %v4070_v47 = vshrl.u32 %v8317_v28, 16 }
 0x18a   : > { %v8226_v50 = vpop.f32.mrf.mxu1  ;;  %9883 = vst [vmem:[#allocation15_spill] sm:$0xff] %v8296_v42  ;;  %v2364_v13 = vadd.f32 %v9889_v46, %v2107_v44  ;;  %v2367_v37 = vadd.f32 %v9890_v49, %v2110_v11  ;;  %v8323_v41 = vsel %vm670_vm0, %v9891_v45, 0  ;;  %v8326_v31 = vld [vmem:[#allocation3 + $0x64] sm:$0x8]  ;;  %v9892_v33 = vld [vmem:[#allocation39_spill] sm:$0xff]  ;;  %v9893_v39 = vld [vmem:[#allocation41_spill] sm:$0xff] }
 0x18b   : > { %v8228_v18 = vpop.f32.mrf.mxu0  ;;  %9887 = vst [vmem:[#allocation17_spill] sm:$0xff] %v8310_v34  ;;  %v8329_v32 = vadd.f32 %v9892_v33, %v1737_v53  ;;  %v8332_v42 = vadd.f32 %v9893_v39, %v1735_v58  ;;  %v8334_v34 = vrot.slane %v3365_v0, 4  ;;  %v4087_v44 = vshrl.u32 %v8326_v31, 16  ;;  %v9894_v46 = vld [vmem:[#allocation42_spill] sm:$0xff]  ;;  %v8347_v33 = vld [vmem:[#allocation3 + $0x7c] sm:$0x8] }
 0x18c   : > { %v8247_v24 = vpop.f32.mrf.mxu1  ;;  %v2365_v11 = vadd.f32 %v9894_v46, %v2108_v4  ;;  %v8340_v45 = vrot.slane %v4053_v62, 11  ;;  %v8344_v9 = vsel %vm670_vm0, %v8315_v29, 0  ;;  %v2727_v39 = vadd.f32 %v8108_v8, %v2366_v12  ;;  %v8355_v62 = vld [vmem:[#allocation3 + $0x94] sm:$0x8]  ;;  %v8364_v8 = vld [vmem:[#allocation3 + $0xac] sm:$0x8] }
 0x18d   : > { %v8238_v54 = vpop.f32.mrf.mxu0  ;;  %9896 = vst [vmem:[#allocation19_spill] sm:$0xff] %v8344_v9  ;;  %v2370_v58 = vadd.f32 %v8119_v10, %v2113_v57  ;;  %v4104_v46 = vshrl.u32 %v8347_v33, 16  ;;  %v8359_v9 = vadd.f32 %v8130_v14, %v2367_v37  ;;  %v8361_v53 = vrot.slane %v4070_v47, 11  ;;  %v8372_v52 = vld [vmem:[#allocation3 + $0x10] sm:$0x1] }
 0x18e   : > { %9895 = vst [vmem:[#allocation18_spill] sm:$0xff] %v8340_v45  ;;  %v2725_v45 = vadd.f32 %v8112_v22, %v2364_v13  ;;  %v4121_v28 = vshrl.u32 %v8355_v62, 16  ;;  %v2368_v10 = vadd.f32 %v8132_v15, %v8252_v21  ;;  %v2371_v57 = vadd.f32 %v8150_v35, %v2114_v51  ;;  %9898 = vst [vmem:[#allocation20_spill] sm:$0xff] %v8372_v52  ;;  %v8392_v37 = vld [vmem:[%s9754_s4 + $0xa] sm:$0x3] }
 0x18f   : > { %v8260_v5 = vpop.f32.mrf.mxu0  ;;  %9897 = vst [vmem:[#allocation21_spill] sm:$0xff] %v8361_v53  ;;  %v8369_v12 = vrot.slane %v4087_v44, 11  ;;  %v4138_v4 = vshrl.u32 %v8364_v8, 16  ;;  %v2369_v22 = vadd.f32 %v8181_v30, %v2112_v40  ;;  %v4538_v47 = vshll.u32 %v8372_v52, 16  ;;  %v4497_v44 = vld [vmem:[#allocation3 + $0x28] sm:$0x1] }
 0x190   : > { %v2726_v53 = vadd.f32 %v8157_v3, %v2365_v11  ;;  %v8380_v15 = vadd.f32 %v8195_v17, %v2370_v58  ;;  %v2374_v35 = vadd.f32 %v8212_v59, %v2117_v20  ;;  %v8383_v51 = vrot.slane %v4104_v46, 11  ;;  %v8411_v58 = vld [vmem:[%s9752_s2] ss:$0 sm:$0xff] }
 0x191   : > { %v2372_v30 = vadd.f32 %v8228_v18, %v2115_v55  ;;  %v8386_v40 = vrot.slane %v4121_v28, 11  ;;  %v4562_v3 = vshll.u32 %v4497_v44, 16  ;;  %v8395_v17 = vadd.f32 %v8205_v27, %v2368_v10  ;;  %v4500_v18 = vld [vmem:[#allocation3 + $0x40] sm:$0x1] }
 0x192   : > { %v8398_v59 = vadd.f32 %v8226_v50, %v2371_v57  ;;  %v2375_v20 = vadd.f32 %v8238_v54, %v2118_v16  ;;  %v8401_v11 = vrot.slane %v4138_v4, 11  ;;  %v8404_v55 = vadd.f32 %v8247_v24, %v2369_v22 }
 0x193   : > { %v8275_v38 = vpop.f32.mrf.mxu1  ;;  %v2373_v28 = vadd.f32 %v8260_v5, %v8294_v36  ;;  %v8413_v46 = vrot.slane %v4538_v47, 5  ;;  %v4586_v50 = vshll.u32 %v4500_v18, 16  ;;  %v8421_v10 = vsel %vm670_vm0, %v8392_v37, 0  ;;  %v4503_v5 = vld [vmem:[#allocation3 + $0x58] sm:$0x1] }
 0x194   : > { %v8416_v54 = vadd.f32 %v8275_v38, %v2374_v35  ;;  %v8431_v38 = vld [vmem:[%s9753_s3] ss:$0 sm:$0xff]  ;;  %v4610_v47 = vshll.u32 %v4503_v5, 16  ;;  %v4509_v18 = vld [vmem:[#allocation3 + $0x88] sm:$0x1]  ;;  %v9906_v52 = vrot.slane %v8094_v48, 10 }
 0x195   : > { %v8285_v23 = vpop.f32.mrf.mxu1  ;;  %v8287_v25 = vpop.f32.mrf.mxu0  ;;  %v8448_v5 = vrot.slane %v4586_v50, 5 }
 0x196   : > { %v8424_v36 = vadd.f32 %v8285_v23, %v2372_v30  ;;  %v2378_v57 = vadd.f32 %v8287_v25, %v8300_v19  ;;  %v8444_v25 = vld [vmem:[%s9754_s4 + $0xc] sm:$0x3]  ;;  %v4506_v19 = vld [vmem:[#allocation3 + $0x70] sm:$0x1]  ;;  %v8463_v50 = vrot.slane %v4610_v47, 5 }
 0x197   : > { %v8306_v2 = vpop.f32.mrf.mxu1  ;;  %v8308_v63 = vpop.f32.mrf.mxu0 }
 0x198   : > { %v8436_v35 = vadd.f32 %v8306_v2, %v2375_v20  ;;  %v2376_v44 = vadd.f32 %v8308_v63, %v8303_v61  ;;  %v4634_v2 = vshll.u32 %v4506_v19, 16  ;;  %v4658_v20 = vshll.u32 %v4509_v18, 16 }
 0x199   : > { %v8338_v49 = vpop.f32.mrf.mxu0  ;;  %v8351_v0 = vpop.f32.mrf.mxu1 }
 0x19a   : > { %v8451_v63 = vadd.f32 %v8351_v0, %v2373_v28 }
 0x19b   : > { %v2352_v14 = vpop.f32.mrf.mxu0 }
 0x19c   : > { %v2377_v13 = vadd.f32 %v2352_v14, %v8332_v42  ;;  %v8471_v42 = vrot.slane %v4634_v2, 5  ;;  %v8473_v14 = vrot.slane %v4658_v20, 5 }
 0x19e   : > { %9899 = vst [vmem:[#allocation22_spill] sm:$0xff] %v8473_v14 }
 0x19f   : > { %v6708_v21 = vpop.f32.mrf.mxu1 }
 0x1a0   : > { %v8456_v24 = vadd.f32 %v6708_v21, %v2378_v57 }
 0x1a1   : > { %v2710_v16 = vpop.f32.mrf.mxu1 }
 0x1a2   : > { %v6714_v27 = vpop.f32.mrf.mxu0  ;;  %v8467_v18 = vadd.f32 %v2710_v16, %v2376_v44 }
 0x1a3   : > { %v2973_v4 = vadd.f32 %v6714_v27, %v2727_v39  ;;  %v8433_v39 = vrot.slane %v4562_v3, 5  ;;  %v2379_v3 = vadd.f32 %v8338_v49, %v8329_v32  ;;  %v6709_v61 = vpop.f32.mrf.mxu1  ;;  %v8461_v49 = vsel %vm670_vm0, %v8444_v25, 0 }
 0x1a4   : > { %v2908_v22 = vpop.f32.mrf.mxu0 }
 0x1a5   : > { %v2995_v23 = vmul.f32 %v8411_v58, %v2973_v4  ;;  %v2971_v30 = vadd.f32 %v2908_v22, %v2725_v45 }
 0x1a6   : > { %v6715_v27 = vpop.f32.mrf.mxu0 }
 0x1a7   : > { %v3017_v45 = vadd.f32 %v8431_v38, %v2995_v23  ;;  %v2993_v4 = vmul.f32 %v8411_v58, %v2971_v30  ;;  %v2974_v22 = vadd.f32 %v6715_v27, %v8359_v9  ;;  %v5128_v30 = vld [vmem:[#allocation3 + $0x10] sm:$0x3]  ;;  %v8469_v9 = vadd.f32 %v6709_v61, %v2379_v3  ;;  %v2713_v3 = vpop.f32.mrf.mxu1 }
 0x1a8   : > { %v2911_v32 = vpop.f32.mrf.mxu0  ;;  %v5153_v16 = vshrl.u32 %v5128_v30, 16  ;;  %v5156_v44 = vshll.u32 %v5128_v30, 16 }
 0x1a9   : > { %v3033_v0 = vmax.f32 %v3017_v45, 0.0  ;;  %v3015_v28 = vadd.f32 %v8431_v38, %v2993_v4  ;;  %v2996_v23 = vmul.f32 %v8411_v58, %v2974_v22  ;;  %v2972_v19 = vadd.f32 %v2911_v32, %v2726_v53  ;;  %v4512_v4 = vld [vmem:[#allocation3 + $0xa0] sm:$0x1] }
 0x1aa   : > { %v6718_v21 = vpop.f32.mrf.mxu0  ;;  %v4682_v32 = vshll.u32 %v4512_v4, 16  ;;  %v8486_v4 = vrot.slane %v5156_v44, 6 }
 0x1ab   : > { %v6351_v57 = vpack.c.bf16 %v3033_v0, %v3033_v0  ;;  %v3031_v27 = vmax.f32 %v3015_v28, 0.0  ;;  %v3018_v47 = vadd.f32 %v8431_v38, %v2996_v23  ;;  %v2994_v45 = vmul.f32 %v8411_v58, %v2972_v19  ;;  %v4515_v28 = vld [vmem:[#allocation3 + $0xb8] sm:$0x1]  ;;  %v8481_v23 = vld [vmem:[#allocation3 + $0x28] sm:$0x3] }
 0x1ac   : > { %v2977_v22 = vadd.f32 %v6718_v21, %v8380_v15  ;;  %v2924_v53 = vpop.f32.mrf.mxu0  ;;  %9900 = vst [vmem:[#allocation23_spill] sm:$0xff] %v8481_v23  ;;  %v4706_v15 = vshll.u32 %v4515_v28, 16  ;;  %v8484_v21 = vrot.slane %v5153_v16, 5  ;;  %9902 = vst [vmem:[#allocation26_spill] sm:$0xff] %v8486_v4  ;;  %v5176_v16 = vshrl.u32 %v8481_v23, 16 }
 0x1ad   : > { %3113 = vst.msk [vmem:[#allocation3 + $0x20] sm:$0xf] %vm338_vm2, %v6351_v57  ;;  %v6349_v2 = vpack.c.bf16 %v3031_v27, %v3031_v27  ;;  %v3034_v61 = vmax.f32 %v3018_v47, 0.0  ;;  %v3016_v20 = vadd.f32 %v8431_v38, %v2994_v45  ;;  %v2975_v0 = vadd.f32 %v2924_v53, %v8395_v17 }
 0x1ae   : > { %v2999_v19 = vmul.f32 %v8411_v58, %v2977_v22  ;;  %v6719_v14 = vpop.f32.mrf.mxu0  ;;  %9901 = vst [vmem:[#allocation24_spill] sm:$0xff] %v8484_v21  ;;  %v8491_v17 = vadd.f32 %v2713_v3, %v2377_v13  ;;  %v8494_v22 = vrot.slane %v4682_v32, 5  ;;  %v8504_v13 = vld [vmem:[%s9754_s4 + $0xe] sm:$0x3]  ;;  %v8506_v32 = vrot.slane %v4706_v15, 5 }
 0x1af   : > { %3111 = vst.msk [vmem:[#allocation3 + $0x8] sm:$0xf] %vm338_vm2, %v6349_v2  ;;  %v6352_v30 = vpack.c.bf16 %v3034_v61, %v3034_v61  ;;  %v3032_v57 = vmax.f32 %v3016_v20, 0.0  ;;  %v2997_v27 = vmul.f32 %v8411_v58, %v2975_v0  ;;  %v2978_v47 = vadd.f32 %v6719_v14, %v8398_v59 }
 0x1b0   : > { %v3021_v45 = vadd.f32 %v8431_v38, %v2999_v19  ;;  %v2927_v53 = vpop.f32.mrf.mxu0  ;;  %v8519_v15 = vsel %vm670_vm0, %v8504_v13, 0 }
 0x1b1   : > { %3114 = vst.msk [vmem:[#allocation3 + $0x24] sm:$0xf] %vm338_vm2, %v6352_v30  ;;  %v6350_v44 = vpack.c.bf16 %v3032_v57, %v3032_v57  ;;  %v3019_v2 = vadd.f32 %v8431_v38, %v2997_v27  ;;  %v3000_v61 = vmul.f32 %v8411_v58, %v2978_v47  ;;  %v2976_v20 = vadd.f32 %v2927_v53, %v8404_v55 }
 0x1b2   : > { %v3037_v59 = vmax.f32 %v3021_v45, 0.0  ;;  %v6722_v14 = vpop.f32.mrf.mxu0  ;;  %v8521_v45 = vrot.slane %v5176_v16, 5 }
 0x1b3   : > { %3112 = vst.msk [vmem:[#allocation3 + $0xc] sm:$0xf] %vm338_vm2, %v6350_v44  ;;  %v3035_v28 = vmax.f32 %v3019_v2, 0.0  ;;  %v3022_v19 = vadd.f32 %v8431_v38, %v3000_v61  ;;  %v2998_v55 = vmul.f32 %v8411_v58, %v2976_v20  ;;  %v2981_v30 = vadd.f32 %v6722_v14, %v8416_v54 }
 0x1b4   : > { %v6355_v57 = vpack.c.bf16 %v3037_v59, %v3037_v59  ;;  %v2940_v27 = vpop.f32.mrf.mxu0  ;;  %v8515_v47 = vld [vmem:[#allocation3 + $0x20] sm:$0xf]  ;;  %9903 = vst [vmem:[#allocation27_spill] sm:$0xff] %v8521_v45  ;;  %v9904_v45 = vrot.slane %v8100_v7, 10 }
 0x1b5   : > { %v6353_v44 = vpack.c.bf16 %v3035_v28, %v3035_v28  ;;  %v3038_v2 = vmax.f32 %v3022_v19, 0.0  ;;  %v3020_v61 = vadd.f32 %v8431_v38, %v2998_v55  ;;  %v3003_v20 = vmul.f32 %v8411_v58, %v2981_v30 }
 0x1b6   : > { %3117 = vst.msk [vmem:[#allocation3 + $0x50] sm:$0xf] %vm338_vm2, %v6355_v57  ;;  %v2979_v54 = vadd.f32 %v2940_v27, %v8424_v36  ;;  %v6723_v59 = vpop.f32.mrf.mxu0  ;;  %v8528_v14 = vld [vmem:[#allocation3 + $0x8] sm:$0xf]  ;;  %v3567_v0 = vrot.slane %v8515_v47, 6  ;;  %v9926_v23 = vshrl.u32 %v8515_v47, 16 }
 0x1b7   : > { %3115 = vst.msk [vmem:[#allocation3 + $0x38] sm:$0xf] %vm338_vm2, %v6353_v44  ;;  %v6356_v28 = vpack.c.bf16 %v3038_v2, %v3038_v2  ;;  %v3036_v19 = vmax.f32 %v3020_v61, 0.0  ;;  %v3025_v55 = vadd.f32 %v8431_v38, %v3003_v20  ;;  %v2982_v30 = vadd.f32 %v6723_v59, %v8436_v35 }
 0x1b8   : > { %v3001_v57 = vmul.f32 %v8411_v58, %v2979_v54  ;;  %v2943_v36 = vpop.f32.mrf.mxu0  ;;  %v3560_v27 = vrot.slane %v8528_v14, 6  ;;  %v3132_v53 = vld [vmem:[#allocation3 + $0x24] sm:$0x3]  ;;  %v3568_v16 = vsel %vm7109_vm8, %v9904_v45, %v3567_v0  ;;  %v3569_v3 = vrot.slane %v3567_v0, 4 }
 0x1b9   : > { %3118 = vst.msk [vmem:[#allocation3 + $0x54] sm:$0xf] %vm338_vm2, %v6356_v28  ;;  %v6354_v44 = vpack.c.bf16 %v3036_v19, %v3036_v19  ;;  %v3041_v2 = vmax.f32 %v3025_v55, 0.0  ;;  %v3004_v61 = vmul.f32 %v8411_v58, %v2982_v30  ;;  %v2980_v35 = vadd.f32 %v2943_v36, %v8451_v63 }
 0x1ba   : > { %v3023_v20 = vadd.f32 %v8431_v38, %v3001_v57  ;;  %v6726_v54 = vpop.f32.mrf.mxu0  ;;  %v3129_v59 = vld [vmem:[#allocation3 + $0xc] sm:$0x3]  ;;  %v3561_v7 = vsel %vm7109_vm8, %v9906_v52, %v3560_v27  ;;  %v3562_v21 = vrot.slane %v3560_v27, 4  ;;  %v3570_v45 = vrot.slane %v3132_v53, 6 }
 0x1bb   : > { %3116 = vst.msk [vmem:[#allocation3 + $0x3c] sm:$0xf] %vm338_vm2, %v6354_v44  ;;  %v6359_v0 = vpack.c.bf16 %v3041_v2, %v3041_v2  ;;  %v3026_v28 = vadd.f32 %v8431_v38, %v3004_v61  ;;  %v3002_v19 = vmul.f32 %v8411_v58, %v2980_v35  ;;  %v2985_v63 = vadd.f32 %v6726_v54, %v8456_v24  ;;  %v8561_v2 = vld [vmem:[#allocation3 + $0xc] sm:$0x7] }
 0x1bc   : > { %v3039_v55 = vmax.f32 %v3023_v20, 0.0  ;;  %v2956_v30 = vpop.f32.mrf.mxu0  ;;  %v3563_v57 = vrot.slane %v3129_v59, 6  ;;  %v3571_v48 = vsel %vm7109_vm8, %v3569_v3, %v3570_v45  ;;  %v3172_v36 = vshrl.u32 %v8528_v14, 16 }
 0x1bd   : > { %3121 = vst.msk [vmem:[#allocation3 + $0x80] sm:$0xf] %vm338_vm2, %v6359_v0  ;;  %v3042_v52 = vmax.f32 %v3026_v28, 0.0  ;;  %v3024_v53 = vadd.f32 %v8431_v38, %v3002_v19  ;;  %v3007_v27 = vmul.f32 %v8411_v58, %v2985_v63  ;;  %v2983_v44 = vadd.f32 %v2956_v30, %v8467_v18 }
 0x1be   : > { %v6357_v24 = vpack.c.bf16 %v3039_v55, %v3039_v55  ;;  %v6727_v61 = vpop.f32.mrf.mxu0  ;;  %v3564_v35 = vsel %vm7109_vm8, %v3562_v21, %v3563_v57  ;;  %v6177_v20 = vcombine.low %v3568_v16, %v3571_v48  ;;  %v3174_v3 = vrot.slane %v3172_v36, 6 }
 0x1bf   : > { %v6360_v54 = vpack.c.bf16 %v3042_v52, %v3042_v52  ;;  %v3040_v59 = vmax.f32 %v3024_v53, 0.0  ;;  %v3029_v45 = vadd.f32 %v8431_v38, %v3007_v27  ;;  %v3005_v0 = vmul.f32 %v8411_v58, %v2983_v44  ;;  %v8581_v53 = vld [vmem:[#allocation3 + $0x24] sm:$0x7] }
 0x1c0   : > { %3119 = vst.msk [vmem:[#allocation3 + $0x68] sm:$0xf] %vm338_vm2, %v6357_v24  ;;  %v2986_v18 = vadd.f32 %v6727_v61, %v8469_v9  ;;  %v2959_v28 = vpop.f32.mrf.mxu0  ;;  %v6176_v19 = vcombine.low %v3561_v7, %v3564_v35  ;;  %v3175_v63 = vshll.u32 %v8528_v14, 16  ;;  %v3182_v21 = vshrl.u32 %v8561_v2, 16 }
 0x1c1   : > { %3122 = vst.msk [vmem:[#allocation3 + $0x84] sm:$0xf] %vm338_vm2, %v6360_v54  ;;  %v6358_v16 = vpack.c.bf16 %v3040_v59, %v3040_v59  ;;  %v3045_v55 = vmax.f32 %v3029_v45, 0.0  ;;  %v3027_v30 = vadd.f32 %v8431_v38, %v3005_v0  ;;  %v2984_v57 = vadd.f32 %v2959_v28, %v8491_v17 }
 0x1c2   : > { %v3008_v48 = vmul.f32 %v8411_v58, %v2986_v18  ;;  %6748 = vmatprep.mubr.msk.bf16.mxu0 %vm645_vm7, %v6176_v19  ;;  %v3177_v9 = vrot.slane %v3175_v63, 7  ;;  %v3184_v7 = vrot.slane %v3182_v21, 6  ;;  %v3185_v52 = vshll.u32 %v8561_v2, 16  ;;  %v8596_v19 = vld [vmem:[#allocation3 + $0x38] sm:$0xf] }
 0x1c3   : > { %3120 = vst.msk [vmem:[#allocation3 + $0x6c] sm:$0xf] %vm338_vm2, %v6358_v16  ;;  %v6363_v27 = vpack.c.bf16 %v3045_v55, %v3045_v55  ;;  %v3043_v44 = vmax.f32 %v3027_v30, 0.0  ;;  %v3006_v24 = vmul.f32 %v8411_v58, %v2984_v57  ;;  %6749 = vmatmul.mubr.msk.bf16.vlgmr.msra.gmra.mxu0 %vm645_vm7, %v6177_v20  ;;  %v9907_v17 = vshrl.u32 %v8515_v47, 16  ;;  %v3135_v21 = vld [vmem:[#allocation3 + $0x3c] sm:$0x3] }
 0x1c4   : > { %v3030_v35 = vadd.f32 %v8431_v38, %v3008_v48  ;;  %v3178_v54 = vor.u32 %v3177_v9, %v3174_v3  ;;  %v3187_v59 = vrot.slane %v3185_v52, 7  ;;  %v9908_v45 = vshll.u32 %v8515_v47, 16  ;;  %6783 = vmatpush3.bf16.msra.mxu0 %v8323_v41  ;;  %v8604_v52 = vld [vmem:[#allocation3 + $0x50] sm:$0xf] }
 0x1c5   : > { %v3202_v61 = vrot.slane %v9907_v17, 6  ;;  %3125 = vst.msk [vmem:[#allocation3 + $0xb0] sm:$0xf] %vm338_vm2, %v6363_v27  ;;  %v6361_v18 = vpack.c.bf16 %v3043_v44, %v3043_v44  ;;  %v3028_v28 = vadd.f32 %v8431_v38, %v3006_v24  ;;  %v3210_v58 = vshrl.u32 %v8581_v53, 16  ;;  %6904 = vmatprep.subr.msk.bf16.mxu0 %vm670_vm0, %v8392_v37  ;;  %v3138_v17 = vld [vmem:[#allocation3 + $0x54] sm:$0x3] }
 0x1c6   : > { %v3205_v0 = vrot.slane %v9908_v45, 7  ;;  %v3213_v20 = vshll.u32 %v8581_v53, 16  ;;  %v3046_v3 = vmax.f32 %v3030_v35, 0.0  ;;  %v3179_v41 = vsel %vm7127_vm9, %v8159_v56, %v3178_v54  ;;  %v8609_v35 = vld [vmem:[#allocation3 + $0x3c] sm:$0x7] }
 0x1c7   : > { %v3180_v55 = vrot.slane %v3178_v54, 4  ;;  %v3188_v30 = vor.u32 %v3187_v59, %v3184_v7  ;;  %3123 = vst.msk [vmem:[#allocation3 + $0x98] sm:$0xf] %vm338_vm2, %v6361_v18  ;;  %v3044_v38 = vmax.f32 %v3028_v28, 0.0  ;;  %v3212_v48 = vrot.slane %v3210_v58, 6 }
 0x1c8   : > { %v3206_v57 = vor.u32 %v3205_v0, %v3202_v61  ;;  %v3215_v9 = vrot.slane %v3213_v20, 7  ;;  %v6364_v27 = vpack.c.bf16 %v3046_v3, %v3046_v3  ;;  %v3574_v37 = vrot.slane %v8596_v19, 6 }
 0x1c9   : > { %v3189_v44 = vsel %vm7127_vm9, %v3180_v55, %v3188_v30  ;;  %v3577_v24 = vrot.slane %v3135_v21, 6  ;;  %v6362_v56 = vpack.c.bf16 %v3044_v38, %v3044_v38  ;;  %v9910_v45 = vrot.slane %v8121_v6, 10  ;;  %v8633_v38 = vld [vmem:[#allocation3 + $0x54] sm:$0x7] }
 0x1ca   : > { %v6152_v7 = vcombine.low %v3179_v41, %v3189_v44  ;;  %v3207_v61 = vsel %vm7127_vm9, %v8173_v1, %v3206_v57  ;;  %v3208_v54 = vrot.slane %v3206_v57, 4  ;;  %3126 = vst.msk [vmem:[#allocation3 + $0xb4] sm:$0xf] %vm338_vm2, %v6364_v27  ;;  %v3216_v59 = vor.u32 %v3215_v9, %v3212_v48  ;;  %v8639_v44 = vld [vmem:[#allocation3 + $0x68] sm:$0xf] }
 0x1cb   : > { %v3575_v0 = vsel %vm7109_vm8, %v9910_v45, %v3574_v37  ;;  %v3576_v18 = vrot.slane %v3574_v37, 4  ;;  %v3581_v28 = vrot.slane %v8604_v52, 6  ;;  %3124 = vst.msk [vmem:[#allocation3 + $0x9c] sm:$0xf] %vm338_vm2, %v6362_v56  ;;  %v3584_v58 = vrot.slane %v3138_v17, 6 }
 0x1cc   : > { %6730 = vmatprep.mubr.msk.bf16.mxu1 %vm645_vm7, %v6152_v7  ;;  %v9791_v20 = vshrl.u32 %v8596_v19, 16  ;;  %v9788_v1 = vshll.u32 %v8596_v19, 16  ;;  %v3238_v21 = vshrl.u32 %v8609_v35, 16  ;;  %v3217_v6 = vsel %vm7127_vm9, %v3208_v54, %v3216_v59  ;;  %v8649_v59 = vld [vmem:[#allocation3 + $0x80] sm:$0xf] }
 0x1cd   : > { %v3578_v3 = vsel %vm7109_vm8, %v3576_v18, %v3577_v24  ;;  %v9911_v41 = vrot.slane %v8114_v60, 10  ;;  %v3583_v30 = vrot.slane %v3581_v28, 4  ;;  %v6153_v57 = vcombine.low %v3207_v61, %v3217_v6  ;;  %v3144_v45 = vld [vmem:[#allocation3 + $0x84] sm:$0x3] }
 0x1ce   : > { %v6178_v48 = vcombine.low %v3575_v0, %v3578_v3  ;;  %v3230_v9 = vrot.slane %v9791_v20, 6  ;;  %v3233_v27 = vrot.slane %v9788_v1, 7  ;;  %v3240_v60 = vrot.slane %v3238_v21, 6  ;;  %v9912_v0 = vld [vmem:[#allocation45_spill] sm:$0xff] }
 0x1cf   : > { %v3582_v55 = vsel %vm7109_vm8, %v9911_v41, %v3581_v28  ;;  %v3585_v37 = vsel %vm7109_vm8, %v3583_v30, %v3584_v58  ;;  %v3241_v24 = vshll.u32 %v8609_v35, 16  ;;  %v9783_v17 = vshrl.u32 %v8604_v52, 16  ;;  %6731 = vmatmul.mubr.msk.bf16.vlgmr.msra.gmra.mxu1 %vm645_vm7, %v6153_v57  ;;  %v3141_v21 = vld [vmem:[#allocation3 + $0x6c] sm:$0x3] }
 0x1d0   : > { %6752 = vmatprep.mubr.msk.bf16.mxu0 %vm645_vm7, %v6178_v48  ;;  %v6179_v56 = vcombine.low %v3582_v55, %v3585_v37  ;;  %v3234_v7 = vor.u32 %v3233_v27, %v3230_v9  ;;  %v9782_v61 = vshll.u32 %v8604_v52, 16  ;;  %v3266_v54 = vshrl.u32 %v8633_v38, 16  ;;  %6765 = vmatpush3.bf16.msra.mxu1 %v9912_v0  ;;  %v9913_v3 = vld [vmem:[#allocation49_spill] sm:$0xff] }
 0x1d1   : > { %v3243_v18 = vrot.slane %v3241_v24, 7  ;;  %v3258_v28 = vrot.slane %v9783_v17, 6  ;;  %v3269_v58 = vshll.u32 %v8633_v38, 16  ;;  %v3588_v6 = vrot.slane %v8639_v44, 6  ;;  %6903 = vmatprep.subr.msk.bf16.mxu1 %vm670_vm0, %v8315_v29  ;;  %v8671_v17 = vld [vmem:[#allocation3 + $0x6c] sm:$0x7] }
 0x1d2   : > { %6753 = vmatmul.mubr.msk.bf16.gmra.mxu0 %vm645_vm7, %v6179_v56  ;;  %v3235_v41 = vsel %vm7127_vm9, %v9913_v3, %v3234_v7  ;;  %v3236_v55 = vrot.slane %v3234_v7, 4  ;;  %v3261_v30 = vrot.slane %v9782_v61, 7  ;;  %v3268_v57 = vrot.slane %v3266_v54, 6 }
 0x1d3   : > { %v3244_v48 = vor.u32 %v3243_v18, %v3240_v60  ;;  %v3271_v9 = vrot.slane %v3269_v58, 7  ;;  %v9914_v27 = vrot.slane %v8161_v26, 10  ;;  %v3590_v24 = vrot.slane %v3588_v6, 4  ;;  %v9915_v18 = vld [vmem:[#allocation46_spill] sm:$0xff] }
 0x1d4   : > { %v3262_v56 = vor.u32 %v3261_v30, %v3258_v28  ;;  %v3591_v0 = vrot.slane %v3141_v21, 6  ;;  %v3595_v3 = vrot.slane %v8649_v59, 6  ;;  %v3598_v7 = vrot.slane %v3144_v45, 6 }
 0x1d5   : > { %v3589_v37 = vsel %vm7109_vm8, %v9914_v27, %v3588_v6  ;;  %v3245_v61 = vsel %vm7127_vm9, %v3236_v55, %v3244_v48  ;;  %v3272_v54 = vor.u32 %v3271_v9, %v3268_v57  ;;  %v9787_v29 = vshrl.u32 %v8639_v44, 16  ;;  %v9916_v6 = vld [vmem:[#allocation43_spill] sm:$0xff] }
 0x1d6   : > { %v9786_v60 = vshll.u32 %v8639_v44, 16  ;;  %v6154_v26 = vcombine.low %v3235_v41, %v3245_v61  ;;  %v3263_v58 = vsel %vm7127_vm9, %v9915_v18, %v3262_v56  ;;  %v3264_v28 = vrot.slane %v3262_v56, 4 }
 0x1d7   : > { %v3592_v21 = vsel %vm7109_vm8, %v3590_v24, %v3591_v0  ;;  %v9917_v30 = vrot.slane %v9916_v6, 10  ;;  %v3597_v57 = vrot.slane %v3595_v3, 4  ;;  %v3286_v48 = vrot.slane %v9787_v29, 6  ;;  %v3147_v6 = vld [vmem:[#allocation3 + $0x9c] sm:$0x3] }
 0x1d8   : > { %v6180_v45 = vcombine.low %v3589_v37, %v3592_v21  ;;  %6734 = vmatprep.mubr.msk.bf16.mxu1 %vm645_vm7, %v6154_v26  ;;  %v3273_v61 = vsel %vm7127_vm9, %v3264_v28, %v3272_v54  ;;  %v3289_v41 = vrot.slane %v9786_v60, 7  ;;  %v3294_v9 = vshrl.u32 %v8671_v17, 16  ;;  %v8693_v37 = vld [vmem:[#allocation3 + $0x84] sm:$0x7]  ;;  %v8700_v54 = vld [vmem:[#allocation3 + $0x98] sm:$0xf] }
 0x1d9   : > { %v3596_v55 = vsel %vm7109_vm8, %v9917_v30, %v3595_v3  ;;  %v3297_v27 = vshll.u32 %v8671_v17, 16  ;;  %v6155_v24 = vcombine.low %v3263_v58, %v3273_v61  ;;  %v3599_v56 = vsel %vm7109_vm8, %v3597_v57, %v3598_v7  ;;  %v8709_v57 = vld [vmem:[#allocation3 + $0xb0] sm:$0xf] }
 0x1da   : > { %6756 = vmatprep.mubr.msk.bf16.mxu0 %vm645_vm7, %v6180_v45  ;;  %v9785_v0 = vshrl.u32 %v8649_v59, 16  ;;  %v9784_v3 = vshll.u32 %v8649_v59, 16  ;;  %v6181_v26 = vcombine.low %v3596_v55, %v3599_v56  ;;  %v3290_v18 = vor.u32 %v3289_v41, %v3286_v48  ;;  %v9918_v55 = vld [vmem:[#allocation13_spill] sm:$0xff] }
 0x1db   : > { %v3296_v28 = vrot.slane %v3294_v9, 6  ;;  %v3299_v21 = vrot.slane %v3297_v27, 7  ;;  %6735 = vmatmul.mubr.msk.bf16.gmra.mxu1 %vm645_vm7, %v6155_v24  ;;  %v3322_v7 = vshrl.u32 %v8693_v37, 16  ;;  %v3325_v30 = vshll.u32 %v8693_v37, 16 }
 0x1dc   : > { %v3314_v58 = vrot.slane %v9785_v0, 6  ;;  %v3317_v45 = vrot.slane %v9784_v3, 7  ;;  %6757 = vmatmul.mubr.msk.bf16.gmra.mxu0 %vm645_vm7, %v6181_v26  ;;  %v3291_v48 = vsel %vm7127_vm9, %v9918_v55, %v3290_v18  ;;  %v3292_v61 = vrot.slane %v3290_v18, 4  ;;  %v3150_v0 = vld [vmem:[#allocation3 + $0xb4] sm:$0x3] }
 0x1dd   : > { %v3300_v41 = vor.u32 %v3299_v21, %v3296_v28  ;;  %v3602_v9 = vrot.slane %v8700_v54, 6  ;;  %v3324_v24 = vrot.slane %v3322_v7, 6  ;;  %v3327_v56 = vrot.slane %v3325_v30, 7  ;;  %v8723_v18 = vld [vmem:[#allocation3 + $0xc] sm:$0xf]  ;;  %v9920_v21 = vld [vmem:[#allocation11_spill] sm:$0xff] }
 0x1de   : > { %v3318_v27 = vor.u32 %v3317_v45, %v3314_v58  ;;  %v3605_v3 = vrot.slane %v3147_v6, 6  ;;  %v9919_v29 = vrot.slane %v8208_v43, 10  ;;  %v3609_v55 = vrot.slane %v8709_v57, 6  ;;  %v9921_v30 = vld [vmem:[#allocation47_spill] sm:$0xff] }
 0x1df   : > { %v3301_v60 = vsel %vm7127_vm9, %v3292_v61, %v3300_v41  ;;  %v3604_v1 = vrot.slane %v3602_v9, 4  ;;  %v3328_v45 = vor.u32 %v3327_v56, %v3324_v24  ;;  %v9922_v43 = vrot.slane %v9921_v30, 10  ;;  %v8740_v24 = vld [vmem:[#allocation3 + $0x9c] sm:$0x7]  ;;  %v9923_v30 = vld [vmem:[#allocation48_spill] sm:$0xff] }
 0x1e0   : > { %v3603_v26 = vsel %vm7109_vm8, %v9919_v29, %v3602_v9  ;;  %v6156_v28 = vcombine.low %v3291_v48, %v3301_v60  ;;  %v3319_v58 = vsel %vm7127_vm9, %v9920_v21, %v3318_v27  ;;  %v3320_v6 = vrot.slane %v3318_v27, 4  ;;  %v8749_v21 = vld [vmem:[#allocation3 + $0xb4] sm:$0x7] }
 0x1e1   : > { %v3606_v7 = vsel %vm7109_vm8, %v3604_v1, %v3605_v3  ;;  %v3610_v29 = vsel %vm7109_vm8, %v9922_v43, %v3609_v55  ;;  %v3611_v61 = vrot.slane %v3609_v55, 4  ;;  %v3612_v41 = vrot.slane %v3150_v0, 6 }
 0x1e2   : > { %6738 = vmatprep.mubr.msk.bf16.mxu1 %vm645_vm7, %v6156_v28  ;;  %v3329_v60 = vsel %vm7127_vm9, %v3320_v6, %v3328_v45  ;;  %v6182_v48 = vcombine.low %v3603_v26, %v3606_v7  ;;  %v4023_v9 = vrot.slane %v3172_v36, 7  ;;  %v4028_v27 = vshrl.u32 %v8723_v18, 16 }
 0x1e3   : > { %v6157_v1 = vcombine.low %v3319_v58, %v3329_v60  ;;  %v3613_v3 = vsel %vm7109_vm8, %v3611_v61, %v3612_v41  ;;  %v4031_v56 = vshll.u32 %v8723_v18, 16  ;;  %v9790_v0 = vshrl.u32 %v8700_v54, 16 }
 0x1e4   : > { %6760 = vmatprep.mubr.msk.bf16.mxu0 %vm645_vm7, %v6182_v48  ;;  %v6183_v55 = vcombine.low %v3610_v29, %v3613_v3  ;;  %v4024_v26 = vor.u32 %v4023_v9, %v3175_v63  ;;  %v4026_v28 = vrot.slane %v4023_v9, 4  ;;  %v4030_v36 = vrot.slane %v4028_v27, 7 }
 0x1e5   : > { %6739 = vmatmul.mubr.msk.bf16.gmra.mxu1 %vm645_vm7, %v6157_v1  ;;  %v3342_v58 = vrot.slane %v9790_v0, 6  ;;  %v9789_v6 = vshll.u32 %v8700_v54, 16  ;;  %v3350_v45 = vshrl.u32 %v8740_v24, 16  ;;  %v3353_v7 = vshll.u32 %v8740_v24, 16 }
 0x1e6   : > { %6761 = vmatmul.mubr.msk.bf16.gmra.mxu0 %vm645_vm7, %v6183_v55  ;;  %v4025_v63 = vsel %vm7360_vm15, %v9923_v30, %v4024_v26  ;;  %v4033_v29 = vor.u32 %v4031_v56, %v4030_v36  ;;  %v9793_v61 = vshrl.u32 %v8709_v57, 16  ;;  %v9792_v41 = vshll.u32 %v8709_v57, 16  ;;  %v8773_v26 = vld [vmem:[#allocation3 + $0x24] sm:$0xf] }
 0x1e7   : > { %v3345_v60 = vrot.slane %v9789_v6, 7  ;;  %v3352_v48 = vrot.slane %v3350_v45, 6  ;;  %v3355_v9 = vrot.slane %v3353_v7, 7  ;;  %v3378_v27 = vshrl.u32 %v8749_v21, 16 }
 0x1e8   : > { %v4034_v1 = vsel %vm7360_vm15, %v4026_v28, %v4033_v29  ;;  %v3370_v3 = vrot.slane %v9793_v61, 6  ;;  %v3373_v56 = vrot.slane %v9792_v41, 7  ;;  %v3381_v55 = vshll.u32 %v8749_v21, 16  ;;  %v9925_v29 = vld [vmem:[#allocation17_spill] sm:$0xff] }
 0x1e9   : > { %v6226_v36 = vcombine.low %v4025_v63, %v4034_v1  ;;  %v3346_v30 = vor.u32 %v3345_v60, %v3342_v58  ;;  %v3356_v6 = vor.u32 %v3355_v9, %v3352_v48  ;;  %v3380_v45 = vrot.slane %v3378_v27, 6  ;;  %v9927_v9 = vld [vmem:[#allocation44_spill] sm:$0xff] }
 0x1ea   : > { %v3374_v7 = vor.u32 %v3373_v56, %v3370_v3  ;;  %v3383_v0 = vrot.slane %v3381_v55, 7  ;;  %v3790_v20 = vrot.slane %v8528_v14, 7  ;;  %v3793_v28 = vrot.slane %v8561_v2, 7 }
 0x1eb   : > { %6784 = vmatprep.mubr.msk.bf16.mxu0 %vm645_vm7, %v6226_v36  ;;  %v3347_v41 = vsel %vm7127_vm9, %v9925_v29, %v3346_v30  ;;  %v3348_v61 = vrot.slane %v3346_v30, 4  ;;  %v4040_v4 = vrot.slane %v9926_v23, 7  ;;  %v4045_v58 = vshrl.u32 %v8773_v26, 16  ;;  %v8795_v30 = vld [vmem:[#allocation3 + $0x3c] sm:$0xf] }
 0x1ec   : > { %v3375_v63 = vsel %vm7127_vm9, %v8334_v34, %v3374_v7  ;;  %v3376_v60 = vrot.slane %v3374_v7, 4  ;;  %v3384_v48 = vor.u32 %v3383_v0, %v3380_v45  ;;  %v9928_v2 = vrot.slane %v9927_v9, 11 }
 0x1ed   : > { %v3357_v3 = vsel %vm7127_vm9, %v3348_v61, %v3356_v6  ;;  %v3792_v56 = vrot.slane %v3790_v20, 4  ;;  %v9930_v55 = vshll.u32 %v8515_v47, 16  ;;  %v4043_v36 = vrot.slane %v4040_v4, 4 }
 0x1ee   : > { %v3791_v1 = vsel %vm7330_vm14, %v9928_v2, %v3790_v20  ;;  %v6158_v29 = vcombine.low %v3347_v41, %v3357_v3  ;;  %v3385_v34 = vsel %vm7127_vm9, %v3376_v60, %v3384_v48  ;;  %v4047_v0 = vrot.slane %v4045_v58, 7  ;;  %v9931_v2 = vld [vmem:[#allocation15_spill] sm:$0xff] }
 0x1ef   : > { %v4041_v23 = vor.u32 %v4040_v4, %v9930_v55  ;;  %v4048_v45 = vshll.u32 %v8773_v26, 16  ;;  %v6159_v7 = vcombine.low %v3375_v63, %v3385_v34  ;;  %v3794_v9 = vsel %vm7330_vm14, %v3792_v56, %v3793_v28 }
 0x1f0   : > { %v9932_v6 = vshrl.u32 %v8596_v19, 16  ;;  %6742 = vmatprep.mubr.msk.bf16.mxu1 %vm645_vm7, %v6158_v29  ;;  %v6201_v61 = vcombine.low %v3791_v1, %v3794_v9  ;;  %v4062_v16 = vshrl.u32 %v8795_v30, 16  ;;  %v4065_v58 = vshll.u32 %v8795_v30, 16  ;;  %v8820_v29 = vld [vmem:[#allocation3 + $0x54] sm:$0xf] }
 0x1f1   : > { %v4042_v20 = vsel %vm7360_vm15, %v9931_v2, %v4041_v23  ;;  %v4050_v41 = vor.u32 %v4048_v45, %v4047_v0  ;;  %6743 = vmatmul.mubr.msk.bf16.gmra.mxu1 %vm645_vm7, %v6159_v7  ;;  %v9933_v63 = vshll.u32 %v8596_v19, 16  ;;  %v3797_v48 = vrot.slane %v8515_v47, 7  ;;  %v9934_v0 = vld [vmem:[#allocation18_spill] sm:$0xff]  ;;  %v9935_v7 = vld [vmem:[#allocation12_spill] sm:$0xff] }
 0x1f2   : > { %v4057_v4 = vrot.slane %v9932_v6, 7  ;;  %v3800_v3 = vrot.slane %v8581_v53, 7  ;;  %6766 = vmatprep.mubr.msk.bf16.mxu1 %vm645_vm7, %v6201_v61  ;;  %v4064_v56 = vrot.slane %v4062_v16, 7  ;;  %v3804_v55 = vrot.slane %v8596_v19, 7 }
 0x1f3   : > { %v4051_v1 = vsel %vm7360_vm15, %v4043_v36, %v4050_v41  ;;  %v3807_v23 = vrot.slane %v8609_v35, 7  ;;  %v9936_v9 = vrot.slane %v9935_v7, 11  ;;  %v3799_v2 = vrot.slane %v3797_v48, 4  ;;  %v9937_v36 = vld [vmem:[#allocation14_spill] sm:$0xff] }
 0x1f4   : > { %v4058_v28 = vor.u32 %v4057_v4, %v9933_v63  ;;  %v4060_v60 = vrot.slane %v4057_v4, 4  ;;  %v6227_v34 = vcombine.low %v4042_v20, %v4051_v1  ;;  %v4067_v6 = vor.u32 %v4065_v58, %v4064_v56 }
 0x1f5   : > { %v3798_v53 = vsel %vm7330_vm14, %v9936_v9, %v3797_v48  ;;  %v9938_v4 = vrot.slane %v9937_v36, 11  ;;  %v3806_v35 = vrot.slane %v3804_v55, 4  ;;  %v9939_v41 = vshrl.u32 %v8604_v52, 16  ;;  %v8840_v48 = vld [vmem:[#allocation3 + $0x6c] sm:$0xf] }
 0x1f6   : > { %v4059_v45 = vsel %vm7360_vm15, %v9934_v0, %v4058_v28  ;;  %6785 = vmatmul.mubr.msk.bf16.vlgmr.msra.gmra.mxu0 %vm645_vm7, %v6227_v34  ;;  %v3801_v16 = vsel %vm7330_vm14, %v3799_v2, %v3800_v3  ;;  %v4079_v63 = vshrl.u32 %v8820_v29, 16  ;;  %v4082_v28 = vshll.u32 %v8820_v29, 16 }
 0x1f7   : > { %v3805_v61 = vsel %vm7330_vm14, %v9938_v4, %v3804_v55  ;;  %v4074_v20 = vrot.slane %v9939_v41, 7  ;;  %v9940_v58 = vshrl.u32 %v8639_v44, 16  ;;  %v4068_v56 = vsel %vm7360_vm15, %v4060_v60, %v4067_v6  ;;  %6819 = vmatpush3.bf16.msra.mxu0 %v8421_v10  ;;  %v9942_v4 = vld [vmem:[#allocation21_spill] sm:$0xff]  ;;  %v9944_v41 = vld [vmem:[#allocation19_spill] sm:$0xff] }
 0x1f8   : > { %v6202_v55 = vcombine.low %v3798_v53, %v3801_v16  ;;  %v3808_v0 = vsel %vm7330_vm14, %v3806_v35, %v3807_v23  ;;  %v9941_v34 = vshll.u32 %v8604_v52, 16  ;;  %v6228_v3 = vcombine.low %v4059_v45, %v4068_v56  ;;  %6906 = vmatprep.subr.msk.bf16.mxu0 %vm670_vm0, %v8504_v13  ;;  %v9945_v56 = vld [vmem:[#allocation16_spill] sm:$0xff] }
 0x1f9   : > { %v4091_v1 = vrot.slane %v9940_v58, 7  ;;  %v6203_v9 = vcombine.low %v3805_v61, %v3808_v0  ;;  %v4077_v2 = vrot.slane %v4074_v20, 4  ;;  %v4081_v36 = vrot.slane %v4079_v63, 7 }
 0x1fa   : > { %v4075_v7 = vor.u32 %v4074_v20, %v9941_v34  ;;  %v9943_v53 = vshll.u32 %v8639_v44, 16  ;;  %v4096_v35 = vshrl.u32 %v8840_v48, 16  ;;  %6788 = vmatprep.mubr.msk.bf16.mxu0 %vm645_vm7, %v6228_v3  ;;  %6767 = vmatmul.mubr.msk.bf16.vlgmr.msra.gmra.mxu1 %vm645_vm7, %v6202_v55  ;;  %v4099_v45 = vshll.u32 %v8840_v48, 16 }
 0x1fb   : > { %v4094_v23 = vrot.slane %v4091_v1, 4  ;;  %v4084_v10 = vor.u32 %v4082_v28, %v4081_v36  ;;  %v3811_v61 = vrot.slane %v8604_v52, 7  ;;  %v3814_v13 = vrot.slane %v8633_v38, 7  ;;  %6801 = vmatpush3.bf16.msra.mxu1 %v9944_v41  ;;  %6770 = vmatprep.mubr.msk.bf16.mxu1 %vm645_vm7, %v6203_v9  ;;  %v8871_v28 = vld [vmem:[#allocation3 + $0x84] sm:$0xf] }
 0x1fc   : > { %v4076_v60 = vsel %vm7360_vm15, %v9942_v4, %v4075_v7  ;;  %v4092_v6 = vor.u32 %v4091_v1, %v9943_v53  ;;  %v4098_v16 = vrot.slane %v4096_v35, 7  ;;  %v3818_v63 = vrot.slane %v8639_v44, 7  ;;  %6905 = vmatprep.subr.msk.bf16.mxu1 %vm670_vm0, %v8444_v25 }
 0x1fd   : > { %v3821_v58 = vrot.slane %v8671_v17, 7  ;;  %v4085_v1 = vsel %vm7360_vm15, %v4077_v2, %v4084_v10  ;;  %v9946_v38 = vrot.slane %v9945_v56, 11  ;;  %v3813_v0 = vrot.slane %v3811_v61, 4  ;;  %v8892_v10 = vld [vmem:[#allocation3 + $0x9c] sm:$0xf] }
 0x1fe   : > { %v4093_v20 = vsel %vm7360_vm15, %v8369_v12, %v4092_v6  ;;  %v9947_v34 = vshrl.u32 %v8649_v59, 16  ;;  %v6229_v12 = vcombine.low %v4076_v60, %v4085_v1  ;;  %v4101_v3 = vor.u32 %v4099_v45, %v4098_v16 }
 0x1ff   : > { %v3812_v55 = vsel %vm7330_vm14, %v9946_v38, %v3811_v61  ;;  %v9948_v17 = vrot.slane %v8326_v31, 11  ;;  %v3820_v2 = vrot.slane %v3818_v63, 4  ;;  %v3815_v36 = vsel %vm7330_vm14, %v3813_v0, %v3814_v13 }
 0x200   : > { %v4108_v7 = vrot.slane %v9947_v34, 7  ;;  %v9949_v4 = vshll.u32 %v8649_v59, 16  ;;  %v4113_v35 = vshrl.u32 %v8871_v28, 16  ;;  %6789 = vmatmul.mubr.msk.bf16.gmra.mxu0 %vm645_vm7, %v6229_v12  ;;  %v4102_v31 = vsel %vm7360_vm15, %v4094_v23, %v4101_v3 }
 0x201   : > { %v3819_v9 = vsel %vm7330_vm14, %v9948_v17, %v3818_v63  ;;  %v6204_v25 = vcombine.low %v3812_v55, %v3815_v36  ;;  %v3822_v60 = vsel %vm7330_vm14, %v3820_v2, %v3821_v58  ;;  %v4116_v45 = vshll.u32 %v8871_v28, 16 }
 0x202   : > { %v4109_v53 = vor.u32 %v4108_v7, %v9949_v4  ;;  %v4111_v6 = vrot.slane %v4108_v7, 4  ;;  %v6230_v61 = vcombine.low %v4093_v20, %v4102_v31  ;;  %v6205_v13 = vcombine.low %v3819_v9, %v3822_v60  ;;  %v8920_v9 = vld [vmem:[#allocation3 + $0xb4] sm:$0xf]  ;;  %v4492_v60 = vld [vmem:[#allocation3 + $0x8] sm:$0xf] }
 0x203   : > { %v4115_v16 = vrot.slane %v4113_v35, 7  ;;  %v9950_v63 = vshrl.u32 %v8700_v54, 16  ;;  %v4130_v56 = vshrl.u32 %v8892_v10, 16  ;;  %v4133_v23 = vshll.u32 %v8892_v10, 16  ;;  %6771 = vmatmul.mubr.msk.bf16.gmra.mxu1 %vm645_vm7, %v6204_v25 }
 0x204   : > { %v4110_v41 = vsel %vm7360_vm15, %v8383_v51, %v4109_v53  ;;  %v3825_v38 = vrot.slane %v8649_v59, 7  ;;  %6792 = vmatprep.mubr.msk.bf16.mxu0 %vm645_vm7, %v6230_v61  ;;  %v3828_v58 = vrot.slane %v8693_v37, 7  ;;  %v3832_v55 = vrot.slane %v8700_v54, 7  ;;  %6774 = vmatprep.mubr.msk.bf16.mxu1 %vm645_vm7, %v6205_v13  ;;  %v8939_v13 = vld [vmem:[#allocation3 + $0xc] sm:$0xf] }
 0x205   : > { %v4125_v1 = vrot.slane %v9950_v63, 7  ;;  %v4118_v20 = vor.u32 %v4116_v45, %v4115_v16  ;;  %v3835_v51 = vrot.slane %v8740_v24, 7  ;;  %v9951_v0 = vshll.u32 %v8700_v54, 16 }
 0x206   : > { %v4132_v12 = vrot.slane %v4130_v56, 7  ;;  %v9952_v3 = vrot.slane %v8347_v33, 11  ;;  %v3827_v2 = vrot.slane %v3825_v38, 4  ;;  %v9953_v24 = vrot.slane %v8355_v62, 11 }
 0x207   : > { %v4126_v34 = vor.u32 %v4125_v1, %v9951_v0  ;;  %v4128_v7 = vrot.slane %v4125_v1, 4  ;;  %v4119_v37 = vsel %vm7360_vm15, %v4111_v6, %v4118_v20  ;;  %v3834_v4 = vrot.slane %v3832_v55, 4 }
 0x208   : > { %v3826_v17 = vsel %vm7330_vm14, %v9952_v3, %v3825_v38  ;;  %v3833_v36 = vsel %vm7330_vm14, %v9953_v24, %v3832_v55  ;;  %v6231_v53 = vcombine.low %v4110_v41, %v4119_v37  ;;  %v4135_v35 = vor.u32 %v4133_v23, %v4132_v12 }
 0x209   : > { %v4127_v33 = vsel %vm7360_vm15, %v8386_v40, %v4126_v34  ;;  %v9954_v31 = vshrl.u32 %v8709_v57, 16  ;;  %v3829_v6 = vsel %vm7330_vm14, %v3827_v2, %v3828_v58  ;;  %v3836_v62 = vsel %vm7330_vm14, %v3834_v4, %v3835_v51  ;;  %v4495_v34 = vld [vmem:[#allocation3 + $0x20] sm:$0xf] }
 0x20a   : > { %v4147_v45 = vshrl.u32 %v8920_v9, 16  ;;  %v4150_v61 = vshll.u32 %v8920_v9, 16  ;;  %6793 = vmatmul.mubr.msk.bf16.gmra.mxu0 %vm645_vm7, %v6231_v53  ;;  %v4136_v40 = vsel %vm7360_vm15, %v4128_v7, %v4135_v35  ;;  %v6206_v41 = vcombine.low %v3826_v17, %v3829_v6 }
 0x20b   : > { %v4142_v25 = vrot.slane %v9954_v31, 7  ;;  %v6207_v16 = vcombine.low %v3833_v36, %v3836_v62  ;;  %v9955_v63 = vshll.u32 %v8709_v57, 16  ;;  %v6232_v56 = vcombine.low %v4127_v33, %v4136_v40  ;;  %v8962_v36 = vld [vmem:[#allocation3 + $0x24] sm:$0xf]  ;;  %v4498_v62 = vld [vmem:[#allocation3 + $0x38] sm:$0xf] }
 0x20c   : > { %v4149_v38 = vrot.slane %v4147_v45, 7  ;;  %v4519_v20 = vshrl.u32 %v4492_v60, 16  ;;  %v4522_v55 = vshll.u32 %v4492_v60, 16  ;;  %v4528_v51 = vshll.u32 %v8939_v13, 16  ;;  %6775 = vmatmul.mubr.msk.bf16.gmra.mxu1 %vm645_vm7, %v6206_v41 }
 0x20d   : > { %v4143_v1 = vor.u32 %v4142_v25, %v9955_v63  ;;  %v4145_v23 = vrot.slane %v4142_v25, 4  ;;  %v4532_v0 = vshrl.u32 %v8939_v13, 16  ;;  %6796 = vmatprep.mubr.msk.bf16.mxu0 %vm645_vm7, %v6232_v56  ;;  %v3839_v3 = vrot.slane %v8709_v57, 7  ;;  %6778 = vmatprep.mubr.msk.bf16.mxu1 %vm645_vm7, %v6207_v16 }
 0x20e   : > { %v4152_v7 = vor.u32 %v4150_v61, %v4149_v38  ;;  %v4521_v12 = vrot.slane %v4519_v20, 4  ;;  %v3842_v17 = vrot.slane %v8749_v21, 7  ;;  %v4524_v37 = vrot.slane %v4522_v55, 5  ;;  %v8974_v61 = vld [vmem:[#allocation3 + $0x3c] sm:$0xf] }
 0x20f   : > { %v4144_v58 = vsel %vm7360_vm15, %v8401_v11, %v4143_v1  ;;  %v4530_v11 = vrot.slane %v4528_v51, 5  ;;  %v4534_v2 = vrot.slane %v4532_v0, 4  ;;  %v6243_v24 = vcombine.low %v8528_v14, %v8723_v18 }
 0x210   : > { %v4153_v4 = vsel %vm7360_vm15, %v4145_v23, %v4152_v7  ;;  %v9956_v53 = vrot.slane %v8364_v8, 11  ;;  %v3841_v33 = vrot.slane %v3839_v3, 4  ;;  %v4543_v35 = vshrl.u32 %v4495_v34, 16  ;;  %v9964_v23 = vld [vmem:[#allocation20_spill] sm:$0xff] }
 0x211   : > { %v6233_v31 = vcombine.low %v4144_v58, %v4153_v4  ;;  %v4525_v25 = vor.u32 %v4524_v37, %v4521_v12  ;;  %v4535_v60 = vor.u32 %v4534_v2, %v4530_v11  ;;  %v4546_v6 = vshll.u32 %v4495_v34, 16  ;;  %v4501_v34 = vld [vmem:[#allocation3 + $0x50] sm:$0xf]  ;;  %v8988_v37 = vld [vmem:[#allocation3 + $0x54] sm:$0xf] }
 0x212   : > { %v3840_v21 = vsel %vm7330_vm14, %v9956_v53, %v3839_v3  ;;  %v3843_v14 = vsel %vm7330_vm14, %v3841_v33, %v3842_v17  ;;  %v4545_v18 = vrot.slane %v4543_v35, 4  ;;  %v4552_v45 = vshll.u32 %v8962_v36, 16 }
 0x213   : > { %v4556_v43 = vshrl.u32 %v8962_v36, 16  ;;  %6797 = vmatmul.mubr.msk.bf16.gmra.mxu0 %vm645_vm7, %v6233_v31  ;;  %v4526_v8 = vrot.slane %v4525_v25, 4  ;;  %v4536_v40 = vrot.slane %v4535_v60, 4  ;;  %v6208_v41 = vcombine.low %v3840_v21, %v3843_v14 }
 0x214   : > { %v4548_v16 = vrot.slane %v4546_v6, 5  ;;  %v4554_v63 = vrot.slane %v4552_v45, 5  ;;  %v4567_v1 = vshrl.u32 %v4498_v62, 16  ;;  %v4570_v56 = vshll.u32 %v4498_v62, 16  ;;  %v4504_v6 = vld [vmem:[#allocation3 + $0x68] sm:$0xf] }
 0x215   : > { %v4558_v27 = vrot.slane %v4556_v43, 4  ;;  %v4531_v38 = vsel %vm7556_vm4, %v4526_v8, %v4530_v11  ;;  %v4541_v20 = vsel %vm7556_vm4, %v4536_v40, %v8413_v46  ;;  %v4576_v55 = vshll.u32 %v8974_v61, 16  ;;  %6779 = vmatmul.mubr.msk.bf16.gmra.mxu1 %vm645_vm7, %v6208_v41 }
 0x216   : > { %v4549_v58 = vor.u32 %v4548_v16, %v4545_v18  ;;  %v6260_v7 = vcombine.low %v4531_v38, %v4541_v20  ;;  %v4569_v3 = vrot.slane %v4567_v1, 4  ;;  %v4572_v17 = vrot.slane %v4570_v56, 5  ;;  %6802 = vmatprep.mubr.msk.bf16.mxu1 %vm645_vm7, %v6243_v24  ;;  %v9022_v20 = vld [vmem:[%s9754_s4 + $0x10] sm:$0x3] }
 0x217   : > { %v4559_v12 = vor.u32 %v4558_v27, %v4554_v63  ;;  %v4578_v11 = vrot.slane %v4576_v55, 5  ;;  %v4580_v46 = vshrl.u32 %v8974_v61, 16  ;;  %v6244_v4 = vcombine.low %v8515_v47, %v8773_v26 }
 0x218   : > { %v4550_v2 = vrot.slane %v4549_v58, 4  ;;  %6820 = vmatprep.mubr.msk.bf16.mxu0 %vm645_vm7, %v6260_v7  ;;  %v4573_v21 = vor.u32 %v4572_v17, %v4569_v3  ;;  %v6245_v33 = vcombine.low %v8596_v19, %v8795_v30  ;;  %v4591_v35 = vshrl.u32 %v4501_v34, 16  ;;  %v9008_v19 = vld [vmem:[#allocation3 + $0x6c] sm:$0xf]  ;;  %v4507_v3 = vld [vmem:[#allocation3 + $0x80] sm:$0xf] }
 0x219   : > { %v4560_v53 = vrot.slane %v4559_v12, 4  ;;  %v4582_v31 = vrot.slane %v4580_v46, 4  ;;  %v4594_v25 = vshll.u32 %v4501_v34, 16  ;;  %v4600_v60 = vshll.u32 %v8988_v37, 16 }
 0x21a   : > { %v4555_v24 = vsel %vm7556_vm4, %v4550_v2, %v4554_v63  ;;  %v4574_v26 = vrot.slane %v4573_v21, 4  ;;  %v4593_v62 = vrot.slane %v4591_v35, 4  ;;  %v4604_v14 = vshrl.u32 %v8988_v37, 16 }
 0x21b   : > { %v4565_v47 = vsel %vm7556_vm4, %v4560_v53, %v8433_v39  ;;  %v4583_v18 = vor.u32 %v4582_v31, %v4578_v11  ;;  %v4596_v8 = vrot.slane %v4594_v25, 5  ;;  %v4602_v40 = vrot.slane %v4600_v60, 5  ;;  %v9037_v53 = vld [vmem:[#allocation3 + $0x84] sm:$0xf] }
 0x21c   : > { %v6261_v30 = vcombine.low %v4555_v24, %v4565_v47  ;;  %v4579_v41 = vsel %vm7556_vm4, %v4574_v26, %v4578_v11  ;;  %v4606_v16 = vrot.slane %v4604_v14, 4  ;;  %v4615_v63 = vshrl.u32 %v4504_v6, 16  ;;  %v4510_v24 = vld [vmem:[#allocation3 + $0x98] sm:$0xf] }
 0x21d   : > { %v4618_v39 = vshll.u32 %v4504_v6, 16  ;;  %v4584_v27 = vrot.slane %v4583_v18, 4  ;;  %v4597_v1 = vor.u32 %v4596_v8, %v4593_v62  ;;  %v4624_v56 = vshll.u32 %v9008_v19, 16  ;;  %6803 = vmatmul.mubr.msk.bf16.vlgmr.msra.gmra.mxu1 %vm645_vm7, %v6244_v4 }
 0x21e   : > { %6821 = vmatmul.mubr.msk.bf16.vlgmr.msra.gmra.mxu0 %vm645_vm7, %v6261_v30  ;;  %v4628_v38 = vshrl.u32 %v9008_v19, 16  ;;  %v4607_v58 = vor.u32 %v4606_v16, %v4602_v40  ;;  %v4617_v34 = vrot.slane %v4615_v63, 4  ;;  %v6246_v12 = vcombine.low %v8604_v52, %v8820_v29  ;;  %6837 = vmatpush3.bf16.msra.mxu1 %v8461_v49 }
 0x21f   : > { %v4620_v7 = vrot.slane %v4618_v39, 5  ;;  %6855 = vmatpush3.bf16.msra.mxu0 %v8519_v15  ;;  %v4589_v17 = vsel %vm7556_vm4, %v4584_v27, %v8448_v5  ;;  %6806 = vmatprep.mubr.msk.bf16.mxu1 %vm645_vm7, %v6245_v33  ;;  %v4598_v2 = vrot.slane %v4597_v1, 4  ;;  %v4626_v11 = vrot.slane %v4624_v56, 5  ;;  %v4513_v27 = vld [vmem:[#allocation3 + $0xb0] sm:$0xf] }
 0x220   : > { %v4630_v4 = vrot.slane %v4628_v38, 4  ;;  %v6262_v52 = vcombine.low %v4579_v41, %v4589_v17  ;;  %v4608_v29 = vrot.slane %v4607_v58, 4  ;;  %v6247_v21 = vcombine.low %v8639_v44, %v8840_v48  ;;  %6907 = vmatprep.subr.msk.bf16.mxu1 %vm670_vm0, %v9022_v20  ;;  %v9051_v48 = vld [vmem:[#allocation3 + $0x9c] sm:$0xf] }
 0x221   : > { %v4621_v15 = vor.u32 %v4620_v7, %v4617_v34  ;;  %v4603_v5 = vsel %vm7556_vm4, %v4598_v2, %v4602_v40  ;;  %v4639_v33 = vshrl.u32 %v4507_v3, 16  ;;  %v4642_v35 = vshll.u32 %v4507_v3, 16  ;;  %v9066_v3 = vld [vmem:[#allocation3 + $0xb4] sm:$0xf] }
 0x222   : > { %v4631_v49 = vor.u32 %v4630_v4, %v4626_v11  ;;  %6824 = vmatprep.mubr.msk.bf16.mxu0 %vm645_vm7, %v6262_v52  ;;  %v4613_v31 = vsel %vm7556_vm4, %v4608_v29, %v8463_v50  ;;  %v4648_v6 = vshll.u32 %v9037_v53, 16  ;;  %v4652_v44 = vshrl.u32 %v9037_v53, 16 }
 0x223   : > { %v4622_v25 = vrot.slane %v4621_v15, 4  ;;  %v6263_v47 = vcombine.low %v4603_v5, %v4613_v31  ;;  %v4641_v62 = vrot.slane %v4639_v33, 4  ;;  %v4644_v30 = vrot.slane %v4642_v35, 5  ;;  %v4874_v33 = vld [vmem:[#allocation3 + $0x8] sm:$0xe]  ;;  %v9958_v35 = vld [vmem:[#allocation22_spill] sm:$0xff] }
 0x224   : > { %v4632_v26 = vrot.slane %v4631_v49, 4  ;;  %v4650_v8 = vrot.slane %v4648_v6, 5  ;;  %v4654_v50 = vrot.slane %v4652_v44, 4  ;;  %v4663_v40 = vshrl.u32 %v4510_v24, 16 }
 0x225   : > { %v4627_v18 = vsel %vm7556_vm4, %v4622_v25, %v4626_v11  ;;  %v4645_v16 = vor.u32 %v4644_v30, %v4641_v62  ;;  %v4666_v63 = vshll.u32 %v4510_v24, 16  ;;  %v4672_v39 = vshll.u32 %v9051_v48, 16  ;;  %6807 = vmatmul.mubr.msk.bf16.gmra.mxu1 %vm645_vm7, %v6246_v12 }
 0x226   : > { %6825 = vmatmul.mubr.msk.bf16.gmra.mxu0 %vm645_vm7, %v6263_v47  ;;  %v4637_v41 = vsel %vm7556_vm4, %v4632_v26, %v8471_v42  ;;  %v4655_v58 = vor.u32 %v4654_v50, %v4650_v8  ;;  %v4665_v34 = vrot.slane %v4663_v40, 4  ;;  %v4676_v7 = vshrl.u32 %v9051_v48, 16  ;;  %6810 = vmatprep.mubr.msk.bf16.mxu1 %vm645_vm7, %v6247_v21 }
 0x227   : > { %v6264_v1 = vcombine.low %v4627_v18, %v4637_v41  ;;  %v4646_v17 = vrot.slane %v4645_v16, 4  ;;  %v4668_v2 = vrot.slane %v4666_v63, 5  ;;  %v4674_v42 = vrot.slane %v4672_v39, 5 }
 0x228   : > { %v6248_v11 = vcombine.low %v8649_v59, %v8871_v28  ;;  %v4656_v4 = vrot.slane %v4655_v58, 4  ;;  %v4678_v12 = vrot.slane %v4676_v7, 4  ;;  %v6249_v52 = vcombine.low %v8700_v54, %v8892_v10  ;;  %v9100_v58 = vld [vmem:[#allocation3 + $0x20] sm:$0xe] }
 0x229   : > { %6828 = vmatprep.mubr.msk.bf16.mxu0 %vm645_vm7, %v6264_v1  ;;  %v4687_v29 = vshrl.u32 %v4513_v27, 16  ;;  %v4651_v15 = vsel %vm7556_vm4, %v4646_v17, %v4650_v8  ;;  %v4669_v21 = vor.u32 %v4668_v2, %v4665_v34  ;;  %v4690_v5 = vshll.u32 %v4513_v27, 16 }
 0x22a   : > { %v4696_v49 = vshll.u32 %v9066_v3, 16  ;;  %v4661_v59 = vsel %vm7556_vm4, %v4656_v4, %v9958_v35  ;;  %v4679_v28 = vor.u32 %v4678_v12, %v4674_v42  ;;  %v4700_v31 = vshrl.u32 %v9066_v3, 16  ;;  %v9960_v35 = vld [vmem:[#allocation26_spill] sm:$0xff] }
 0x22b   : > { %v4689_v24 = vrot.slane %v4687_v29, 4  ;;  %v6265_v25 = vcombine.low %v4651_v15, %v4661_v59  ;;  %v4670_v47 = vrot.slane %v4669_v21, 4  ;;  %v4692_v54 = vrot.slane %v4690_v5, 5  ;;  %v9961_v59 = vld [vmem:[#allocation24_spill] sm:$0xff] }
 0x22c   : > { %v4698_v10 = vrot.slane %v4696_v49, 5  ;;  %v4680_v26 = vrot.slane %v4679_v28, 4  ;;  %v4702_v62 = vrot.slane %v4700_v31, 4  ;;  %v5139_v30 = vshrl.u32 %v4874_v33, 16 }
 0x22d   : > { %v5142_v18 = vshll.u32 %v4874_v33, 16  ;;  %v4675_v8 = vsel %vm7556_vm4, %v4670_v47, %v4674_v42  ;;  %v4693_v50 = vor.u32 %v4692_v54, %v4689_v24  ;;  %v5147_v40 = vrot.slane %v4532_v0, 5  ;;  %6811 = vmatmul.mubr.msk.bf16.gmra.mxu1 %vm645_vm7, %v6248_v11  ;;  %v5487_v24 = vld [vmem:[#allocation3 + $0x20] sm:$0xc] }
 0x22e   : > { %6829 = vmatmul.mubr.msk.bf16.gmra.mxu0 %vm645_vm7, %v6265_v25  ;;  %v5148_v41 = vrot.slane %v4528_v51, 6  ;;  %v4685_v16 = vsel %vm7556_vm4, %v4680_v26, %v8494_v22  ;;  %v4703_v63 = vor.u32 %v4702_v62, %v4698_v10  ;;  %v5141_v27 = vrot.slane %v5139_v30, 5  ;;  %6814 = vmatprep.mubr.msk.bf16.mxu1 %vm645_vm7, %v6249_v52 }
 0x22f   : > { %v5144_v1 = vrot.slane %v5142_v18, 6  ;;  %v6266_v34 = vcombine.low %v4675_v8, %v4685_v16  ;;  %v4694_v17 = vrot.slane %v4693_v50, 4  ;;  %v6250_v0 = vcombine.low %v8709_v57, %v8920_v9  ;;  %v9131_v8 = vld [vmem:[#allocation3 + $0x40] sm:$0x3]  ;;  %v9966_v16 = vld [vmem:[#allocation23_spill] sm:$0xff] }
 0x230   : > { %v5149_v2 = vor.u32 %v5148_v41, %v5147_v40  ;;  %v4704_v51 = vrot.slane %v4703_v63, 4  ;;  %v6277_v4 = vrot.slane %v4874_v33, 9  ;;  %v4910_v22 = vrot.slane %v8939_v13, 5 }
 0x231   : > { %v5145_v42 = vor.u32 %v5144_v1, %v5141_v27  ;;  %6832 = vmatprep.mubr.msk.bf16.mxu0 %vm645_vm7, %v6266_v34  ;;  %v4699_v11 = vsel %vm7556_vm4, %v4694_v17, %v4698_v10  ;;  %v5162_v29 = vshrl.u32 %v9100_v58, 16  ;;  %v5165_v52 = vshll.u32 %v9100_v58, 16  ;;  %v4876_v10 = vld [vmem:[#allocation3 + $0x38] sm:$0xe] }
 0x232   : > { %v5151_v12 = vrot.slane %v5149_v2, 4  ;;  %v4709_v15 = vsel %vm7556_vm4, %v4704_v51, %v8506_v32  ;;  %v4911_v21 = vsel %vm7690_vm10, %v6277_v4, %v4910_v22  ;;  %v4912_v5 = vrot.slane %v4910_v22, 4 }
 0x233   : > { %v5146_v57 = vrot.slane %v5145_v42, 4  ;;  %v6267_v33 = vcombine.low %v4699_v11, %v4709_v15  ;;  %v9962_v28 = vor.u32 %v9960_v35, %v9961_v59  ;;  %v5164_v47 = vrot.slane %v5162_v29, 5 }
 0x234   : > { %v5167_v54 = vrot.slane %v5165_v52, 6  ;;  %v9965_v32 = vrot.slane %v9964_v23, 5  ;;  %v5170_v30 = vrot.slane %v4556_v43, 5  ;;  %v5171_v18 = vrot.slane %v4552_v45, 6 }
 0x235   : > { %v5160_v25 = vsel %vm7732_vm13, %v5151_v12, %v9962_v28  ;;  %v5150_v26 = vsel %vm7732_vm13, %v5146_v57, %v5149_v2  ;;  %v9967_v63 = vshll.u32 %v9966_v16, 16  ;;  %6815 = vmatmul.mubr.msk.bf16.gmra.mxu1 %vm645_vm7, %v6250_v0  ;;  %v5185_v34 = vshrl.u32 %v4876_v10, 16  ;;  %v9968_v2 = vld [vmem:[#allocation27_spill] sm:$0xff]  ;;  %v6925_v28 = vld [vmem:[#allocation3 + $0x28] sm:$0x1] }
 0x236   : > { %v4914_v62 = vsel %vm7690_vm10, %v4912_v5, %v9965_v32  ;;  %6833 = vmatmul.mubr.msk.bf16.gmra.mxu0 %vm645_vm7, %v6267_v33  ;;  %v6302_v50 = vcombine.low %v5150_v26, %v5160_v25  ;;  %v5168_v41 = vor.u32 %v5167_v54, %v5164_v47  ;;  %v5172_v1 = vor.u32 %v5171_v18, %v5170_v30  ;;  %v9152_v33 = vld [vmem:[#allocation3 + $0x50] sm:$0xe]  ;;  %v6926_v30 = vld [vmem:[#allocation3 + $0x40] sm:$0x1]  ;;  %v9167_v16 = vld [vmem:[#allocation3 + $0x58] sm:$0x3] }
 0x237   : > { %v6285_v40 = vcombine.low %v4911_v21, %v4914_v62  ;;  %v5181_v27 = vrot.slane %v9967_v63, 6  ;;  %v5188_v17 = vshll.u32 %v4876_v10, 16  ;;  %v5193_v43 = vrot.slane %v4580_v46, 5 }
 0x238   : > { %6856 = vmatprep.mubr.msk.bf16.mxu0 %vm645_vm7, %v6302_v50  ;;  %v5169_v45 = vrot.slane %v5168_v41, 4  ;;  %v5194_v42 = vrot.slane %v4576_v55, 6  ;;  %v5199_v4 = vshrl.u32 %v9131_v8, 16  ;;  %v5174_v22 = vrot.slane %v5172_v1, 4 }
 0x239   : > { %6838 = vmatprep.mubr.msk.bf16.mxu1 %vm645_vm7, %v6285_v40  ;;  %v5182_v51 = vor.u32 %v5181_v27, %v9968_v2  ;;  %v5187_v0 = vrot.slane %v5185_v34, 5  ;;  %v5190_v11 = vrot.slane %v5188_v17, 6  ;;  %v5202_v12 = vshll.u32 %v9131_v8, 16 }
 0x23a   : > { %v5173_v46 = vsel %vm7732_vm13, %v5169_v45, %v5172_v1  ;;  %v5195_v29 = vor.u32 %v5194_v42, %v5193_v43  ;;  %v5201_v52 = vrot.slane %v5199_v4, 5  ;;  %v6278_v15 = vrot.slane %v9100_v58, 9 }
 0x23b   : > { %v5183_v57 = vsel %vm7732_vm13, %v5174_v22, %v5182_v51  ;;  %v5191_v21 = vor.u32 %v5190_v11, %v5187_v0  ;;  %v5204_v5 = vrot.slane %v5202_v12, 6  ;;  %v4917_v55 = vrot.slane %v8962_v36, 5 }
 0x23c   : > { %v6303_v35 = vcombine.low %v5173_v46, %v5183_v57  ;;  %v5197_v59 = vrot.slane %v5195_v29, 4  ;;  %v4920_v25 = vrot.slane %v6925_v28, 5  ;;  %v5617_v47 = vsel %vm670_vm0, %v9022_v20, 0  ;;  %v9185_v46 = vld [vmem:[#allocation3 + $0x70] sm:$0x3] }
 0x23d   : > { %v5192_v54 = vrot.slane %v5191_v21, 4  ;;  %v5205_v26 = vor.u32 %v5204_v5, %v5201_v52  ;;  %v4918_v58 = vsel %vm7690_vm10, %v6278_v15, %v4917_v55  ;;  %v4919_v23 = vrot.slane %v4917_v55, 4 }
 0x23e   : > { %6857 = vmatmul.mubr.msk.bf16.vlgmr.msra.gmra.mxu0 %vm645_vm7, %v6303_v35  ;;  %v6279_v32 = vrot.slane %v4876_v10, 9  ;;  %v4924_v62 = vrot.slane %v8974_v61, 5  ;;  %v4927_v18 = vrot.slane %v6926_v30, 5  ;;  %v5208_v50 = vshrl.u32 %v9152_v33, 16  ;;  %v9170_v10 = vld [vmem:[#allocation3 + $0x68] sm:$0xe] }
 0x23f   : > { %v5196_v40 = vsel %vm7732_vm13, %v5192_v54, %v5195_v29  ;;  %v5206_v20 = vsel %vm7732_vm13, %v5197_v59, %v5205_v26  ;;  %v4921_v41 = vsel %vm7690_vm10, %v4919_v23, %v4920_v25  ;;  %v5211_v63 = vshll.u32 %v9152_v33, 16 }
 0x240   : > { %v6304_v27 = vcombine.low %v5196_v40, %v5206_v20  ;;  %v6286_v1 = vcombine.low %v4918_v58, %v4921_v41  ;;  %v4925_v34 = vsel %vm7690_vm10, %v6279_v32, %v4924_v62  ;;  %v4926_v17 = vrot.slane %v4924_v62, 4 }
 0x241   : > { %v5210_v43 = vrot.slane %v5208_v50, 5  ;;  %v5213_v45 = vrot.slane %v5211_v63, 6  ;;  %v5216_v2 = vrot.slane %v4604_v14, 5  ;;  %v5217_v51 = vrot.slane %v4600_v60, 6 }
 0x242   : > { %6860 = vmatprep.mubr.msk.bf16.mxu0 %vm645_vm7, %v6304_v27  ;;  %6839 = vmatmul.mubr.msk.bf16.vlgmr.msra.gmra.mxu1 %vm645_vm7, %v6286_v1  ;;  %v4928_v42 = vsel %vm7690_vm10, %v4926_v17, %v4927_v18  ;;  %v5222_v4 = vshrl.u32 %v9167_v16, 16  ;;  %v5225_v22 = vshll.u32 %v9167_v16, 16  ;;  %v5231_v0 = vshrl.u32 %v9170_v10, 16  ;;  %v9201_v18 = vld [vmem:[#allocation3 + $0x80] sm:$0xe] }
 0x243   : > { %6873 = vmatpush3.bf16.msra.mxu1 %v5617_v47  ;;  %v6287_v11 = vcombine.low %v4925_v34, %v4928_v42  ;;  %v5214_v12 = vor.u32 %v5213_v45, %v5210_v43  ;;  %v5218_v14 = vor.u32 %v5217_v51, %v5216_v2  ;;  %v5234_v60 = vshll.u32 %v9170_v10, 16  ;;  %v6928_v17 = vld [vmem:[#allocation3 + $0x70] sm:$0x1]  ;;  %v9210_v45 = vld [vmem:[#allocation3 + $0x88] sm:$0x3] }
 0x244   : > { %v5224_v29 = vrot.slane %v5222_v4, 5  ;;  %v5227_v52 = vrot.slane %v5225_v22, 6  ;;  %v5233_v15 = vrot.slane %v5231_v0, 5  ;;  %v5239_v57 = vrot.slane %v4628_v38, 5  ;;  %v9220_v0 = vld [vmem:[#allocation3 + $0x98] sm:$0xe] }
 0x245   : > { %6842 = vmatprep.mubr.msk.bf16.mxu1 %vm645_vm7, %v6287_v11  ;;  %v5215_v21 = vrot.slane %v5214_v12, 4  ;;  %v5220_v5 = vrot.slane %v5218_v14, 4  ;;  %v5236_v55 = vrot.slane %v5234_v60, 6  ;;  %v5240_v35 = vrot.slane %v4624_v56, 6  ;;  %v6927_v56 = vld [vmem:[#allocation3 + $0x58] sm:$0x1] }
 0x246   : > { %v5228_v59 = vor.u32 %v5227_v52, %v5224_v29  ;;  %v5245_v28 = vshrl.u32 %v9185_v46, 16  ;;  %v5248_v25 = vshll.u32 %v9185_v46, 16  ;;  %v6280_v47 = vrot.slane %v9152_v33, 9 }
 0x247   : > { %v5219_v54 = vsel %vm7732_vm13, %v5215_v21, %v5218_v14  ;;  %v5237_v26 = vor.u32 %v5236_v55, %v5233_v15  ;;  %v5241_v38 = vor.u32 %v5240_v35, %v5239_v57  ;;  %v4931_v58 = vrot.slane %v8988_v37, 5  ;;  %v9232_v35 = vld [vmem:[#allocation3 + $0xa0] sm:$0x3] }
 0x248   : > { %v5229_v23 = vsel %vm7732_vm13, %v5220_v5, %v5228_v59  ;;  %v5247_v32 = vrot.slane %v5245_v28, 5  ;;  %v5250_v62 = vrot.slane %v5248_v25, 6  ;;  %v4934_v30 = vrot.slane %v6927_v56, 5 }
 0x249   : > { %v6305_v50 = vcombine.low %v5219_v54, %v5229_v23  ;;  %v5238_v40 = vrot.slane %v5237_v26, 4  ;;  %v5243_v20 = vrot.slane %v5241_v38, 4  ;;  %v4932_v33 = vsel %vm7690_vm10, %v6280_v47, %v4931_v58 }
 0x24a   : > { %v5251_v41 = vor.u32 %v5250_v62, %v5247_v32  ;;  %v4933_v63 = vrot.slane %v4931_v58, 4  ;;  %v6281_v27 = vrot.slane %v9170_v10, 9  ;;  %v4938_v1 = vrot.slane %v9008_v19, 5 }
 0x24b   : > { %6861 = vmatmul.mubr.msk.bf16.gmra.mxu0 %vm645_vm7, %v6305_v50  ;;  %v5242_v34 = vsel %vm7732_vm13, %v5238_v40, %v5241_v38  ;;  %v4941_v43 = vrot.slane %v6928_v17, 5  ;;  %v5254_v2 = vshrl.u32 %v9201_v18, 16  ;;  %v5257_v51 = vshll.u32 %v9201_v18, 16 }
 0x24c   : > { %v5252_v42 = vsel %vm7732_vm13, %v5243_v20, %v5251_v41  ;;  %v4935_v10 = vsel %vm7690_vm10, %v4933_v63, %v4934_v30  ;;  %v4939_v4 = vsel %vm7690_vm10, %v6281_v27, %v4938_v1  ;;  %v4940_v22 = vrot.slane %v4938_v1, 4  ;;  %v4881_v41 = vld [vmem:[#allocation3 + $0xb0] sm:$0xe]  ;;  %v6929_v1 = vld [vmem:[#allocation3 + $0x88] sm:$0x1] }
 0x24d   : > { %v6306_v11 = vcombine.low %v5242_v34, %v5252_v42  ;;  %v6288_v12 = vcombine.low %v4932_v33, %v4935_v10  ;;  %v5256_v14 = vrot.slane %v5254_v2, 5  ;;  %v5259_v60 = vrot.slane %v5257_v51, 6 }
 0x24e   : > { %v4942_v29 = vsel %vm7690_vm10, %v4940_v22, %v4941_v43  ;;  %v5262_v52 = vrot.slane %v4652_v44, 5  ;;  %v5263_v15 = vrot.slane %v4648_v6, 6  ;;  %v5268_v57 = vshrl.u32 %v9210_v45, 16 }
 0x24f   : > { %6864 = vmatprep.mubr.msk.bf16.mxu0 %vm645_vm7, %v6306_v11  ;;  %6843 = vmatmul.mubr.msk.bf16.gmra.mxu1 %vm645_vm7, %v6288_v12  ;;  %v6289_v21 = vcombine.low %v4939_v4, %v4942_v29  ;;  %v5260_v5 = vor.u32 %v5259_v60, %v5256_v14  ;;  %v5271_v55 = vshll.u32 %v9210_v45, 16  ;;  %v5277_v59 = vshrl.u32 %v9220_v0, 16  ;;  %v6930_v4 = vld [vmem:[#allocation3 + $0xa0] sm:$0x1]  ;;  %v9256_v14 = vld [vmem:[#allocation3 + $0xb8] sm:$0x3] }
 0x250   : > { %v5264_v28 = vor.u32 %v5263_v15, %v5262_v52  ;;  %v5270_v25 = vrot.slane %v5268_v57, 5  ;;  %v5280_v44 = vshll.u32 %v9220_v0, 16  ;;  %v5285_v6 = vrot.slane %v4676_v7, 5 }
 0x251   : > { %6846 = vmatprep.mubr.msk.bf16.mxu1 %vm645_vm7, %v6289_v21  ;;  %v5261_v47 = vrot.slane %v5260_v5, 4  ;;  %v5273_v54 = vrot.slane %v5271_v55, 6  ;;  %v5279_v26 = vrot.slane %v5277_v59, 5  ;;  %v5286_v38 = vrot.slane %v4672_v39, 6 }
 0x252   : > { %v5266_v58 = vrot.slane %v5264_v28, 4  ;;  %v5282_v23 = vrot.slane %v5280_v44, 6  ;;  %v5291_v32 = vshrl.u32 %v9232_v35, 16  ;;  %v5294_v62 = vshll.u32 %v9232_v35, 16 }
 0x253   : > { %v5265_v56 = vsel %vm7732_vm13, %v5261_v47, %v5264_v28  ;;  %v5274_v30 = vor.u32 %v5273_v54, %v5270_v25  ;;  %v5287_v50 = vor.u32 %v5286_v38, %v5285_v6  ;;  %v4945_v33 = vrot.slane %v9037_v53, 5 }
 0x254   : > { %v5283_v7 = vor.u32 %v5282_v23, %v5279_v26  ;;  %v5293_v40 = vrot.slane %v5291_v32, 5  ;;  %v5296_v20 = vrot.slane %v5294_v62, 6  ;;  %v6282_v27 = vrot.slane %v9201_v18, 9  ;;  %v5486_v32 = vld [vmem:[#allocation3 + $0x8] sm:$0xc] }
 0x255   : > { %v5275_v39 = vsel %vm7732_vm13, %v5266_v58, %v5274_v30  ;;  %v5289_v63 = vrot.slane %v5287_v50, 4  ;;  %v4948_v34 = vrot.slane %v6929_v1, 5  ;;  %v6283_v51 = vrot.slane %v9220_v0, 9  ;;  %v6931_v58 = vld [vmem:[#allocation3 + $0xb8] sm:$0x1] }
 0x256   : > { %v6307_v17 = vcombine.low %v5265_v56, %v5275_v39  ;;  %v5284_v43 = vrot.slane %v5283_v7, 4  ;;  %v5297_v2 = vor.u32 %v5296_v20, %v5293_v40  ;;  %v4947_v42 = vrot.slane %v4945_v33, 4  ;;  %v6932_v20 = vld [vmem:[#allocation3 + $0x10] sm:$0x3] }
 0x257   : > { %v4952_v10 = vrot.slane %v9051_v48, 5  ;;  %v4955_v22 = vrot.slane %v6930_v4, 5  ;;  %v5300_v11 = vshrl.u32 %v4881_v41, 16  ;;  %v5303_v60 = vshll.u32 %v4881_v41, 16 }
 0x258   : > { %6865 = vmatmul.mubr.msk.bf16.gmra.mxu0 %vm645_vm7, %v6307_v17  ;;  %v5288_v12 = vsel %vm7732_vm13, %v5284_v43, %v5287_v50  ;;  %v5298_v18 = vsel %vm7732_vm13, %v5289_v63, %v5297_v2  ;;  %v5308_v0 = vrot.slane %v4700_v31, 5  ;;  %v4946_v52 = vsel %vm7690_vm10, %v6282_v27, %v4945_v33  ;;  %v6933_v2 = vld [vmem:[#allocation3 + $0x28] sm:$0x3] }
 0x259   : > { %v6308_v29 = vcombine.low %v5288_v12, %v5298_v18  ;;  %v4949_v15 = vsel %vm7690_vm10, %v4947_v42, %v4948_v34  ;;  %v4954_v57 = vrot.slane %v4952_v10, 4  ;;  %v5302_v5 = vrot.slane %v5300_v11, 5  ;;  %v5488_v12 = vld [vmem:[#allocation3 + $0x38] sm:$0xc] }
 0x25a   : > { %v6290_v21 = vcombine.low %v4946_v52, %v4949_v15  ;;  %v5305_v55 = vrot.slane %v5303_v60, 6  ;;  %v5309_v59 = vrot.slane %v4696_v49, 6  ;;  %v4953_v28 = vsel %vm7690_vm10, %v6283_v51, %v4952_v10 }
 0x25b   : > { %6868 = vmatprep.mubr.msk.bf16.mxu0 %vm645_vm7, %v6308_v29  ;;  %v4956_v31 = vsel %vm7690_vm10, %v4954_v57, %v4955_v22  ;;  %v5314_v25 = vshrl.u32 %v9256_v14, 16  ;;  %v5317_v44 = vshll.u32 %v9256_v14, 16  ;;  %v4959_v26 = vrot.slane %v9066_v3, 5 }
 0x25c   : > { %6847 = vmatmul.mubr.msk.bf16.gmra.mxu1 %vm645_vm7, %v6290_v21  ;;  %v6291_v6 = vcombine.low %v4953_v28, %v4956_v31  ;;  %v5306_v47 = vor.u32 %v5305_v55, %v5302_v5  ;;  %v5310_v54 = vor.u32 %v5309_v59, %v5308_v0  ;;  %v4962_v23 = vrot.slane %v6931_v58, 5 }
 0x25d   : > { %v5316_v49 = vrot.slane %v5314_v25, 5  ;;  %v5319_v38 = vrot.slane %v5317_v44, 6  ;;  %v6284_v56 = vrot.slane %v4881_v41, 9  ;;  %v4961_v30 = vrot.slane %v4959_v26, 4 }
 0x25e   : > { %6850 = vmatprep.mubr.msk.bf16.mxu1 %vm645_vm7, %v6291_v6  ;;  %v5312_v62 = vrot.slane %v5310_v54, 4  ;;  %v5307_v50 = vrot.slane %v5306_v47, 4  ;;  %v5514_v40 = vrot.slane %v8939_v13, 6  ;;  %v5517_v33 = vrot.slane %v6932_v20, 6 }
 0x25f   : > { %v5320_v7 = vor.u32 %v5319_v38, %v5316_v49  ;;  %v4963_v39 = vsel %vm7690_vm10, %v4961_v30, %v4962_v23  ;;  %v6319_v63 = vrot.slane %v5486_v32, 10  ;;  %v5521_v27 = vrot.slane %v8962_v36, 6 }
 0x260   : > { %v5311_v1 = vsel %vm7732_vm13, %v5307_v50, %v5310_v54  ;;  %v4960_v41 = vsel %vm7690_vm10, %v6284_v56, %v4959_v26  ;;  %v5516_v17 = vrot.slane %v5514_v40, 4  ;;  %v5524_v51 = vrot.slane %v6933_v2, 6 }
 0x261   : > { %v5321_v34 = vsel %vm7732_vm13, %v5312_v62, %v5320_v7  ;;  %v6292_v13 = vcombine.low %v4960_v41, %v4963_v39  ;;  %v5515_v10 = vsel %vm7109_vm8, %v6319_v63, %v5514_v40  ;;  %v5523_v4 = vrot.slane %v5521_v27, 4 }
 0x262   : > { %v6309_v43 = vcombine.low %v5311_v1, %v5321_v34  ;;  %v5518_v36 = vsel %vm7109_vm8, %v5516_v17, %v5517_v33  ;;  %v5528_v22 = vrot.slane %v8974_v61, 6  ;;  %v5531_v11 = vrot.slane %v9131_v8, 6 }
 0x263   : > { %v6327_v9 = vcombine.low %v5515_v10, %v5518_v36  ;;  %v6320_v60 = vrot.slane %v5487_v24, 10  ;;  %v5525_v0 = vsel %vm7109_vm8, %v5523_v4, %v5524_v51  ;;  %v5535_v29 = vrot.slane %v8988_v37, 6  ;;  %v5489_v37 = vld [vmem:[#allocation3 + $0x50] sm:$0xc] }
 0x264   : > { %6869 = vmatmul.mubr.msk.bf16.gmra.mxu0 %vm645_vm7, %v6309_v43  ;;  %6851 = vmatmul.mubr.msk.bf16.gmra.mxu1 %vm645_vm7, %v6292_v13  ;;  %v5530_v18 = vrot.slane %v5528_v22, 4  ;;  %v6321_v52 = vrot.slane %v5488_v12, 10  ;;  %v5542_v15 = vrot.slane %v9008_v19, 6  ;;  %v5538_v59 = vrot.slane %v9167_v16, 6  ;;  %v5490_v19 = vld [vmem:[#allocation3 + $0x68] sm:$0xc] }
 0x265   : > { %6874 = vmatprep.mubr.msk.bf16.mxu1 %vm645_vm7, %v6327_v9  ;;  %v5522_v57 = vsel %vm7109_vm8, %v6320_v60, %v5521_v27  ;;  %v5537_v55 = vrot.slane %v5535_v29, 4  ;;  %v5545_v31 = vrot.slane %v9185_v46, 6  ;;  %v6322_v25 = vrot.slane %v5489_v37, 10  ;;  %v5493_v27 = vld [vmem:[#allocation3 + $0xb0] sm:$0xc] }
 0x266   : > { %v5532_v61 = vsel %vm7109_vm8, %v5530_v18, %v5531_v11  ;;  %v6328_v8 = vcombine.low %v5522_v57, %v5525_v0  ;;  %v5529_v21 = vsel %vm7109_vm8, %v6321_v52, %v5528_v22  ;;  %v5544_v28 = vrot.slane %v5542_v15, 4 }
 0x267   : > { %v6329_v5 = vcombine.low %v5529_v21, %v5532_v61  ;;  %v5539_v44 = vsel %vm7109_vm8, %v5537_v55, %v5538_v59  ;;  %v5549_v6 = vrot.slane %v9037_v53, 6  ;;  %v6323_v47 = vrot.slane %v5490_v19, 10  ;;  %v5491_v53 = vld [vmem:[#allocation3 + $0x80] sm:$0xc] }
 0x268   : > { %v5546_v54 = vsel %vm7109_vm8, %v5544_v28, %v5545_v31  ;;  %v5556_v16 = vrot.slane %v9051_v48, 6  ;;  %v5536_v26 = vsel %vm7109_vm8, %v6322_v25, %v5535_v29  ;;  %v5552_v23 = vrot.slane %v9210_v45, 6  ;;  %v5492_v48 = vld [vmem:[#allocation3 + $0x98] sm:$0xc] }
 0x269   : > { %v6330_v49 = vcombine.low %v5536_v26, %v5539_v44  ;;  %v5543_v46 = vsel %vm7109_vm8, %v6323_v47, %v5542_v15  ;;  %v5551_v58 = vrot.slane %v5549_v6, 4  ;;  %v5559_v62 = vrot.slane %v9232_v35, 6 }
 0x26a   : > { %v6331_v38 = vcombine.low %v5543_v46, %v5546_v54  ;;  %v5558_v32 = vrot.slane %v5556_v16, 4  ;;  %v6324_v56 = vrot.slane %v5491_v53, 10  ;;  %v5563_v50 = vrot.slane %v9066_v3, 6 }
 0x26b   : > { %v5553_v30 = vsel %vm7109_vm8, %v5551_v58, %v5552_v23  ;;  %v6325_v7 = vrot.slane %v5492_v48, 10  ;;  %v5566_v63 = vrot.slane %v9256_v14, 6  ;;  %v6326_v3 = vrot.slane %v5493_v27, 10 }
 0x26c   : > { %6875 = vmatmul.mubr.msk.bf16.vlgmr.msra.gmra.mxu1 %vm645_vm7, %v6328_v8  ;;  %v5560_v40 = vsel %vm7109_vm8, %v5558_v32, %v5559_v62  ;;  %v5550_v45 = vsel %vm7109_vm8, %v6324_v56, %v5549_v6  ;;  %v5565_v39 = vrot.slane %v5563_v50, 4 }
 0x26d   : > { %6878 = vmatprep.mubr.msk.bf16.mxu1 %vm645_vm7, %v6329_v5  ;;  %v6332_v20 = vcombine.low %v5550_v45, %v5553_v30  ;;  %v5557_v35 = vsel %vm7109_vm8, %v6325_v7, %v5556_v16  ;;  %v5564_v34 = vsel %vm7109_vm8, %v6326_v3, %v5563_v50 }
 0x26e   : > { %v6333_v33 = vcombine.low %v5557_v35, %v5560_v40  ;;  %v5567_v1 = vsel %vm7109_vm8, %v5565_v39, %v5566_v63 }
 0x26f   : > { %v6334_v41 = vcombine.low %v5564_v34, %v5567_v1 }
 0x274   : > { %6879 = vmatmul.mubr.msk.bf16.gmra.mxu1 %vm645_vm7, %v6330_v49 }
 0x275   : > { %6882 = vmatprep.mubr.msk.bf16.mxu1 %vm645_vm7, %v6331_v38 }
 0x27c   : > { %6883 = vmatmul.mubr.msk.bf16.gmra.mxu1 %vm645_vm7, %v6332_v20 }
 0x27d   : > { %6886 = vmatprep.mubr.msk.bf16.mxu1 %vm645_vm7, %v6333_v33 }
 0x283   : > { %v6750_v17 = vpop.f32.mrf.mxu0 }
 0x284   : > { %6887 = vmatmul.mubr.msk.bf16.gmra.mxu1 %vm645_vm7, %v6334_v41 }
 0x285   : > { %v3699_v43 = vpop.f32.mrf.mxu0 }
 0x287   : > { %v6751_v13 = vpop.f32.mrf.mxu0 }
 0x289   : > { %v3702_v2 = vpop.f32.mrf.mxu0 }
 0x28f   : > { %v6732_v14 = vpop.f32.mrf.mxu1 }
 0x290   : > { %v3708_v51 = vadd.f32 %v6750_v17, %v6732_v14 }
 0x291   : > { %v3471_v10 = vpop.f32.mrf.mxu1 }
 0x292   : > { %v6754_v36 = vpop.f32.mrf.mxu0  ;;  %v3700_v4 = vadd.f32 %v3699_v43, %v3471_v10 }
 0x293   : > { %v6733_v22 = vpop.f32.mrf.mxu1 }
 0x294   : > { %v3715_v9 = vpop.f32.mrf.mxu0  ;;  %v3711_v24 = vadd.f32 %v6751_v13, %v6733_v22 }
 0x295   : > { %v3474_v11 = vpop.f32.mrf.mxu1 }
 0x296   : > { %v6755_v12 = vpop.f32.mrf.mxu0  ;;  %v3703_v18 = vadd.f32 %v3702_v2, %v3474_v11 }
 0x298   : > { %v3718_v42 = vpop.f32.mrf.mxu0 }
 0x29b   : > { %v6736_v60 = vpop.f32.mrf.mxu1 }
 0x29c   : > { %v3724_v0 = vadd.f32 %v6754_v36, %v6736_v60  ;;  %v6758_v29 = vpop.f32.mrf.mxu0 }
 0x29d   : > { %v3487_v52 = vpop.f32.mrf.mxu1 }
 0x29e   : > { %v3716_v61 = vadd.f32 %v3715_v9, %v3487_v52  ;;  %v3731_v15 = vpop.f32.mrf.mxu0 }
 0x29f   : > { %v6737_v57 = vpop.f32.mrf.mxu1 }
 0x2a0   : > { %v3727_v8 = vadd.f32 %v6755_v12, %v6737_v57  ;;  %v6759_v21 = vpop.f32.mrf.mxu0 }
 0x2a1   : > { %v3490_v5 = vpop.f32.mrf.mxu1 }
 0x2a2   : > { %v3719_v55 = vadd.f32 %v3718_v42, %v3490_v5  ;;  %v3734_v59 = vpop.f32.mrf.mxu0 }
 0x2a5   : > { %v6740_v37 = vpop.f32.mrf.mxu1 }
 0x2a6   : > { %v3740_v28 = vadd.f32 %v6758_v29, %v6740_v37  ;;  %v6762_v31 = vpop.f32.mrf.mxu0 }
 0x2a7   : > { %v3503_v19 = vpop.f32.mrf.mxu1 }
 0x2a8   : > { %v3732_v25 = vadd.f32 %v3731_v15, %v3503_v19  ;;  %v3747_v6 = vpop.f32.mrf.mxu0 }
 0x2a9   : > { %v6741_v44 = vpop.f32.mrf.mxu1 }
 0x2aa   : > { %v3743_v47 = vadd.f32 %v6759_v21, %v6741_v44  ;;  %v6763_v26 = vpop.f32.mrf.mxu0 }
 0x2ab   : > { %v3506_v54 = vpop.f32.mrf.mxu1 }
 0x2ac   : > { %v3735_v16 = vadd.f32 %v3734_v59, %v3506_v54  ;;  %v3750_v46 = vpop.f32.mrf.mxu0 }
 0x2b1   : > { %v6744_v49 = vpop.f32.mrf.mxu1 }
 0x2b2   : > { %v3756_v38 = vadd.f32 %v6762_v31, %v6744_v49 }
 0x2b3   : > { %v3519_v58 = vpop.f32.mrf.mxu1 }
 0x2b4   : > { %v3748_v23 = vadd.f32 %v3747_v6, %v3519_v58 }
 0x2b5   : > { %v6745_v53 = vpop.f32.mrf.mxu1 }
 0x2b6   : > { %v9340_v32 = vpop.f32.mrf.mxu0  ;;  %v3759_v62 = vadd.f32 %v6763_v26, %v6745_v53 }
 0x2b7   : > { %v3522_v48 = vpop.f32.mrf.mxu1 }
 0x2b8   : > { %v9342_v56 = vpop.f32.mrf.mxu0  ;;  %v3751_v30 = vadd.f32 %v3750_v46, %v3522_v48 }
 0x2ba   : > { %v6768_v50 = vpop.f32.mrf.mxu1  ;;  %v9344_v7 = vpop.f32.mrf.mxu0 }
 0x2bb   : > { %v9346_v40 = vadd.f32 %v6768_v50, %v3708_v51 }
 0x2bc   : > { %v3929_v45 = vpop.f32.mrf.mxu1  ;;  %v9348_v20 = vpop.f32.mrf.mxu0 }
 0x2bd   : > { %v9350_v35 = vadd.f32 %v3929_v45, %v3700_v4 }
 0x2be   : > { %v6769_v33 = vpop.f32.mrf.mxu1 }
 0x2bf   : > { %v9352_v39 = vadd.f32 %v6769_v33, %v3711_v24 }
 0x2c0   : > { %v9354_v63 = vpop.f32.mrf.mxu0  ;;  %v3932_v27 = vpop.f32.mrf.mxu1 }
 0x2c1   : > { %v9356_v3 = vadd.f32 %v3932_v27, %v3703_v18 }
 0x2c2   : > { %v9358_v1 = vpop.f32.mrf.mxu0 }
 0x2c3   : > { %v6772_v34 = vpop.f32.mrf.mxu1 }
 0x2c4   : > { %v9360_v41 = vadd.f32 %v6772_v34, %v3724_v0  ;;  %v9362_v17 = vpop.f32.mrf.mxu0 }
 0x2c5   : > { %v3945_v43 = vpop.f32.mrf.mxu1 }
 0x2c6   : > { %v9364_v13 = vadd.f32 %v3945_v43, %v3716_v61  ;;  %v9366_v2 = vpop.f32.mrf.mxu0 }
 0x2c7   : > { %v6773_v14 = vpop.f32.mrf.mxu1 }
 0x2c8   : > { %v9368_v51 = vadd.f32 %v6773_v14, %v3727_v8 }
 0x2c9   : > { %v3948_v36 = vpop.f32.mrf.mxu1 }
 0x2ca   : > { %v9370_v10 = vpop.f32.mrf.mxu0  ;;  %v9372_v4 = vadd.f32 %v3948_v36, %v3719_v55 }
 0x2cc   : > { %v9374_v22 = vpop.f32.mrf.mxu0  ;;  %v6776_v9 = vpop.f32.mrf.mxu1 }
 0x2cd   : > { %v9376_v24 = vadd.f32 %v6776_v9, %v3740_v28 }
 0x2ce   : > { %v9378_v11 = vpop.f32.mrf.mxu0  ;;  %v3961_v12 = vpop.f32.mrf.mxu1 }
 0x2cf   : > { %v9380_v18 = vadd.f32 %v3961_v12, %v3732_v25 }
 0x2d0   : > { %v9382_v42 = vpop.f32.mrf.mxu0  ;;  %v6777_v60 = vpop.f32.mrf.mxu1 }
 0x2d1   : > { %v9384_v0 = vadd.f32 %v6777_v60, %v3743_v47 }
 0x2d2   : > { %v3964_v52 = vpop.f32.mrf.mxu1 }
 0x2d3   : > { %v9386_v29 = vpop.f32.mrf.mxu0  ;;  %v9388_v61 = vadd.f32 %v3964_v52, %v3735_v16 }
 0x2d5   : > { %v9390_v15 = vpop.f32.mrf.mxu0  ;;  %v6780_v57 = vpop.f32.mrf.mxu1 }
 0x2d6   : > { %v9392_v8 = vadd.f32 %v6780_v57, %v3756_v38 }
 0x2d7   : > { %v9394_v21 = vpop.f32.mrf.mxu0  ;;  %v3977_v5 = vpop.f32.mrf.mxu1 }
 0x2d8   : > { %v9396_v55 = vadd.f32 %v3977_v5, %v3748_v23 }
 0x2d9   : > { %v9398_v59 = vpop.f32.mrf.mxu0  ;;  %v6781_v37 = vpop.f32.mrf.mxu1 }
 0x2da   : > { %v9400_v28 = vadd.f32 %v6781_v37, %v3759_v62 }
 0x2db   : > { %v3980_v31 = vpop.f32.mrf.mxu1 }
 0x2dc   : > { %v9404_v25 = vadd.f32 %v3980_v31, %v3751_v30 }
 0x2dd   : > { %v6804_v44 = vpop.f32.mrf.mxu1 }
 0x2de   : > { %v9402_v19 = vpop.f32.mrf.mxu0 }
 0x2df   : > { %v9408_v47 = vpop.f32.mrf.mxu1 }
 0x2e0   : > { %v9406_v6 = vpop.f32.mrf.mxu0 }
 0x2e1   : > { %v9412_v16 = vpop.f32.mrf.mxu1 }
 0x2e2   : > { %v9410_v54 = vpop.f32.mrf.mxu0 }
 0x2e3   : > { %v9416_v49 = vpop.f32.mrf.mxu1 }
 0x2e4   : > { %v9414_v26 = vpop.f32.mrf.mxu0 }
 0x2e5   : > { %v9420_v38 = vpop.f32.mrf.mxu1 }
 0x2e6   : > { %v9418_v46 = vpop.f32.mrf.mxu0 }
 0x2e7   : > { %9970 = vst [vmem:[#allocation25_spill] sm:$0xff] %v9418_v46  ;;  %v9424_v23 = vpop.f32.mrf.mxu1 }
 0x2e8   : > { %v9422_v58 = vpop.f32.mrf.mxu0 }
 0x2e9   : > { %9971 = vst [vmem:[#allocation28_spill] sm:$0xff] %v9422_v58  ;;  %v9428_v62 = vpop.f32.mrf.mxu1  ;;  %v4302_v58 = vadd.f32 %v9342_v56, %v9350_v35  ;;  %v4305_v35 = vadd.f32 %v9344_v7, %v9352_v39  ;;  %v4309_v39 = vadd.f32 %v9362_v17, %v9368_v51  ;;  %v4311_v17 = vadd.f32 %v9382_v42, %v9388_v61 }
 0x2ea   : > { %v9426_v53 = vpop.f32.mrf.mxu0  ;;  %v4314_v42 = vadd.f32 %v9390_v15, %v9396_v55 }
 0x2eb   : > { %9972 = vst [vmem:[#allocation30_spill] sm:$0xff] %v9426_v53  ;;  %v9432_v30 = vpop.f32.mrf.mxu1  ;;  %v9493_v53 = vld [vmem:[%s7032_s15 + $0x8] sm:$0xff]   ;;  %v4476_v56 = vadd.f32 %v9408_v47, %v4302_v58  ;;  %v4479_v7 = vadd.f32 %v9412_v16, %v4305_v35  ;;  %v4310_v58 = vadd.f32 %v9374_v22, %v9380_v18  ;;  %v4313_v16 = vadd.f32 %v9378_v11, %v9384_v0 }
 0x2ec   : > { %v9430_v48 = vpop.f32.mrf.mxu0  ;;  %v4483_v22 = vadd.f32 %v9428_v62, %v4309_v39 }
 0x2ed   : > { %9973 = vst [vmem:[#allocation29_spill] sm:$0xff] %v9430_v48  ;;  %v9436_v45 = vpop.f32.mrf.mxu1  ;;  %v4858_v51 = vadd.f32 %v9406_v6, %v4476_v56  ;;  %v4861_v61 = vadd.f32 %v9410_v54, %v4479_v7 }
 0x2ee   : > { %v9434_v50 = vpop.f32.mrf.mxu0 }
 0x2ef   : > { %9974 = vst [vmem:[#allocation33_spill] sm:$0xff] %v9434_v50  ;;  %v9440_v27 = vpop.f32.mrf.mxu1 }
 0x2f0   : > { %v9438_v33 = vpop.f32.mrf.mxu0  ;;  %v4484_v6 = vadd.f32 %v9440_v27, %v4310_v58 }
 0x2f1   : > { %9975 = vst [vmem:[#allocation31_spill] sm:$0xff] %v9438_v33  ;;  %v9444_v43 = vpop.f32.mrf.mxu1 }
 0x2f2   : > { %v9442_v34 = vpop.f32.mrf.mxu0 }
 0x2f3   : > { %9976 = vst [vmem:[#allocation32_spill] sm:$0xff] %v9442_v34  ;;  %v9446_v14 = vpop.f32.mrf.mxu1 }
 0x2f4   : > { %9977 = vst [vmem:[#allocation34_spill] sm:$0xff] %v9446_v14  ;;  %v9448_v36 = vpop.f32.mrf.mxu0  ;;  %v9518_v14 = vld [vmem:[%s7032_s15 + $0x28] sm:$0xff]  }
 0x2f5   : > { %9978 = vst [vmem:[#allocation35_spill] sm:$0xff] %v9448_v36  ;;  %v9450_v9 = vpop.f32.mrf.mxu1  ;;  %v6388_v47 = vunpack.c.h.bf16 %v9518_v14 }
 0x2f6   : > { %9979 = vst [vmem:[#allocation36_spill] sm:$0xff] %v9450_v9  ;;  %v9454_v60 = vpop.f32.mrf.mxu0 }
 0x2f7   : > { %v9452_v12 = vpop.f32.mrf.mxu1  ;;  %9981 = vst [vmem:[#allocation40_spill] sm:$0xff] %v9454_v60 }
 0x2f8   : > { %9980 = vst [vmem:[#allocation38_spill] sm:$0xff] %v9452_v12  ;;  %v9460_v5 = vpop.f32.mrf.mxu0 }
 0x2f9   : > { %v9456_v52 = vpop.f32.mrf.mxu1  ;;  %9984 = vst [vmem:[#allocation41_spill] sm:$0xff] %v9460_v5 }
 0x2fa   : > { %9982 = vst [vmem:[#allocation37_spill] sm:$0xff] %v9456_v52  ;;  %v9462_v31 = vpop.f32.mrf.mxu0 }
 0x2fb   : > { %v9458_v57 = vpop.f32.mrf.mxu1  ;;  %9985 = vst [vmem:[#allocation42_spill] sm:$0xff] %v9462_v31  ;;  %v10000_v62 = vld [vmem:[#allocation34_spill] sm:$0xff] }
 0x2fc   : > { %9983 = vst [vmem:[#allocation39_spill] sm:$0xff] %v9458_v57  ;;  %v9466_v36 = vpop.f32.mrf.mxu0 }
 0x2fd   : > { %9986 = vst [vmem:[#allocation5_spill] sm:$0xff] %v9466_v36 }
 0x2fe   : > { %v9470_v50 = vpop.f32.mrf.mxu0 }
 0x300   : > { %v9474_v57 = vpop.f32.mrf.mxu0 }
 0x301   : > { %9988 = vst [vmem:[#allocation49_spill] sm:$0xff] %v9474_v57 }
 0x302   : > { %v6840_v37 = vpop.f32.mrf.mxu1  ;;  %v9480_v31 = vpop.f32.mrf.mxu0 }
 0x303   : > { %9991 = vst [vmem:[#allocation13_spill] sm:$0xff] %v9480_v31 }
 0x304   : > { %v9464_v34 = vpop.f32.mrf.mxu1  ;;  %v9484_v9 = vpop.f32.mrf.mxu0 }
 0x305   : > { %9993 = vst [vmem:[#allocation47_spill] sm:$0xff] %v9484_v9  ;;  %v9505_v9 = vld [vmem:[%s7032_s15 + $0x18] sm:$0xff]   ;;  %v5112_v0 = vadd.f32 %v9464_v34, %v4858_v51  ;;  %v10003_v34 = vld [vmem:[#allocation30_spill] sm:$0xff] }
 0x306   : > { %v9468_v33 = vpop.f32.mrf.mxu1 }
 0x307   : > { %v5115_v15 = vadd.f32 %v9468_v33, %v4861_v61 }
 0x308   : > { %v9472_v60 = vpop.f32.mrf.mxu1 }
 0x309   : > { %9987 = vst [vmem:[#allocation45_spill] sm:$0xff] %v9472_v60 }
 0x30b   : > { %v9488_v48 = vpop.f32.mrf.mxu0 }
 0x30c   : > { %9995 = vst [vmem:[#allocation7_spill] sm:$0xff] %v9488_v48  ;;  %v6387_v48 = vunpack.c.l.bf16 %v9518_v14 }
 0x30f   : > { %v9476_v5 = vpop.f32.mrf.mxu1 }
 0x310   : > { %9989 = vst [vmem:[#allocation46_spill] sm:$0xff] %v9476_v5  ;;  %v9498_v5 = vld [vmem:[%s7032_s15] sm:$0xff]  }
 0x311   : > { %v9478_v52 = vpop.f32.mrf.mxu1 }
 0x312   : > { %9990 = vst [vmem:[#allocation43_spill] sm:$0xff] %v9478_v52  ;;  %v4304_v52 = vadd.f32 %v9340_v32, %v9346_v40  ;;  %v9521_v32 = vld [vmem:[%s7032_s15 + $0x20] sm:$0xff]  }
 0x313   : > { %v9482_v12 = vpop.f32.mrf.mxu1 }
 0x314   : > { %9992 = vst [vmem:[#allocation11_spill] sm:$0xff] %v9482_v12  ;;  %v9502_v12 = vpop.f32.mrf.mxu0 }
 0x315   : > { %v9486_v36 = vpop.f32.mrf.mxu1  ;;  %9998 = vst [vmem:[#allocation6_spill] sm:$0xff] %v9502_v12  ;;  %v4308_v12 = vadd.f32 %v9354_v63, %v9360_v41  ;;  %v4307_v63 = vadd.f32 %v9366_v2, %v9372_v4  ;;  %v4312_v41 = vadd.f32 %v9370_v10, %v9376_v24  ;;  %v4316_v24 = vadd.f32 %v9386_v29, %v9392_v8 }
 0x316   : > { %9994 = vst [vmem:[#allocation48_spill] sm:$0xff] %v9486_v36  ;;  %v9508_v36 = vld [vmem:[%s7032_s15 + $0x10] sm:$0xff]   ;;  %v9534_v46 = vpop.f32.mrf.mxu0  ;;  %v4315_v29 = vadd.f32 %v9398_v59, %v9404_v25  ;;  %v4865_v59 = vadd.f32 %v10003_v34, %v4483_v22  ;;  %v9599_v25 = vld [vmem:[%s9755_s5] ss:$0 sm:$0xff]  ;;  %v10012_v22 = vld [vmem:[#allocation13_spill] sm:$0xff] }
 0x317   : > { %v4482_v10 = vadd.f32 %v9420_v38, %v4308_v12  ;;  %v4481_v18 = vadd.f32 %v9432_v30, %v4307_v63  ;;  %v4487_v38 = vadd.f32 %v9444_v43, %v4313_v16  ;;  %v4485_v30 = vadd.f32 %v10000_v62, %v4311_v17  ;;  %v10004_v43 = vld [vmem:[#allocation45_spill] sm:$0xff]  ;;  %v9611_v16 = vld [vmem:[%s9756_s6] ss:$0 sm:$0xff]  ;;  %v10017_v34 = vld [vmem:[#allocation47_spill] sm:$0xff] }
 0x318   : > { %v9564_v2 = vpop.f32.mrf.mxu0  ;;  %v10005_v12 = vld [vmem:[#allocation29_spill] sm:$0xff] }
 0x31c   : > { %v9490_v60 = vpop.f32.mrf.mxu1 }
 0x31d   : > { %9996 = vst [vmem:[#allocation17_spill] sm:$0xff] %v9490_v60  ;;  %v4478_v60 = vadd.f32 %v6804_v44, %v4304_v52  ;;  %v4303_v52 = vadd.f32 %v9348_v20, %v9356_v3  ;;  %v6383_v44 = vunpack.c.l.bf16 %v9521_v32  ;;  %v4306_v20 = vadd.f32 %v9358_v1, %v9364_v13 }
 0x31e   : > { %v9495_v57 = vpop.f32.mrf.mxu1 }
 0x31f   : > { %9997 = vst [vmem:[#allocation44_spill] sm:$0xff] %v9495_v57  ;;  %v6376_v57 = vunpack.c.h.bf16 %v9508_v36  ;;  %v4860_v3 = vadd.f32 %v9402_v19, %v4478_v60  ;;  %v4477_v1 = vadd.f32 %v9416_v49, %v4303_v52  ;;  %v4480_v4 = vadd.f32 %v9424_v23, %v4306_v20  ;;  %v9589_v23 = vpop.f32.mrf.mxu0  ;;  %v10007_v52 = vld [vmem:[#allocation36_spill] sm:$0xff]  ;;  %v10008_v20 = vld [vmem:[#allocation38_spill] sm:$0xff] }
 0x320   : > { %v9510_v31 = vpop.f32.mrf.mxu1  ;;  %v4486_v19 = vadd.f32 %v9436_v45, %v4312_v41  ;;  %v4317_v49 = vadd.f32 %v9394_v21, %v9400_v28  ;;  %v10001_v45 = vld [vmem:[#allocation25_spill] sm:$0xff]  ;;  %v10002_v21 = vld [vmem:[#allocation28_spill] sm:$0xff]  ;;  %v4863_v60 = vadd.f32 %v10005_v12, %v4481_v18  ;;  %v4490_v7 = vadd.f32 %v10007_v52, %v4316_v24  ;;  %v10010_v41 = vld [vmem:[#allocation31_spill] sm:$0xff] }
 0x321   : > { %9999 = vst [vmem:[#allocation15_spill] sm:$0xff] %v9510_v31  ;;  %v5114_v13 = vadd.f32 %v6840_v37, %v4860_v3  ;;  %v4859_v55 = vadd.f32 %v9414_v26, %v4477_v1  ;;  %v4864_v27 = vadd.f32 %v10001_v45, %v4482_v10  ;;  %v4862_v28 = vadd.f32 %v10002_v21, %v4480_v4  ;;  %v10009_v3 = vld [vmem:[#allocation33_spill] sm:$0xff]  ;;  %v9613_v17 = vpop.f32.mrf.mxu0 }
 0x322   : > { %v9523_v40 = vpop.f32.mrf.mxu1  ;;  %v4488_v39 = vadd.f32 %v10008_v20, %v4314_v42  ;;  %v4868_v63 = vadd.f32 %v10009_v3, %v4486_v19  ;;  %v4866_v58 = vadd.f32 %v10010_v41, %v4484_v6  ;;  %v5473_v24 = vadd.f32 %v10012_v22, %v5115_v15  ;;  %v10013_v18 = vld [vmem:[#allocation37_spill] sm:$0xff]  ;;  %v10015_v19 = vld [vmem:[#allocation46_spill] sm:$0xff]  ;;  %v10019_v15 = vld [vmem:[#allocation11_spill] sm:$0xff] }
 0x323   : > { %v5472_v54 = vadd.f32 %v9470_v50, %v5114_v13  ;;  %v5113_v26 = vadd.f32 %v10004_v43, %v4859_v55  ;;  %v10006_v50 = vld [vmem:[#allocation49_spill] sm:$0xff]  ;;  %v10011_v13 = vld [vmem:[#allocation32_spill] sm:$0xff]  ;;  %v4491_v42 = vadd.f32 %v10013_v18, %v4317_v49  ;;  %v5118_v6 = vadd.f32 %v10015_v19, %v4864_v27  ;;  %v10016_v55 = vld [vmem:[#allocation35_spill] sm:$0xff]  ;;  %v6867_v52 = vpop.f32.mrf.mxu0 }
 0x324   : > { %v9539_v31 = vpop.f32.mrf.mxu1  ;;  %v5470_v56 = vadd.f32 %v10006_v50, %v5112_v0  ;;  %v4869_v51 = vadd.f32 %v10011_v13, %v4487_v38  ;;  %v10014_v0 = vld [vmem:[#allocation39_spill] sm:$0xff]  ;;  %v10020_v50 = vld [vmem:[#allocation40_spill] sm:$0xff]  ;;  %v10023_v13 = vld [vmem:[#allocation42_spill] sm:$0xff]  ;;  %v10026_v22 = vunpack.c.l.bf16 %v9493_v53 }
 0x325   : > { %v4489_v61 = vadd.f32 %v10014_v0, %v4315_v29  ;;  %v10018_v43 = vld [vmem:[#allocation43_spill] sm:$0xff]  ;;  %v4872_v49 = vadd.f32 %v10020_v50, %v4490_v7 }
 0x326   : > { %v9558_v35 = vpop.f32.mrf.mxu1  ;;  %v5116_v12 = vadd.f32 %v10018_v43, %v4862_v28  ;;  %v9636_v28 = vadd.f32 %v10023_v13, %v4491_v42  ;;  %v10025_v7 = vld [vmem:[#allocation7_spill] sm:$0xff]  ;;  %v10028_v42 = vld [vmem:[#allocation6_spill] sm:$0xff] }
 0x328   : > { %v9571_v11 = vpop.f32.mrf.mxu1 }
 0x32a   : > { %v9584_v8 = vpop.f32.mrf.mxu1 }
 0x32c   : > { %v6876_v33 = vpop.f32.mrf.mxu1 }
 0x32d   : > { %v5718_v37 = vadd.f32 %v6876_v33, %v5472_v54  ;;  %v4867_v54 = vadd.f32 %v10016_v55, %v4485_v30  ;;  %v5471_v33 = vadd.f32 %v10017_v34, %v5113_v26  ;;  %v10027_v55 = vld [vmem:[#allocation17_spill] sm:$0xff]  ;;  %v10029_v34 = vunpack.c.l.bf16 %v9498_v5 }
 0x32e   : > { %v5653_v1 = vpop.f32.mrf.mxu1 }
 0x32f   : > { %v5740_v10 = vmul.f32 %v9599_v25, %v5718_v37  ;;  %v5716_v4 = vadd.f32 %v5653_v1, %v5470_v56  ;;  %v5119_v37 = vadd.f32 %v10019_v15, %v4865_v59  ;;  %v10021_v56 = vld [vmem:[#allocation41_spill] sm:$0xff]  ;;  %v10022_v1 = vld [vmem:[#allocation48_spill] sm:$0xff] }
 0x330   : > { %v6877_v62 = vpop.f32.mrf.mxu1  ;;  %v9629_v29 = vadd.f32 %v10021_v56, %v4488_v39  ;;  %v5117_v26 = vadd.f32 %v10022_v1, %v4863_v60  ;;  %v10024_v59 = vld [vmem:[#allocation5_spill] sm:$0xff]  ;;  %v5476_v39 = vadd.f32 %v10025_v7, %v5118_v6  ;;  %v10030_v15 = vld [vmem:[#allocation44_spill] sm:$0xff]  ;;  %v10032_v1 = vld [vmem:[#allocation15_spill] sm:$0xff] }
 0x331   : > { %v5762_v45 = vadd.f32 %v9611_v16, %v5740_v10  ;;  %v5738_v21 = vmul.f32 %v9599_v25, %v5716_v4  ;;  %v5719_v38 = vadd.f32 %v6877_v62, %v5473_v24  ;;  %v9639_v10 = vadd.f32 %v10024_v59, %v4489_v61 }
 0x332   : > { %v5656_v27 = vpop.f32.mrf.mxu1  ;;  %v5122_v62 = vadd.f32 %v10027_v55, %v4868_v63  ;;  %v5474_v61 = vadd.f32 %v10028_v42, %v5116_v12  ;;  %v5120_v50 = vadd.f32 %v10030_v15, %v4866_v58  ;;  %v5475_v12 = vadd.f32 %v9564_v2, %v5117_v26 }
 0x333   : > { %v5778_v30 = vmax.f32 %v5762_v45, 0.0  ;;  %v5760_v20 = vadd.f32 %v9611_v16, %v5738_v21  ;;  %v5741_v3 = vmul.f32 %v9599_v25, %v5719_v38  ;;  %v5717_v41 = vadd.f32 %v5656_v27, %v5471_v33  ;;  %v5442_v21 = vpop.f32.mrf.mxu0 }
 0x334   : > { %v6880_v4 = vpop.f32.mrf.mxu1  ;;  %v5477_v45 = vadd.f32 %v9534_v46, %v5119_v37  ;;  %v10031_v37 = vunpack.c.h.bf16 %v9493_v53  ;;  %v5123_v13 = vadd.f32 %v10032_v1, %v4869_v51  ;;  %v10033_v26 = vunpack.c.h.bf16 %v9498_v5 }
 0x335   : > { %v5826_v24 = vadd.f32 %v10026_v22, %v5778_v30  ;;  %v5776_v18 = vmax.f32 %v5760_v20, 0.0  ;;  %v5763_v0 = vadd.f32 %v9611_v16, %v5741_v3  ;;  %v5739_v19 = vmul.f32 %v9599_v25, %v5717_v41 }
 0x336   : > { %v5722_v60 = vadd.f32 %v6880_v4, %v5476_v39  ;;  %v5669_v6 = vpop.f32.mrf.mxu1  ;;  %v5480_v39 = vadd.f32 %v9589_v23, %v5122_v62  ;;  %v6870_v4 = vpop.f32.mrf.mxu0  ;;  %v5121_v51 = vadd.f32 %v9523_v40, %v4867_v54  ;;  %v5478_v55 = vadd.f32 %v9613_v17, %v5120_v50 }
 0x337   : > { %v5842_v38 = vmax.f32 %v5826_v24, 0.0  ;;  %v5824_v33 = vadd.f32 %v10029_v34, %v5776_v18  ;;  %v5779_v43 = vmax.f32 %v5763_v0, 0.0  ;;  %v5761_v63 = vadd.f32 %v9611_v16, %v5739_v19 }
 0x338   : > { %v5744_v56 = vmul.f32 %v9599_v25, %v5722_v60  ;;  %v5720_v27 = vadd.f32 %v5669_v6, %v5474_v61  ;;  %v6881_v30 = vpop.f32.mrf.mxu1  ;;  %v5126_v42 = vadd.f32 %v9539_v31, %v4872_v49  ;;  %v10034_v61 = vunpack.c.l.bf16 %v9505_v9 }
 0x339   : > { %5858 = vst.msk [vmem:[%s9650_s13 + $0x10] sm:$0xff] %vm645_vm7, %v5842_v38  ;;  %v5840_v46 = vmax.f32 %v5824_v33, 0.0  ;;  %v5827_v20 = vadd.f32 %v10031_v37, %v5779_v43  ;;  %v5777_v3 = vmax.f32 %v5761_v63, 0.0  ;;  %v5723_v41 = vadd.f32 %v6881_v30, %v5477_v45  ;;  %v5455_v38 = vpop.f32.mrf.mxu0 }
 0x33a   : > { %v5766_v58 = vadd.f32 %v9611_v16, %v5744_v56  ;;  %v5742_v59 = vmul.f32 %v9599_v25, %v5720_v27  ;;  %v5672_v7 = vpop.f32.mrf.mxu1  ;;  %v5481_v45 = vadd.f32 %v6867_v52, %v5123_v13  ;;  %v5124_v63 = vadd.f32 %v9558_v35, %v9629_v29 }
 0x33b   : > { %5856 = vst.msk [vmem:[%s9650_s13] sm:$0xff] %vm645_vm7, %v5840_v46  ;;  %v5843_v2 = vmax.f32 %v5827_v20, 0.0  ;;  %v5825_v53 = vadd.f32 %v10033_v26, %v5777_v3  ;;  %v5745_v22 = vmul.f32 %v9599_v25, %v5723_v41  ;;  %v5721_v24 = vadd.f32 %v5672_v7, %v5475_v12 }
 0x33c   : > { %v5782_v18 = vmax.f32 %v5766_v58, 0.0  ;;  %v5764_v0 = vadd.f32 %v9611_v16, %v5742_v59  ;;  %v6884_v19 = vpop.f32.mrf.mxu1  ;;  %v10035_v49 = vunpack.c.l.bf16 %v9508_v36  ;;  %v5479_v56 = vadd.f32 %v5442_v21, %v5121_v51  ;;  %v6871_v21 = vpop.f32.mrf.mxu0 }
 0x33d   : > { %5859 = vst.msk [vmem:[%s9650_s13 + $0x18] sm:$0xff] %vm645_vm7, %v5843_v2  ;;  %v5841_v23 = vmax.f32 %v5825_v53, 0.0  ;;  %v5767_v62 = vadd.f32 %v9611_v16, %v5745_v22  ;;  %v5743_v5 = vmul.f32 %v9599_v25, %v5721_v24  ;;  %v5726_v60 = vadd.f32 %v6884_v19, %v5480_v39  ;;  %v6403_v2 = vld [vmem:[%s7032_s15 + $0x38] sm:$0xff]   ;;  %v6402_v19 = vld [vmem:[%s7032_s15 + $0x30] sm:$0xff]  }
 0x33e   : > { %v5830_v40 = vadd.f32 %v10034_v61, %v5782_v18  ;;  %v5780_v54 = vmax.f32 %v5764_v0, 0.0  ;;  %v5685_v6 = vpop.f32.mrf.mxu1  ;;  %v10036_v52 = vunpack.c.h.bf16 %v9505_v9  ;;  %v5127_v37 = vadd.f32 %v9571_v11, %v9636_v28  ;;  %v5458_v24 = vpop.f32.mrf.mxu0 }
 0x33f   : > { %5857 = vst.msk [vmem:[%s9650_s13 + $0x8] sm:$0xff] %vm645_vm7, %v5841_v23  ;;  %v5783_v17 = vmax.f32 %v5767_v62, 0.0  ;;  %v5765_v34 = vadd.f32 %v9611_v16, %v5743_v5  ;;  %v5748_v33 = vmul.f32 %v9599_v25, %v5726_v60  ;;  %v5724_v43 = vadd.f32 %v5685_v6, %v5478_v55 }
 0x340   : > { %v5846_v31 = vmax.f32 %v5830_v40, 0.0  ;;  %v5828_v15 = vadd.f32 %v10035_v49, %v5780_v54  ;;  %v6885_v50 = vpop.f32.mrf.mxu1  ;;  %v5484_v3 = vadd.f32 %v6870_v4, %v5126_v42  ;;  %v5125_v58 = vadd.f32 %v9584_v8, %v9639_v10 }
 0x341   : > { %v5831_v27 = vadd.f32 %v10036_v52, %v5783_v17  ;;  %v5781_v30 = vmax.f32 %v5765_v34, 0.0  ;;  %v5770_v12 = vadd.f32 %v9611_v16, %v5748_v33  ;;  %v5746_v46 = vmul.f32 %v9599_v25, %v5724_v43 }
 0x342   : > { %5862 = vst.msk [vmem:[%s9650_s13 + $0x30] sm:$0xff] %vm645_vm7, %v5846_v31  ;;  %v5844_v35 = vmax.f32 %v5828_v15, 0.0  ;;  %v5727_v29 = vadd.f32 %v6885_v50, %v5481_v45  ;;  %v5688_v20 = vpop.f32.mrf.mxu1  ;;  %v5482_v7 = vadd.f32 %v5455_v38, %v5124_v63  ;;  %v6384_v26 = vunpack.c.h.bf16 %v9521_v32 }
 0x343   : > { %v5847_v9 = vmax.f32 %v5831_v27, 0.0  ;;  %v5829_v41 = vadd.f32 %v6376_v57, %v5781_v30  ;;  %v5786_v1 = vmax.f32 %v5770_v12, 0.0  ;;  %v5768_v13 = vadd.f32 %v9611_v16, %v5746_v46 }
 0x344   : > { %5860 = vst.msk [vmem:[%s9650_s13 + $0x20] sm:$0xff] %vm645_vm7, %v5844_v35  ;;  %v5749_v11 = vmul.f32 %v9599_v25, %v5727_v29  ;;  %v5725_v28 = vadd.f32 %v5688_v20, %v5479_v56  ;;  %v6888_v59 = vpop.f32.mrf.mxu1  ;;  %v5485_v22 = vadd.f32 %v6871_v21, %v5127_v37  ;;  %v6395_v62 = vunpack.c.l.bf16 %v6403_v2 }
 0x345   : > { %5863 = vst.msk [vmem:[%s9650_s13 + $0x38] sm:$0xff] %vm645_vm7, %v5847_v9  ;;  %v5845_v39 = vmax.f32 %v5829_v41, 0.0  ;;  %v5834_v36 = vadd.f32 %v6387_v48, %v5786_v1  ;;  %v5784_v57 = vmax.f32 %v5768_v13, 0.0  ;;  %v5730_v4 = vadd.f32 %v6888_v59, %v5484_v3 }
 0x346   : > { %v5771_v8 = vadd.f32 %v9611_v16, %v5749_v11  ;;  %v5747_v10 = vmul.f32 %v9599_v25, %v5725_v28  ;;  %v5701_v53 = vpop.f32.mrf.mxu1  ;;  %v5483_v60 = vadd.f32 %v5458_v24, %v5125_v58  ;;  %v6391_v6 = vunpack.c.l.bf16 %v6402_v19 }
 0x347   : > { %5861 = vst.msk [vmem:[%s9650_s13 + $0x28] sm:$0xff] %vm645_vm7, %v5845_v39  ;;  %v5850_v51 = vmax.f32 %v5834_v36, 0.0  ;;  %v5832_v18 = vadd.f32 %v6383_v44, %v5784_v57  ;;  %v5752_v48 = vmul.f32 %v9599_v25, %v5730_v4  ;;  %v5728_v0 = vadd.f32 %v5701_v53, %v5482_v7 }
 0x348   : > { %v5787_v55 = vmax.f32 %v5771_v8, 0.0  ;;  %v5769_v23 = vadd.f32 %v9611_v16, %v5747_v10  ;;  %v6889_v5 = vpop.f32.mrf.mxu1  ;;  %v6396_v31 = vunpack.c.h.bf16 %v6403_v2  ;;  %v6392_v56 = vunpack.c.h.bf16 %v6402_v19 }
 0x349   : > { %5866 = vst.msk [vmem:[%s9650_s13 + $0x50] sm:$0xff] %vm645_vm7, %v5850_v51  ;;  %v5848_v42 = vmax.f32 %v5832_v18, 0.0  ;;  %v5774_v61 = vadd.f32 %v9611_v16, %v5752_v48  ;;  %v5750_v40 = vmul.f32 %v9599_v25, %v5728_v0  ;;  %v5731_v32 = vadd.f32 %v6889_v5, %v5485_v22 }
 0x34a   : > { %v5835_v44 = vadd.f32 %v6388_v47, %v5787_v55  ;;  %v5785_v54 = vmax.f32 %v5769_v23, 0.0  ;;  %v5704_v45 = vpop.f32.mrf.mxu1 }
 0x34b   : > { %5864 = vst.msk [vmem:[%s9650_s13 + $0x40] sm:$0xff] %vm645_vm7, %v5848_v42  ;;  %v5790_v38 = vmax.f32 %v5774_v61, 0.0  ;;  %v5772_v17 = vadd.f32 %v9611_v16, %v5750_v40  ;;  %v5753_v34 = vmul.f32 %v9599_v25, %v5731_v32  ;;  %v5729_v33 = vadd.f32 %v5704_v45, %v5483_v60 }
 0x34c   : > { %v5851_v43 = vmax.f32 %v5835_v44, 0.0  ;;  %v5833_v63 = vadd.f32 %v6384_v26, %v5785_v54 }
 0x34d   : > { %v5838_v49 = vadd.f32 %v6395_v62, %v5790_v38  ;;  %v5788_v14 = vmax.f32 %v5772_v17, 0.0  ;;  %v5775_v47 = vadd.f32 %v9611_v16, %v5753_v34  ;;  %v5751_v15 = vmul.f32 %v9599_v25, %v5729_v33 }
 0x34e   : > { %5867 = vst.msk [vmem:[%s9650_s13 + $0x58] sm:$0xff] %vm645_vm7, %v5851_v43  ;;  %v5849_v50 = vmax.f32 %v5833_v63, 0.0 }
 0x34f   : > { %v5854_v52 = vmax.f32 %v5838_v49, 0.0  ;;  %v5836_v27 = vadd.f32 %v6391_v6, %v5788_v14  ;;  %v5791_v30 = vmax.f32 %v5775_v47, 0.0  ;;  %v5773_v12 = vadd.f32 %v9611_v16, %v5751_v15 }
 0x350   : > { %5865 = vst.msk [vmem:[%s9650_s13 + $0x48] sm:$0xff] %vm645_vm7, %v5849_v50 }
 0x351   : > { %5870 = vst.msk [vmem:[%s9650_s13 + $0x70] sm:$0xff] %vm645_vm7, %v5854_v52  ;;  %v5852_v46 = vmax.f32 %v5836_v27, 0.0  ;;  %v5839_v37 = vadd.f32 %v6396_v31, %v5791_v30  ;;  %v5789_v35 = vmax.f32 %v5773_v12, 0.0 }
 0x353   : > { %5868 = vst.msk [vmem:[%s9650_s13 + $0x60] sm:$0xff] %vm645_vm7, %v5852_v46  ;;  %v5855_v25 = vmax.f32 %v5839_v37, 0.0  ;;  %v5837_v29 = vadd.f32 %v6392_v56, %v5789_v35 }
 0x355   : > { %5871 = vst.msk [vmem:[%s9650_s13 + $0x78] sm:$0xff] %vm645_vm7, %v5855_v25  ;;  %v5853_v20 = vmax.f32 %v5837_v29, 0.0 }
 0x357   : > { %5869 = vst.msk [vmem:[%s9650_s13 + $0x68] sm:$0xff] %vm645_vm7, %v5853_v20 }
 0x358 PF: > { %s17_s24 = sadd.s32 1, %s6940_s24  }
 0x359   : > { %p14_p4 = scmp.ge.s32.totalorder %s17_s24, 6  }
 0x35b   :  { %16 = sbr.rel (!%p14_p4) target bundleno = 1 (0x1), region = 94 }

// kernel: _basic_block_nchw.1
= control target key start
LH: loop header
LB: loop body
LE: loop exit
PB: predicated region body
PF: predicated region fallthrough
CT: control target
= control target key end

     0   :  { %s6983_s24 = smov 0   ;;  %s9750_s0 = inlined_call_operand.vmem [shape: bf16[32,16,4], index: 0, kind: input, shape index: {}]   ;;  %s9751_s1 = inlined_call_operand.vmem [shape: bf16[9,4,4], index: 1, kind: input, shape index: {}]   ;;  %s9752_s2 = inlined_call_operand.vmem [shape: f32[1,4], index: 2, kind: input, shape index: {}]   ;;  %s9753_s3 = inlined_call_operand.vmem [shape: f32[1,4], index: 3, kind: input, shape index: {}]   ;;  %s9754_s4 = inlined_call_operand.vmem [shape: bf16[9,4,4], index: 4, kind: input, shape index: {}]   ;;  %s9755_s5 = inlined_call_operand.vmem [shape: f32[1,4], index: 5, kind: input, shape index: {}]   ;;  %s9756_s6 = inlined_call_operand.vmem [shape: f32[1,4], index: 6, kind: input, shape index: {}]   ;;  %s9757_s7 = inlined_call_operand.vmem [shape: f32[32,16,4], index: 7, kind: output, shape index: {}]  }
   0x1 LB: > { %s5930_s25 = sadd.s32 4294967295, %s6940_s24   ;;  %p5934_p0 = scmp.ge.s32.totalorder %s6940_s24, 1  ;;  %s6940_s24 = sphi %s6983_s24, %s17_s24  }
   0x2   : > { %p239_p1 = scmp.lt.s32.totalorder %s6940_s24, 5 }
   0x4   : > { %p240_p2 = pnand %p5934_p0, %p239_p1 }
   0x6   : > { %243 = sbr.rel (%p240_p2) target bundleno = 856 (0x358), region = 48 }
   0xb   : > { %v5941_v0 = vld [vmem:[%s9751_s1 + $0x2] sm:$0x3]  ;;  %vm670_vm0 = vcmask 1041408   ;;  %v383_v1 = vld [vmem:[%s9751_s1] sm:$0x3]  ;;  %s5935_s30 = sshll.u32 %s5930_s25, 3 }
   0xc   : > { %6890 = vmatprep.subr.msk.bf16.mxu0 %vm670_vm0, %v5941_v0  ;;  %v672_v2 = vsel %vm670_vm0, %v5941_v0, 0  ;;  %6891 = vmatprep.subr.msk.bf16.mxu1 %vm670_vm0, %v383_v1  ;;  %v903_v3 = vsel %vm670_vm0, %v383_v1, 0  ;;  %p274_p3 = scmp.lt.s32.totalorder %s5935_s30, 31  ;;  %vm288_vm1 = vcmask 27650   ;;  %v6942_v4 = vmov 0  }
   0xd   : > { %6567 = vmatpush3.bf16.msra.mxu0 %v672_v2  ;;  %6585 = vmatpush3.bf16.msra.mxu1 %v903_v3  ;;  %289 = vst.msk [vmem:[#allocation2 + $0x4] sm:$0xc] %vm288_vm1, %v6942_v4  ;;  %290 = vst.msk [vmem:[#allocation2 + $0x1c] sm:$0xc] %vm288_vm1, %v6942_v4  ;;  %v5982_v5 = vld [vmem:[%s9751_s1 + $0x4] sm:$0x3] }
   0xe   : > { %291 = vst.msk [vmem:[#allocation2 + $0x34] sm:$0xc] %vm288_vm1, %v6942_v4  ;;  %292 = vst.msk [vmem:[#allocation2 + $0x4c] sm:$0xc] %vm288_vm1, %v6942_v4  ;;  %s10038_s30 = smov (!%p274_p3, %s5935_s30), 31  ;;  %6892 = vmatprep.subr.msk.bf16.mxu0 %vm670_vm0, %v5982_v5  ;;  %vm338_vm2 = vcmask 27648  }
   0xf   : > { %293 = vst.msk [vmem:[#allocation2 + $0x64] sm:$0xc] %vm288_vm1, %v6942_v4  ;;  %294 = vst.msk [vmem:[#allocation2 + $0x7c] sm:$0xc] %vm288_vm1, %v6942_v4  ;;  %v6007_v6 = vld [vmem:[%s9751_s1 + $0x6] sm:$0x3] }
  0x10   : > { %295 = vst.msk [vmem:[#allocation2 + $0x94] sm:$0xc] %vm288_vm1, %v6942_v4  ;;  %296 = vst.msk [vmem:[#allocation2 + $0xac] sm:$0xc] %vm288_vm1, %v6942_v4  ;;  %6893 = vmatprep.subr.msk.bf16.mxu1 %vm670_vm0, %v6007_v6  ;;  %s6347_s12 = sshll.u32 %s10038_s30, 3  ;;  %vm796_vm3 = vcmask 1045508  }
  0x11   : > { %306 = vst.msk [vmem:[#allocation3 + $0x4] sm:$0xc] %vm288_vm1, %v6942_v4  ;;  %307 = vst.msk [vmem:[#allocation3 + $0x1c] sm:$0xc] %vm288_vm1, %v6942_v4  ;;  %s7032_s15 = scalar_lea.vmem %s9750_s0, %s6347_s12  ;;  %v7035_v7 = vsel %vm670_vm0, %v5982_v5, 0  ;;  %v7038_v8 = vsel %vm670_vm0, %v6007_v6, 0 }
  0x12   : > { %308 = vst.msk [vmem:[#allocation3 + $0x34] sm:$0xc] %vm288_vm1, %v6942_v4  ;;  %309 = vst.msk [vmem:[#allocation3 + $0x4c] sm:$0xc] %vm288_vm1, %v6942_v4  ;;  %v7043_v9 = vld [vmem:[%s9751_s1 + $0x8] sm:$0x3] }
  0x13   : > { %310 = vst.msk [vmem:[#allocation3 + $0x64] sm:$0xc] %vm288_vm1, %v6942_v4  ;;  %311 = vst.msk [vmem:[#allocation3 + $0x7c] sm:$0xc] %vm288_vm1, %v6942_v4  ;;  %vm297_vm4 = vcmask 25600   ;;  %v7081_v23 = vsel %vm670_vm0, %v7043_v9, 0 }
  0x14   : > { %312 = vst.msk [vmem:[#allocation3 + $0x94] sm:$0xc] %vm288_vm1, %v6942_v4  ;;  %313 = vst.msk [vmem:[#allocation3 + $0xac] sm:$0xc] %vm288_vm1, %v6942_v4  ;;  %v322_v10 = vld [vmem:[%s7032_s15] sm:$0xf] }
  0x15   : > { %v323_v11 = vld [vmem:[%s7032_s15 + $0x4] sm:$0xf]  ;;  %v324_v12 = vld [vmem:[%s7032_s15 + $0x8] sm:$0xf]  ;;  %298 = vst.msk [vmem:[#allocation2 + $0x10] sm:$0x3] %vm297_vm4, %v6942_v4  ;;  %vm7109_vm8 = vmor %vm670_vm0, %vm796_vm3 }
  0x16   : > { %299 = vst.msk [vmem:[#allocation2 + $0x28] sm:$0x3] %vm297_vm4, %v6942_v4  ;;  %300 = vst.msk [vmem:[#allocation2 + $0x40] sm:$0x3] %vm297_vm4, %v6942_v4  ;;  %vm394_vm5 = vsmask.f32 1280 }
  0x17   : > { %301 = vst.msk [vmem:[#allocation2 + $0x58] sm:$0x3] %vm297_vm4, %v6942_v4  ;;  %302 = vst.msk [vmem:[#allocation2 + $0x70] sm:$0x3] %vm297_vm4, %v6942_v4  ;;  %vm395_vm6 = vsmask.f32 5392 }
  0x18   : > { %303 = vst.msk [vmem:[#allocation2 + $0x88] sm:$0x3] %vm297_vm4, %v6942_v4  ;;  %304 = vst.msk [vmem:[#allocation2 + $0xa0] sm:$0x3] %vm297_vm4, %v6942_v4  ;;  %v325_v13 = vld [vmem:[%s7032_s15 + $0xc] sm:$0xf] }
  0x19   : > { %305 = vst.msk [vmem:[#allocation2 + $0xb8] sm:$0x3] %vm297_vm4, %v6942_v4  ;;  %314 = vst.msk [vmem:[#allocation3 + $0x10] sm:$0x3] %vm297_vm4, %v6942_v4  ;;  %v326_v14 = vld [vmem:[%s7032_s15 + $0x10] sm:$0xf] }
  0x1a   : > { %315 = vst.msk [vmem:[#allocation3 + $0x28] sm:$0x3] %vm297_vm4, %v6942_v4  ;;  %316 = vst.msk [vmem:[#allocation3 + $0x40] sm:$0x3] %vm297_vm4, %v6942_v4  ;;  %v327_v15 = vld [vmem:[%s7032_s15 + $0x14] sm:$0xf] }
  0x1b   : > { %317 = vst.msk [vmem:[#allocation3 + $0x58] sm:$0x3] %vm297_vm4, %v6942_v4  ;;  %318 = vst.msk [vmem:[#allocation3 + $0x70] sm:$0x3] %vm297_vm4, %v6942_v4  ;;  %v359_v16 = vld [vmem:[#allocation2 + $0x4] sm:$0xc] }
  0x1c   : > { %319 = vst.msk [vmem:[#allocation3 + $0x88] sm:$0x3] %vm297_vm4, %v6942_v4  ;;  %320 = vst.msk [vmem:[#allocation3 + $0xa0] sm:$0x3] %vm297_vm4, %v6942_v4  ;;  %v7071_v17 = vld [vmem:[#allocation2 + $0x1c] sm:$0xc] }
  0x1d   : > { %321 = vst.msk [vmem:[#allocation3 + $0xb8] sm:$0x3] %vm297_vm4, %v6942_v4  ;;  %v7075_v18 = vld [vmem:[#allocation2 + $0x34] sm:$0xc]  ;;  %v398_v19 = vshrl.u32 %v359_v16, 16  ;;  %v401_v20 = vshll.u32 %v359_v16, 16  ;;  %vm7127_vm9 = vmor %vm394_vm5, %vm395_vm6 }
  0x1e   : > { %339 = vst.msk [vmem:[#allocation2 + $0x8] sm:$0xf] %vm338_vm2, %v322_v10  ;;  %340 = vst.msk [vmem:[#allocation2 + $0xc] sm:$0xf] %vm338_vm2, %v323_v11  ;;  %v426_v21 = vshrl.u32 %v7071_v17, 16  ;;  %v5958_v24 = vrot.slane %v359_v16, 10 }
  0x1f   : > { %341 = vst.msk [vmem:[#allocation2 + $0x20] sm:$0xf] %vm338_vm2, %v324_v12  ;;  %342 = vst.msk [vmem:[#allocation2 + $0x24] sm:$0xf] %vm338_vm2, %v325_v13  ;;  %v328_v22 = vld [vmem:[%s7032_s15 + $0x18] sm:$0xf] }
  0x20   : > { %343 = vst.msk [vmem:[#allocation2 + $0x38] sm:$0xf] %vm338_vm2, %v326_v14  ;;  %344 = vst.msk [vmem:[#allocation2 + $0x3c] sm:$0xf] %vm338_vm2, %v327_v15  ;;  %v429_v25 = vshll.u32 %v7071_v17, 16  ;;  %v454_v26 = vshrl.u32 %v7075_v18, 16 }
  0x21   : > { %v457_v27 = vshll.u32 %v7075_v18, 16  ;;  %v329_v28 = vld [vmem:[%s7032_s15 + $0x1c] sm:$0xf]  ;;  %345 = vst.msk [vmem:[#allocation2 + $0x50] sm:$0xf] %vm338_vm2, %v328_v22  ;;  %v400_v29 = vrot.slane %v398_v19, 6 }
  0x22   : > { %v403_v30 = vrot.slane %v401_v20, 7  ;;  %v428_v31 = vrot.slane %v426_v21, 6  ;;  %v5959_v32 = vrot.slane %v7071_v17, 10  ;;  %346 = vst.msk [vmem:[#allocation2 + $0x54] sm:$0xf] %vm338_vm2, %v329_v28  ;;  %vm645_vm7 = vcmask 31744  }
  0x23   : > { %v7090_v33 = vld [vmem:[#allocation2 + $0x4c] sm:$0xc]  ;;  %v431_v34 = vrot.slane %v429_v25, 7  ;;  %v456_v35 = vrot.slane %v454_v26, 6  ;;  %v459_v36 = vrot.slane %v457_v27, 7  ;;  %v5960_v37 = vrot.slane %v7075_v18, 10 }
  0x24   : > { %v330_v38 = vld [vmem:[%s7032_s15 + $0x20] sm:$0xf]  ;;  %v404_v39 = vor.u32 %v403_v30, %v400_v29  ;;  %v482_v40 = vshrl.u32 %v7090_v33, 16  ;;  %v485_v41 = vshll.u32 %v7090_v33, 16  ;;  %v5961_v42 = vrot.slane %v7090_v33, 10  ;;  %s6348_s11 = sshll.u32 %s10038_s30, 4 }
  0x25   : > { %v331_v43 = vld [vmem:[%s7032_s15 + $0x24] sm:$0xf]  ;;  %347 = vst.msk [vmem:[#allocation2 + $0x68] sm:$0xf] %vm338_vm2, %v330_v38  ;;  %v7099_v44 = vld [vmem:[#allocation2 + $0x8] sm:$0xf]  ;;  %v432_v47 = vor.u32 %v431_v34, %v428_v31  ;;  %v460_v48 = vor.u32 %v459_v36, %v456_v35  ;;  %s9650_s13 = scalar_lea.vmem %s9757_s7, %s6348_s11 }
  0x26   : > { %v7101_v45 = vld [vmem:[#allocation2 + $0xc] sm:$0x7]  ;;  %348 = vst.msk [vmem:[#allocation2 + $0x6c] sm:$0xf] %vm338_vm2, %v331_v43  ;;  %v405_v49 = vrot.slane %v404_v39, 4  ;;  %v407_v50 = vshrl.u32 %v7099_v44, 16 }
  0x27   : > { %v361_v46 = vld [vmem:[#allocation2 + $0xc] sm:$0x3]  ;;  %v410_v51 = vshll.u32 %v7099_v44, 16  ;;  %v417_v52 = vshrl.u32 %v7101_v45, 16  ;;  %v9796_v53 = vmov 0  ;;  %v420_v55 = vshll.u32 %v7101_v45, 16 }
  0x28   : > { %v9797_v53 = vsel %vm7109_vm8, 4294967295, %v9796_v53  ;;  %v7113_v54 = vld [vmem:[#allocation2 + $0x20] sm:$0xf]  ;;  %v800_v56 = vrot.slane %v7099_v44, 6  ;;  %v803_v57 = vrot.slane %v361_v46, 6  ;;  %v7119_v59 = vrot.slane %v432_v47, 4 }
  0x29   : > { %9798 = vst [vmem:[#allocation4_spill] sm:$0xff] %v9797_v53  ;;  %v7117_v58 = vld [vmem:[#allocation2 + $0x24] sm:$0x7]  ;;  %v409_v60 = vrot.slane %v407_v50, 6  ;;  %v412_v61 = vrot.slane %v410_v51, 7  ;;  %v419_v62 = vrot.slane %v417_v52, 6 }
  0x2a   : > { %v7123_v63 = vrot.slane %v407_v50, 7  ;;  %v9799_v0 = vmov 0  ;;  %v422_v1 = vrot.slane %v420_v55, 7  ;;  %v801_v2 = vsel %vm7109_vm8, %v5958_v24, %v800_v56  ;;  %v364_v16 = vld [vmem:[#allocation2 + $0x24] sm:$0x3] }
  0x2b   : > { %v9800_v0 = vsel %vm7127_vm9, 4294967295, %v9799_v0  ;;  %v802_v3 = vrot.slane %v800_v56, 4  ;;  %v435_v4 = vshrl.u32 %v7113_v54, 16  ;;  %v413_v5 = vor.u32 %v412_v61, %v409_v60  ;;  %v7145_v28 = vld [vmem:[#allocation2 + $0x38] sm:$0xf] }
  0x2c   : > { %9801 = vst [vmem:[#allocation5_spill] sm:$0xff] %v9800_v0  ;;  %v438_v6 = vshll.u32 %v7113_v54, 16  ;;  %v445_v10 = vshrl.u32 %v7117_v58, 16  ;;  %v448_v11 = vshll.u32 %v7117_v58, 16  ;;  %v423_v12 = vor.u32 %v422_v1, %v419_v62  ;;  %v7150_v34 = vld [vmem:[#allocation2 + $0x3c] sm:$0x7] }
  0x2d   : > { %v804_v13 = vsel %vm7109_vm8, %v802_v3, %v803_v57  ;;  %v437_v14 = vrot.slane %v435_v4, 6  ;;  %v1043_v15 = vrot.slane %v7117_v58, 7  ;;  %v414_v19 = vsel %vm7127_vm9, %v405_v49, %v413_v5  ;;  %v367_v36 = vld [vmem:[#allocation2 + $0x3c] sm:$0x3]  ;;  %v332_v47 = vld [vmem:[%s7032_s15 + $0x28] sm:$0xf] }
  0x2e   : > { %v415_v20 = vrot.slane %v413_v5, 4  ;;  %v5966_v21 = vcombine.low %v801_v2, %v804_v13  ;;  %v440_v22 = vrot.slane %v438_v6, 7  ;;  %v447_v24 = vrot.slane %v445_v10, 6  ;;  %v333_v49 = vld [vmem:[%s7032_s15 + $0x2c] sm:$0xf] }
  0x2f   : > { %v450_v25 = vrot.slane %v448_v11, 7  ;;  %v7142_v26 = vrot.slane %v435_v4, 7  ;;  %v807_v27 = vrot.slane %v7113_v54, 6  ;;  %v810_v31 = vrot.slane %v364_v16, 6  ;;  %349 = vst.msk [vmem:[#allocation2 + $0x80] sm:$0xf] %vm338_vm2, %v332_v47 }
  0x30   : > { %v424_v29 = vsel %vm7127_vm9, %v415_v20, %v423_v12  ;;  %6586 = vmatprep.mubr.msk.bf16.mxu1 %vm645_vm7, %v5966_v21  ;;  %v441_v30 = vor.u32 %v440_v22, %v437_v14  ;;  %v7152_v35 = vrot.slane %v460_v48, 4  ;;  %350 = vst.msk [vmem:[#allocation2 + $0x84] sm:$0xf] %vm338_vm2, %v333_v49  ;;  %v334_v56 = vld [vmem:[%s7032_s15 + $0x30] sm:$0xf]  ;;  %v463_v57 = vshrl.u32 %v7145_v28, 16 }
  0x31   : > { %v5942_v38 = vcombine.low %v414_v19, %v424_v29  ;;  %v451_v39 = vor.u32 %v450_v25, %v447_v24  ;;  %v7155_v43 = vor.u32 %v7142_v26, %v438_v6  ;;  %v1289_v46 = vrot.slane %v7142_v26, 4  ;;  %v335_v61 = vld [vmem:[%s7032_s15 + $0x34] sm:$0xf]  ;;  %351 = vst.msk [vmem:[#allocation2 + $0x98] sm:$0xf] %vm338_vm2, %v334_v56 }
  0x32   : > { %v442_v50 = vsel %vm7127_vm9, %v7119_v59, %v441_v30  ;;  %v443_v52 = vrot.slane %v441_v30, 4  ;;  %v808_v48 = vsel %vm7109_vm8, %v5959_v32, %v807_v27  ;;  %v809_v55 = vrot.slane %v807_v27, 4  ;;  %v7182_v3 = vld [vmem:[#allocation2 + $0x50] sm:$0xf]  ;;  %352 = vst.msk [vmem:[#allocation2 + $0x9c] sm:$0xf] %vm338_vm2, %v335_v61 }
  0x33   : > { %6568 = vmatprep.mubr.msk.bf16.mxu0 %vm645_vm7, %v5942_v38  ;;  %v466_v60 = vshll.u32 %v7145_v28, 16  ;;  %v473_v59 = vshrl.u32 %v7150_v34, 16  ;;  %v476_v17 = vshll.u32 %v7150_v34, 16  ;;  %v814_v1 = vrot.slane %v7145_v28, 6  ;;  %v336_v4 = vld [vmem:[%s7032_s15 + $0x38] sm:$0xf] }
  0x34   : > { %v452_v32 = vsel %vm7127_vm9, %v443_v52, %v451_v39  ;;  %v811_v62 = vsel %vm7109_vm8, %v809_v55, %v810_v31  ;;  %v817_v2 = vrot.slane %v367_v36, 6  ;;  %v465_v10 = vrot.slane %v463_v57, 6  ;;  %v7190_v12 = vld [vmem:[#allocation2 + $0x54] sm:$0x7]  ;;  %v337_v13 = vld [vmem:[%s7032_s15 + $0x3c] sm:$0xf] }
  0x35   : > { %v5943_v5 = vcombine.low %v442_v50, %v452_v32  ;;  %v5967_v6 = vcombine.low %v808_v48, %v811_v62  ;;  %v468_v11 = vrot.slane %v466_v60, 7  ;;  %353 = vst.msk [vmem:[#allocation2 + $0xb0] sm:$0xf] %vm338_vm2, %v336_v4  ;;  %v475_v14 = vrot.slane %v473_v59, 6  ;;  %354 = vst.msk [vmem:[#allocation2 + $0xb4] sm:$0xf] %vm338_vm2, %v337_v13 }
  0x36   : > { %v478_v16 = vrot.slane %v476_v17, 7  ;;  %v815_v19 = vsel %vm7109_vm8, %v5960_v37, %v814_v1  ;;  %v816_v20 = vrot.slane %v814_v1, 4  ;;  %v7202_v21 = vld [vmem:[%s9751_s1 + $0xa] sm:$0x3]  ;;  %v484_v24 = vrot.slane %v482_v40, 6 }
  0x37   : > { %6569 = vmatmul.mubr.msk.bf16.vlgmr.msra.gmra.mxu0 %vm645_vm7, %v5943_v5  ;;  %6587 = vmatmul.mubr.msk.bf16.vlgmr.msra.gmra.mxu1 %vm645_vm7, %v5967_v6  ;;  %v469_v22 = vor.u32 %v468_v11, %v465_v10  ;;  %v487_v18 = vrot.slane %v485_v41, 7  ;;  %v491_v37 = vshrl.u32 %v7182_v3, 16  ;;  %v494_v29 = vshll.u32 %v7182_v3, 16  ;;  %v370_v31 = vld [vmem:[#allocation2 + $0x54] sm:$0x3] }
  0x38   : > { %6603 = vmatpush3.bf16.msra.mxu0 %v7035_v7  ;;  %v479_v25 = vor.u32 %v478_v16, %v475_v14  ;;  %v818_v27 = vsel %vm7109_vm8, %v816_v20, %v817_v2  ;;  %v501_v30 = vshrl.u32 %v7190_v12, 16  ;;  %6621 = vmatpush3.bf16.msra.mxu1 %v7038_v8  ;;  %v371_v39 = vld [vmem:[#allocation2 + $0x64] sm:$0xc]  ;;  %v504_v49 = vshll.u32 %v7190_v12, 16  ;;  %v7239_v62 = vld [vmem:[#allocation2 + $0x6c] sm:$0x7] }
  0x39   : > { %v470_v40 = vsel %vm7127_vm9, %v7152_v35, %v469_v22  ;;  %v471_v41 = vrot.slane %v469_v22, 4  ;;  %v5968_v36 = vcombine.low %v815_v19, %v818_v27  ;;  %v488_v38 = vor.u32 %v487_v18, %v484_v24  ;;  %6894 = vmatprep.subr.msk.bf16.mxu0 %vm670_vm0, %v7043_v9  ;;  %6895 = vmatprep.subr.msk.bf16.mxu1 %vm670_vm0, %v7202_v21  ;;  %v7229_v35 = vld [vmem:[#allocation2 + $0x68] sm:$0xf]  ;;  %v373_v14 = vld [vmem:[#allocation2 + $0x6c] sm:$0x3] }
  0x3a   : > { %v493_v7 = vrot.slane %v491_v37, 6  ;;  %v496_v8 = vrot.slane %v494_v29, 7  ;;  %v503_v47 = vrot.slane %v501_v30, 6  ;;  %v821_v52 = vrot.slane %v7182_v3, 6  ;;  %v374_v24 = vld [vmem:[#allocation2 + $0x7c] sm:$0xc] }
  0x3b   : > { %v480_v50 = vsel %vm7127_vm9, %v471_v41, %v479_v25  ;;  %6590 = vmatprep.mubr.msk.bf16.mxu1 %vm645_vm7, %v5968_v36  ;;  %v489_v9 = vrot.slane %v488_v38, 4  ;;  %v824_v48 = vrot.slane %v370_v31, 6  ;;  %v506_v59 = vrot.slane %v504_v49, 7  ;;  %v7256_v31 = vld [vmem:[#allocation2 + $0x80] sm:$0xf] }
  0x3c   : > { %v5944_v55 = vcombine.low %v470_v40, %v480_v50  ;;  %v497_v56 = vor.u32 %v496_v8, %v493_v7  ;;  %v510_v17 = vshrl.u32 %v371_v39, 16  ;;  %v822_v61 = vsel %vm7109_vm8, %v5961_v42, %v821_v52 }
  0x3d   : > { %v823_v32 = vrot.slane %v821_v52, 4  ;;  %v513_v1 = vshll.u32 %v371_v39, 16  ;;  %v519_v2 = vshrl.u32 %v7229_v35, 16  ;;  %v507_v6 = vor.u32 %v506_v59, %v503_v47  ;;  %v7261_v47 = vld [vmem:[#allocation2 + $0x84] sm:$0x7] }
  0x3e   : > { %6572 = vmatprep.mubr.msk.bf16.mxu0 %vm645_vm7, %v5944_v55  ;;  %v498_v4 = vsel %vm7127_vm9, %v489_v9, %v497_v56  ;;  %v499_v5 = vrot.slane %v497_v56, 4  ;;  %v512_v10 = vrot.slane %v510_v17, 6  ;;  %v522_v13 = vshll.u32 %v7229_v35, 16 }
  0x3f   : > { %v825_v33 = vsel %vm7109_vm8, %v823_v32, %v824_v48  ;;  %v515_v11 = vrot.slane %v513_v1, 7  ;;  %v521_v42 = vrot.slane %v519_v2, 6  ;;  %v529_v20 = vshrl.u32 %v7239_v62, 16 }
  0x40   : > { %v508_v16 = vsel %vm7127_vm9, %v499_v5, %v507_v6  ;;  %v5969_v19 = vcombine.low %v822_v61, %v825_v33  ;;  %v532_v22 = vshll.u32 %v7239_v62, 16  ;;  %v524_v27 = vrot.slane %v522_v13, 7  ;;  %v376_v5 = vld [vmem:[#allocation2 + $0x84] sm:$0x3] }
  0x41   : > { %v5945_v18 = vcombine.low %v498_v4, %v508_v16  ;;  %v516_v25 = vor.u32 %v515_v11, %v512_v10  ;;  %v5962_v30 = vrot.slane %v371_v39, 10  ;;  %v531_v40 = vrot.slane %v529_v20, 6 }
  0x42   : > { %6591 = vmatmul.mubr.msk.bf16.gmra.mxu1 %vm645_vm7, %v5969_v19  ;;  %v534_v41 = vrot.slane %v532_v22, 7  ;;  %v828_v36 = vrot.slane %v7229_v35, 6  ;;  %v831_v38 = vrot.slane %v373_v14, 6  ;;  %v525_v8 = vor.u32 %v524_v27, %v521_v42  ;;  %v377_v42 = vld [vmem:[#allocation2 + $0x94] sm:$0xc] }
  0x43   : > { %6573 = vmatmul.mubr.msk.bf16.gmra.mxu0 %vm645_vm7, %v5945_v18  ;;  %v517_v7 = vrot.slane %v516_v25, 4  ;;  %v538_v49 = vshrl.u32 %v374_v24, 16  ;;  %v541_v50 = vshll.u32 %v374_v24, 16  ;;  %v547_v48 = vshrl.u32 %v7256_v31, 16  ;;  %v7277_v14 = vld [vmem:[#allocation2 + $0x98] sm:$0xf] }
  0x44   : > { %v535_v9 = vor.u32 %v534_v41, %v531_v40  ;;  %v829_v39 = vsel %vm7109_vm8, %v5962_v30, %v828_v36  ;;  %v830_v52 = vrot.slane %v828_v36, 4  ;;  %v527_v56 = vrot.slane %v525_v8, 4  ;;  %v7284_v41 = vld [vmem:[#allocation2 + $0x9c] sm:$0x7] }
  0x45   : > { %v526_v55 = vsel %vm7127_vm9, %v517_v7, %v525_v8  ;;  %v540_v59 = vrot.slane %v538_v49, 6  ;;  %v543_v17 = vrot.slane %v541_v50, 7  ;;  %v549_v32 = vrot.slane %v547_v48, 6 }
  0x46   : > { %v832_v61 = vsel %vm7109_vm8, %v830_v52, %v831_v38  ;;  %v550_v1 = vshll.u32 %v7256_v31, 16  ;;  %v557_v4 = vshrl.u32 %v7261_v47, 16  ;;  %v536_v6 = vsel %vm7127_vm9, %v527_v56, %v535_v9 }
  0x47   : > { %v5970_v10 = vcombine.low %v829_v39, %v832_v61  ;;  %v544_v33 = vor.u32 %v543_v17, %v540_v59  ;;  %v560_v11 = vshll.u32 %v7261_v47, 16  ;;  %v5946_v16 = vcombine.low %v526_v55, %v536_v6 }
  0x48   : > { %v552_v19 = vrot.slane %v550_v1, 7  ;;  %v559_v20 = vrot.slane %v557_v4, 6  ;;  %v5963_v22 = vrot.slane %v374_v24, 10  ;;  %v835_v27 = vrot.slane %v7256_v31, 6 }
  0x49   : > { %6594 = vmatprep.mubr.msk.bf16.mxu1 %vm645_vm7, %v5970_v10  ;;  %v545_v18 = vrot.slane %v544_v33, 4  ;;  %v562_v25 = vrot.slane %v560_v11, 7  ;;  %v838_v30 = vrot.slane %v376_v5, 6  ;;  %6576 = vmatprep.mubr.msk.bf16.mxu0 %vm645_vm7, %v5946_v16  ;;  %v566_v36 = vshrl.u32 %v377_v42, 16  ;;  %v380_v33 = vld [vmem:[#allocation2 + $0xac] sm:$0xc] }
  0x4a   : > { %v553_v40 = vor.u32 %v552_v19, %v549_v32  ;;  %v569_v38 = vshll.u32 %v377_v42, 16  ;;  %v575_v7 = vshrl.u32 %v7277_v14, 16  ;;  %v836_v24 = vsel %vm7109_vm8, %v5963_v22, %v835_v27  ;;  %v379_v32 = vld [vmem:[#allocation2 + $0x9c] sm:$0x3]  ;;  %v7302_v11 = vld [vmem:[#allocation2 + $0xb0] sm:$0xf] }
  0x4b   : > { %v563_v8 = vor.u32 %v562_v25, %v559_v20  ;;  %v837_v49 = vrot.slane %v835_v27, 4  ;;  %v578_v50 = vshll.u32 %v7277_v14, 16  ;;  %v568_v52 = vrot.slane %v566_v36, 6  ;;  %v7307_v36 = vld [vmem:[#allocation2 + $0xb4] sm:$0x7] }
  0x4c   : > { %v554_v9 = vsel %vm7127_vm9, %v545_v18, %v553_v40  ;;  %v555_v39 = vrot.slane %v553_v40, 4  ;;  %v571_v55 = vrot.slane %v569_v38, 7  ;;  %vm1028_vm10 = vcmask 1040384  }
  0x4d   : > { %vm1029_vm11 = vcmask 1044484   ;;  %v839_v56 = vsel %vm7109_vm8, %v837_v49, %v838_v30  ;;  %v577_v59 = vrot.slane %v575_v7, 6  ;;  %v580_v17 = vrot.slane %v578_v50, 7 }
  0x4e   : > { %v585_v61 = vshrl.u32 %v7284_v41, 16  ;;  %v564_v4 = vsel %vm7127_vm9, %v555_v39, %v563_v8  ;;  %v5971_v5 = vcombine.low %v836_v24, %v839_v56  ;;  %v572_v6 = vor.u32 %v571_v55, %v568_v52  ;;  %vm7330_vm14 = vmor %vm1028_vm10, %vm1029_vm11 }
  0x4f   : > { %v588_v10 = vshll.u32 %v7284_v41, 16  ;;  %v5947_v16 = vcombine.low %v554_v9, %v564_v4  ;;  %v581_v19 = vor.u32 %v580_v17, %v577_v59  ;;  %v5964_v22 = vrot.slane %v377_v42, 10 }
  0x50   : > { %v587_v20 = vrot.slane %v585_v61, 6  ;;  %6595 = vmatmul.mubr.msk.bf16.gmra.mxu1 %vm645_vm7, %v5971_v5  ;;  %v573_v18 = vrot.slane %v572_v6, 4  ;;  %v842_v27 = vrot.slane %v7277_v14, 6  ;;  %v845_v30 = vrot.slane %v379_v32, 6  ;;  %v382_v5 = vld [vmem:[#allocation2 + $0xb4] sm:$0x3] }
  0x51   : > { %v590_v25 = vrot.slane %v588_v10, 7  ;;  %6577 = vmatmul.mubr.msk.bf16.gmra.mxu0 %vm645_vm7, %v5947_v16  ;;  %v583_v40 = vrot.slane %v581_v19, 4  ;;  %v594_v38 = vshrl.u32 %v380_v33, 16  ;;  %v597_v8 = vshll.u32 %v380_v33, 16  ;;  %v1002_v6 = vld [vmem:[#allocation2 + $0x4] sm:$0x8] }
  0x52   : > { %v603_v24 = vshrl.u32 %v7302_v11, 16  ;;  %vm1261_vm12 = vsmask.f32 256  ;;  %vm1262_vm13 = vsmask.f32 4368  ;;  %v582_v42 = vsel %vm7127_vm9, %v573_v18, %v581_v19 }
  0x53   : > { %v591_v49 = vor.u32 %v590_v25, %v587_v20  ;;  %v843_v9 = vsel %vm7109_vm8, %v5964_v22, %v842_v27  ;;  %v844_v39 = vrot.slane %v842_v27, 4  ;;  %v596_v52 = vrot.slane %v594_v38, 6  ;;  %vm7360_vm15 = vmor %vm1261_vm12, %vm1262_vm13 }
  0x54   : > { %v599_v55 = vrot.slane %v597_v8, 7  ;;  %v605_v56 = vrot.slane %v603_v24, 6  ;;  %v606_v59 = vshll.u32 %v7302_v11, 16  ;;  %v613_v32 = vshrl.u32 %v7307_v36, 16 }
  0x55   : > { %v592_v17 = vsel %vm7127_vm9, %v583_v40, %v591_v49  ;;  %v846_v61 = vsel %vm7109_vm8, %v844_v39, %v845_v30  ;;  %v616_v4 = vshll.u32 %v7307_v36, 16  ;;  %v5965_v25 = vrot.slane %v380_v33, 10  ;;  %v1003_v40 = vld [vmem:[#allocation2 + $0x1c] sm:$0x8] }
  0x56   : > { %v5948_v10 = vcombine.low %v582_v42, %v592_v17  ;;  %v5972_v16 = vcombine.low %v843_v9, %v846_v61  ;;  %v600_v19 = vor.u32 %v599_v55, %v596_v52  ;;  %v608_v20 = vrot.slane %v606_v59, 7 }
  0x57   : > { %v615_v22 = vrot.slane %v613_v32, 6  ;;  %v618_v18 = vrot.slane %v616_v4, 7  ;;  %v849_v27 = vrot.slane %v7302_v11, 6  ;;  %v852_v8 = vrot.slane %v382_v5, 6 }
  0x58   : > { %6580 = vmatprep.mubr.msk.bf16.mxu0 %vm645_vm7, %v5948_v10  ;;  %6598 = vmatprep.mubr.msk.bf16.mxu1 %vm645_vm7, %v5972_v16  ;;  %v601_v30 = vrot.slane %v600_v19, 4  ;;  %v609_v38 = vor.u32 %v608_v20, %v605_v56  ;;  %v9802_v42 = vmov 0  ;;  %v5983_v49 = vrot.slane %v1002_v6, 11  ;;  %v7345_v16 = vld [vmem:[#allocation2 + $0xc] sm:$0xf] }
  0x59   : > { %v9803_v42 = vsel %vm7330_vm14, 4294967295, %v9802_v42  ;;  %v619_v9 = vor.u32 %v618_v18, %v615_v22  ;;  %v850_v33 = vsel %vm7109_vm8, %v5965_v25, %v849_v27  ;;  %v851_v39 = vrot.slane %v849_v27, 4  ;;  %v7352_v18 = vld [vmem:[#allocation2 + $0x24] sm:$0xf] }
  0x5a   : > { %9804 = vst [vmem:[#allocation6_spill] sm:$0xff] %v9803_v42  ;;  %v1033_v52 = vrot.slane %v7099_v44, 7  ;;  %v610_v55 = vsel %vm7127_vm9, %v601_v30, %v609_v38  ;;  %v611_v17 = vrot.slane %v609_v38, 4  ;;  %v1036_v56 = vrot.slane %v7101_v45, 7 }
  0x5b   : > { %v5984_v61 = vrot.slane %v1003_v40, 11  ;;  %v853_v32 = vsel %vm7109_vm8, %v851_v39, %v852_v8  ;;  %v1040_v10 = vrot.slane %v7113_v54, 7  ;;  %v1265_v22 = vshrl.u32 %v1002_v6, 16 }
  0x5c   : > { %v1034_v4 = vsel %vm7330_vm14, %v5983_v49, %v1033_v52  ;;  %v1035_v5 = vrot.slane %v1033_v52, 4  ;;  %v620_v19 = vsel %vm7127_vm9, %v611_v17, %v619_v9  ;;  %v5973_v20 = vcombine.low %v850_v33, %v853_v32  ;;  %v1004_v33 = vld [vmem:[#allocation2 + $0x34] sm:$0x8] }
  0x5d   : > { %v1270_v45 = vor.u32 %v7123_v63, %v410_v51  ;;  %v5949_v25 = vcombine.low %v610_v55, %v620_v19  ;;  %v1041_v30 = vsel %vm7330_vm14, %v5984_v61, %v1040_v10  ;;  %v1042_v38 = vrot.slane %v1040_v10, 4 }
  0x5e   : > { %v1037_v27 = vsel %vm7330_vm14, %v1035_v5, %v1036_v56  ;;  %v9805_v8 = vmov 0  ;;  %6599 = vmatmul.mubr.msk.bf16.gmra.mxu1 %vm645_vm7, %v5973_v20  ;;  %v6008_v51 = vrot.slane %v1265_v22, 11  ;;  %v1272_v49 = vrot.slane %v7123_v63, 4  ;;  %v1005_v56 = vld [vmem:[#allocation2 + $0x4c] sm:$0x8] }
  0x5f   : > { %v9806_v8 = vsel %vm7360_vm15, 4294967295, %v9805_v8  ;;  %v5991_v6 = vcombine.low %v1034_v4, %v1037_v27  ;;  %v1274_v9 = vshrl.u32 %v7345_v16, 16  ;;  %6581 = vmatmul.mubr.msk.bf16.gmra.mxu0 %vm645_vm7, %v5949_v25  ;;  %v1044_v39 = vsel %vm7330_vm14, %v1042_v38, %v1043_v15 }
  0x60   : > { %9807 = vst [vmem:[#allocation7_spill] sm:$0xff] %v9806_v8  ;;  %v1277_v52 = vshll.u32 %v7345_v16, 16  ;;  %v1282_v55 = vshrl.u32 %v1003_v40, 16  ;;  %v1291_v17 = vshrl.u32 %v7352_v18, 16  ;;  %v5992_v61 = vcombine.low %v1041_v30, %v1044_v39 }
  0x61   : > { %6604 = vmatprep.mubr.msk.bf16.mxu0 %vm645_vm7, %v5991_v6  ;;  %v1271_v63 = vsel %vm7360_vm15, %v6008_v51, %v1270_v45  ;;  %v1276_v32 = vrot.slane %v1274_v9, 7  ;;  %v1294_v4 = vshll.u32 %v7352_v18, 16  ;;  %v5985_v10 = vrot.slane %v1004_v33, 11  ;;  %v7391_v9 = vld [vmem:[#allocation2 + $0x3c] sm:$0xf] }
  0x62   : > { %v6009_v5 = vrot.slane %v1282_v55, 11  ;;  %v1293_v58 = vrot.slane %v1291_v17, 7  ;;  %v1047_v15 = vrot.slane %v7145_v28, 7  ;;  %v1050_v40 = vrot.slane %v7150_v34, 7 }
  0x63   : > { %v1279_v19 = vor.u32 %v1277_v52, %v1276_v32  ;;  %v5986_v20 = vrot.slane %v1005_v56, 11  ;;  %v1054_v22 = vrot.slane %v7182_v3, 7  ;;  %v1057_v34 = vrot.slane %v7190_v12, 7 }
  0x64   : > { %v1288_v25 = vsel %vm7360_vm15, %v6009_v5, %v7155_v43  ;;  %v1296_v27 = vor.u32 %v1294_v4, %v1293_v58  ;;  %v1048_v45 = vsel %vm7330_vm14, %v5985_v10, %v1047_v15  ;;  %v1049_v30 = vrot.slane %v1047_v15, 4 }
  0x65   : > { %v1280_v38 = vsel %vm7360_vm15, %v1272_v49, %v1279_v19  ;;  %v1055_v6 = vsel %vm7330_vm14, %v5986_v20, %v1054_v22  ;;  %v1056_v51 = vrot.slane %v1054_v22, 4  ;;  %v1299_v55 = vshrl.u32 %v1004_v33, 16  ;;  %v7402_v49 = vld [vmem:[%s9751_s1 + $0xc] sm:$0x3] }
  0x66   : > { %v6016_v39 = vcombine.low %v1271_v63, %v1280_v38  ;;  %v1297_v43 = vsel %vm7360_vm15, %v1289_v46, %v1296_v27  ;;  %v1051_v52 = vsel %vm7330_vm14, %v1049_v30, %v1050_v40  ;;  %v1303_v26 = vrot.slane %v463_v57, 7  ;;  %v7408_v63 = vld [vmem:[#allocation2 + $0x54] sm:$0xf]  ;;  %v1006_v46 = vld [vmem:[#allocation2 + $0x64] sm:$0x8] }
  0x67   : > { %v6017_v17 = vcombine.low %v1288_v25, %v1297_v43  ;;  %v5993_v32 = vcombine.low %v1048_v45, %v1051_v52  ;;  %v1058_v12 = vsel %vm7330_vm14, %v1056_v51, %v1057_v34  ;;  %6605 = vmatmul.mubr.msk.bf16.vlgmr.msra.gmra.mxu0 %vm645_vm7, %v5992_v61  ;;  %v6010_v4 = vrot.slane %v1299_v55, 11  ;;  %v1007_v25 = vld [vmem:[#allocation2 + $0x7c] sm:$0x8]  ;;  %v7435_v43 = vld [vmem:[#allocation2 + $0x6c] sm:$0xf] }
  0x68   : > { %6622 = vmatprep.mubr.msk.bf16.mxu1 %vm645_vm7, %v6016_v39  ;;  %v5994_v33 = vcombine.low %v1055_v6, %v1058_v12  ;;  %v1308_v5 = vshrl.u32 %v7391_v9, 16  ;;  %v1311_v58 = vshll.u32 %v7391_v9, 16  ;;  %6639 = vmatpush3.bf16.msra.mxu0 %v7081_v23  ;;  %v1304_v57 = vor.u32 %v1303_v26, %v466_v60 }
  0x69   : > { %6623 = vmatmul.mubr.msk.bf16.vlgmr.msra.gmra.mxu1 %vm645_vm7, %v6017_v17  ;;  %v1306_v10 = vrot.slane %v1303_v26, 4  ;;  %v1316_v15 = vshrl.u32 %v1005_v56, 16  ;;  %v1320_v61 = vrot.slane %v491_v37, 7  ;;  %6608 = vmatprep.mubr.msk.bf16.mxu0 %vm645_vm7, %v5993_v32  ;;  %v1325_v40 = vshrl.u32 %v7408_v63, 16 }
  0x6a   : > { %v1310_v19 = vrot.slane %v1308_v5, 7  ;;  %v1328_v20 = vshll.u32 %v7408_v63, 16  ;;  %v5987_v22 = vrot.slane %v1006_v46, 11  ;;  %6896 = vmatprep.subr.msk.bf16.mxu0 %vm670_vm0, %v7402_v49  ;;  %v1305_v23 = vsel %vm7360_vm15, %v6010_v4, %v1304_v57  ;;  %v7451_v57 = vld [vmem:[#allocation2 + $0x84] sm:$0xf] }
  0x6b   : > { %v6011_v60 = vrot.slane %v1316_v15, 11  ;;  %v1321_v56 = vor.u32 %v1320_v61, %v494_v29  ;;  %v1323_v37 = vrot.slane %v1320_v61, 4  ;;  %v1327_v45 = vrot.slane %v1325_v40, 7  ;;  %v1008_v61 = vld [vmem:[#allocation2 + $0x94] sm:$0x8] }
  0x6c   : > { %v1313_v27 = vor.u32 %v1311_v58, %v1310_v19  ;;  %v1061_v30 = vrot.slane %v7229_v35, 7  ;;  %v1064_v38 = vrot.slane %v7239_v62, 7  ;;  %v5988_v51 = vrot.slane %v1007_v25, 11 }
  0x6d   : > { %v1322_v6 = vsel %vm7360_vm15, %v6011_v60, %v1321_v56  ;;  %v1068_v34 = vrot.slane %v7256_v31, 7  ;;  %v1071_v39 = vrot.slane %v7261_v47, 7  ;;  %v1330_v52 = vor.u32 %v1328_v20, %v1327_v45 }
  0x6e   : > { %v1314_v29 = vsel %vm7360_vm15, %v1306_v10, %v1313_v27  ;;  %v1062_v55 = vsel %vm7330_vm14, %v5987_v22, %v1061_v30  ;;  %v1063_v17 = vrot.slane %v1061_v30, 4  ;;  %v1333_v26 = vshrl.u32 %v1006_v46, 16  ;;  %v1009_v30 = vld [vmem:[#allocation2 + $0xac] sm:$0x8] }
  0x6f   : > { %v6018_v32 = vcombine.low %v1305_v23, %v1314_v29  ;;  %v1069_v62 = vsel %vm7330_vm14, %v5988_v51, %v1068_v34  ;;  %v1070_v12 = vrot.slane %v1068_v34, 4  ;;  %6609 = vmatmul.mubr.msk.bf16.gmra.mxu0 %vm645_vm7, %v5994_v33  ;;  %v1331_v47 = vsel %vm7360_vm15, %v1323_v37, %v1330_v52 }
  0x70   : > { %v1065_v4 = vsel %vm7330_vm14, %v1063_v17, %v1064_v38  ;;  %v1337_v5 = vrot.slane %v519_v2, 7  ;;  %v1342_v58 = vshrl.u32 %v7435_v43, 16  ;;  %v6019_v10 = vcombine.low %v1322_v6, %v1331_v47 }
  0x71   : > { %6626 = vmatprep.mubr.msk.bf16.mxu1 %vm645_vm7, %v6018_v32  ;;  %v5995_v15 = vcombine.low %v1062_v55, %v1065_v4  ;;  %v1072_v46 = vsel %vm7330_vm14, %v1070_v12, %v1071_v39  ;;  %v6012_v33 = vrot.slane %v1333_v26, 11  ;;  %v1345_v2 = vshll.u32 %v7435_v43, 16 }
  0x72   : > { %v5996_v19 = vcombine.low %v1069_v62, %v1072_v46  ;;  %v1338_v40 = vor.u32 %v1337_v5, %v522_v13  ;;  %v1340_v20 = vrot.slane %v1337_v5, 4  ;;  %v1344_v22 = vrot.slane %v1342_v58, 7  ;;  %6627 = vmatmul.mubr.msk.bf16.gmra.mxu1 %vm645_vm7, %v6019_v10  ;;  %v7478_v62 = vld [vmem:[#allocation2 + $0x9c] sm:$0xf] }
  0x73   : > { %6612 = vmatprep.mubr.msk.bf16.mxu0 %vm645_vm7, %v5995_v15  ;;  %v1350_v23 = vshrl.u32 %v1007_v25, 16  ;;  %v1354_v60 = vrot.slane %v547_v48, 7  ;;  %v1359_v56 = vshrl.u32 %v7451_v57, 16  ;;  %v1362_v27 = vshll.u32 %v7451_v57, 16 }
  0x74   : > { %v1339_v37 = vsel %vm7360_vm15, %v6012_v33, %v1338_v40  ;;  %v5989_v13 = vrot.slane %v1008_v61, 11  ;;  %v1075_v45 = vrot.slane %v7277_v14, 7  ;;  %v1347_v38 = vor.u32 %v1345_v2, %v1344_v22 }
  0x75   : > { %v6013_v6 = vrot.slane %v1350_v23, 11  ;;  %v1355_v51 = vor.u32 %v1354_v60, %v550_v1  ;;  %v1357_v25 = vrot.slane %v1354_v60, 4  ;;  %v1361_v34 = vrot.slane %v1359_v56, 7 }
  0x76   : > { %v1076_v48 = vsel %vm7330_vm14, %v5989_v13, %v1075_v45  ;;  %v1077_v39 = vrot.slane %v1075_v45, 4  ;;  %v1078_v29 = vrot.slane %v7284_v41, 7  ;;  %v1348_v52 = vsel %vm7360_vm15, %v1340_v20, %v1347_v38  ;;  %v7508_v13 = vld [vmem:[%s9751_s1 + $0xe] sm:$0x3] }
  0x77   : > { %v1356_v55 = vsel %vm7360_vm15, %v6013_v6, %v1355_v51  ;;  %v5990_v17 = vrot.slane %v1009_v30, 11  ;;  %v1082_v32 = vrot.slane %v7302_v11, 7  ;;  %6613 = vmatmul.mubr.msk.bf16.gmra.mxu0 %vm645_vm7, %v5996_v19  ;;  %v6020_v1 = vcombine.low %v1339_v37, %v1348_v52  ;;  %v7493_v19 = vld [vmem:[#allocation2 + $0xb4] sm:$0xf]  ;;  %v7516_v6 = vld [vmem:[#allocation2 + $0xc] sm:$0xf] }
  0x78   : > { %v1364_v12 = vor.u32 %v1362_v27, %v1361_v34  ;;  %v1079_v26 = vsel %vm7330_vm14, %v1077_v39, %v1078_v29  ;;  %v1085_v41 = vrot.slane %v7307_v36, 7  ;;  %v1367_v58 = vshrl.u32 %v1008_v61, 16  ;;  %v7522_v39 = vld [vmem:[#allocation2 + $0x10] sm:$0x1]  ;;  %v1741_v29 = vld [vmem:[#allocation2 + $0x20] sm:$0xf] }
  0x79   : > { %v5997_v47 = vcombine.low %v1076_v48, %v1079_v26  ;;  %v1083_v4 = vsel %vm7330_vm14, %v5990_v17, %v1082_v32  ;;  %v1084_v5 = vrot.slane %v1082_v32, 4  ;;  %6630 = vmatprep.mubr.msk.bf16.mxu1 %vm645_vm7, %v6020_v1  ;;  %v1371_v15 = vrot.slane %v575_v7, 7  ;;  %v7537_v32 = vld [vmem:[#allocation2 + $0x24] sm:$0xf]  ;;  %v7542_v26 = vld [vmem:[#allocation2 + $0x28] sm:$0x1] }
  0x7a   : > { %v1365_v10 = vsel %vm7360_vm15, %v1357_v25, %v1364_v12  ;;  %v1376_v46 = vshrl.u32 %v7478_v62, 16  ;;  %v1379_v33 = vshll.u32 %v7478_v62, 16  ;;  %v6014_v40 = vrot.slane %v1367_v58, 11 }
  0x7b   : > { %v6021_v36 = vcombine.low %v1356_v55, %v1365_v10  ;;  %6616 = vmatprep.mubr.msk.bf16.mxu0 %vm645_vm7, %v5997_v47  ;;  %v1086_v61 = vsel %vm7330_vm14, %v1084_v5, %v1085_v41  ;;  %v1384_v20 = vshrl.u32 %v1009_v30, 16  ;;  %v1372_v2 = vor.u32 %v1371_v15, %v578_v50 }
  0x7c   : > { %v5998_v22 = vcombine.low %v1083_v4, %v1086_v61  ;;  %v1374_v23 = vrot.slane %v1371_v15, 4  ;;  %v1378_v7 = vrot.slane %v1376_v46, 7  ;;  %v1388_v56 = vrot.slane %v603_v24, 7  ;;  %v1738_v24 = vld [vmem:[#allocation2 + $0x8] sm:$0xf] }
  0x7d   : > { %6631 = vmatmul.mubr.msk.bf16.gmra.mxu1 %vm645_vm7, %v6021_v36  ;;  %v6015_v60 = vrot.slane %v1384_v20, 11  ;;  %v1393_v37 = vshrl.u32 %v7493_v19, 16  ;;  %v1396_v27 = vshll.u32 %v7493_v19, 16  ;;  %v1373_v50 = vsel %vm7360_vm15, %v6014_v40, %v1372_v2  ;;  %v1744_v2 = vld [vmem:[#allocation2 + $0x38] sm:$0xf] }
  0x7e   : > { %v1381_v45 = vor.u32 %v1379_v33, %v1378_v7  ;;  %v2008_v30 = vsel %vm670_vm0, %v7202_v21, 0  ;;  %v6033_v38 = vcombine.low %v7099_v44, %v7345_v16  ;;  %v1389_v51 = vor.u32 %v1388_v56, %v606_v59 }
  0x7f   : > { %v1391_v25 = vrot.slane %v1388_v56, 4  ;;  %v1395_v34 = vrot.slane %v1393_v37, 7  ;;  %6657 = vmatpush3.bf16.msra.mxu1 %v2008_v30  ;;  %v6034_v48 = vcombine.low %v7113_v54, %v7352_v18  ;;  %6617 = vmatmul.mubr.msk.bf16.gmra.mxu0 %vm645_vm7, %v5998_v22  ;;  %v2265_v21 = vsel %vm670_vm0, %v7402_v49, 0 }
  0x80   : > { %v1382_v44 = vsel %vm7360_vm15, %v1374_v23, %v1381_v45  ;;  %vm1764_vm1 = vsmask.f32 3328  ;;  %vm1765_vm3 = vsmask.f32 7440  ;;  %6897 = vmatprep.subr.msk.bf16.mxu1 %vm670_vm0, %v7508_v13  ;;  %v1390_v54 = vsel %vm7360_vm15, %v6015_v60, %v1389_v51  ;;  %6640 = vmatprep.mubr.msk.bf16.mxu0 %vm645_vm7, %v6033_v38  ;;  %v7552_v23 = vld [vmem:[#allocation2 + $0x3c] sm:$0xf] }
  0x81   : > { %v6022_v59 = vcombine.low %v1373_v50, %v1382_v44  ;;  %v1398_v16 = vor.u32 %v1396_v27, %v1395_v34  ;;  %v1768_v18 = vshrl.u32 %v1738_v24, 16  ;;  %v1771_v52 = vshll.u32 %v1738_v24, 16  ;;  %vm7556_vm4 = vmor %vm1764_vm1, %vm1765_vm3  ;;  %v7569_v50 = vld [vmem:[%s9751_s1 + $0x10] sm:$0x3] }
  0x82   : > { %v1777_v55 = vshll.u32 %v7516_v6, 16  ;;  %v1781_v17 = vshrl.u32 %v7516_v6, 16  ;;  %v1787_v49 = vshll.u32 %v7522_v39, 16  ;;  %v1792_v41 = vshrl.u32 %v1741_v29, 16  ;;  %v1747_v44 = vld [vmem:[#allocation2 + $0x50] sm:$0xf] }
  0x83   : > { %6634 = vmatprep.mubr.msk.bf16.mxu1 %vm645_vm7, %v6022_v59  ;;  %v1399_v1 = vsel %vm7360_vm15, %v1391_v25, %v1398_v16  ;;  %v1770_v12 = vrot.slane %v1768_v18, 4  ;;  %v1795_v47 = vshll.u32 %v1741_v29, 16  ;;  %v1773_v5 = vrot.slane %v1771_v52, 5 }
  0x84   : > { %v6023_v4 = vcombine.low %v1390_v54, %v1399_v1  ;;  %v1779_v58 = vrot.slane %v1777_v55, 5  ;;  %v1783_v10 = vrot.slane %v1781_v17, 4  ;;  %v1789_v15 = vrot.slane %v1787_v49, 5 }
  0x85   : > { %v1794_v46 = vrot.slane %v1792_v41, 4  ;;  %v1797_v33 = vrot.slane %v1795_v47, 5  ;;  %v1801_v36 = vshll.u32 %v7537_v32, 16  ;;  %v1774_v61 = vor.u32 %v1773_v5, %v1770_v12  ;;  %v7595_v47 = vld [vmem:[#allocation2 + $0x58] sm:$0x1] }
  0x86   : > { %6635 = vmatmul.mubr.msk.bf16.gmra.mxu1 %vm645_vm7, %v6023_v4  ;;  %v1784_v40 = vor.u32 %v1783_v10, %v1779_v58  ;;  %v1805_v20 = vshrl.u32 %v7537_v32, 16  ;;  %v1811_v22 = vshll.u32 %v7542_v26, 16  ;;  %v9808_v7 = vmov 0 }
  0x87   : > { %v9809_v7 = vsel %vm7556_vm4, 4294967295, %v9808_v7  ;;  %v1798_v60 = vor.u32 %v1797_v33, %v1794_v46  ;;  %v1803_v56 = vrot.slane %v1801_v36, 5  ;;  %v6035_v37 = vcombine.low %v7145_v28, %v7391_v9  ;;  %6641 = vmatmul.mubr.msk.bf16.vlgmr.msra.gmra.mxu0 %vm645_vm7, %v6034_v48  ;;  %v7575_v28 = vld [vmem:[#allocation2 + $0x40] sm:$0x1] }
  0x88   : > { %9810 = vst [vmem:[#allocation8_spill] sm:$0xff] %v9809_v7  ;;  %v6036_v27 = vcombine.low %v7182_v3, %v7408_v63  ;;  %v1775_v45 = vrot.slane %v1774_v61, 4  ;;  %v1785_v30 = vrot.slane %v1784_v40, 4  ;;  %v1807_v38 = vrot.slane %v1805_v20, 4  ;;  %6675 = vmatpush3.bf16.msra.mxu0 %v2265_v21  ;;  %v7583_v21 = vld [vmem:[#allocation2 + $0x54] sm:$0xf] }
  0x89   : > { %v1813_v24 = vrot.slane %v1811_v22, 5  ;;  %v1799_v51 = vrot.slane %v1798_v60, 4  ;;  %6644 = vmatprep.mubr.msk.bf16.mxu0 %vm645_vm7, %v6035_v37  ;;  %v1816_v3 = vshrl.u32 %v1744_v2, 16  ;;  %v1819_v9 = vshll.u32 %v1744_v2, 16  ;;  %6898 = vmatprep.subr.msk.bf16.mxu0 %vm670_vm0, %v7569_v50  ;;  %v1750_v60 = vld [vmem:[#allocation2 + $0x68] sm:$0xf] }
  0x8a   : > { %v1825_v63 = vshll.u32 %v7552_v23, 16  ;;  %v1780_v25 = vsel %vm7556_vm4, %v1775_v45, %v1779_v58  ;;  %v1790_v34 = vsel %vm7556_vm4, %v1785_v30, %v1789_v15  ;;  %v1808_v48 = vor.u32 %v1807_v38, %v1803_v56  ;;  %v7607_v38 = vld [vmem:[#allocation2 + $0x6c] sm:$0xf] }
  0x8b   : > { %v1829_v29 = vshrl.u32 %v7552_v23, 16  ;;  %v6050_v59 = vcombine.low %v1780_v25, %v1790_v34  ;;  %v1804_v54 = vsel %vm7556_vm4, %v1799_v51, %v1803_v56  ;;  %v1818_v16 = vrot.slane %v1816_v3, 4 }
  0x8c   : > { %v1821_v18 = vrot.slane %v1819_v9, 5  ;;  %v1809_v52 = vrot.slane %v1808_v48, 4  ;;  %v1827_v49 = vrot.slane %v1825_v63, 5  ;;  %v1835_v12 = vshll.u32 %v7575_v28, 16  ;;  %v7616_v9 = vld [vmem:[#allocation2 + $0x70] sm:$0x1] }
  0x8d   : > { %v1831_v1 = vrot.slane %v1829_v29, 4  ;;  %6658 = vmatprep.mubr.msk.bf16.mxu1 %vm645_vm7, %v6050_v59  ;;  %v1840_v4 = vshrl.u32 %v1747_v44, 16  ;;  %v1843_v5 = vshll.u32 %v1747_v44, 16  ;;  %v1849_v58 = vshll.u32 %v7583_v21, 16  ;;  %v1753_v59 = vld [vmem:[#allocation2 + $0x80] sm:$0xf] }
  0x8e   : > { %v1822_v41 = vor.u32 %v1821_v18, %v1818_v16  ;;  %v1814_v10 = vsel %vm7556_vm4, %v1809_v52, %v1813_v24  ;;  %v1837_v46 = vrot.slane %v1835_v12, 5  ;;  %v1853_v33 = vshrl.u32 %v7583_v21, 16 }
  0x8f   : > { %v1832_v15 = vor.u32 %v1831_v1, %v1827_v49  ;;  %v6051_v61 = vcombine.low %v1804_v54, %v1814_v10  ;;  %v1842_v22 = vrot.slane %v1840_v4, 4  ;;  %v1845_v2 = vrot.slane %v1843_v5, 5  ;;  %6645 = vmatmul.mubr.msk.bf16.gmra.mxu0 %vm645_vm7, %v6036_v27  ;;  %v7631_v4 = vld [vmem:[#allocation2 + $0x88] sm:$0x1] }
  0x90   : > { %v1823_v40 = vrot.slane %v1822_v41, 4  ;;  %v1851_v37 = vrot.slane %v1849_v58, 5  ;;  %v1855_v45 = vrot.slane %v1853_v33, 4  ;;  %v1859_v30 = vshll.u32 %v7595_v47, 16 }
  0x91   : > { %v1833_v56 = vrot.slane %v1832_v15, 4  ;;  %6659 = vmatmul.mubr.msk.bf16.vlgmr.msra.gmra.mxu1 %vm645_vm7, %v6051_v61  ;;  %v1846_v51 = vor.u32 %v1845_v2, %v1842_v22  ;;  %v6037_v27 = vcombine.low %v7229_v35, %v7435_v43  ;;  %v6038_v3 = vcombine.low %v7256_v31, %v7451_v57 }
  0x92   : > { %v1828_v24 = vsel %vm7556_vm4, %v1823_v40, %v1827_v49  ;;  %v1856_v34 = vor.u32 %v1855_v45, %v1851_v37  ;;  %v1861_v48 = vrot.slane %v1859_v30, 5  ;;  %v1864_v44 = vshrl.u32 %v1750_v60, 16  ;;  %v7624_v49 = vld [vmem:[#allocation2 + $0x84] sm:$0xf] }
  0x93   : > { %v1838_v25 = vsel %vm7556_vm4, %v1833_v56, %v1837_v46  ;;  %v1847_v16 = vrot.slane %v1846_v51, 4  ;;  %6648 = vmatprep.mubr.msk.bf16.mxu0 %vm645_vm7, %v6037_v27  ;;  %v1867_v18 = vshll.u32 %v1750_v60, 16  ;;  %v1873_v52 = vshll.u32 %v7607_v38, 16  ;;  %v1756_v56 = vld [vmem:[#allocation2 + $0x98] sm:$0xf] }
  0x94   : > { %v6052_v54 = vcombine.low %v1828_v24, %v1838_v25  ;;  %v1857_v35 = vrot.slane %v1856_v34, 4  ;;  %v1866_v43 = vrot.slane %v1864_v44, 4  ;;  %v1877_v31 = vshrl.u32 %v7607_v38, 16  ;;  %v7641_v51 = vld [vmem:[#allocation2 + $0x9c] sm:$0xf] }
  0x95   : > { %v1883_v57 = vshll.u32 %v7616_v9, 16  ;;  %v1852_v1 = vsel %vm7556_vm4, %v1847_v16, %v1851_v37  ;;  %v1869_v12 = vrot.slane %v1867_v18, 5  ;;  %v1875_v41 = vrot.slane %v1873_v52, 5  ;;  %v7655_v18 = vld [vmem:[#allocation2 + $0xa0] sm:$0x1] }
  0x96   : > { %6662 = vmatprep.mubr.msk.bf16.mxu1 %vm645_vm7, %v6052_v54  ;;  %v1888_v5 = vshrl.u32 %v1753_v59, 16  ;;  %v1862_v10 = vsel %vm7556_vm4, %v1857_v35, %v1861_v48  ;;  %v1879_v15 = vrot.slane %v1877_v31, 4  ;;  %v1891_v61 = vshll.u32 %v1753_v59, 16 }
  0x97   : > { %v1885_v46 = vrot.slane %v1883_v57, 5  ;;  %v6053_v40 = vcombine.low %v1852_v1, %v1862_v10  ;;  %v1870_v22 = vor.u32 %v1869_v12, %v1866_v43  ;;  %v1897_v60 = vshll.u32 %v7624_v49, 16  ;;  %6649 = vmatmul.mubr.msk.bf16.gmra.mxu0 %vm645_vm7, %v6038_v3  ;;  %v1759_v1 = vld [vmem:[#allocation2 + $0xb0] sm:$0xf]  ;;  %v7661_v12 = vld [vmem:[#allocation2 + $0xb4] sm:$0xf] }
  0x98   : > { %v1890_v2 = vrot.slane %v1888_v5, 4  ;;  %v1880_v37 = vor.u32 %v1879_v15, %v1875_v41  ;;  %v1893_v45 = vrot.slane %v1891_v61, 5  ;;  %v1901_v30 = vshrl.u32 %v7624_v49, 16 }
  0x99   : > { %v1907_v24 = vshll.u32 %v7631_v4, 16  ;;  %6663 = vmatmul.mubr.msk.bf16.gmra.mxu1 %vm645_vm7, %v6053_v40  ;;  %v1871_v27 = vrot.slane %v1870_v22, 4  ;;  %v1899_v25 = vrot.slane %v1897_v60, 5  ;;  %v6039_v34 = vcombine.low %v7277_v14, %v7478_v62 }
  0x9a   : > { %v6040_v3 = vcombine.low %v7302_v11, %v7493_v19  ;;  %v1881_v48 = vrot.slane %v1880_v37, 4  ;;  %v1894_v44 = vor.u32 %v1893_v45, %v1890_v2  ;;  %v1903_v59 = vrot.slane %v1901_v30, 4 }
  0x9b   : > { %v1909_v54 = vrot.slane %v1907_v24, 5  ;;  %v1876_v16 = vsel %vm7556_vm4, %v1871_v27, %v1875_v41  ;;  %6652 = vmatprep.mubr.msk.bf16.mxu0 %vm645_vm7, %v6039_v34  ;;  %v1912_v35 = vshrl.u32 %v1756_v56, 16  ;;  %v1915_v43 = vshll.u32 %v1756_v56, 16  ;;  %v7671_v56 = vld [vmem:[#allocation2 + $0xb8] sm:$0x1] }
  0x9c   : > { %v1921_v14 = vshll.u32 %v7641_v51, 16  ;;  %v1886_v11 = vsel %vm7556_vm4, %v1881_v48, %v1885_v46  ;;  %v1895_v62 = vrot.slane %v1894_v44, 4  ;;  %v1904_v19 = vor.u32 %v1903_v59, %v1899_v25 }
  0x9d   : > { %v1925_v57 = vshrl.u32 %v7641_v51, 16  ;;  %v6054_v5 = vcombine.low %v1876_v16, %v1886_v11  ;;  %v1914_v41 = vrot.slane %v1912_v35, 4  ;;  %v1917_v10 = vrot.slane %v1915_v43, 5 }
  0x9e   : > { %v1923_v15 = vrot.slane %v1921_v14, 5  ;;  %v1900_v61 = vsel %vm7556_vm4, %v1895_v62, %v1899_v25  ;;  %v1905_v40 = vrot.slane %v1904_v19, 4  ;;  %v1931_v22 = vshll.u32 %v7655_v18, 16 }
  0x9f   : > { %v1927_v46 = vrot.slane %v1925_v57, 4  ;;  %6666 = vmatprep.mubr.msk.bf16.mxu1 %vm645_vm7, %v6054_v5  ;;  %v1918_v2 = vor.u32 %v1917_v10, %v1914_v41  ;;  %v1936_v37 = vshrl.u32 %v1759_v1, 16  ;;  %v1939_v45 = vshll.u32 %v1759_v1, 16  ;;  %6653 = vmatmul.mubr.msk.bf16.gmra.mxu0 %vm645_vm7, %v6040_v3 }
  0xa0   : > { %v1945_v24 = vshll.u32 %v7661_v12, 16  ;;  %v1910_v27 = vsel %vm7556_vm4, %v1905_v40, %v1909_v54  ;;  %v1933_v34 = vrot.slane %v1931_v22, 5  ;;  %v1949_v48 = vshrl.u32 %v7661_v12, 16 }
  0xa1   : > { %v1928_v25 = vor.u32 %v1927_v46, %v1923_v15  ;;  %v6055_v44 = vcombine.low %v1900_v61, %v1910_v27  ;;  %v1919_v59 = vrot.slane %v1918_v2, 4  ;;  %v1938_v16 = vrot.slane %v1936_v37, 4  ;;  %v2123_v61 = vld [vmem:[#allocation2 + $0x8] sm:$0xe]  ;;  %v2124_v37 = vld [vmem:[#allocation2 + $0x20] sm:$0xe] }
  0xa2   : > { %v1941_v35 = vrot.slane %v1939_v45, 5  ;;  %v1947_v11 = vrot.slane %v1945_v24, 5  ;;  %v1951_v62 = vrot.slane %v1949_v48, 4  ;;  %v1955_v19 = vshll.u32 %v7671_v56, 16 }
  0xa3   : > { %v1929_v43 = vrot.slane %v1928_v25, 4  ;;  %6667 = vmatmul.mubr.msk.bf16.gmra.mxu1 %vm645_vm7, %v6055_v44  ;;  %v1924_v3 = vsel %vm7556_vm4, %v1919_v59, %v1923_v15  ;;  %v2626_v1 = vsel %vm670_vm0, %v7508_v13, 0  ;;  %vm2157_vm5 = vcmask 1042432  }
  0xa4   : > { %v1942_v54 = vor.u32 %v1941_v35, %v1938_v16  ;;  %v1952_v41 = vor.u32 %v1951_v62, %v1947_v11  ;;  %v1957_v10 = vrot.slane %v1955_v19, 5  ;;  %6693 = vmatpush3.bf16.msra.mxu1 %v2626_v1  ;;  %vm2158_vm6 = vcmask 1046532   ;;  %v7709_v19 = vld [vmem:[#allocation2 + $0x10] sm:$0x3] }
  0xa5   : > { %v1934_v5 = vsel %vm7556_vm4, %v1929_v43, %v1933_v34  ;;  %vm7690_vm10 = vmor %vm2157_vm5, %vm2158_vm6  ;;  %v9811_v22 = vmov 0  ;;  %v6067_v15 = vrot.slane %v2123_v61, 9  ;;  %v2162_v2 = vrot.slane %v7516_v6, 5 }
  0xa6   : > { %v6056_v40 = vcombine.low %v1924_v3, %v1934_v5  ;;  %v1943_v46 = vrot.slane %v1942_v54, 4  ;;  %v9812_v22 = vsel %vm7690_vm10, 4294967295, %v9811_v22  ;;  %v1953_v13 = vrot.slane %v1952_v41, 4 }
  0xa7   : > { %9813 = vst [vmem:[#allocation9_spill] sm:$0xff] %v9812_v22  ;;  %v2165_v45 = vrot.slane %v7522_v39, 5  ;;  %v6068_v27 = vrot.slane %v2124_v37, 9  ;;  %v2169_v25 = vrot.slane %v7537_v32, 5  ;;  %v2163_v44 = vsel %vm7690_vm10, %v6067_v15, %v2162_v2 }
  0xa8   : > { %6670 = vmatprep.mubr.msk.bf16.mxu1 %vm645_vm7, %v6056_v40  ;;  %v1948_v34 = vsel %vm7556_vm4, %v1943_v46, %v1947_v11  ;;  %v2164_v59 = vrot.slane %v2162_v2, 4  ;;  %v2172_v16 = vrot.slane %v7542_v26, 5  ;;  %v1958_v35 = vsel %vm7556_vm4, %v1953_v13, %v1957_v10  ;;  %v7723_v13 = vld [vmem:[#allocation2 + $0x28] sm:$0x3] }
  0xa9   : > { %v2170_v39 = vsel %vm7690_vm10, %v6068_v27, %v2169_v25  ;;  %v2171_v43 = vrot.slane %v2169_v25, 4  ;;  %v2872_v62 = vsel %vm670_vm0, %v7569_v50, 0  ;;  %v6057_v3 = vcombine.low %v1948_v34, %v1958_v35 }
  0xaa   : > { %v2166_v11 = vsel %vm7690_vm10, %v2164_v59, %v2165_v45  ;;  %vm2390_vm11 = vsmask.f32 2304  ;;  %vm2391_vm12 = vsmask.f32 6416  ;;  %v2394_v1 = vshrl.u32 %v2123_v61, 16 }
  0xab   : > { %v6075_v54 = vcombine.low %v2163_v44, %v2166_v11  ;;  %v2173_v26 = vsel %vm7690_vm10, %v2171_v43, %v2172_v16  ;;  %v2397_v5 = vshll.u32 %v2123_v61, 16  ;;  %6671 = vmatmul.mubr.msk.bf16.gmra.mxu1 %vm645_vm7, %v6057_v3  ;;  %v2402_v50 = vrot.slane %v1781_v17, 5  ;;  %vm7732_vm13 = vmor %vm2390_vm11, %vm2391_vm12 }
  0xac   : > { %v6076_v41 = vcombine.low %v2170_v39, %v2173_v26  ;;  %v2403_v10 = vrot.slane %v1777_v55, 6  ;;  %v2408_v40 = vshrl.u32 %v7709_v19, 16  ;;  %v2396_v46 = vrot.slane %v2394_v1, 5 }
  0xad   : > { %6676 = vmatprep.mubr.msk.bf16.mxu0 %vm645_vm7, %v6075_v54  ;;  %v2399_v15 = vrot.slane %v2397_v5, 6  ;;  %v2411_v2 = vshll.u32 %v7709_v19, 16  ;;  %v2417_v61 = vshrl.u32 %v2124_v37, 16  ;;  %v2420_v25 = vshll.u32 %v2124_v37, 16 }
  0xae   : > { %6677 = vmatmul.mubr.msk.bf16.vlgmr.msra.gmra.mxu0 %vm645_vm7, %v6076_v41  ;;  %v2404_v45 = vor.u32 %v2403_v10, %v2402_v50  ;;  %v2410_v27 = vrot.slane %v2408_v40, 5  ;;  %v2425_v17 = vrot.slane %v1805_v20, 5  ;;  %v2426_v59 = vrot.slane %v1801_v36, 6  ;;  %v2125_v20 = vld [vmem:[#allocation2 + $0x38] sm:$0xe] }
  0xaf   : > { %6711 = vmatpush3.bf16.msra.mxu0 %v2872_v62  ;;  %v2400_v55 = vor.u32 %v2399_v15, %v2396_v46  ;;  %v2413_v34 = vrot.slane %v2411_v2, 6  ;;  %v2419_v44 = vrot.slane %v2417_v61, 5  ;;  %v9814_v16 = vmov 0 }
  0xb0   : > { %v9815_v16 = vsel %vm7732_vm13, 4294967295, %v9814_v16  ;;  %v2406_v35 = vrot.slane %v2404_v45, 4  ;;  %v2422_v39 = vrot.slane %v2420_v25, 6  ;;  %v2431_v37 = vshrl.u32 %v7723_v13, 16 }
  0xb1   : > { %9816 = vst [vmem:[#allocation10_spill] sm:$0xff] %v9815_v16  ;;  %v2434_v43 = vshll.u32 %v7723_v13, 16  ;;  %v2401_v62 = vrot.slane %v2400_v55, 4  ;;  %v2414_v3 = vor.u32 %v2413_v34, %v2410_v27  ;;  %v2427_v11 = vor.u32 %v2426_v59, %v2425_v17  ;;  %v2126_v27 = vld [vmem:[#allocation2 + $0x50] sm:$0xe] }
  0xb2   : > { %v6069_v54 = vrot.slane %v2125_v20, 9  ;;  %v2423_v26 = vor.u32 %v2422_v39, %v2419_v44  ;;  %v2433_v1 = vrot.slane %v2431_v37, 5  ;;  %v2176_v5 = vrot.slane %v7552_v23, 5  ;;  %v7753_v44 = vld [vmem:[#allocation2 + $0x40] sm:$0x3] }
  0xb3   : > { %v2436_v36 = vrot.slane %v2434_v43, 6  ;;  %v2405_v41 = vsel %vm7732_vm13, %v2401_v62, %v2404_v45  ;;  %v2415_v50 = vsel %vm7732_vm13, %v2406_v35, %v2414_v3  ;;  %v2429_v10 = vrot.slane %v2427_v11, 4 }
  0xb4   : > { %v2179_v40 = vrot.slane %v7575_v28, 5  ;;  %v6092_v46 = vcombine.low %v2405_v41, %v2415_v50  ;;  %v2424_v15 = vrot.slane %v2423_v26, 4  ;;  %v2177_v61 = vsel %vm7690_vm10, %v6069_v54, %v2176_v5  ;;  %v7769_v50 = vld [vmem:[#allocation2 + $0x58] sm:$0x3] }
  0xb5   : > { %v2437_v2 = vor.u32 %v2436_v36, %v2433_v1  ;;  %v2178_v25 = vrot.slane %v2176_v5, 4  ;;  %v6070_v17 = vrot.slane %v2126_v27, 9  ;;  %v2183_v55 = vrot.slane %v7583_v21, 5 }
  0xb6   : > { %v2186_v34 = vrot.slane %v7595_v47, 5  ;;  %6694 = vmatprep.mubr.msk.bf16.mxu1 %vm645_vm7, %v6092_v46  ;;  %v2428_v45 = vsel %vm7732_vm13, %v2424_v15, %v2427_v11  ;;  %v2440_v59 = vshrl.u32 %v2125_v20, 16  ;;  %v2443_v35 = vshll.u32 %v2125_v20, 16 }
  0xb7   : > { %v2438_v28 = vsel %vm7732_vm13, %v2429_v10, %v2437_v2  ;;  %v2180_v37 = vsel %vm7690_vm10, %v2178_v25, %v2179_v40  ;;  %v2184_v43 = vsel %vm7690_vm10, %v6070_v17, %v2183_v55  ;;  %v2185_v47 = vrot.slane %v2183_v55, 4 }
  0xb8   : > { %v6093_v39 = vcombine.low %v2428_v45, %v2438_v28  ;;  %v6077_v62 = vcombine.low %v2177_v61, %v2180_v37  ;;  %v2442_v3 = vrot.slane %v2440_v59, 5  ;;  %v2445_v54 = vrot.slane %v2443_v35, 6  ;;  %v2127_v28 = vld [vmem:[#allocation2 + $0x68] sm:$0xe] }
  0xb9   : > { %v2448_v11 = vrot.slane %v1829_v29, 5  ;;  %v2187_v26 = vsel %vm7690_vm10, %v2185_v47, %v2186_v34  ;;  %v2449_v20 = vrot.slane %v1825_v63, 6  ;;  %v2454_v1 = vshrl.u32 %v7753_v44, 16 }
  0xba   : > { %6695 = vmatmul.mubr.msk.bf16.vlgmr.msra.gmra.mxu1 %vm645_vm7, %v6093_v39  ;;  %v2457_v36 = vshll.u32 %v7753_v44, 16  ;;  %6680 = vmatprep.mubr.msk.bf16.mxu0 %vm645_vm7, %v6077_v62  ;;  %v6078_v5 = vcombine.low %v2184_v43, %v2187_v26  ;;  %v2446_v41 = vor.u32 %v2445_v54, %v2442_v3  ;;  %v2463_v10 = vshrl.u32 %v2126_v27, 16  ;;  %v2128_v26 = vld [vmem:[#allocation2 + $0x80] sm:$0xe] }
  0xbb   : > { %v2466_v29 = vshll.u32 %v2126_v27, 16  ;;  %v2450_v40 = vor.u32 %v2449_v20, %v2448_v11  ;;  %v2456_v46 = vrot.slane %v2454_v1, 5  ;;  %v2471_v2 = vrot.slane %v1853_v33, 5 }
  0xbc   : > { %v2459_v15 = vrot.slane %v2457_v36, 6  ;;  %6681 = vmatmul.mubr.msk.bf16.gmra.mxu0 %vm645_vm7, %v6078_v5  ;;  %v2447_v63 = vrot.slane %v2446_v41, 4  ;;  %v2465_v61 = vrot.slane %v2463_v10, 5  ;;  %v2472_v17 = vrot.slane %v1849_v58, 6 }
  0xbd   : > { %v2468_v25 = vrot.slane %v2466_v29, 6  ;;  %v2452_v55 = vrot.slane %v2450_v40, 4  ;;  %v2477_v45 = vshrl.u32 %v7769_v50, 16  ;;  %v2480_v27 = vshll.u32 %v7769_v50, 16 }
  0xbe   : > { %v2460_v34 = vor.u32 %v2459_v15, %v2456_v46  ;;  %v2451_v59 = vsel %vm7732_vm13, %v2447_v63, %v2450_v40  ;;  %v2473_v33 = vor.u32 %v2472_v17, %v2471_v2  ;;  %v6071_v39 = vrot.slane %v2127_v28, 9  ;;  %v7791_v40 = vld [vmem:[#allocation2 + $0x70] sm:$0x3] }
  0xbf   : > { %v2469_v35 = vor.u32 %v2468_v25, %v2465_v61  ;;  %v2479_v43 = vrot.slane %v2477_v45, 5  ;;  %v2482_v47 = vrot.slane %v2480_v27, 6  ;;  %v2190_v58 = vrot.slane %v7607_v38, 5 }
  0xc0   : > { %v2461_v37 = vsel %vm7732_vm13, %v2452_v55, %v2460_v34  ;;  %v2475_v54 = vrot.slane %v2473_v33, 4  ;;  %v2193_v11 = vrot.slane %v7616_v9, 5  ;;  %v6072_v5 = vrot.slane %v2128_v26, 9 }
  0xc1   : > { %v6094_v62 = vcombine.low %v2451_v59, %v2461_v37  ;;  %v2470_v3 = vrot.slane %v2469_v35, 4  ;;  %v2483_v20 = vor.u32 %v2482_v47, %v2479_v43  ;;  %v2191_v1 = vsel %vm7690_vm10, %v6071_v39, %v2190_v58  ;;  %v7809_v59 = vld [vmem:[#allocation2 + $0x88] sm:$0x3] }
  0xc2   : > { %v2192_v36 = vrot.slane %v2190_v58, 4  ;;  %v2197_v10 = vrot.slane %v7624_v49, 5  ;;  %v2200_v29 = vrot.slane %v7631_v4, 5  ;;  %v2486_v46 = vshrl.u32 %v2127_v28, 16 }
  0xc3   : > { %6698 = vmatprep.mubr.msk.bf16.mxu1 %vm645_vm7, %v6094_v62  ;;  %v2474_v41 = vsel %vm7732_vm13, %v2470_v3, %v2473_v33  ;;  %v2484_v9 = vsel %vm7732_vm13, %v2475_v54, %v2483_v20  ;;  %v2489_v2 = vshll.u32 %v2127_v28, 16  ;;  %v2494_v63 = vrot.slane %v1877_v31, 5 }
  0xc4   : > { %v2194_v15 = vsel %vm7690_vm10, %v2192_v36, %v2193_v11  ;;  %v6095_v61 = vcombine.low %v2474_v41, %v2484_v9  ;;  %v2198_v17 = vsel %vm7690_vm10, %v6072_v5, %v2197_v10  ;;  %v2199_v55 = vrot.slane %v2197_v10, 4 }
  0xc5   : > { %v6079_v25 = vcombine.low %v2191_v1, %v2194_v15  ;;  %v2488_v4 = vrot.slane %v2486_v46, 5  ;;  %v2491_v34 = vrot.slane %v2489_v2, 6  ;;  %v2495_v45 = vrot.slane %v1873_v52, 6 }
  0xc6   : > { %v2500_v27 = vshrl.u32 %v7791_v40, 16  ;;  %6699 = vmatmul.mubr.msk.bf16.gmra.mxu1 %vm645_vm7, %v6095_v61  ;;  %v2201_v31 = vsel %vm7690_vm10, %v2199_v55, %v2200_v29  ;;  %v2503_v28 = vshll.u32 %v7791_v40, 16  ;;  %v2509_v35 = vshrl.u32 %v2128_v26, 16 }
  0xc7   : > { %6684 = vmatprep.mubr.msk.bf16.mxu0 %vm645_vm7, %v6079_v25  ;;  %v2512_v33 = vshll.u32 %v2128_v26, 16  ;;  %v6080_v39 = vcombine.low %v2198_v17, %v2201_v31  ;;  %v2492_v37 = vor.u32 %v2491_v34, %v2488_v4  ;;  %v2496_v43 = vor.u32 %v2495_v45, %v2494_v63  ;;  %v2129_v26 = vld [vmem:[#allocation2 + $0x98] sm:$0xe]  ;;  %v2130_v4 = vld [vmem:[#allocation2 + $0xb0] sm:$0xe] }
  0xc8   : > { %v2502_v47 = vrot.slane %v2500_v27, 5  ;;  %v2505_v52 = vrot.slane %v2503_v28, 6  ;;  %v2511_v58 = vrot.slane %v2509_v35, 5  ;;  %v2517_v3 = vrot.slane %v1901_v30, 5  ;;  %v7833_v35 = vld [vmem:[#allocation2 + $0xa0] sm:$0x3] }
  0xc9   : > { %v2514_v62 = vrot.slane %v2512_v33, 6  ;;  %6685 = vmatmul.mubr.msk.bf16.gmra.mxu0 %vm645_vm7, %v6080_v39  ;;  %v2493_v54 = vrot.slane %v2492_v37, 4  ;;  %v2498_v11 = vrot.slane %v2496_v43, 4  ;;  %v2518_v20 = vrot.slane %v1897_v60, 6 }
  0xca   : > { %v2523_v1 = vshrl.u32 %v7809_v59, 16  ;;  %v2506_v36 = vor.u32 %v2505_v52, %v2502_v47  ;;  %v2526_v41 = vshll.u32 %v7809_v59, 16  ;;  %v6073_v10 = vrot.slane %v2129_v26, 9 }
  0xcb   : > { %v2515_v5 = vor.u32 %v2514_v62, %v2511_v58  ;;  %v2497_v29 = vsel %vm7732_vm13, %v2493_v54, %v2496_v43  ;;  %v2519_v46 = vor.u32 %v2518_v20, %v2517_v3  ;;  %v2204_v9 = vrot.slane %v7641_v51, 5 }
  0xcc   : > { %v2525_v30 = vrot.slane %v2523_v1, 5  ;;  %v2507_v15 = vsel %vm7732_vm13, %v2498_v11, %v2506_v36  ;;  %v2528_v60 = vrot.slane %v2526_v41, 6  ;;  %v2207_v63 = vrot.slane %v7655_v18, 5 }
  0xcd   : > { %v2516_v2 = vrot.slane %v2515_v5, 4  ;;  %v6096_v61 = vcombine.low %v2497_v29, %v2507_v15  ;;  %v2521_v25 = vrot.slane %v2519_v46, 4  ;;  %v2205_v17 = vsel %vm7690_vm10, %v6073_v10, %v2204_v9  ;;  %v7849_v5 = vld [vmem:[#allocation2 + $0xb8] sm:$0x3] }
  0xce   : > { %v2206_v55 = vrot.slane %v2204_v9, 4  ;;  %v2529_v45 = vor.u32 %v2528_v60, %v2525_v30  ;;  %v6074_v27 = vrot.slane %v2130_v4, 9  ;;  %v2211_v31 = vrot.slane %v7661_v12, 5  ;;  %v2741_v9 = vld [vmem:[#allocation2 + $0x8] sm:$0xc] }
  0xcf   : > { %v2520_v34 = vsel %vm7732_vm13, %v2516_v2, %v2519_v46  ;;  %6702 = vmatprep.mubr.msk.bf16.mxu1 %vm645_vm7, %v6096_v61  ;;  %v2214_v18 = vrot.slane %v7671_v56, 5  ;;  %v2532_v33 = vshrl.u32 %v2129_v26, 16  ;;  %v2535_v39 = vshll.u32 %v2129_v26, 16 }
  0xd0   : > { %v2208_v28 = vsel %vm7690_vm10, %v2206_v55, %v2207_v63  ;;  %v2530_v37 = vsel %vm7732_vm13, %v2521_v25, %v2529_v45  ;;  %v2212_v47 = vsel %vm7690_vm10, %v6074_v27, %v2211_v31  ;;  %v2213_v52 = vrot.slane %v2211_v31, 4  ;;  %v2742_v45 = vld [vmem:[#allocation2 + $0x20] sm:$0xc] }
  0xd1   : > { %v6081_v43 = vcombine.low %v2205_v17, %v2208_v28  ;;  %v6097_v58 = vcombine.low %v2520_v34, %v2530_v37  ;;  %v2534_v62 = vrot.slane %v2532_v33, 5  ;;  %v2537_v3 = vrot.slane %v2535_v39, 6 }
  0xd2   : > { %v2540_v54 = vrot.slane %v1925_v57, 5  ;;  %v2215_v56 = vsel %vm7690_vm10, %v2213_v52, %v2214_v18  ;;  %v2541_v11 = vrot.slane %v1921_v14, 6  ;;  %v2546_v20 = vshrl.u32 %v7833_v35, 16  ;;  %v2743_v18 = vld [vmem:[#allocation2 + $0x38] sm:$0xc] }
  0xd3   : > { %6688 = vmatprep.mubr.msk.bf16.mxu0 %vm645_vm7, %v6081_v43  ;;  %v2549_v1 = vshll.u32 %v7833_v35, 16  ;;  %6703 = vmatmul.mubr.msk.bf16.gmra.mxu1 %vm645_vm7, %v6097_v58  ;;  %v6082_v26 = vcombine.low %v2212_v47, %v2215_v56  ;;  %v2538_v36 = vor.u32 %v2537_v3, %v2534_v62  ;;  %v2555_v41 = vshrl.u32 %v2130_v4, 16 }
  0xd4   : > { %v2558_v57 = vshll.u32 %v2130_v4, 16  ;;  %v2542_v10 = vor.u32 %v2541_v11, %v2540_v54  ;;  %v2548_v29 = vrot.slane %v2546_v20, 5  ;;  %v2563_v30 = vrot.slane %v1949_v48, 5 }
  0xd5   : > { %v2551_v46 = vrot.slane %v2549_v1, 6  ;;  %6689 = vmatmul.mubr.msk.bf16.gmra.mxu0 %vm645_vm7, %v6082_v26  ;;  %v2539_v14 = vrot.slane %v2538_v36, 4  ;;  %v2557_v15 = vrot.slane %v2555_v41, 5  ;;  %v2564_v60 = vrot.slane %v1945_v24, 6  ;;  %v2744_v26 = vld [vmem:[#allocation2 + $0x50] sm:$0xc] }
  0xd6   : > { %v2560_v2 = vrot.slane %v2558_v57, 6  ;;  %v2544_v63 = vrot.slane %v2542_v10, 4  ;;  %v2569_v25 = vshrl.u32 %v7849_v5, 16  ;;  %v2572_v17 = vshll.u32 %v7849_v5, 16 }
  0xd7   : > { %v2552_v61 = vor.u32 %v2551_v46, %v2548_v29  ;;  %v2543_v55 = vsel %vm7732_vm13, %v2539_v14, %v2542_v10  ;;  %v2565_v48 = vor.u32 %v2564_v60, %v2563_v30  ;;  %v6109_v34 = vrot.slane %v2741_v9, 10  ;;  %v2745_v10 = vld [vmem:[#allocation2 + $0x68] sm:$0xc] }
  0xd8   : > { %v2561_v4 = vor.u32 %v2560_v2, %v2557_v15  ;;  %v2571_v31 = vrot.slane %v2569_v25, 5  ;;  %v2574_v28 = vrot.slane %v2572_v17, 6  ;;  %v2769_v24 = vrot.slane %v7516_v6, 6 }
  0xd9   : > { %v2553_v27 = vsel %vm7732_vm13, %v2544_v63, %v2552_v61  ;;  %v2567_v37 = vrot.slane %v2565_v48, 4  ;;  %v2772_v43 = vrot.slane %v7709_v19, 6  ;;  %v6110_v62 = vrot.slane %v2742_v45, 10 }
  0xda   : > { %v6098_v33 = vcombine.low %v2543_v55, %v2553_v27  ;;  %v2562_v39 = vrot.slane %v2561_v4, 4  ;;  %v2575_v47 = vor.u32 %v2574_v28, %v2571_v31  ;;  %v2770_v52 = vsel %vm7109_vm8, %v6109_v34, %v2769_v24  ;;  %v2746_v4 = vld [vmem:[#allocation2 + $0x80] sm:$0xc] }
  0xdb   : > { %v2771_v58 = vrot.slane %v2769_v24, 4  ;;  %v2776_v54 = vrot.slane %v7537_v32, 6  ;;  %v2779_v6 = vrot.slane %v7723_v13, 6  ;;  %v6111_v56 = vrot.slane %v2743_v18, 10 }
  0xdc   : > { %6706 = vmatprep.mubr.msk.bf16.mxu1 %vm645_vm7, %v6098_v33  ;;  %v2566_v3 = vsel %vm7732_vm13, %v2562_v39, %v2565_v48  ;;  %v2576_v11 = vsel %vm7732_vm13, %v2567_v37, %v2575_v47  ;;  %v2783_v20 = vrot.slane %v7552_v23, 6  ;;  %v2786_v1 = vrot.slane %v7753_v44, 6  ;;  %v2747_v48 = vld [vmem:[#allocation2 + $0x98] sm:$0xc] }
  0xdd   : > { %v2773_v19 = vsel %vm7109_vm8, %v2771_v58, %v2772_v43  ;;  %v6099_v36 = vcombine.low %v2566_v3, %v2576_v11  ;;  %v2777_v57 = vsel %vm7109_vm8, %v6110_v62, %v2776_v54  ;;  %v2778_v32 = vrot.slane %v2776_v54, 4  ;;  %v2748_v43 = vld [vmem:[#allocation2 + $0xb0] sm:$0xc] }
  0xde   : > { %v6117_v41 = vcombine.low %v2770_v52, %v2773_v19  ;;  %v2784_v13 = vsel %vm7109_vm8, %v6111_v56, %v2783_v20  ;;  %v2785_v29 = vrot.slane %v2783_v20, 4  ;;  %v2790_v46 = vrot.slane %v7583_v21, 6 }
  0xdf   : > { %6707 = vmatmul.mubr.msk.bf16.gmra.mxu1 %vm645_vm7, %v6099_v36  ;;  %v2780_v23 = vsel %vm7109_vm8, %v2778_v32, %v2779_v6  ;;  %v6112_v44 = vrot.slane %v2744_v26, 10  ;;  %v2793_v30 = vrot.slane %v7769_v50, 6  ;;  %v2797_v9 = vrot.slane %v7607_v38, 6 }
  0xe0   : > { %6712 = vmatprep.mubr.msk.bf16.mxu0 %vm645_vm7, %v6117_v41  ;;  %v6118_v14 = vcombine.low %v2777_v57, %v2780_v23  ;;  %v2787_v15 = vsel %vm7109_vm8, %v2785_v29, %v2786_v1  ;;  %v2792_v2 = vrot.slane %v2790_v46, 4  ;;  %v6113_v60 = vrot.slane %v2745_v10, 10 }
  0xe1   : > { %v6119_v63 = vcombine.low %v2784_v13, %v2787_v15  ;;  %v2799_v21 = vrot.slane %v2797_v9, 4  ;;  %v2800_v61 = vrot.slane %v7791_v40, 6  ;;  %v2791_v25 = vsel %vm7109_vm8, %v6112_v44, %v2790_v46 }
  0xe2   : > { %6713 = vmatmul.mubr.msk.bf16.vlgmr.msra.gmra.mxu0 %vm645_vm7, %v6118_v14  ;;  %v2794_v38 = vsel %vm7109_vm8, %v2792_v2, %v2793_v30  ;;  %v2804_v50 = vrot.slane %v7624_v49, 6  ;;  %v2798_v17 = vsel %vm7109_vm8, %v6113_v60, %v2797_v9  ;;  %v2811_v40 = vrot.slane %v7641_v51, 6 }
  0xe3   : > { %6716 = vmatprep.mubr.msk.bf16.mxu0 %vm645_vm7, %v6119_v63  ;;  %v2801_v55 = vsel %vm7109_vm8, %v2799_v21, %v2800_v61  ;;  %v6120_v34 = vcombine.low %v2791_v25, %v2794_v38  ;;  %v6114_v27 = vrot.slane %v2746_v4, 10  ;;  %v2807_v28 = vrot.slane %v7809_v59, 6 }
  0xe4   : > { %v6121_v45 = vcombine.low %v2798_v17, %v2801_v55  ;;  %v2806_v31 = vrot.slane %v2804_v50, 4  ;;  %v6115_v24 = vrot.slane %v2747_v48, 10  ;;  %v2813_v18 = vrot.slane %v2811_v40, 4 }
  0xe5   : > { %v2814_v49 = vrot.slane %v7833_v35, 6  ;;  %v2805_v33 = vsel %vm7109_vm8, %v6114_v27, %v2804_v50  ;;  %v2818_v39 = vrot.slane %v7661_v12, 6  ;;  %v6116_v52 = vrot.slane %v2748_v43, 10 }
  0xe6   : > { %v2808_v51 = vsel %vm7109_vm8, %v2806_v31, %v2807_v28  ;;  %v2812_v37 = vsel %vm7109_vm8, %v6115_v24, %v2811_v40  ;;  %v2821_v62 = vrot.slane %v7849_v5, 6 }
  0xe7   : > { %v2815_v59 = vsel %vm7109_vm8, %v2813_v18, %v2814_v49  ;;  %v6122_v35 = vcombine.low %v2805_v33, %v2808_v51  ;;  %v2820_v58 = vrot.slane %v2818_v39, 4  ;;  %v2819_v12 = vsel %vm7109_vm8, %v6116_v52, %v2818_v39 }
  0xe8   : > { %v6123_v47 = vcombine.low %v2812_v37, %v2815_v59 }
  0xe9   : > { %v2822_v3 = vsel %vm7109_vm8, %v2820_v58, %v2821_v62 }
  0xea   : > { %6717 = vmatmul.mubr.msk.bf16.gmra.mxu0 %vm645_vm7, %v6120_v34  ;;  %v6124_v54 = vcombine.low %v2819_v12, %v2822_v3  ;;  %v6151_v12 = vld [vmem:[%s9754_s4 + $0x2] sm:$0x3] }
  0xeb   : > { %6720 = vmatprep.mubr.msk.bf16.mxu0 %vm645_vm7, %v6121_v45  ;;  %6899 = vmatprep.subr.msk.bf16.mxu1 %vm670_vm0, %v6151_v12 }
  0xf2   : > { %6721 = vmatmul.mubr.msk.bf16.gmra.mxu0 %vm645_vm7, %v6122_v35 }
  0xf3   : > { %6724 = vmatprep.mubr.msk.bf16.mxu0 %vm645_vm7, %v6123_v47 }
  0xf7   : > { %v6570_v6 = vpop.f32.mrf.mxu0  ;;  %v6588_v56 = vpop.f32.mrf.mxu1 }
  0xf8   : > { %v948_v11 = vadd.f32 %v6588_v56, %v6570_v6 }
  0xf9   : > { %v708_v19 = vpop.f32.mrf.mxu0  ;;  %v939_v20 = vpop.f32.mrf.mxu1 }
  0xfa   : > { %6725 = vmatmul.mubr.msk.bf16.gmra.mxu0 %vm645_vm7, %v6124_v54  ;;  %v940_v1 = vadd.f32 %v939_v20, %v708_v19  ;;  %v3435_v54 = vsel %vm670_vm0, %v6151_v12, 0 }
  0xfb   : > { %v6571_v5 = vpop.f32.mrf.mxu0  ;;  %v6589_v26 = vpop.f32.mrf.mxu1  ;;  %6729 = vmatpush3.bf16.msra.mxu1 %v3435_v54 }
  0xfc   : > { %v951_v36 = vadd.f32 %v6589_v26, %v6571_v5 }
  0xfd   : > { %v7924_v41 = vpop.f32.mrf.mxu1  ;;  %v7926_v57 = vpop.f32.mrf.mxu0 }
 0x102   : > { %v6592_v32 = vpop.f32.mrf.mxu1 }
 0x103   : > { %v6574_v10 = vpop.f32.mrf.mxu0 }
 0x104   : > { %v964_v13 = vadd.f32 %v6592_v32, %v6574_v10  ;;  %v955_v29 = vpop.f32.mrf.mxu1 }
 0x105   : > { %v724_v46 = vpop.f32.mrf.mxu0 }
 0x106   : > { %v956_v23 = vadd.f32 %v955_v29, %v724_v46  ;;  %v6593_v44 = vpop.f32.mrf.mxu1 }
 0x107   : > { %v6575_v30 = vpop.f32.mrf.mxu0 }
 0x108   : > { %v967_v9 = vadd.f32 %v6593_v44, %v6575_v30  ;;  %v7928_v14 = vpop.f32.mrf.mxu1 }
 0x109   : > { %v7930_v15 = vpop.f32.mrf.mxu0 }
 0x110   : > { %v6596_v2 = vpop.f32.mrf.mxu1 }
 0x111   : > { %v6578_v60 = vpop.f32.mrf.mxu0 }
 0x112   : > { %v980_v63 = vadd.f32 %v6596_v2, %v6578_v60  ;;  %v971_v21 = vpop.f32.mrf.mxu1  ;;  %v3151_v60 = vld [vmem:[%s9754_s4] sm:$0x3] }
 0x113   : > { %v740_v61 = vpop.f32.mrf.mxu0  ;;  %6900 = vmatprep.subr.msk.bf16.mxu0 %vm670_vm0, %v3151_v60 }
 0x114   : > { %v972_v25 = vadd.f32 %v971_v21, %v740_v61  ;;  %v6597_v38 = vpop.f32.mrf.mxu1 }
 0x115   : > { %v6579_v50 = vpop.f32.mrf.mxu0 }
 0x116   : > { %v983_v17 = vadd.f32 %v6597_v38, %v6579_v50  ;;  %v7932_v55 = vpop.f32.mrf.mxu1 }
 0x117   : > { %v7934_v4 = vpop.f32.mrf.mxu0 }
 0x11e   : > { %v6600_v40 = vpop.f32.mrf.mxu1 }
 0x11f   : > { %v6582_v48 = vpop.f32.mrf.mxu0 }
 0x120   : > { %v996_v34 = vadd.f32 %v6600_v40, %v6582_v48  ;;  %v987_v45 = vpop.f32.mrf.mxu1 }
 0x121   : > { %v756_v27 = vpop.f32.mrf.mxu0 }
 0x122   : > { %v988_v31 = vadd.f32 %v987_v45, %v756_v27  ;;  %v6601_v28 = vpop.f32.mrf.mxu1 }
 0x123   : > { %v6583_v24 = vpop.f32.mrf.mxu0 }
 0x124   : > { %v999_v18 = vadd.f32 %v6601_v28, %v6583_v24  ;;  %v7938_v33 = vpop.f32.mrf.mxu1 }
 0x125   : > { %v7936_v49 = vpop.f32.mrf.mxu0 }
 0x127   : > { %v6606_v51 = vpop.f32.mrf.mxu0 }
 0x128   : > { %v7940_v39 = vadd.f32 %v6606_v51, %v948_v11 }
 0x129   : > { %v7942_v37 = vpop.f32.mrf.mxu1  ;;  %v1172_v59 = vpop.f32.mrf.mxu0 }
 0x12a   : > { %v7944_v43 = vadd.f32 %v1172_v59, %v940_v1 }
 0x12b   : > { %v7946_v35 = vpop.f32.mrf.mxu1  ;;  %v6607_v47 = vpop.f32.mrf.mxu0 }
 0x12c   : > { %v7948_v52 = vadd.f32 %v6607_v47, %v951_v36 }
 0x12d   : > { %v7950_v58 = vpop.f32.mrf.mxu1  ;;  %v7952_v62 = vpop.f32.mrf.mxu0 }
 0x12f   : > { %v7957_v3 = vpop.f32.mrf.mxu1  ;;  %v6610_v6 = vpop.f32.mrf.mxu0 }
 0x130   : > { %v7961_v56 = vadd.f32 %v6610_v6, %v964_v13 }
 0x131   : > { %v1188_v11 = vpop.f32.mrf.mxu0 }
 0x132   : > { %v7963_v19 = vadd.f32 %v1188_v11, %v956_v23  ;;  %v7965_v20 = vpop.f32.mrf.mxu1 }
 0x133   : > { %v6611_v1 = vpop.f32.mrf.mxu0 }
 0x134   : > { %v7967_v5 = vadd.f32 %v6611_v1, %v967_v9  ;;  %v7969_v26 = vpop.f32.mrf.mxu1 }
 0x135   : > { %v7971_v36 = vpop.f32.mrf.mxu0 }
 0x136   : > { %v7973_v32 = vpop.f32.mrf.mxu1 }
 0x137   : > { %v6614_v10 = vpop.f32.mrf.mxu0 }
 0x138   : > { %v7975_v29 = vadd.f32 %v6614_v10, %v980_v63  ;;  %v7977_v46 = vpop.f32.mrf.mxu1  ;;  %v3663_v63 = vsel %vm670_vm0, %v3151_v60, 0 }
 0x139   : > { %v1204_v13 = vpop.f32.mrf.mxu0  ;;  %6747 = vmatpush3.bf16.msra.mxu0 %v3663_v63 }
 0x13a   : > { %v7979_v44 = vadd.f32 %v1204_v13, %v972_v25 }
 0x13b   : > { %v6615_v23 = vpop.f32.mrf.mxu0 }
 0x13c   : > { %v7983_v2 = vadd.f32 %v6615_v23, %v983_v17 }
 0x13d   : > { %v7981_v30 = vpop.f32.mrf.mxu1  ;;  %v7985_v9 = vpop.f32.mrf.mxu0 }
 0x13f   : > { %v7990_v21 = vpop.f32.mrf.mxu1  ;;  %v6618_v61 = vpop.f32.mrf.mxu0 }
 0x140   : > { %v7996_v38 = vadd.f32 %v6618_v61, %v996_v34 }
 0x141   : > { %v7994_v25 = vpop.f32.mrf.mxu1  ;;  %v1220_v50 = vpop.f32.mrf.mxu0 }
 0x142   : > { %v8000_v40 = vadd.f32 %v1220_v50, %v988_v31  ;;  %v8019_v31 = vld [vmem:[%s9754_s4 + $0x4] sm:$0x3] }
 0x143   : > { %v7998_v17 = vpop.f32.mrf.mxu1  ;;  %v6619_v48 = vpop.f32.mrf.mxu0  ;;  %6901 = vmatprep.subr.msk.bf16.mxu1 %vm670_vm0, %v8019_v31 }
 0x144   : > { %v8002_v45 = vadd.f32 %v6619_v48, %v999_v18 }
 0x145   : > { %v8006_v28 = vpop.f32.mrf.mxu0 }
 0x146   : > { %v8004_v27 = vpop.f32.mrf.mxu1 }
 0x147   : > { %v8010_v51 = vpop.f32.mrf.mxu0 }
 0x148   : > { %v8008_v24 = vpop.f32.mrf.mxu1 }
 0x149   : > { %v8014_v34 = vpop.f32.mrf.mxu0 }
 0x14a   : > { %v8012_v59 = vpop.f32.mrf.mxu1 }
 0x14b   : > { %v8023_v18 = vpop.f32.mrf.mxu0 }
 0x14c   : > { %v8025_v47 = vpop.f32.mrf.mxu1 }
 0x14d   : > { %v8027_v12 = vpop.f32.mrf.mxu0 }
 0x14f   : > { %v8029_v54 = vpop.f32.mrf.mxu0 }
 0x151   : > { %v8031_v6 = vpop.f32.mrf.mxu1  ;;  %v8033_v11 = vpop.f32.mrf.mxu0 }
 0x152   : > { %9817 = vst [vmem:[#allocation11_spill] sm:$0xff] %v8031_v6  ;;  %9818 = vst [vmem:[#allocation12_spill] sm:$0xff] %v8033_v11  ;;  %v8121_v6 = vld [vmem:[#allocation3 + $0x34] sm:$0xc] }
 0x153   : > { %v8035_v1 = vpop.f32.mrf.mxu1  ;;  %v8037_v10 = vpop.f32.mrf.mxu0 }
 0x154   : > { %9819 = vst [vmem:[#allocation13_spill] sm:$0xff] %v8035_v1  ;;  %9820 = vst [vmem:[#allocation14_spill] sm:$0xff] %v8037_v10 }
 0x155   : > { %v8039_v13 = vpop.f32.mrf.mxu1  ;;  %v8041_v23 = vpop.f32.mrf.mxu0 }
 0x156   : > { %9821 = vst [vmem:[#allocation15_spill] sm:$0xff] %v8039_v13  ;;  %9822 = vst [vmem:[#allocation16_spill] sm:$0xff] %v8041_v23  ;;  %v959_v13 = vadd.f32 %v7928_v14, %v7930_v15 }
 0x157   : > { %v8043_v60 = vpop.f32.mrf.mxu1  ;;  %v8045_v63 = vpop.f32.mrf.mxu0 }
 0x158   : > { %9823 = vst [vmem:[#allocation17_spill] sm:$0xff] %v8043_v60  ;;  %9824 = vst [vmem:[#allocation18_spill] sm:$0xff] %v8045_v63  ;;  %v8114_v60 = vld [vmem:[#allocation3 + $0x4c] sm:$0xc] }
 0x159   : > { %v8047_v61 = vpop.f32.mrf.mxu1  ;;  %v8049_v50 = vpop.f32.mrf.mxu0 }
 0x15a   : > { %9825 = vst [vmem:[#allocation19_spill] sm:$0xff] %v8047_v61  ;;  %9826 = vst [vmem:[#allocation20_spill] sm:$0xff] %v8049_v50 }
 0x15b   : > { %v8051_v48 = vpop.f32.mrf.mxu1  ;;  %v8053_v16 = vpop.f32.mrf.mxu0 }
 0x15c   : > { %9827 = vst [vmem:[#allocation21_spill] sm:$0xff] %v8051_v48  ;;  %9828 = vst [vmem:[#allocation22_spill] sm:$0xff] %v8053_v16 }
 0x15d   : > { %v8055_v22 = vpop.f32.mrf.mxu1  ;;  %v8057_v7 = vpop.f32.mrf.mxu0 }
 0x15e   : > { %9829 = vst [vmem:[#allocation23_spill] sm:$0xff] %v8055_v22  ;;  %9830 = vst [vmem:[#allocation24_spill] sm:$0xff] %v8057_v7 }
 0x15f   : > { %v8059_v42 = vpop.f32.mrf.mxu1  ;;  %v8061_v8 = vpop.f32.mrf.mxu0 }
 0x160   : > { %9831 = vst [vmem:[#allocation25_spill] sm:$0xff] %v8059_v42  ;;  %9832 = vst [vmem:[#allocation26_spill] sm:$0xff] %v8061_v8 }
 0x161   : > { %v8063_v0 = vpop.f32.mrf.mxu0 }
 0x162   : > { %9833 = vst [vmem:[#allocation27_spill] sm:$0xff] %v8063_v0 }
 0x163   : > { %v8065_v53 = vpop.f32.mrf.mxu1  ;;  %v8069_v61 = vpop.f32.mrf.mxu0 }
 0x164   : > { %9834 = vst [vmem:[#allocation28_spill] sm:$0xff] %v8065_v53  ;;  %9836 = vst [vmem:[#allocation30_spill] sm:$0xff] %v8069_v61  ;;  %v8086_v53 = vld [vmem:[%s9754_s4 + $0x6] sm:$0x3] }
 0x165   : > { %v8067_v63 = vpop.f32.mrf.mxu1  ;;  %v8075_v16 = vpop.f32.mrf.mxu0  ;;  %9843 = vst [vmem:[#allocation37_spill] sm:$0xff] %v8086_v53  ;;  %6902 = vmatprep.subr.msk.bf16.mxu0 %vm670_vm0, %v8086_v53 }
 0x166   : > { %9835 = vst [vmem:[#allocation29_spill] sm:$0xff] %v8067_v63  ;;  %9839 = vst [vmem:[#allocation33_spill] sm:$0xff] %v8075_v16 }
 0x167   : > { %v8071_v50 = vpop.f32.mrf.mxu1 }
 0x168   : > { %9837 = vst [vmem:[#allocation31_spill] sm:$0xff] %v8071_v50 }
 0x169   : > { %v8073_v48 = vpop.f32.mrf.mxu1 }
 0x16a   : > { %9838 = vst [vmem:[#allocation32_spill] sm:$0xff] %v8073_v48  ;;  %v8094_v48 = vld [vmem:[#allocation3 + $0x4] sm:$0xc] }
 0x16b   : > { %v8077_v22 = vpop.f32.mrf.mxu1  ;;  %v3166_v61 = vshll.u32 %v8094_v48, 16 }
 0x16c   : > { %9840 = vst [vmem:[#allocation34_spill] sm:$0xff] %v8077_v22 }
 0x16d   : > { %v8079_v7 = vpop.f32.mrf.mxu1  ;;  %v3168_v23 = vrot.slane %v3166_v61, 7  ;;  %v1240_v61 = vadd.f32 %v7971_v36, %v959_v13  ;;  %v1555_v13 = vadd.f32 %v7973_v32, %v7967_v5  ;;  %v1558_v5 = vadd.f32 %v7981_v30, %v7975_v29 }
 0x16e   : > { %9841 = vst [vmem:[#allocation35_spill] sm:$0xff] %v8079_v7  ;;  %v8081_v42 = vpop.f32.mrf.mxu0  ;;  %v8100_v7 = vld [vmem:[#allocation3 + $0x1c] sm:$0xc]  ;;  %v8167_v32 = vadd.f32 %v7990_v21, %v7979_v44 }
 0x16f   : > { %9842 = vst [vmem:[#allocation36_spill] sm:$0xff] %v8081_v42  ;;  %v8092_v50 = vpop.f32.mrf.mxu1  ;;  %v3163_v42 = vshrl.u32 %v8094_v48, 16  ;;  %v3194_v53 = vshll.u32 %v8100_v7, 16 }
 0x170   : > { %v8088_v63 = vpop.f32.mrf.mxu0  ;;  %9845 = vst [vmem:[#allocation39_spill] sm:$0xff] %v8092_v50  ;;  %v943_v50 = vadd.f32 %v7924_v41, %v7926_v57  ;;  %v975_v41 = vadd.f32 %v7932_v55, %v7934_v4  ;;  %v1550_v57 = vadd.f32 %v7942_v37, %v7940_v39  ;;  %v1548_v55 = vadd.f32 %v7946_v35, %v7944_v43 }
 0x171   : > { %9844 = vst [vmem:[#allocation38_spill] sm:$0xff] %v8088_v63  ;;  %v8098_v22 = vpop.f32.mrf.mxu1  ;;  %v3191_v63 = vshrl.u32 %v8100_v7, 16  ;;  %v3196_v1 = vrot.slane %v3194_v53, 7  ;;  %v3247_v53 = vshrl.u32 %v8114_v60, 16  ;;  %v1551_v4 = vadd.f32 %v7950_v58, %v7948_v52  ;;  %v9860_v58 = vld [vmem:[#allocation15_spill] sm:$0xff] }
 0x172   : > { %v8096_v16 = vpop.f32.mrf.mxu0  ;;  %9847 = vst [vmem:[#allocation41_spill] sm:$0xff] %v8098_v22  ;;  %v1554_v37 = vadd.f32 %v7965_v20, %v7961_v56  ;;  %v1244_v43 = vadd.f32 %v7985_v9, %v975_v41 }
 0x173   : > { %9846 = vst [vmem:[#allocation40_spill] sm:$0xff] %v8096_v16  ;;  %v3165_v16 = vrot.slane %v3163_v42, 6  ;;  %v3193_v11 = vrot.slane %v3191_v63, 6  ;;  %v991_v42 = vadd.f32 %v7938_v33, %v7936_v49  ;;  %v3250_v63 = vshll.u32 %v8114_v60, 16 }
 0x174   : > { %v8104_v0 = vpop.f32.mrf.mxu0  ;;  %v3219_v49 = vshrl.u32 %v8121_v6, 16  ;;  %v3222_v33 = vshll.u32 %v8121_v6, 16 }
 0x175   : > { %9848 = vst [vmem:[#allocation42_spill] sm:$0xff] %v8104_v0  ;;  %v1236_v0 = vadd.f32 %v7952_v62, %v943_v50  ;;  %v3169_v62 = vor.u32 %v3168_v23, %v3165_v16  ;;  %v1552_v16 = vadd.f32 %v7969_v26, %v7963_v19  ;;  %v3197_v36 = vor.u32 %v3196_v1, %v3193_v11  ;;  %v8154_v23 = vld [vmem:[#allocation3 + $0x7c] sm:$0xc]  ;;  %v8161_v26 = vld [vmem:[#allocation3 + $0x64] sm:$0xc] }
 0x176   : > { %9849 = vst [vmem:[#allocation43_spill] sm:$0xff] %v8154_v23  ;;  %v3249_v19 = vrot.slane %v3247_v53, 6  ;;  %v3252_v20 = vrot.slane %v3250_v63, 7  ;;  %v3221_v9 = vrot.slane %v3219_v49, 6  ;;  %v3224_v11 = vrot.slane %v3222_v33, 7  ;;  %v9859_v49 = vld [vmem:[#allocation14_spill] sm:$0xff] }
 0x177   : > { %v1549_v39 = vadd.f32 %v7957_v3, %v1236_v0  ;;  %v1553_v0 = vadd.f32 %v7977_v46, %v1240_v61  ;;  %v8159_v56 = vrot.slane %v3169_v62, 4  ;;  %v8171_v46 = vadd.f32 %v7994_v25, %v7983_v2  ;;  %v8185_v62 = vld [vmem:[#allocation3 + $0x4] sm:$0x8] }
 0x178   : > { %v8173_v1 = vrot.slane %v3197_v36, 4  ;;  %v3303_v50 = vshrl.u32 %v8154_v23, 16  ;;  %v3306_v41 = vshll.u32 %v8154_v23, 16  ;;  %v8178_v61 = vadd.f32 %v7998_v17, %v1244_v43  ;;  %9850 = vst [vmem:[#allocation44_spill] sm:$0xff] %v8185_v62  ;;  %v8208_v43 = vld [vmem:[#allocation3 + $0x94] sm:$0xc] }
 0x179   : > { %v1248_v29 = vadd.f32 %v8006_v28, %v991_v42  ;;  %v3275_v44 = vshrl.u32 %v8161_v26, 16  ;;  %v3278_v21 = vshll.u32 %v8161_v26, 16  ;;  %v8189_v2 = vadd.f32 %v8004_v27, %v7996_v38 }
 0x17a   : > { %v8108_v8 = vpop.f32.mrf.mxu1  ;;  %v8193_v25 = vadd.f32 %v8008_v24, %v8000_v40  ;;  %v3253_v53 = vor.u32 %v3252_v20, %v3249_v19  ;;  %v4019_v28 = vshrl.u32 %v8185_v62, 16  ;;  %v8200_v42 = vadd.f32 %v8012_v59, %v8002_v45  ;;  %v9878_v62 = vld [vmem:[#allocation29_spill] sm:$0xff] }
 0x17b   : > { %v1724_v63 = vadd.f32 %v8010_v51, %v1550_v57  ;;  %v3225_v33 = vor.u32 %v3224_v11, %v3221_v9  ;;  %v1722_v38 = vadd.f32 %v8014_v34, %v1548_v55  ;;  %v3305_v24 = vrot.slane %v3303_v50, 6  ;;  %v8221_v9 = vld [vmem:[#allocation3 + $0xac] sm:$0xc] }
 0x17c   : > { %v8112_v22 = vpop.f32.mrf.mxu1  ;;  %v8119_v10 = vpop.f32.mrf.mxu0  ;;  %v3308_v36 = vrot.slane %v3306_v41, 7  ;;  %v1561_v19 = vadd.f32 %v8025_v47, %v1248_v29  ;;  %v1725_v45 = vadd.f32 %v8023_v18, %v1551_v4  ;;  %v3277_v51 = vrot.slane %v3275_v44, 6  ;;  %9853 = vst [vmem:[#allocation47_spill] sm:$0xff] %v8221_v9  ;;  %v9857_v29 = vld [vmem:[#allocation13_spill] sm:$0xff] }
 0x17d   : > { %v3280_v57 = vrot.slane %v3278_v21, 7  ;;  %v1723_v20 = vadd.f32 %v8027_v12, %v1549_v39  ;;  %v8217_v34 = vsel %vm670_vm0, %v8019_v31, 0  ;;  %v8219_v55 = vrot.slane %v3253_v53, 4  ;;  %v9856_v31 = vld [vmem:[#allocation11_spill] sm:$0xff]  ;;  %v9858_v21 = vld [vmem:[#allocation12_spill] sm:$0xff] }
 0x17e   : > { %v8130_v14 = vpop.f32.mrf.mxu1  ;;  %v8132_v15 = vpop.f32.mrf.mxu0  ;;  %9851 = vst [vmem:[#allocation45_spill] sm:$0xff] %v8217_v34  ;;  %v8223_v11 = vrot.slane %v4019_v28, 11  ;;  %v1728_v47 = vadd.f32 %v8029_v54, %v1554_v37  ;;  %v8230_v4 = vrot.slane %v3225_v33, 4  ;;  %v3331_v12 = vshrl.u32 %v8208_v43, 16  ;;  %v9862_v34 = vld [vmem:[#allocation16_spill] sm:$0xff] }
 0x17f   : > { %9852 = vst [vmem:[#allocation46_spill] sm:$0xff] %v8219_v55  ;;  %v3334_v39 = vshll.u32 %v8208_v43, 16  ;;  %v2109_v41 = vadd.f32 %v9856_v31, %v1724_v63  ;;  %v2107_v44 = vadd.f32 %v9857_v29, %v1722_v38  ;;  %v1726_v53 = vadd.f32 %v9858_v21, %v1552_v16  ;;  %v9861_v55 = vld [vmem:[#allocation17_spill] sm:$0xff]  ;;  %v9863_v31 = vld [vmem:[#allocation18_spill] sm:$0xff] }
 0x180   : > { %v8150_v35 = vpop.f32.mrf.mxu0  ;;  %v8157_v3 = vpop.f32.mrf.mxu1  ;;  %9854 = vst [vmem:[#allocation48_spill] sm:$0xff] %v8223_v11  ;;  %9855 = vst [vmem:[#allocation49_spill] sm:$0xff] %v8230_v4  ;;  %v3309_v28 = vor.u32 %v3308_v36, %v3305_v24  ;;  %v1729_v40 = vadd.f32 %v9859_v49, %v1555_v13  ;;  %v3281_v37 = vor.u32 %v3280_v57, %v3277_v51  ;;  %v3359_v52 = vshrl.u32 %v8221_v9, 16  ;;  %v9864_v51 = vld [vmem:[#allocation19_spill] sm:$0xff]  ;;  %v9865_v29 = vld [vmem:[#allocation21_spill] sm:$0xff] }
 0x181   : > { %v3362_v33 = vshll.u32 %v8221_v9, 16  ;;  %v2110_v11 = vadd.f32 %v9860_v58, %v1725_v45  ;;  %v2108_v4 = vadd.f32 %v9861_v55, %v1723_v20  ;;  %v1727_v63 = vadd.f32 %v9862_v34, %v1553_v0  ;;  %v9866_v58 = vld [vmem:[#allocation20_spill] sm:$0xff]  ;;  %v9868_v0 = vld [vmem:[#allocation22_spill] sm:$0xff]  ;;  %v9875_v13 = vld [vmem:[#allocation25_spill] sm:$0xff] }
 0x182   : > { %v8181_v30 = vpop.f32.mrf.mxu0  ;;  %v1732_v16 = vadd.f32 %v9863_v31, %v1558_v5  ;;  %v3333_v49 = vrot.slane %v3331_v12, 6  ;;  %v3336_v36 = vrot.slane %v3334_v39, 7  ;;  %v2113_v57 = vadd.f32 %v9864_v51, %v1728_v47  ;;  %v8264_v39 = vld [vmem:[#allocation3 + $0x1c] sm:$0x8] }
 0x183   : > { %v8252_v21 = vadd.f32 %v9865_v29, %v1726_v53  ;;  %v1730_v45 = vadd.f32 %v9866_v58, %v8167_v32  ;;  %v8256_v20 = vrot.slane %v3309_v28, 4  ;;  %v1733_v34 = vadd.f32 %v9868_v0, %v8171_v46  ;;  %9870 = vst [vmem:[#allocation12_spill] sm:$0xff] %v8264_v39  ;;  %v9871_v47 = vld [vmem:[#allocation23_spill] sm:$0xff]  ;;  %v9872_v53 = vld [vmem:[#allocation24_spill] sm:$0xff]  ;;  %v9873_v58 = vld [vmem:[#allocation26_spill] sm:$0xff] }
 0x184   : > { %v8262_v55 = vrot.slane %v3281_v37, 4  ;;  %v3361_v31 = vrot.slane %v3359_v52, 6  ;;  %v3364_v12 = vrot.slane %v3362_v33, 7  ;;  %v2114_v51 = vadd.f32 %v9871_v47, %v1729_v40  ;;  %v9874_v0 = vld [vmem:[#allocation27_spill] sm:$0xff]  ;;  %v9876_v47 = vld [vmem:[#allocation28_spill] sm:$0xff] }
 0x185   : > { %9867 = vst [vmem:[#allocation11_spill] sm:$0xff] %v8256_v20  ;;  %v1731_v29 = vadd.f32 %v9872_v53, %v8178_v61  ;;  %v4036_v28 = vshrl.u32 %v8264_v39, 16  ;;  %v1736_v46 = vadd.f32 %v9873_v58, %v8189_v2  ;;  %v1734_v37 = vadd.f32 %v9874_v0, %v8193_v25  ;;  %v9877_v61 = vld [vmem:[#allocation30_spill] sm:$0xff]  ;;  %v9879_v2 = vld [vmem:[#allocation33_spill] sm:$0xff] }
 0x186   : > { %v8195_v17 = vpop.f32.mrf.mxu1  ;;  %9869 = vst [vmem:[#allocation13_spill] sm:$0xff] %v8262_v55  ;;  %v3337_v33 = vor.u32 %v3336_v36, %v3333_v49  ;;  %v2112_v40 = vadd.f32 %v9875_v13, %v1727_v63  ;;  %v2117_v20 = vadd.f32 %v9876_v47, %v1732_v16  ;;  %v1737_v53 = vadd.f32 %v9877_v61, %v8200_v42  ;;  %v8289_v52 = vld [vmem:[#allocation3 + $0x34] sm:$0x8]  ;;  %v9881_v13 = vld [vmem:[#allocation31_spill] sm:$0xff]  ;;  %v9882_v49 = vld [vmem:[#allocation32_spill] sm:$0xff] }
 0x187   : > { %v2115_v55 = vadd.f32 %v9878_v62, %v1730_v45  ;;  %v1735_v58 = vadd.f32 %v9879_v2, %v1561_v19  ;;  %v3365_v0 = vor.u32 %v3364_v12, %v3361_v31  ;;  %9880 = vst [vmem:[#allocation14_spill] sm:$0xff] %v8289_v52  ;;  %v2118_v16 = vadd.f32 %v9881_v13, %v1733_v34  ;;  %v9884_v45 = vld [vmem:[#allocation34_spill] sm:$0xff]  ;;  %v9885_v47 = vld [vmem:[#allocation35_spill] sm:$0xff]  ;;  %v9886_v31 = vld [vmem:[#allocation36_spill] sm:$0xff] }
 0x188   : > { %v8205_v27 = vpop.f32.mrf.mxu1  ;;  %v8294_v36 = vadd.f32 %v9882_v49, %v1731_v29  ;;  %v8296_v42 = vrot.slane %v4036_v28, 11  ;;  %v4053_v62 = vshrl.u32 %v8289_v52, 16  ;;  %v8300_v19 = vadd.f32 %v9884_v45, %v1736_v46  ;;  %v8315_v29 = vld [vmem:[%s9754_s4 + $0x8] sm:$0x3]  ;;  %v8317_v28 = vld [vmem:[#allocation3 + $0x4c] sm:$0x8] }
 0x189   : > { %v8212_v59 = vpop.f32.mrf.mxu0  ;;  %v8303_v61 = vadd.f32 %v9885_v47, %v1734_v37  ;;  %v2366_v12 = vadd.f32 %v9886_v31, %v2109_v41  ;;  %v8310_v34 = vrot.slane %v3337_v33, 4  ;;  %9888 = vst [vmem:[#allocation16_spill] sm:$0xff] %v8317_v28  ;;  %v9889_v46 = vld [vmem:[#allocation38_spill] sm:$0xff]  ;;  %v9890_v49 = vld [vmem:[#allocation40_spill] sm:$0xff]  ;;  %v9891_v45 = vld [vmem:[#allocation37_spill] sm:$0xff]  ;;  %v4070_v47 = vshrl.u32 %v8317_v28, 16 }
 0x18a   : > { %v8226_v50 = vpop.f32.mrf.mxu1  ;;  %9883 = vst [vmem:[#allocation15_spill] sm:$0xff] %v8296_v42  ;;  %v2364_v13 = vadd.f32 %v9889_v46, %v2107_v44  ;;  %v2367_v37 = vadd.f32 %v9890_v49, %v2110_v11  ;;  %v8323_v41 = vsel %vm670_vm0, %v9891_v45, 0  ;;  %v8326_v31 = vld [vmem:[#allocation3 + $0x64] sm:$0x8]  ;;  %v9892_v33 = vld [vmem:[#allocation39_spill] sm:$0xff]  ;;  %v9893_v39 = vld [vmem:[#allocation41_spill] sm:$0xff] }
 0x18b   : > { %v8228_v18 = vpop.f32.mrf.mxu0  ;;  %9887 = vst [vmem:[#allocation17_spill] sm:$0xff] %v8310_v34  ;;  %v8329_v32 = vadd.f32 %v9892_v33, %v1737_v53  ;;  %v8332_v42 = vadd.f32 %v9893_v39, %v1735_v58  ;;  %v8334_v34 = vrot.slane %v3365_v0, 4  ;;  %v4087_v44 = vshrl.u32 %v8326_v31, 16  ;;  %v9894_v46 = vld [vmem:[#allocation42_spill] sm:$0xff]  ;;  %v8347_v33 = vld [vmem:[#allocation3 + $0x7c] sm:$0x8] }
 0x18c   : > { %v8247_v24 = vpop.f32.mrf.mxu1  ;;  %v2365_v11 = vadd.f32 %v9894_v46, %v2108_v4  ;;  %v8340_v45 = vrot.slane %v4053_v62, 11  ;;  %v8344_v9 = vsel %vm670_vm0, %v8315_v29, 0  ;;  %v2727_v39 = vadd.f32 %v8108_v8, %v2366_v12  ;;  %v8355_v62 = vld [vmem:[#allocation3 + $0x94] sm:$0x8]  ;;  %v8364_v8 = vld [vmem:[#allocation3 + $0xac] sm:$0x8] }
 0x18d   : > { %v8238_v54 = vpop.f32.mrf.mxu0  ;;  %9896 = vst [vmem:[#allocation19_spill] sm:$0xff] %v8344_v9  ;;  %v2370_v58 = vadd.f32 %v8119_v10, %v2113_v57  ;;  %v4104_v46 = vshrl.u32 %v8347_v33, 16  ;;  %v8359_v9 = vadd.f32 %v8130_v14, %v2367_v37  ;;  %v8361_v53 = vrot.slane %v4070_v47, 11  ;;  %v8372_v52 = vld [vmem:[#allocation3 + $0x10] sm:$0x1] }
 0x18e   : > { %9895 = vst [vmem:[#allocation18_spill] sm:$0xff] %v8340_v45  ;;  %v2725_v45 = vadd.f32 %v8112_v22, %v2364_v13  ;;  %v4121_v28 = vshrl.u32 %v8355_v62, 16  ;;  %v2368_v10 = vadd.f32 %v8132_v15, %v8252_v21  ;;  %v2371_v57 = vadd.f32 %v8150_v35, %v2114_v51  ;;  %9898 = vst [vmem:[#allocation20_spill] sm:$0xff] %v8372_v52  ;;  %v8392_v37 = vld [vmem:[%s9754_s4 + $0xa] sm:$0x3] }
 0x18f   : > { %v8260_v5 = vpop.f32.mrf.mxu0  ;;  %9897 = vst [vmem:[#allocation21_spill] sm:$0xff] %v8361_v53  ;;  %v8369_v12 = vrot.slane %v4087_v44, 11  ;;  %v4138_v4 = vshrl.u32 %v8364_v8, 16  ;;  %v2369_v22 = vadd.f32 %v8181_v30, %v2112_v40  ;;  %v4538_v47 = vshll.u32 %v8372_v52, 16  ;;  %v4497_v44 = vld [vmem:[#allocation3 + $0x28] sm:$0x1] }
 0x190   : > { %v2726_v53 = vadd.f32 %v8157_v3, %v2365_v11  ;;  %v8380_v15 = vadd.f32 %v8195_v17, %v2370_v58  ;;  %v2374_v35 = vadd.f32 %v8212_v59, %v2117_v20  ;;  %v8383_v51 = vrot.slane %v4104_v46, 11  ;;  %v8411_v58 = vld [vmem:[%s9752_s2] ss:$0 sm:$0xff] }
 0x191   : > { %v2372_v30 = vadd.f32 %v8228_v18, %v2115_v55  ;;  %v8386_v40 = vrot.slane %v4121_v28, 11  ;;  %v4562_v3 = vshll.u32 %v4497_v44, 16  ;;  %v8395_v17 = vadd.f32 %v8205_v27, %v2368_v10  ;;  %v4500_v18 = vld [vmem:[#allocation3 + $0x40] sm:$0x1] }
 0x192   : > { %v8398_v59 = vadd.f32 %v8226_v50, %v2371_v57  ;;  %v2375_v20 = vadd.f32 %v8238_v54, %v2118_v16  ;;  %v8401_v11 = vrot.slane %v4138_v4, 11  ;;  %v8404_v55 = vadd.f32 %v8247_v24, %v2369_v22 }
 0x193   : > { %v8275_v38 = vpop.f32.mrf.mxu1  ;;  %v2373_v28 = vadd.f32 %v8260_v5, %v8294_v36  ;;  %v8413_v46 = vrot.slane %v4538_v47, 5  ;;  %v4586_v50 = vshll.u32 %v4500_v18, 16  ;;  %v8421_v10 = vsel %vm670_vm0, %v8392_v37, 0  ;;  %v4503_v5 = vld [vmem:[#allocation3 + $0x58] sm:$0x1] }
 0x194   : > { %v8416_v54 = vadd.f32 %v8275_v38, %v2374_v35  ;;  %v8431_v38 = vld [vmem:[%s9753_s3] ss:$0 sm:$0xff]  ;;  %v4610_v47 = vshll.u32 %v4503_v5, 16  ;;  %v4509_v18 = vld [vmem:[#allocation3 + $0x88] sm:$0x1]  ;;  %v9906_v52 = vrot.slane %v8094_v48, 10 }
 0x195   : > { %v8285_v23 = vpop.f32.mrf.mxu1  ;;  %v8287_v25 = vpop.f32.mrf.mxu0  ;;  %v8448_v5 = vrot.slane %v4586_v50, 5 }
 0x196   : > { %v8424_v36 = vadd.f32 %v8285_v23, %v2372_v30  ;;  %v2378_v57 = vadd.f32 %v8287_v25, %v8300_v19  ;;  %v8444_v25 = vld [vmem:[%s9754_s4 + $0xc] sm:$0x3]  ;;  %v4506_v19 = vld [vmem:[#allocation3 + $0x70] sm:$0x1]  ;;  %v8463_v50 = vrot.slane %v4610_v47, 5 }
 0x197   : > { %v8306_v2 = vpop.f32.mrf.mxu1  ;;  %v8308_v63 = vpop.f32.mrf.mxu0 }
 0x198   : > { %v8436_v35 = vadd.f32 %v8306_v2, %v2375_v20  ;;  %v2376_v44 = vadd.f32 %v8308_v63, %v8303_v61  ;;  %v4634_v2 = vshll.u32 %v4506_v19, 16  ;;  %v4658_v20 = vshll.u32 %v4509_v18, 16 }
 0x199   : > { %v8338_v49 = vpop.f32.mrf.mxu0  ;;  %v8351_v0 = vpop.f32.mrf.mxu1 }
 0x19a   : > { %v8451_v63 = vadd.f32 %v8351_v0, %v2373_v28 }
 0x19b   : > { %v2352_v14 = vpop.f32.mrf.mxu0 }
 0x19c   : > { %v2377_v13 = vadd.f32 %v2352_v14, %v8332_v42  ;;  %v8471_v42 = vrot.slane %v4634_v2, 5  ;;  %v8473_v14 = vrot.slane %v4658_v20, 5 }
 0x19e   : > { %9899 = vst [vmem:[#allocation22_spill] sm:$0xff] %v8473_v14 }
 0x19f   : > { %v6708_v21 = vpop.f32.mrf.mxu1 }
 0x1a0   : > { %v8456_v24 = vadd.f32 %v6708_v21, %v2378_v57 }
 0x1a1   : > { %v2710_v16 = vpop.f32.mrf.mxu1 }
 0x1a2   : > { %v6714_v27 = vpop.f32.mrf.mxu0  ;;  %v8467_v18 = vadd.f32 %v2710_v16, %v2376_v44 }
 0x1a3   : > { %v2973_v4 = vadd.f32 %v6714_v27, %v2727_v39  ;;  %v8433_v39 = vrot.slane %v4562_v3, 5  ;;  %v2379_v3 = vadd.f32 %v8338_v49, %v8329_v32  ;;  %v6709_v61 = vpop.f32.mrf.mxu1  ;;  %v8461_v49 = vsel %vm670_vm0, %v8444_v25, 0 }
 0x1a4   : > { %v2908_v22 = vpop.f32.mrf.mxu0 }
 0x1a5   : > { %v2995_v23 = vmul.f32 %v8411_v58, %v2973_v4  ;;  %v2971_v30 = vadd.f32 %v2908_v22, %v2725_v45 }
 0x1a6   : > { %v6715_v27 = vpop.f32.mrf.mxu0 }
 0x1a7   : > { %v3017_v45 = vadd.f32 %v8431_v38, %v2995_v23  ;;  %v2993_v4 = vmul.f32 %v8411_v58, %v2971_v30  ;;  %v2974_v22 = vadd.f32 %v6715_v27, %v8359_v9  ;;  %v5128_v30 = vld [vmem:[#allocation3 + $0x10] sm:$0x3]  ;;  %v8469_v9 = vadd.f32 %v6709_v61, %v2379_v3  ;;  %v2713_v3 = vpop.f32.mrf.mxu1 }
 0x1a8   : > { %v2911_v32 = vpop.f32.mrf.mxu0  ;;  %v5153_v16 = vshrl.u32 %v5128_v30, 16  ;;  %v5156_v44 = vshll.u32 %v5128_v30, 16 }
 0x1a9   : > { %v3033_v0 = vmax.f32 %v3017_v45, 0.0  ;;  %v3015_v28 = vadd.f32 %v8431_v38, %v2993_v4  ;;  %v2996_v23 = vmul.f32 %v8411_v58, %v2974_v22  ;;  %v2972_v19 = vadd.f32 %v2911_v32, %v2726_v53  ;;  %v4512_v4 = vld [vmem:[#allocation3 + $0xa0] sm:$0x1] }
 0x1aa   : > { %v6718_v21 = vpop.f32.mrf.mxu0  ;;  %v4682_v32 = vshll.u32 %v4512_v4, 16  ;;  %v8486_v4 = vrot.slane %v5156_v44, 6 }
 0x1ab   : > { %v6351_v57 = vpack.c.bf16 %v3033_v0, %v3033_v0  ;;  %v3031_v27 = vmax.f32 %v3015_v28, 0.0  ;;  %v3018_v47 = vadd.f32 %v8431_v38, %v2996_v23  ;;  %v2994_v45 = vmul.f32 %v8411_v58, %v2972_v19  ;;  %v4515_v28 = vld [vmem:[#allocation3 + $0xb8] sm:$0x1]  ;;  %v8481_v23 = vld [vmem:[#allocation3 + $0x28] sm:$0x3] }
 0x1ac   : > { %v2977_v22 = vadd.f32 %v6718_v21, %v8380_v15  ;;  %v2924_v53 = vpop.f32.mrf.mxu0  ;;  %9900 = vst [vmem:[#allocation23_spill] sm:$0xff] %v8481_v23  ;;  %v4706_v15 = vshll.u32 %v4515_v28, 16  ;;  %v8484_v21 = vrot.slane %v5153_v16, 5  ;;  %9902 = vst [vmem:[#allocation26_spill] sm:$0xff] %v8486_v4  ;;  %v5176_v16 = vshrl.u32 %v8481_v23, 16 }
 0x1ad   : > { %3113 = vst.msk [vmem:[#allocation3 + $0x20] sm:$0xf] %vm338_vm2, %v6351_v57  ;;  %v6349_v2 = vpack.c.bf16 %v3031_v27, %v3031_v27  ;;  %v3034_v61 = vmax.f32 %v3018_v47, 0.0  ;;  %v3016_v20 = vadd.f32 %v8431_v38, %v2994_v45  ;;  %v2975_v0 = vadd.f32 %v2924_v53, %v8395_v17 }
 0x1ae   : > { %v2999_v19 = vmul.f32 %v8411_v58, %v2977_v22  ;;  %v6719_v14 = vpop.f32.mrf.mxu0  ;;  %9901 = vst [vmem:[#allocation24_spill] sm:$0xff] %v8484_v21  ;;  %v8491_v17 = vadd.f32 %v2713_v3, %v2377_v13  ;;  %v8494_v22 = vrot.slane %v4682_v32, 5  ;;  %v8504_v13 = vld [vmem:[%s9754_s4 + $0xe] sm:$0x3]  ;;  %v8506_v32 = vrot.slane %v4706_v15, 5 }
 0x1af   : > { %3111 = vst.msk [vmem:[#allocation3 + $0x8] sm:$0xf] %vm338_vm2, %v6349_v2  ;;  %v6352_v30 = vpack.c.bf16 %v3034_v61, %v3034_v61  ;;  %v3032_v57 = vmax.f32 %v3016_v20, 0.0  ;;  %v2997_v27 = vmul.f32 %v8411_v58, %v2975_v0  ;;  %v2978_v47 = vadd.f32 %v6719_v14, %v8398_v59 }
 0x1b0   : > { %v3021_v45 = vadd.f32 %v8431_v38, %v2999_v19  ;;  %v2927_v53 = vpop.f32.mrf.mxu0  ;;  %v8519_v15 = vsel %vm670_vm0, %v8504_v13, 0 }
 0x1b1   : > { %3114 = vst.msk [vmem:[#allocation3 + $0x24] sm:$0xf] %vm338_vm2, %v6352_v30  ;;  %v6350_v44 = vpack.c.bf16 %v3032_v57, %v3032_v57  ;;  %v3019_v2 = vadd.f32 %v8431_v38, %v2997_v27  ;;  %v3000_v61 = vmul.f32 %v8411_v58, %v2978_v47  ;;  %v2976_v20 = vadd.f32 %v2927_v53, %v8404_v55 }
 0x1b2   : > { %v3037_v59 = vmax.f32 %v3021_v45, 0.0  ;;  %v6722_v14 = vpop.f32.mrf.mxu0  ;;  %v8521_v45 = vrot.slane %v5176_v16, 5 }
 0x1b3   : > { %3112 = vst.msk [vmem:[#allocation3 + $0xc] sm:$0xf] %vm338_vm2, %v6350_v44  ;;  %v3035_v28 = vmax.f32 %v3019_v2, 0.0  ;;  %v3022_v19 = vadd.f32 %v8431_v38, %v3000_v61  ;;  %v2998_v55 = vmul.f32 %v8411_v58, %v2976_v20  ;;  %v2981_v30 = vadd.f32 %v6722_v14, %v8416_v54 }
 0x1b4   : > { %v6355_v57 = vpack.c.bf16 %v3037_v59, %v3037_v59  ;;  %v2940_v27 = vpop.f32.mrf.mxu0  ;;  %v8515_v47 = vld [vmem:[#allocation3 + $0x20] sm:$0xf]  ;;  %9903 = vst [vmem:[#allocation27_spill] sm:$0xff] %v8521_v45  ;;  %v9904_v45 = vrot.slane %v8100_v7, 10 }
 0x1b5   : > { %v6353_v44 = vpack.c.bf16 %v3035_v28, %v3035_v28  ;;  %v3038_v2 = vmax.f32 %v3022_v19, 0.0  ;;  %v3020_v61 = vadd.f32 %v8431_v38, %v2998_v55  ;;  %v3003_v20 = vmul.f32 %v8411_v58, %v2981_v30 }
 0x1b6   : > { %3117 = vst.msk [vmem:[#allocation3 + $0x50] sm:$0xf] %vm338_vm2, %v6355_v57  ;;  %v2979_v54 = vadd.f32 %v2940_v27, %v8424_v36  ;;  %v6723_v59 = vpop.f32.mrf.mxu0  ;;  %v8528_v14 = vld [vmem:[#allocation3 + $0x8] sm:$0xf]  ;;  %v3567_v0 = vrot.slane %v8515_v47, 6  ;;  %v9926_v23 = vshrl.u32 %v8515_v47, 16 }
 0x1b7   : > { %3115 = vst.msk [vmem:[#allocation3 + $0x38] sm:$0xf] %vm338_vm2, %v6353_v44  ;;  %v6356_v28 = vpack.c.bf16 %v3038_v2, %v3038_v2  ;;  %v3036_v19 = vmax.f32 %v3020_v61, 0.0  ;;  %v3025_v55 = vadd.f32 %v8431_v38, %v3003_v20  ;;  %v2982_v30 = vadd.f32 %v6723_v59, %v8436_v35 }
 0x1b8   : > { %v3001_v57 = vmul.f32 %v8411_v58, %v2979_v54  ;;  %v2943_v36 = vpop.f32.mrf.mxu0  ;;  %v3560_v27 = vrot.slane %v8528_v14, 6  ;;  %v3132_v53 = vld [vmem:[#allocation3 + $0x24] sm:$0x3]  ;;  %v3568_v16 = vsel %vm7109_vm8, %v9904_v45, %v3567_v0  ;;  %v3569_v3 = vrot.slane %v3567_v0, 4 }
 0x1b9   : > { %3118 = vst.msk [vmem:[#allocation3 + $0x54] sm:$0xf] %vm338_vm2, %v6356_v28  ;;  %v6354_v44 = vpack.c.bf16 %v3036_v19, %v3036_v19  ;;  %v3041_v2 = vmax.f32 %v3025_v55, 0.0  ;;  %v3004_v61 = vmul.f32 %v8411_v58, %v2982_v30  ;;  %v2980_v35 = vadd.f32 %v2943_v36, %v8451_v63 }
 0x1ba   : > { %v3023_v20 = vadd.f32 %v8431_v38, %v3001_v57  ;;  %v6726_v54 = vpop.f32.mrf.mxu0  ;;  %v3129_v59 = vld [vmem:[#allocation3 + $0xc] sm:$0x3]  ;;  %v3561_v7 = vsel %vm7109_vm8, %v9906_v52, %v3560_v27  ;;  %v3562_v21 = vrot.slane %v3560_v27, 4  ;;  %v3570_v45 = vrot.slane %v3132_v53, 6 }
 0x1bb   : > { %3116 = vst.msk [vmem:[#allocation3 + $0x3c] sm:$0xf] %vm338_vm2, %v6354_v44  ;;  %v6359_v0 = vpack.c.bf16 %v3041_v2, %v3041_v2  ;;  %v3026_v28 = vadd.f32 %v8431_v38, %v3004_v61  ;;  %v3002_v19 = vmul.f32 %v8411_v58, %v2980_v35  ;;  %v2985_v63 = vadd.f32 %v6726_v54, %v8456_v24  ;;  %v8561_v2 = vld [vmem:[#allocation3 + $0xc] sm:$0x7] }
 0x1bc   : > { %v3039_v55 = vmax.f32 %v3023_v20, 0.0  ;;  %v2956_v30 = vpop.f32.mrf.mxu0  ;;  %v3563_v57 = vrot.slane %v3129_v59, 6  ;;  %v3571_v48 = vsel %vm7109_vm8, %v3569_v3, %v3570_v45  ;;  %v3172_v36 = vshrl.u32 %v8528_v14, 16 }
 0x1bd   : > { %3121 = vst.msk [vmem:[#allocation3 + $0x80] sm:$0xf] %vm338_vm2, %v6359_v0  ;;  %v3042_v52 = vmax.f32 %v3026_v28, 0.0  ;;  %v3024_v53 = vadd.f32 %v8431_v38, %v3002_v19  ;;  %v3007_v27 = vmul.f32 %v8411_v58, %v2985_v63  ;;  %v2983_v44 = vadd.f32 %v2956_v30, %v8467_v18 }
 0x1be   : > { %v6357_v24 = vpack.c.bf16 %v3039_v55, %v3039_v55  ;;  %v6727_v61 = vpop.f32.mrf.mxu0  ;;  %v3564_v35 = vsel %vm7109_vm8, %v3562_v21, %v3563_v57  ;;  %v6177_v20 = vcombine.low %v3568_v16, %v3571_v48  ;;  %v3174_v3 = vrot.slane %v3172_v36, 6 }
 0x1bf   : > { %v6360_v54 = vpack.c.bf16 %v3042_v52, %v3042_v52  ;;  %v3040_v59 = vmax.f32 %v3024_v53, 0.0  ;;  %v3029_v45 = vadd.f32 %v8431_v38, %v3007_v27  ;;  %v3005_v0 = vmul.f32 %v8411_v58, %v2983_v44  ;;  %v8581_v53 = vld [vmem:[#allocation3 + $0x24] sm:$0x7] }
 0x1c0   : > { %3119 = vst.msk [vmem:[#allocation3 + $0x68] sm:$0xf] %vm338_vm2, %v6357_v24  ;;  %v2986_v18 = vadd.f32 %v6727_v61, %v8469_v9  ;;  %v2959_v28 = vpop.f32.mrf.mxu0  ;;  %v6176_v19 = vcombine.low %v3561_v7, %v3564_v35  ;;  %v3175_v63 = vshll.u32 %v8528_v14, 16  ;;  %v3182_v21 = vshrl.u32 %v8561_v2, 16 }
 0x1c1   : > { %3122 = vst.msk [vmem:[#allocation3 + $0x84] sm:$0xf] %vm338_vm2, %v6360_v54  ;;  %v6358_v16 = vpack.c.bf16 %v3040_v59, %v3040_v59  ;;  %v3045_v55 = vmax.f32 %v3029_v45, 0.0  ;;  %v3027_v30 = vadd.f32 %v8431_v38, %v3005_v0  ;;  %v2984_v57 = vadd.f32 %v2959_v28, %v8491_v17 }
 0x1c2   : > { %v3008_v48 = vmul.f32 %v8411_v58, %v2986_v18  ;;  %6748 = vmatprep.mubr.msk.bf16.mxu0 %vm645_vm7, %v6176_v19  ;;  %v3177_v9 = vrot.slane %v3175_v63, 7  ;;  %v3184_v7 = vrot.slane %v3182_v21, 6  ;;  %v3185_v52 = vshll.u32 %v8561_v2, 16  ;;  %v8596_v19 = vld [vmem:[#allocation3 + $0x38] sm:$0xf] }
 0x1c3   : > { %3120 = vst.msk [vmem:[#allocation3 + $0x6c] sm:$0xf] %vm338_vm2, %v6358_v16  ;;  %v6363_v27 = vpack.c.bf16 %v3045_v55, %v3045_v55  ;;  %v3043_v44 = vmax.f32 %v3027_v30, 0.0  ;;  %v3006_v24 = vmul.f32 %v8411_v58, %v2984_v57  ;;  %6749 = vmatmul.mubr.msk.bf16.vlgmr.msra.gmra.mxu0 %vm645_vm7, %v6177_v20  ;;  %v9907_v17 = vshrl.u32 %v8515_v47, 16  ;;  %v3135_v21 = vld [vmem:[#allocation3 + $0x3c] sm:$0x3] }
 0x1c4   : > { %v3030_v35 = vadd.f32 %v8431_v38, %v3008_v48  ;;  %v3178_v54 = vor.u32 %v3177_v9, %v3174_v3  ;;  %v3187_v59 = vrot.slane %v3185_v52, 7  ;;  %v9908_v45 = vshll.u32 %v8515_v47, 16  ;;  %6783 = vmatpush3.bf16.msra.mxu0 %v8323_v41  ;;  %v8604_v52 = vld [vmem:[#allocation3 + $0x50] sm:$0xf] }
 0x1c5   : > { %v3202_v61 = vrot.slane %v9907_v17, 6  ;;  %3125 = vst.msk [vmem:[#allocation3 + $0xb0] sm:$0xf] %vm338_vm2, %v6363_v27  ;;  %v6361_v18 = vpack.c.bf16 %v3043_v44, %v3043_v44  ;;  %v3028_v28 = vadd.f32 %v8431_v38, %v3006_v24  ;;  %v3210_v58 = vshrl.u32 %v8581_v53, 16  ;;  %6904 = vmatprep.subr.msk.bf16.mxu0 %vm670_vm0, %v8392_v37  ;;  %v3138_v17 = vld [vmem:[#allocation3 + $0x54] sm:$0x3] }
 0x1c6   : > { %v3205_v0 = vrot.slane %v9908_v45, 7  ;;  %v3213_v20 = vshll.u32 %v8581_v53, 16  ;;  %v3046_v3 = vmax.f32 %v3030_v35, 0.0  ;;  %v3179_v41 = vsel %vm7127_vm9, %v8159_v56, %v3178_v54  ;;  %v8609_v35 = vld [vmem:[#allocation3 + $0x3c] sm:$0x7] }
 0x1c7   : > { %v3180_v55 = vrot.slane %v3178_v54, 4  ;;  %v3188_v30 = vor.u32 %v3187_v59, %v3184_v7  ;;  %3123 = vst.msk [vmem:[#allocation3 + $0x98] sm:$0xf] %vm338_vm2, %v6361_v18  ;;  %v3044_v38 = vmax.f32 %v3028_v28, 0.0  ;;  %v3212_v48 = vrot.slane %v3210_v58, 6 }
 0x1c8   : > { %v3206_v57 = vor.u32 %v3205_v0, %v3202_v61  ;;  %v3215_v9 = vrot.slane %v3213_v20, 7  ;;  %v6364_v27 = vpack.c.bf16 %v3046_v3, %v3046_v3  ;;  %v3574_v37 = vrot.slane %v8596_v19, 6 }
 0x1c9   : > { %v3189_v44 = vsel %vm7127_vm9, %v3180_v55, %v3188_v30  ;;  %v3577_v24 = vrot.slane %v3135_v21, 6  ;;  %v6362_v56 = vpack.c.bf16 %v3044_v38, %v3044_v38  ;;  %v9910_v45 = vrot.slane %v8121_v6, 10  ;;  %v8633_v38 = vld [vmem:[#allocation3 + $0x54] sm:$0x7] }
 0x1ca   : > { %v6152_v7 = vcombine.low %v3179_v41, %v3189_v44  ;;  %v3207_v61 = vsel %vm7127_vm9, %v8173_v1, %v3206_v57  ;;  %v3208_v54 = vrot.slane %v3206_v57, 4  ;;  %3126 = vst.msk [vmem:[#allocation3 + $0xb4] sm:$0xf] %vm338_vm2, %v6364_v27  ;;  %v3216_v59 = vor.u32 %v3215_v9, %v3212_v48  ;;  %v8639_v44 = vld [vmem:[#allocation3 + $0x68] sm:$0xf] }
 0x1cb   : > { %v3575_v0 = vsel %vm7109_vm8, %v9910_v45, %v3574_v37  ;;  %v3576_v18 = vrot.slane %v3574_v37, 4  ;;  %v3581_v28 = vrot.slane %v8604_v52, 6  ;;  %3124 = vst.msk [vmem:[#allocation3 + $0x9c] sm:$0xf] %vm338_vm2, %v6362_v56  ;;  %v3584_v58 = vrot.slane %v3138_v17, 6 }
 0x1cc   : > { %6730 = vmatprep.mubr.msk.bf16.mxu1 %vm645_vm7, %v6152_v7  ;;  %v9791_v20 = vshrl.u32 %v8596_v19, 16  ;;  %v9788_v1 = vshll.u32 %v8596_v19, 16  ;;  %v3238_v21 = vshrl.u32 %v8609_v35, 16  ;;  %v3217_v6 = vsel %vm7127_vm9, %v3208_v54, %v3216_v59  ;;  %v8649_v59 = vld [vmem:[#allocation3 + $0x80] sm:$0xf] }
 0x1cd   : > { %v3578_v3 = vsel %vm7109_vm8, %v3576_v18, %v3577_v24  ;;  %v9911_v41 = vrot.slane %v8114_v60, 10  ;;  %v3583_v30 = vrot.slane %v3581_v28, 4  ;;  %v6153_v57 = vcombine.low %v3207_v61, %v3217_v6  ;;  %v3144_v45 = vld [vmem:[#allocation3 + $0x84] sm:$0x3] }
 0x1ce   : > { %v6178_v48 = vcombine.low %v3575_v0, %v3578_v3  ;;  %v3230_v9 = vrot.slane %v9791_v20, 6  ;;  %v3233_v27 = vrot.slane %v9788_v1, 7  ;;  %v3240_v60 = vrot.slane %v3238_v21, 6  ;;  %v9912_v0 = vld [vmem:[#allocation45_spill] sm:$0xff] }
 0x1cf   : > { %v3582_v55 = vsel %vm7109_vm8, %v9911_v41, %v3581_v28  ;;  %v3585_v37 = vsel %vm7109_vm8, %v3583_v30, %v3584_v58  ;;  %v3241_v24 = vshll.u32 %v8609_v35, 16  ;;  %v9783_v17 = vshrl.u32 %v8604_v52, 16  ;;  %6731 = vmatmul.mubr.msk.bf16.vlgmr.msra.gmra.mxu1 %vm645_vm7, %v6153_v57  ;;  %v3141_v21 = vld [vmem:[#allocation3 + $0x6c] sm:$0x3] }
 0x1d0   : > { %6752 = vmatprep.mubr.msk.bf16.mxu0 %vm645_vm7, %v6178_v48  ;;  %v6179_v56 = vcombine.low %v3582_v55, %v3585_v37  ;;  %v3234_v7 = vor.u32 %v3233_v27, %v3230_v9  ;;  %v9782_v61 = vshll.u32 %v8604_v52, 16  ;;  %v3266_v54 = vshrl.u32 %v8633_v38, 16  ;;  %6765 = vmatpush3.bf16.msra.mxu1 %v9912_v0  ;;  %v9913_v3 = vld [vmem:[#allocation49_spill] sm:$0xff] }
 0x1d1   : > { %v3243_v18 = vrot.slane %v3241_v24, 7  ;;  %v3258_v28 = vrot.slane %v9783_v17, 6  ;;  %v3269_v58 = vshll.u32 %v8633_v38, 16  ;;  %v3588_v6 = vrot.slane %v8639_v44, 6  ;;  %6903 = vmatprep.subr.msk.bf16.mxu1 %vm670_vm0, %v8315_v29  ;;  %v8671_v17 = vld [vmem:[#allocation3 + $0x6c] sm:$0x7] }
 0x1d2   : > { %6753 = vmatmul.mubr.msk.bf16.gmra.mxu0 %vm645_vm7, %v6179_v56  ;;  %v3235_v41 = vsel %vm7127_vm9, %v9913_v3, %v3234_v7  ;;  %v3236_v55 = vrot.slane %v3234_v7, 4  ;;  %v3261_v30 = vrot.slane %v9782_v61, 7  ;;  %v3268_v57 = vrot.slane %v3266_v54, 6 }
 0x1d3   : > { %v3244_v48 = vor.u32 %v3243_v18, %v3240_v60  ;;  %v3271_v9 = vrot.slane %v3269_v58, 7  ;;  %v9914_v27 = vrot.slane %v8161_v26, 10  ;;  %v3590_v24 = vrot.slane %v3588_v6, 4  ;;  %v9915_v18 = vld [vmem:[#allocation46_spill] sm:$0xff] }
 0x1d4   : > { %v3262_v56 = vor.u32 %v3261_v30, %v3258_v28  ;;  %v3591_v0 = vrot.slane %v3141_v21, 6  ;;  %v3595_v3 = vrot.slane %v8649_v59, 6  ;;  %v3598_v7 = vrot.slane %v3144_v45, 6 }
 0x1d5   : > { %v3589_v37 = vsel %vm7109_vm8, %v9914_v27, %v3588_v6  ;;  %v3245_v61 = vsel %vm7127_vm9, %v3236_v55, %v3244_v48  ;;  %v3272_v54 = vor.u32 %v3271_v9, %v3268_v57  ;;  %v9787_v29 = vshrl.u32 %v8639_v44, 16  ;;  %v9916_v6 = vld [vmem:[#allocation43_spill] sm:$0xff] }
 0x1d6   : > { %v9786_v60 = vshll.u32 %v8639_v44, 16  ;;  %v6154_v26 = vcombine.low %v3235_v41, %v3245_v61  ;;  %v3263_v58 = vsel %vm7127_vm9, %v9915_v18, %v3262_v56  ;;  %v3264_v28 = vrot.slane %v3262_v56, 4 }
 0x1d7   : > { %v3592_v21 = vsel %vm7109_vm8, %v3590_v24, %v3591_v0  ;;  %v9917_v30 = vrot.slane %v9916_v6, 10  ;;  %v3597_v57 = vrot.slane %v3595_v3, 4  ;;  %v3286_v48 = vrot.slane %v9787_v29, 6  ;;  %v3147_v6 = vld [vmem:[#allocation3 + $0x9c] sm:$0x3] }
 0x1d8   : > { %v6180_v45 = vcombine.low %v3589_v37, %v3592_v21  ;;  %6734 = vmatprep.mubr.msk.bf16.mxu1 %vm645_vm7, %v6154_v26  ;;  %v3273_v61 = vsel %vm7127_vm9, %v3264_v28, %v3272_v54  ;;  %v3289_v41 = vrot.slane %v9786_v60, 7  ;;  %v3294_v9 = vshrl.u32 %v8671_v17, 16  ;;  %v8693_v37 = vld [vmem:[#allocation3 + $0x84] sm:$0x7]  ;;  %v8700_v54 = vld [vmem:[#allocation3 + $0x98] sm:$0xf] }
 0x1d9   : > { %v3596_v55 = vsel %vm7109_vm8, %v9917_v30, %v3595_v3  ;;  %v3297_v27 = vshll.u32 %v8671_v17, 16  ;;  %v6155_v24 = vcombine.low %v3263_v58, %v3273_v61  ;;  %v3599_v56 = vsel %vm7109_vm8, %v3597_v57, %v3598_v7  ;;  %v8709_v57 = vld [vmem:[#allocation3 + $0xb0] sm:$0xf] }
 0x1da   : > { %6756 = vmatprep.mubr.msk.bf16.mxu0 %vm645_vm7, %v6180_v45  ;;  %v9785_v0 = vshrl.u32 %v8649_v59, 16  ;;  %v9784_v3 = vshll.u32 %v8649_v59, 16  ;;  %v6181_v26 = vcombine.low %v3596_v55, %v3599_v56  ;;  %v3290_v18 = vor.u32 %v3289_v41, %v3286_v48  ;;  %v9918_v55 = vld [vmem:[#allocation13_spill] sm:$0xff] }
 0x1db   : > { %v3296_v28 = vrot.slane %v3294_v9, 6  ;;  %v3299_v21 = vrot.slane %v3297_v27, 7  ;;  %6735 = vmatmul.mubr.msk.bf16.gmra.mxu1 %vm645_vm7, %v6155_v24  ;;  %v3322_v7 = vshrl.u32 %v8693_v37, 16  ;;  %v3325_v30 = vshll.u32 %v8693_v37, 16 }
 0x1dc   : > { %v3314_v58 = vrot.slane %v9785_v0, 6  ;;  %v3317_v45 = vrot.slane %v9784_v3, 7  ;;  %6757 = vmatmul.mubr.msk.bf16.gmra.mxu0 %vm645_vm7, %v6181_v26  ;;  %v3291_v48 = vsel %vm7127_vm9, %v9918_v55, %v3290_v18  ;;  %v3292_v61 = vrot.slane %v3290_v18, 4  ;;  %v3150_v0 = vld [vmem:[#allocation3 + $0xb4] sm:$0x3] }
 0x1dd   : > { %v3300_v41 = vor.u32 %v3299_v21, %v3296_v28  ;;  %v3602_v9 = vrot.slane %v8700_v54, 6  ;;  %v3324_v24 = vrot.slane %v3322_v7, 6  ;;  %v3327_v56 = vrot.slane %v3325_v30, 7  ;;  %v8723_v18 = vld [vmem:[#allocation3 + $0xc] sm:$0xf]  ;;  %v9920_v21 = vld [vmem:[#allocation11_spill] sm:$0xff] }
 0x1de   : > { %v3318_v27 = vor.u32 %v3317_v45, %v3314_v58  ;;  %v3605_v3 = vrot.slane %v3147_v6, 6  ;;  %v9919_v29 = vrot.slane %v8208_v43, 10  ;;  %v3609_v55 = vrot.slane %v8709_v57, 6  ;;  %v9921_v30 = vld [vmem:[#allocation47_spill] sm:$0xff] }
 0x1df   : > { %v3301_v60 = vsel %vm7127_vm9, %v3292_v61, %v3300_v41  ;;  %v3604_v1 = vrot.slane %v3602_v9, 4  ;;  %v3328_v45 = vor.u32 %v3327_v56, %v3324_v24  ;;  %v9922_v43 = vrot.slane %v9921_v30, 10  ;;  %v8740_v24 = vld [vmem:[#allocation3 + $0x9c] sm:$0x7]  ;;  %v9923_v30 = vld [vmem:[#allocation48_spill] sm:$0xff] }
 0x1e0   : > { %v3603_v26 = vsel %vm7109_vm8, %v9919_v29, %v3602_v9  ;;  %v6156_v28 = vcombine.low %v3291_v48, %v3301_v60  ;;  %v3319_v58 = vsel %vm7127_vm9, %v9920_v21, %v3318_v27  ;;  %v3320_v6 = vrot.slane %v3318_v27, 4  ;;  %v8749_v21 = vld [vmem:[#allocation3 + $0xb4] sm:$0x7] }
 0x1e1   : > { %v3606_v7 = vsel %vm7109_vm8, %v3604_v1, %v3605_v3  ;;  %v3610_v29 = vsel %vm7109_vm8, %v9922_v43, %v3609_v55  ;;  %v3611_v61 = vrot.slane %v3609_v55, 4  ;;  %v3612_v41 = vrot.slane %v3150_v0, 6 }
 0x1e2   : > { %6738 = vmatprep.mubr.msk.bf16.mxu1 %vm645_vm7, %v6156_v28  ;;  %v3329_v60 = vsel %vm7127_vm9, %v3320_v6, %v3328_v45  ;;  %v6182_v48 = vcombine.low %v3603_v26, %v3606_v7  ;;  %v4023_v9 = vrot.slane %v3172_v36, 7  ;;  %v4028_v27 = vshrl.u32 %v8723_v18, 16 }
 0x1e3   : > { %v6157_v1 = vcombine.low %v3319_v58, %v3329_v60  ;;  %v3613_v3 = vsel %vm7109_vm8, %v3611_v61, %v3612_v41  ;;  %v4031_v56 = vshll.u32 %v8723_v18, 16  ;;  %v9790_v0 = vshrl.u32 %v8700_v54, 16 }
 0x1e4   : > { %6760 = vmatprep.mubr.msk.bf16.mxu0 %vm645_vm7, %v6182_v48  ;;  %v6183_v55 = vcombine.low %v3610_v29, %v3613_v3  ;;  %v4024_v26 = vor.u32 %v4023_v9, %v3175_v63  ;;  %v4026_v28 = vrot.slane %v4023_v9, 4  ;;  %v4030_v36 = vrot.slane %v4028_v27, 7 }
 0x1e5   : > { %6739 = vmatmul.mubr.msk.bf16.gmra.mxu1 %vm645_vm7, %v6157_v1  ;;  %v3342_v58 = vrot.slane %v9790_v0, 6  ;;  %v9789_v6 = vshll.u32 %v8700_v54, 16  ;;  %v3350_v45 = vshrl.u32 %v8740_v24, 16  ;;  %v3353_v7 = vshll.u32 %v8740_v24, 16 }
 0x1e6   : > { %6761 = vmatmul.mubr.msk.bf16.gmra.mxu0 %vm645_vm7, %v6183_v55  ;;  %v4025_v63 = vsel %vm7360_vm15, %v9923_v30, %v4024_v26  ;;  %v4033_v29 = vor.u32 %v4031_v56, %v4030_v36  ;;  %v9793_v61 = vshrl.u32 %v8709_v57, 16  ;;  %v9792_v41 = vshll.u32 %v8709_v57, 16  ;;  %v8773_v26 = vld [vmem:[#allocation3 + $0x24] sm:$0xf] }
 0x1e7   : > { %v3345_v60 = vrot.slane %v9789_v6, 7  ;;  %v3352_v48 = vrot.slane %v3350_v45, 6  ;;  %v3355_v9 = vrot.slane %v3353_v7, 7  ;;  %v3378_v27 = vshrl.u32 %v8749_v21, 16 }
 0x1e8   : > { %v4034_v1 = vsel %vm7360_vm15, %v4026_v28, %v4033_v29  ;;  %v3370_v3 = vrot.slane %v9793_v61, 6  ;;  %v3373_v56 = vrot.slane %v9792_v41, 7  ;;  %v3381_v55 = vshll.u32 %v8749_v21, 16  ;;  %v9925_v29 = vld [vmem:[#allocation17_spill] sm:$0xff] }
 0x1e9   : > { %v6226_v36 = vcombine.low %v4025_v63, %v4034_v1  ;;  %v3346_v30 = vor.u32 %v3345_v60, %v3342_v58  ;;  %v3356_v6 = vor.u32 %v3355_v9, %v3352_v48  ;;  %v3380_v45 = vrot.slane %v3378_v27, 6  ;;  %v9927_v9 = vld [vmem:[#allocation44_spill] sm:$0xff] }
 0x1ea   : > { %v3374_v7 = vor.u32 %v3373_v56, %v3370_v3  ;;  %v3383_v0 = vrot.slane %v3381_v55, 7  ;;  %v3790_v20 = vrot.slane %v8528_v14, 7  ;;  %v3793_v28 = vrot.slane %v8561_v2, 7 }
 0x1eb   : > { %6784 = vmatprep.mubr.msk.bf16.mxu0 %vm645_vm7, %v6226_v36  ;;  %v3347_v41 = vsel %vm7127_vm9, %v9925_v29, %v3346_v30  ;;  %v3348_v61 = vrot.slane %v3346_v30, 4  ;;  %v4040_v4 = vrot.slane %v9926_v23, 7  ;;  %v4045_v58 = vshrl.u32 %v8773_v26, 16  ;;  %v8795_v30 = vld [vmem:[#allocation3 + $0x3c] sm:$0xf] }
 0x1ec   : > { %v3375_v63 = vsel %vm7127_vm9, %v8334_v34, %v3374_v7  ;;  %v3376_v60 = vrot.slane %v3374_v7, 4  ;;  %v3384_v48 = vor.u32 %v3383_v0, %v3380_v45  ;;  %v9928_v2 = vrot.slane %v9927_v9, 11 }
 0x1ed   : > { %v3357_v3 = vsel %vm7127_vm9, %v3348_v61, %v3356_v6  ;;  %v3792_v56 = vrot.slane %v3790_v20, 4  ;;  %v9930_v55 = vshll.u32 %v8515_v47, 16  ;;  %v4043_v36 = vrot.slane %v4040_v4, 4 }
 0x1ee   : > { %v3791_v1 = vsel %vm7330_vm14, %v9928_v2, %v3790_v20  ;;  %v6158_v29 = vcombine.low %v3347_v41, %v3357_v3  ;;  %v3385_v34 = vsel %vm7127_vm9, %v3376_v60, %v3384_v48  ;;  %v4047_v0 = vrot.slane %v4045_v58, 7  ;;  %v9931_v2 = vld [vmem:[#allocation15_spill] sm:$0xff] }
 0x1ef   : > { %v4041_v23 = vor.u32 %v4040_v4, %v9930_v55  ;;  %v4048_v45 = vshll.u32 %v8773_v26, 16  ;;  %v6159_v7 = vcombine.low %v3375_v63, %v3385_v34  ;;  %v3794_v9 = vsel %vm7330_vm14, %v3792_v56, %v3793_v28 }
 0x1f0   : > { %v9932_v6 = vshrl.u32 %v8596_v19, 16  ;;  %6742 = vmatprep.mubr.msk.bf16.mxu1 %vm645_vm7, %v6158_v29  ;;  %v6201_v61 = vcombine.low %v3791_v1, %v3794_v9  ;;  %v4062_v16 = vshrl.u32 %v8795_v30, 16  ;;  %v4065_v58 = vshll.u32 %v8795_v30, 16  ;;  %v8820_v29 = vld [vmem:[#allocation3 + $0x54] sm:$0xf] }
 0x1f1   : > { %v4042_v20 = vsel %vm7360_vm15, %v9931_v2, %v4041_v23  ;;  %v4050_v41 = vor.u32 %v4048_v45, %v4047_v0  ;;  %6743 = vmatmul.mubr.msk.bf16.gmra.mxu1 %vm645_vm7, %v6159_v7  ;;  %v9933_v63 = vshll.u32 %v8596_v19, 16  ;;  %v3797_v48 = vrot.slane %v8515_v47, 7  ;;  %v9934_v0 = vld [vmem:[#allocation18_spill] sm:$0xff]  ;;  %v9935_v7 = vld [vmem:[#allocation12_spill] sm:$0xff] }
 0x1f2   : > { %v4057_v4 = vrot.slane %v9932_v6, 7  ;;  %v3800_v3 = vrot.slane %v8581_v53, 7  ;;  %6766 = vmatprep.mubr.msk.bf16.mxu1 %vm645_vm7, %v6201_v61  ;;  %v4064_v56 = vrot.slane %v4062_v16, 7  ;;  %v3804_v55 = vrot.slane %v8596_v19, 7 }
 0x1f3   : > { %v4051_v1 = vsel %vm7360_vm15, %v4043_v36, %v4050_v41  ;;  %v3807_v23 = vrot.slane %v8609_v35, 7  ;;  %v9936_v9 = vrot.slane %v9935_v7, 11  ;;  %v3799_v2 = vrot.slane %v3797_v48, 4  ;;  %v9937_v36 = vld [vmem:[#allocation14_spill] sm:$0xff] }
 0x1f4   : > { %v4058_v28 = vor.u32 %v4057_v4, %v9933_v63  ;;  %v4060_v60 = vrot.slane %v4057_v4, 4  ;;  %v6227_v34 = vcombine.low %v4042_v20, %v4051_v1  ;;  %v4067_v6 = vor.u32 %v4065_v58, %v4064_v56 }
 0x1f5   : > { %v3798_v53 = vsel %vm7330_vm14, %v9936_v9, %v3797_v48  ;;  %v9938_v4 = vrot.slane %v9937_v36, 11  ;;  %v3806_v35 = vrot.slane %v3804_v55, 4  ;;  %v9939_v41 = vshrl.u32 %v8604_v52, 16  ;;  %v8840_v48 = vld [vmem:[#allocation3 + $0x6c] sm:$0xf] }
 0x1f6   : > { %v4059_v45 = vsel %vm7360_vm15, %v9934_v0, %v4058_v28  ;;  %6785 = vmatmul.mubr.msk.bf16.vlgmr.msra.gmra.mxu0 %vm645_vm7, %v6227_v34  ;;  %v3801_v16 = vsel %vm7330_vm14, %v3799_v2, %v3800_v3  ;;  %v4079_v63 = vshrl.u32 %v8820_v29, 16  ;;  %v4082_v28 = vshll.u32 %v8820_v29, 16 }
 0x1f7   : > { %v3805_v61 = vsel %vm7330_vm14, %v9938_v4, %v3804_v55  ;;  %v4074_v20 = vrot.slane %v9939_v41, 7  ;;  %v9940_v58 = vshrl.u32 %v8639_v44, 16  ;;  %v4068_v56 = vsel %vm7360_vm15, %v4060_v60, %v4067_v6  ;;  %6819 = vmatpush3.bf16.msra.mxu0 %v8421_v10  ;;  %v9942_v4 = vld [vmem:[#allocation21_spill] sm:$0xff]  ;;  %v9944_v41 = vld [vmem:[#allocation19_spill] sm:$0xff] }
 0x1f8   : > { %v6202_v55 = vcombine.low %v3798_v53, %v3801_v16  ;;  %v3808_v0 = vsel %vm7330_vm14, %v3806_v35, %v3807_v23  ;;  %v9941_v34 = vshll.u32 %v8604_v52, 16  ;;  %v6228_v3 = vcombine.low %v4059_v45, %v4068_v56  ;;  %6906 = vmatprep.subr.msk.bf16.mxu0 %vm670_vm0, %v8504_v13  ;;  %v9945_v56 = vld [vmem:[#allocation16_spill] sm:$0xff] }
 0x1f9   : > { %v4091_v1 = vrot.slane %v9940_v58, 7  ;;  %v6203_v9 = vcombine.low %v3805_v61, %v3808_v0  ;;  %v4077_v2 = vrot.slane %v4074_v20, 4  ;;  %v4081_v36 = vrot.slane %v4079_v63, 7 }
 0x1fa   : > { %v4075_v7 = vor.u32 %v4074_v20, %v9941_v34  ;;  %v9943_v53 = vshll.u32 %v8639_v44, 16  ;;  %v4096_v35 = vshrl.u32 %v8840_v48, 16  ;;  %6788 = vmatprep.mubr.msk.bf16.mxu0 %vm645_vm7, %v6228_v3  ;;  %6767 = vmatmul.mubr.msk.bf16.vlgmr.msra.gmra.mxu1 %vm645_vm7, %v6202_v55  ;;  %v4099_v45 = vshll.u32 %v8840_v48, 16 }
 0x1fb   : > { %v4094_v23 = vrot.slane %v4091_v1, 4  ;;  %v4084_v10 = vor.u32 %v4082_v28, %v4081_v36  ;;  %v3811_v61 = vrot.slane %v8604_v52, 7  ;;  %v3814_v13 = vrot.slane %v8633_v38, 7  ;;  %6801 = vmatpush3.bf16.msra.mxu1 %v9944_v41  ;;  %6770 = vmatprep.mubr.msk.bf16.mxu1 %vm645_vm7, %v6203_v9  ;;  %v8871_v28 = vld [vmem:[#allocation3 + $0x84] sm:$0xf] }
 0x1fc   : > { %v4076_v60 = vsel %vm7360_vm15, %v9942_v4, %v4075_v7  ;;  %v4092_v6 = vor.u32 %v4091_v1, %v9943_v53  ;;  %v4098_v16 = vrot.slane %v4096_v35, 7  ;;  %v3818_v63 = vrot.slane %v8639_v44, 7  ;;  %6905 = vmatprep.subr.msk.bf16.mxu1 %vm670_vm0, %v8444_v25 }
 0x1fd   : > { %v3821_v58 = vrot.slane %v8671_v17, 7  ;;  %v4085_v1 = vsel %vm7360_vm15, %v4077_v2, %v4084_v10  ;;  %v9946_v38 = vrot.slane %v9945_v56, 11  ;;  %v3813_v0 = vrot.slane %v3811_v61, 4  ;;  %v8892_v10 = vld [vmem:[#allocation3 + $0x9c] sm:$0xf] }
 0x1fe   : > { %v4093_v20 = vsel %vm7360_vm15, %v8369_v12, %v4092_v6  ;;  %v9947_v34 = vshrl.u32 %v8649_v59, 16  ;;  %v6229_v12 = vcombine.low %v4076_v60, %v4085_v1  ;;  %v4101_v3 = vor.u32 %v4099_v45, %v4098_v16 }
 0x1ff   : > { %v3812_v55 = vsel %vm7330_vm14, %v9946_v38, %v3811_v61  ;;  %v9948_v17 = vrot.slane %v8326_v31, 11  ;;  %v3820_v2 = vrot.slane %v3818_v63, 4  ;;  %v3815_v36 = vsel %vm7330_vm14, %v3813_v0, %v3814_v13 }
 0x200   : > { %v4108_v7 = vrot.slane %v9947_v34, 7  ;;  %v9949_v4 = vshll.u32 %v8649_v59, 16  ;;  %v4113_v35 = vshrl.u32 %v8871_v28, 16  ;;  %6789 = vmatmul.mubr.msk.bf16.gmra.mxu0 %vm645_vm7, %v6229_v12  ;;  %v4102_v31 = vsel %vm7360_vm15, %v4094_v23, %v4101_v3 }
 0x201   : > { %v3819_v9 = vsel %vm7330_vm14, %v9948_v17, %v3818_v63  ;;  %v6204_v25 = vcombine.low %v3812_v55, %v3815_v36  ;;  %v3822_v60 = vsel %vm7330_vm14, %v3820_v2, %v3821_v58  ;;  %v4116_v45 = vshll.u32 %v8871_v28, 16 }
 0x202   : > { %v4109_v53 = vor.u32 %v4108_v7, %v9949_v4  ;;  %v4111_v6 = vrot.slane %v4108_v7, 4  ;;  %v6230_v61 = vcombine.low %v4093_v20, %v4102_v31  ;;  %v6205_v13 = vcombine.low %v3819_v9, %v3822_v60  ;;  %v8920_v9 = vld [vmem:[#allocation3 + $0xb4] sm:$0xf]  ;;  %v4492_v60 = vld [vmem:[#allocation3 + $0x8] sm:$0xf] }
 0x203   : > { %v4115_v16 = vrot.slane %v4113_v35, 7  ;;  %v9950_v63 = vshrl.u32 %v8700_v54, 16  ;;  %v4130_v56 = vshrl.u32 %v8892_v10, 16  ;;  %v4133_v23 = vshll.u32 %v8892_v10, 16  ;;  %6771 = vmatmul.mubr.msk.bf16.gmra.mxu1 %vm645_vm7, %v6204_v25 }
 0x204   : > { %v4110_v41 = vsel %vm7360_vm15, %v8383_v51, %v4109_v53  ;;  %v3825_v38 = vrot.slane %v8649_v59, 7  ;;  %6792 = vmatprep.mubr.msk.bf16.mxu0 %vm645_vm7, %v6230_v61  ;;  %v3828_v58 = vrot.slane %v8693_v37, 7  ;;  %v3832_v55 = vrot.slane %v8700_v54, 7  ;;  %6774 = vmatprep.mubr.msk.bf16.mxu1 %vm645_vm7, %v6205_v13  ;;  %v8939_v13 = vld [vmem:[#allocation3 + $0xc] sm:$0xf] }
 0x205   : > { %v4125_v1 = vrot.slane %v9950_v63, 7  ;;  %v4118_v20 = vor.u32 %v4116_v45, %v4115_v16  ;;  %v3835_v51 = vrot.slane %v8740_v24, 7  ;;  %v9951_v0 = vshll.u32 %v8700_v54, 16 }
 0x206   : > { %v4132_v12 = vrot.slane %v4130_v56, 7  ;;  %v9952_v3 = vrot.slane %v8347_v33, 11  ;;  %v3827_v2 = vrot.slane %v3825_v38, 4  ;;  %v9953_v24 = vrot.slane %v8355_v62, 11 }
 0x207   : > { %v4126_v34 = vor.u32 %v4125_v1, %v9951_v0  ;;  %v4128_v7 = vrot.slane %v4125_v1, 4  ;;  %v4119_v37 = vsel %vm7360_vm15, %v4111_v6, %v4118_v20  ;;  %v3834_v4 = vrot.slane %v3832_v55, 4 }
 0x208   : > { %v3826_v17 = vsel %vm7330_vm14, %v9952_v3, %v3825_v38  ;;  %v3833_v36 = vsel %vm7330_vm14, %v9953_v24, %v3832_v55  ;;  %v6231_v53 = vcombine.low %v4110_v41, %v4119_v37  ;;  %v4135_v35 = vor.u32 %v4133_v23, %v4132_v12 }
 0x209   : > { %v4127_v33 = vsel %vm7360_vm15, %v8386_v40, %v4126_v34  ;;  %v9954_v31 = vshrl.u32 %v8709_v57, 16  ;;  %v3829_v6 = vsel %vm7330_vm14, %v3827_v2, %v3828_v58  ;;  %v3836_v62 = vsel %vm7330_vm14, %v3834_v4, %v3835_v51  ;;  %v4495_v34 = vld [vmem:[#allocation3 + $0x20] sm:$0xf] }
 0x20a   : > { %v4147_v45 = vshrl.u32 %v8920_v9, 16  ;;  %v4150_v61 = vshll.u32 %v8920_v9, 16  ;;  %6793 = vmatmul.mubr.msk.bf16.gmra.mxu0 %vm645_vm7, %v6231_v53  ;;  %v4136_v40 = vsel %vm7360_vm15, %v4128_v7, %v4135_v35  ;;  %v6206_v41 = vcombine.low %v3826_v17, %v3829_v6 }
 0x20b   : > { %v4142_v25 = vrot.slane %v9954_v31, 7  ;;  %v6207_v16 = vcombine.low %v3833_v36, %v3836_v62  ;;  %v9955_v63 = vshll.u32 %v8709_v57, 16  ;;  %v6232_v56 = vcombine.low %v4127_v33, %v4136_v40  ;;  %v8962_v36 = vld [vmem:[#allocation3 + $0x24] sm:$0xf]  ;;  %v4498_v62 = vld [vmem:[#allocation3 + $0x38] sm:$0xf] }
 0x20c   : > { %v4149_v38 = vrot.slane %v4147_v45, 7  ;;  %v4519_v20 = vshrl.u32 %v4492_v60, 16  ;;  %v4522_v55 = vshll.u32 %v4492_v60, 16  ;;  %v4528_v51 = vshll.u32 %v8939_v13, 16  ;;  %6775 = vmatmul.mubr.msk.bf16.gmra.mxu1 %vm645_vm7, %v6206_v41 }
 0x20d   : > { %v4143_v1 = vor.u32 %v4142_v25, %v9955_v63  ;;  %v4145_v23 = vrot.slane %v4142_v25, 4  ;;  %v4532_v0 = vshrl.u32 %v8939_v13, 16  ;;  %6796 = vmatprep.mubr.msk.bf16.mxu0 %vm645_vm7, %v6232_v56  ;;  %v3839_v3 = vrot.slane %v8709_v57, 7  ;;  %6778 = vmatprep.mubr.msk.bf16.mxu1 %vm645_vm7, %v6207_v16 }
 0x20e   : > { %v4152_v7 = vor.u32 %v4150_v61, %v4149_v38  ;;  %v4521_v12 = vrot.slane %v4519_v20, 4  ;;  %v3842_v17 = vrot.slane %v8749_v21, 7  ;;  %v4524_v37 = vrot.slane %v4522_v55, 5  ;;  %v8974_v61 = vld [vmem:[#allocation3 + $0x3c] sm:$0xf] }
 0x20f   : > { %v4144_v58 = vsel %vm7360_vm15, %v8401_v11, %v4143_v1  ;;  %v4530_v11 = vrot.slane %v4528_v51, 5  ;;  %v4534_v2 = vrot.slane %v4532_v0, 4  ;;  %v6243_v24 = vcombine.low %v8528_v14, %v8723_v18 }
 0x210   : > { %v4153_v4 = vsel %vm7360_vm15, %v4145_v23, %v4152_v7  ;;  %v9956_v53 = vrot.slane %v8364_v8, 11  ;;  %v3841_v33 = vrot.slane %v3839_v3, 4  ;;  %v4543_v35 = vshrl.u32 %v4495_v34, 16  ;;  %v9964_v23 = vld [vmem:[#allocation20_spill] sm:$0xff] }
 0x211   : > { %v6233_v31 = vcombine.low %v4144_v58, %v4153_v4  ;;  %v4525_v25 = vor.u32 %v4524_v37, %v4521_v12  ;;  %v4535_v60 = vor.u32 %v4534_v2, %v4530_v11  ;;  %v4546_v6 = vshll.u32 %v4495_v34, 16  ;;  %v4501_v34 = vld [vmem:[#allocation3 + $0x50] sm:$0xf]  ;;  %v8988_v37 = vld [vmem:[#allocation3 + $0x54] sm:$0xf] }
 0x212   : > { %v3840_v21 = vsel %vm7330_vm14, %v9956_v53, %v3839_v3  ;;  %v3843_v14 = vsel %vm7330_vm14, %v3841_v33, %v3842_v17  ;;  %v4545_v18 = vrot.slane %v4543_v35, 4  ;;  %v4552_v45 = vshll.u32 %v8962_v36, 16 }
 0x213   : > { %v4556_v43 = vshrl.u32 %v8962_v36, 16  ;;  %6797 = vmatmul.mubr.msk.bf16.gmra.mxu0 %vm645_vm7, %v6233_v31  ;;  %v4526_v8 = vrot.slane %v4525_v25, 4  ;;  %v4536_v40 = vrot.slane %v4535_v60, 4  ;;  %v6208_v41 = vcombine.low %v3840_v21, %v3843_v14 }
 0x214   : > { %v4548_v16 = vrot.slane %v4546_v6, 5  ;;  %v4554_v63 = vrot.slane %v4552_v45, 5  ;;  %v4567_v1 = vshrl.u32 %v4498_v62, 16  ;;  %v4570_v56 = vshll.u32 %v4498_v62, 16  ;;  %v4504_v6 = vld [vmem:[#allocation3 + $0x68] sm:$0xf] }
 0x215   : > { %v4558_v27 = vrot.slane %v4556_v43, 4  ;;  %v4531_v38 = vsel %vm7556_vm4, %v4526_v8, %v4530_v11  ;;  %v4541_v20 = vsel %vm7556_vm4, %v4536_v40, %v8413_v46  ;;  %v4576_v55 = vshll.u32 %v8974_v61, 16  ;;  %6779 = vmatmul.mubr.msk.bf16.gmra.mxu1 %vm645_vm7, %v6208_v41 }
 0x216   : > { %v4549_v58 = vor.u32 %v4548_v16, %v4545_v18  ;;  %v6260_v7 = vcombine.low %v4531_v38, %v4541_v20  ;;  %v4569_v3 = vrot.slane %v4567_v1, 4  ;;  %v4572_v17 = vrot.slane %v4570_v56, 5  ;;  %6802 = vmatprep.mubr.msk.bf16.mxu1 %vm645_vm7, %v6243_v24  ;;  %v9022_v20 = vld [vmem:[%s9754_s4 + $0x10] sm:$0x3] }
 0x217   : > { %v4559_v12 = vor.u32 %v4558_v27, %v4554_v63  ;;  %v4578_v11 = vrot.slane %v4576_v55, 5  ;;  %v4580_v46 = vshrl.u32 %v8974_v61, 16  ;;  %v6244_v4 = vcombine.low %v8515_v47, %v8773_v26 }
 0x218   : > { %v4550_v2 = vrot.slane %v4549_v58, 4  ;;  %6820 = vmatprep.mubr.msk.bf16.mxu0 %vm645_vm7, %v6260_v7  ;;  %v4573_v21 = vor.u32 %v4572_v17, %v4569_v3  ;;  %v6245_v33 = vcombine.low %v8596_v19, %v8795_v30  ;;  %v4591_v35 = vshrl.u32 %v4501_v34, 16  ;;  %v9008_v19 = vld [vmem:[#allocation3 + $0x6c] sm:$0xf]  ;;  %v4507_v3 = vld [vmem:[#allocation3 + $0x80] sm:$0xf] }
 0x219   : > { %v4560_v53 = vrot.slane %v4559_v12, 4  ;;  %v4582_v31 = vrot.slane %v4580_v46, 4  ;;  %v4594_v25 = vshll.u32 %v4501_v34, 16  ;;  %v4600_v60 = vshll.u32 %v8988_v37, 16 }
 0x21a   : > { %v4555_v24 = vsel %vm7556_vm4, %v4550_v2, %v4554_v63  ;;  %v4574_v26 = vrot.slane %v4573_v21, 4  ;;  %v4593_v62 = vrot.slane %v4591_v35, 4  ;;  %v4604_v14 = vshrl.u32 %v8988_v37, 16 }
 0x21b   : > { %v4565_v47 = vsel %vm7556_vm4, %v4560_v53, %v8433_v39  ;;  %v4583_v18 = vor.u32 %v4582_v31, %v4578_v11  ;;  %v4596_v8 = vrot.slane %v4594_v25, 5  ;;  %v4602_v40 = vrot.slane %v4600_v60, 5  ;;  %v9037_v53 = vld [vmem:[#allocation3 + $0x84] sm:$0xf] }
 0x21c   : > { %v6261_v30 = vcombine.low %v4555_v24, %v4565_v47  ;;  %v4579_v41 = vsel %vm7556_vm4, %v4574_v26, %v4578_v11  ;;  %v4606_v16 = vrot.slane %v4604_v14, 4  ;;  %v4615_v63 = vshrl.u32 %v4504_v6, 16  ;;  %v4510_v24 = vld [vmem:[#allocation3 + $0x98] sm:$0xf] }
 0x21d   : > { %v4618_v39 = vshll.u32 %v4504_v6, 16  ;;  %v4584_v27 = vrot.slane %v4583_v18, 4  ;;  %v4597_v1 = vor.u32 %v4596_v8, %v4593_v62  ;;  %v4624_v56 = vshll.u32 %v9008_v19, 16  ;;  %6803 = vmatmul.mubr.msk.bf16.vlgmr.msra.gmra.mxu1 %vm645_vm7, %v6244_v4 }
 0x21e   : > { %6821 = vmatmul.mubr.msk.bf16.vlgmr.msra.gmra.mxu0 %vm645_vm7, %v6261_v30  ;;  %v4628_v38 = vshrl.u32 %v9008_v19, 16  ;;  %v4607_v58 = vor.u32 %v4606_v16, %v4602_v40  ;;  %v4617_v34 = vrot.slane %v4615_v63, 4  ;;  %v6246_v12 = vcombine.low %v8604_v52, %v8820_v29  ;;  %6837 = vmatpush3.bf16.msra.mxu1 %v8461_v49 }
 0x21f   : > { %v4620_v7 = vrot.slane %v4618_v39, 5  ;;  %6855 = vmatpush3.bf16.msra.mxu0 %v8519_v15  ;;  %v4589_v17 = vsel %vm7556_vm4, %v4584_v27, %v8448_v5  ;;  %6806 = vmatprep.mubr.msk.bf16.mxu1 %vm645_vm7, %v6245_v33  ;;  %v4598_v2 = vrot.slane %v4597_v1, 4  ;;  %v4626_v11 = vrot.slane %v4624_v56, 5  ;;  %v4513_v27 = vld [vmem:[#allocation3 + $0xb0] sm:$0xf] }
 0x220   : > { %v4630_v4 = vrot.slane %v4628_v38, 4  ;;  %v6262_v52 = vcombine.low %v4579_v41, %v4589_v17  ;;  %v4608_v29 = vrot.slane %v4607_v58, 4  ;;  %v6247_v21 = vcombine.low %v8639_v44, %v8840_v48  ;;  %6907 = vmatprep.subr.msk.bf16.mxu1 %vm670_vm0, %v9022_v20  ;;  %v9051_v48 = vld [vmem:[#allocation3 + $0x9c] sm:$0xf] }
 0x221   : > { %v4621_v15 = vor.u32 %v4620_v7, %v4617_v34  ;;  %v4603_v5 = vsel %vm7556_vm4, %v4598_v2, %v4602_v40  ;;  %v4639_v33 = vshrl.u32 %v4507_v3, 16  ;;  %v4642_v35 = vshll.u32 %v4507_v3, 16  ;;  %v9066_v3 = vld [vmem:[#allocation3 + $0xb4] sm:$0xf] }
 0x222   : > { %v4631_v49 = vor.u32 %v4630_v4, %v4626_v11  ;;  %6824 = vmatprep.mubr.msk.bf16.mxu0 %vm645_vm7, %v6262_v52  ;;  %v4613_v31 = vsel %vm7556_vm4, %v4608_v29, %v8463_v50  ;;  %v4648_v6 = vshll.u32 %v9037_v53, 16  ;;  %v4652_v44 = vshrl.u32 %v9037_v53, 16 }
 0x223   : > { %v4622_v25 = vrot.slane %v4621_v15, 4  ;;  %v6263_v47 = vcombine.low %v4603_v5, %v4613_v31  ;;  %v4641_v62 = vrot.slane %v4639_v33, 4  ;;  %v4644_v30 = vrot.slane %v4642_v35, 5  ;;  %v4874_v33 = vld [vmem:[#allocation3 + $0x8] sm:$0xe]  ;;  %v9958_v35 = vld [vmem:[#allocation22_spill] sm:$0xff] }
 0x224   : > { %v4632_v26 = vrot.slane %v4631_v49, 4  ;;  %v4650_v8 = vrot.slane %v4648_v6, 5  ;;  %v4654_v50 = vrot.slane %v4652_v44, 4  ;;  %v4663_v40 = vshrl.u32 %v4510_v24, 16 }
 0x225   : > { %v4627_v18 = vsel %vm7556_vm4, %v4622_v25, %v4626_v11  ;;  %v4645_v16 = vor.u32 %v4644_v30, %v4641_v62  ;;  %v4666_v63 = vshll.u32 %v4510_v24, 16  ;;  %v4672_v39 = vshll.u32 %v9051_v48, 16  ;;  %6807 = vmatmul.mubr.msk.bf16.gmra.mxu1 %vm645_vm7, %v6246_v12 }
 0x226   : > { %6825 = vmatmul.mubr.msk.bf16.gmra.mxu0 %vm645_vm7, %v6263_v47  ;;  %v4637_v41 = vsel %vm7556_vm4, %v4632_v26, %v8471_v42  ;;  %v4655_v58 = vor.u32 %v4654_v50, %v4650_v8  ;;  %v4665_v34 = vrot.slane %v4663_v40, 4  ;;  %v4676_v7 = vshrl.u32 %v9051_v48, 16  ;;  %6810 = vmatprep.mubr.msk.bf16.mxu1 %vm645_vm7, %v6247_v21 }
 0x227   : > { %v6264_v1 = vcombine.low %v4627_v18, %v4637_v41  ;;  %v4646_v17 = vrot.slane %v4645_v16, 4  ;;  %v4668_v2 = vrot.slane %v4666_v63, 5  ;;  %v4674_v42 = vrot.slane %v4672_v39, 5 }
 0x228   : > { %v6248_v11 = vcombine.low %v8649_v59, %v8871_v28  ;;  %v4656_v4 = vrot.slane %v4655_v58, 4  ;;  %v4678_v12 = vrot.slane %v4676_v7, 4  ;;  %v6249_v52 = vcombine.low %v8700_v54, %v8892_v10  ;;  %v9100_v58 = vld [vmem:[#allocation3 + $0x20] sm:$0xe] }
 0x229   : > { %6828 = vmatprep.mubr.msk.bf16.mxu0 %vm645_vm7, %v6264_v1  ;;  %v4687_v29 = vshrl.u32 %v4513_v27, 16  ;;  %v4651_v15 = vsel %vm7556_vm4, %v4646_v17, %v4650_v8  ;;  %v4669_v21 = vor.u32 %v4668_v2, %v4665_v34  ;;  %v4690_v5 = vshll.u32 %v4513_v27, 16 }
 0x22a   : > { %v4696_v49 = vshll.u32 %v9066_v3, 16  ;;  %v4661_v59 = vsel %vm7556_vm4, %v4656_v4, %v9958_v35  ;;  %v4679_v28 = vor.u32 %v4678_v12, %v4674_v42  ;;  %v4700_v31 = vshrl.u32 %v9066_v3, 16  ;;  %v9960_v35 = vld [vmem:[#allocation26_spill] sm:$0xff] }
 0x22b   : > { %v4689_v24 = vrot.slane %v4687_v29, 4  ;;  %v6265_v25 = vcombine.low %v4651_v15, %v4661_v59  ;;  %v4670_v47 = vrot.slane %v4669_v21, 4  ;;  %v4692_v54 = vrot.slane %v4690_v5, 5  ;;  %v9961_v59 = vld [vmem:[#allocation24_spill] sm:$0xff] }
 0x22c   : > { %v4698_v10 = vrot.slane %v4696_v49, 5  ;;  %v4680_v26 = vrot.slane %v4679_v28, 4  ;;  %v4702_v62 = vrot.slane %v4700_v31, 4  ;;  %v5139_v30 = vshrl.u32 %v4874_v33, 16 }
 0x22d   : > { %v5142_v18 = vshll.u32 %v4874_v33, 16  ;;  %v4675_v8 = vsel %vm7556_vm4, %v4670_v47, %v4674_v42  ;;  %v4693_v50 = vor.u32 %v4692_v54, %v4689_v24  ;;  %v5147_v40 = vrot.slane %v4532_v0, 5  ;;  %6811 = vmatmul.mubr.msk.bf16.gmra.mxu1 %vm645_vm7, %v6248_v11  ;;  %v5487_v24 = vld [vmem:[#allocation3 + $0x20] sm:$0xc] }
 0x22e   : > { %6829 = vmatmul.mubr.msk.bf16.gmra.mxu0 %vm645_vm7, %v6265_v25  ;;  %v5148_v41 = vrot.slane %v4528_v51, 6  ;;  %v4685_v16 = vsel %vm7556_vm4, %v4680_v26, %v8494_v22  ;;  %v4703_v63 = vor.u32 %v4702_v62, %v4698_v10  ;;  %v5141_v27 = vrot.slane %v5139_v30, 5  ;;  %6814 = vmatprep.mubr.msk.bf16.mxu1 %vm645_vm7, %v6249_v52 }
 0x22f   : > { %v5144_v1 = vrot.slane %v5142_v18, 6  ;;  %v6266_v34 = vcombine.low %v4675_v8, %v4685_v16  ;;  %v4694_v17 = vrot.slane %v4693_v50, 4  ;;  %v6250_v0 = vcombine.low %v8709_v57, %v8920_v9  ;;  %v9131_v8 = vld [vmem:[#allocation3 + $0x40] sm:$0x3]  ;;  %v9966_v16 = vld [vmem:[#allocation23_spill] sm:$0xff] }
 0x230   : > { %v5149_v2 = vor.u32 %v5148_v41, %v5147_v40  ;;  %v4704_v51 = vrot.slane %v4703_v63, 4  ;;  %v6277_v4 = vrot.slane %v4874_v33, 9  ;;  %v4910_v22 = vrot.slane %v8939_v13, 5 }
 0x231   : > { %v5145_v42 = vor.u32 %v5144_v1, %v5141_v27  ;;  %6832 = vmatprep.mubr.msk.bf16.mxu0 %vm645_vm7, %v6266_v34  ;;  %v4699_v11 = vsel %vm7556_vm4, %v4694_v17, %v4698_v10  ;;  %v5162_v29 = vshrl.u32 %v9100_v58, 16  ;;  %v5165_v52 = vshll.u32 %v9100_v58, 16  ;;  %v4876_v10 = vld [vmem:[#allocation3 + $0x38] sm:$0xe] }
 0x232   : > { %v5151_v12 = vrot.slane %v5149_v2, 4  ;;  %v4709_v15 = vsel %vm7556_vm4, %v4704_v51, %v8506_v32  ;;  %v4911_v21 = vsel %vm7690_vm10, %v6277_v4, %v4910_v22  ;;  %v4912_v5 = vrot.slane %v4910_v22, 4 }
 0x233   : > { %v5146_v57 = vrot.slane %v5145_v42, 4  ;;  %v6267_v33 = vcombine.low %v4699_v11, %v4709_v15  ;;  %v9962_v28 = vor.u32 %v9960_v35, %v9961_v59  ;;  %v5164_v47 = vrot.slane %v5162_v29, 5 }
 0x234   : > { %v5167_v54 = vrot.slane %v5165_v52, 6  ;;  %v9965_v32 = vrot.slane %v9964_v23, 5  ;;  %v5170_v30 = vrot.slane %v4556_v43, 5  ;;  %v5171_v18 = vrot.slane %v4552_v45, 6 }
 0x235   : > { %v5160_v25 = vsel %vm7732_vm13, %v5151_v12, %v9962_v28  ;;  %v5150_v26 = vsel %vm7732_vm13, %v5146_v57, %v5149_v2  ;;  %v9967_v63 = vshll.u32 %v9966_v16, 16  ;;  %6815 = vmatmul.mubr.msk.bf16.gmra.mxu1 %vm645_vm7, %v6250_v0  ;;  %v5185_v34 = vshrl.u32 %v4876_v10, 16  ;;  %v9968_v2 = vld [vmem:[#allocation27_spill] sm:$0xff]  ;;  %v6925_v28 = vld [vmem:[#allocation3 + $0x28] sm:$0x1] }
 0x236   : > { %v4914_v62 = vsel %vm7690_vm10, %v4912_v5, %v9965_v32  ;;  %6833 = vmatmul.mubr.msk.bf16.gmra.mxu0 %vm645_vm7, %v6267_v33  ;;  %v6302_v50 = vcombine.low %v5150_v26, %v5160_v25  ;;  %v5168_v41 = vor.u32 %v5167_v54, %v5164_v47  ;;  %v5172_v1 = vor.u32 %v5171_v18, %v5170_v30  ;;  %v9152_v33 = vld [vmem:[#allocation3 + $0x50] sm:$0xe]  ;;  %v6926_v30 = vld [vmem:[#allocation3 + $0x40] sm:$0x1]  ;;  %v9167_v16 = vld [vmem:[#allocation3 + $0x58] sm:$0x3] }
 0x237   : > { %v6285_v40 = vcombine.low %v4911_v21, %v4914_v62  ;;  %v5181_v27 = vrot.slane %v9967_v63, 6  ;;  %v5188_v17 = vshll.u32 %v4876_v10, 16  ;;  %v5193_v43 = vrot.slane %v4580_v46, 5 }
 0x238   : > { %6856 = vmatprep.mubr.msk.bf16.mxu0 %vm645_vm7, %v6302_v50  ;;  %v5169_v45 = vrot.slane %v5168_v41, 4  ;;  %v5194_v42 = vrot.slane %v4576_v55, 6  ;;  %v5199_v4 = vshrl.u32 %v9131_v8, 16  ;;  %v5174_v22 = vrot.slane %v5172_v1, 4 }
 0x239   : > { %6838 = vmatprep.mubr.msk.bf16.mxu1 %vm645_vm7, %v6285_v40  ;;  %v5182_v51 = vor.u32 %v5181_v27, %v9968_v2  ;;  %v5187_v0 = vrot.slane %v5185_v34, 5  ;;  %v5190_v11 = vrot.slane %v5188_v17, 6  ;;  %v5202_v12 = vshll.u32 %v9131_v8, 16 }
 0x23a   : > { %v5173_v46 = vsel %vm7732_vm13, %v5169_v45, %v5172_v1  ;;  %v5195_v29 = vor.u32 %v5194_v42, %v5193_v43  ;;  %v5201_v52 = vrot.slane %v5199_v4, 5  ;;  %v6278_v15 = vrot.slane %v9100_v58, 9 }
 0x23b   : > { %v5183_v57 = vsel %vm7732_vm13, %v5174_v22, %v5182_v51  ;;  %v5191_v21 = vor.u32 %v5190_v11, %v5187_v0  ;;  %v5204_v5 = vrot.slane %v5202_v12, 6  ;;  %v4917_v55 = vrot.slane %v8962_v36, 5 }
 0x23c   : > { %v6303_v35 = vcombine.low %v5173_v46, %v5183_v57  ;;  %v5197_v59 = vrot.slane %v5195_v29, 4  ;;  %v4920_v25 = vrot.slane %v6925_v28, 5  ;;  %v5617_v47 = vsel %vm670_vm0, %v9022_v20, 0  ;;  %v9185_v46 = vld [vmem:[#allocation3 + $0x70] sm:$0x3] }
 0x23d   : > { %v5192_v54 = vrot.slane %v5191_v21, 4  ;;  %v5205_v26 = vor.u32 %v5204_v5, %v5201_v52  ;;  %v4918_v58 = vsel %vm7690_vm10, %v6278_v15, %v4917_v55  ;;  %v4919_v23 = vrot.slane %v4917_v55, 4 }
 0x23e   : > { %6857 = vmatmul.mubr.msk.bf16.vlgmr.msra.gmra.mxu0 %vm645_vm7, %v6303_v35  ;;  %v6279_v32 = vrot.slane %v4876_v10, 9  ;;  %v4924_v62 = vrot.slane %v8974_v61, 5  ;;  %v4927_v18 = vrot.slane %v6926_v30, 5  ;;  %v5208_v50 = vshrl.u32 %v9152_v33, 16  ;;  %v9170_v10 = vld [vmem:[#allocation3 + $0x68] sm:$0xe] }
 0x23f   : > { %v5196_v40 = vsel %vm7732_vm13, %v5192_v54, %v5195_v29  ;;  %v5206_v20 = vsel %vm7732_vm13, %v5197_v59, %v5205_v26  ;;  %v4921_v41 = vsel %vm7690_vm10, %v4919_v23, %v4920_v25  ;;  %v5211_v63 = vshll.u32 %v9152_v33, 16 }
 0x240   : > { %v6304_v27 = vcombine.low %v5196_v40, %v5206_v20  ;;  %v6286_v1 = vcombine.low %v4918_v58, %v4921_v41  ;;  %v4925_v34 = vsel %vm7690_vm10, %v6279_v32, %v4924_v62  ;;  %v4926_v17 = vrot.slane %v4924_v62, 4 }
 0x241   : > { %v5210_v43 = vrot.slane %v5208_v50, 5  ;;  %v5213_v45 = vrot.slane %v5211_v63, 6  ;;  %v5216_v2 = vrot.slane %v4604_v14, 5  ;;  %v5217_v51 = vrot.slane %v4600_v60, 6 }
 0x242   : > { %6860 = vmatprep.mubr.msk.bf16.mxu0 %vm645_vm7, %v6304_v27  ;;  %6839 = vmatmul.mubr.msk.bf16.vlgmr.msra.gmra.mxu1 %vm645_vm7, %v6286_v1  ;;  %v4928_v42 = vsel %vm7690_vm10, %v4926_v17, %v4927_v18  ;;  %v5222_v4 = vshrl.u32 %v9167_v16, 16  ;;  %v5225_v22 = vshll.u32 %v9167_v16, 16  ;;  %v5231_v0 = vshrl.u32 %v9170_v10, 16  ;;  %v9201_v18 = vld [vmem:[#allocation3 + $0x80] sm:$0xe] }
 0x243   : > { %6873 = vmatpush3.bf16.msra.mxu1 %v5617_v47  ;;  %v6287_v11 = vcombine.low %v4925_v34, %v4928_v42  ;;  %v5214_v12 = vor.u32 %v5213_v45, %v5210_v43  ;;  %v5218_v14 = vor.u32 %v5217_v51, %v5216_v2  ;;  %v5234_v60 = vshll.u32 %v9170_v10, 16  ;;  %v6928_v17 = vld [vmem:[#allocation3 + $0x70] sm:$0x1]  ;;  %v9210_v45 = vld [vmem:[#allocation3 + $0x88] sm:$0x3] }
 0x244   : > { %v5224_v29 = vrot.slane %v5222_v4, 5  ;;  %v5227_v52 = vrot.slane %v5225_v22, 6  ;;  %v5233_v15 = vrot.slane %v5231_v0, 5  ;;  %v5239_v57 = vrot.slane %v4628_v38, 5  ;;  %v9220_v0 = vld [vmem:[#allocation3 + $0x98] sm:$0xe] }
 0x245   : > { %6842 = vmatprep.mubr.msk.bf16.mxu1 %vm645_vm7, %v6287_v11  ;;  %v5215_v21 = vrot.slane %v5214_v12, 4  ;;  %v5220_v5 = vrot.slane %v5218_v14, 4  ;;  %v5236_v55 = vrot.slane %v5234_v60, 6  ;;  %v5240_v35 = vrot.slane %v4624_v56, 6  ;;  %v6927_v56 = vld [vmem:[#allocation3 + $0x58] sm:$0x1] }
 0x246   : > { %v5228_v59 = vor.u32 %v5227_v52, %v5224_v29  ;;  %v5245_v28 = vshrl.u32 %v9185_v46, 16  ;;  %v5248_v25 = vshll.u32 %v9185_v46, 16  ;;  %v6280_v47 = vrot.slane %v9152_v33, 9 }
 0x247   : > { %v5219_v54 = vsel %vm7732_vm13, %v5215_v21, %v5218_v14  ;;  %v5237_v26 = vor.u32 %v5236_v55, %v5233_v15  ;;  %v5241_v38 = vor.u32 %v5240_v35, %v5239_v57  ;;  %v4931_v58 = vrot.slane %v8988_v37, 5  ;;  %v9232_v35 = vld [vmem:[#allocation3 + $0xa0] sm:$0x3] }
 0x248   : > { %v5229_v23 = vsel %vm7732_vm13, %v5220_v5, %v5228_v59  ;;  %v5247_v32 = vrot.slane %v5245_v28, 5  ;;  %v5250_v62 = vrot.slane %v5248_v25, 6  ;;  %v4934_v30 = vrot.slane %v6927_v56, 5 }
 0x249   : > { %v6305_v50 = vcombine.low %v5219_v54, %v5229_v23  ;;  %v5238_v40 = vrot.slane %v5237_v26, 4  ;;  %v5243_v20 = vrot.slane %v5241_v38, 4  ;;  %v4932_v33 = vsel %vm7690_vm10, %v6280_v47, %v4931_v58 }
 0x24a   : > { %v5251_v41 = vor.u32 %v5250_v62, %v5247_v32  ;;  %v4933_v63 = vrot.slane %v4931_v58, 4  ;;  %v6281_v27 = vrot.slane %v9170_v10, 9  ;;  %v4938_v1 = vrot.slane %v9008_v19, 5 }
 0x24b   : > { %6861 = vmatmul.mubr.msk.bf16.gmra.mxu0 %vm645_vm7, %v6305_v50  ;;  %v5242_v34 = vsel %vm7732_vm13, %v5238_v40, %v5241_v38  ;;  %v4941_v43 = vrot.slane %v6928_v17, 5  ;;  %v5254_v2 = vshrl.u32 %v9201_v18, 16  ;;  %v5257_v51 = vshll.u32 %v9201_v18, 16 }
 0x24c   : > { %v5252_v42 = vsel %vm7732_vm13, %v5243_v20, %v5251_v41  ;;  %v4935_v10 = vsel %vm7690_vm10, %v4933_v63, %v4934_v30  ;;  %v4939_v4 = vsel %vm7690_vm10, %v6281_v27, %v4938_v1  ;;  %v4940_v22 = vrot.slane %v4938_v1, 4  ;;  %v4881_v41 = vld [vmem:[#allocation3 + $0xb0] sm:$0xe]  ;;  %v6929_v1 = vld [vmem:[#allocation3 + $0x88] sm:$0x1] }
 0x24d   : > { %v6306_v11 = vcombine.low %v5242_v34, %v5252_v42  ;;  %v6288_v12 = vcombine.low %v4932_v33, %v4935_v10  ;;  %v5256_v14 = vrot.slane %v5254_v2, 5  ;;  %v5259_v60 = vrot.slane %v5257_v51, 6 }
 0x24e   : > { %v4942_v29 = vsel %vm7690_vm10, %v4940_v22, %v4941_v43  ;;  %v5262_v52 = vrot.slane %v4652_v44, 5  ;;  %v5263_v15 = vrot.slane %v4648_v6, 6  ;;  %v5268_v57 = vshrl.u32 %v9210_v45, 16 }
 0x24f   : > { %6864 = vmatprep.mubr.msk.bf16.mxu0 %vm645_vm7, %v6306_v11  ;;  %6843 = vmatmul.mubr.msk.bf16.gmra.mxu1 %vm645_vm7, %v6288_v12  ;;  %v6289_v21 = vcombine.low %v4939_v4, %v4942_v29  ;;  %v5260_v5 = vor.u32 %v5259_v60, %v5256_v14  ;;  %v5271_v55 = vshll.u32 %v9210_v45, 16  ;;  %v5277_v59 = vshrl.u32 %v9220_v0, 16  ;;  %v6930_v4 = vld [vmem:[#allocation3 + $0xa0] sm:$0x1]  ;;  %v9256_v14 = vld [vmem:[#allocation3 + $0xb8] sm:$0x3] }
 0x250   : > { %v5264_v28 = vor.u32 %v5263_v15, %v5262_v52  ;;  %v5270_v25 = vrot.slane %v5268_v57, 5  ;;  %v5280_v44 = vshll.u32 %v9220_v0, 16  ;;  %v5285_v6 = vrot.slane %v4676_v7, 5 }
 0x251   : > { %6846 = vmatprep.mubr.msk.bf16.mxu1 %vm645_vm7, %v6289_v21  ;;  %v5261_v47 = vrot.slane %v5260_v5, 4  ;;  %v5273_v54 = vrot.slane %v5271_v55, 6  ;;  %v5279_v26 = vrot.slane %v5277_v59, 5  ;;  %v5286_v38 = vrot.slane %v4672_v39, 6 }
 0x252   : > { %v5266_v58 = vrot.slane %v5264_v28, 4  ;;  %v5282_v23 = vrot.slane %v5280_v44, 6  ;;  %v5291_v32 = vshrl.u32 %v9232_v35, 16  ;;  %v5294_v62 = vshll.u32 %v9232_v35, 16 }
 0x253   : > { %v5265_v56 = vsel %vm7732_vm13, %v5261_v47, %v5264_v28  ;;  %v5274_v30 = vor.u32 %v5273_v54, %v5270_v25  ;;  %v5287_v50 = vor.u32 %v5286_v38, %v5285_v6  ;;  %v4945_v33 = vrot.slane %v9037_v53, 5 }
 0x254   : > { %v5283_v7 = vor.u32 %v5282_v23, %v5279_v26  ;;  %v5293_v40 = vrot.slane %v5291_v32, 5  ;;  %v5296_v20 = vrot.slane %v5294_v62, 6  ;;  %v6282_v27 = vrot.slane %v9201_v18, 9  ;;  %v5486_v32 = vld [vmem:[#allocation3 + $0x8] sm:$0xc] }
 0x255   : > { %v5275_v39 = vsel %vm7732_vm13, %v5266_v58, %v5274_v30  ;;  %v5289_v63 = vrot.slane %v5287_v50, 4  ;;  %v4948_v34 = vrot.slane %v6929_v1, 5  ;;  %v6283_v51 = vrot.slane %v9220_v0, 9  ;;  %v6931_v58 = vld [vmem:[#allocation3 + $0xb8] sm:$0x1] }
 0x256   : > { %v6307_v17 = vcombine.low %v5265_v56, %v5275_v39  ;;  %v5284_v43 = vrot.slane %v5283_v7, 4  ;;  %v5297_v2 = vor.u32 %v5296_v20, %v5293_v40  ;;  %v4947_v42 = vrot.slane %v4945_v33, 4  ;;  %v6932_v20 = vld [vmem:[#allocation3 + $0x10] sm:$0x3] }
 0x257   : > { %v4952_v10 = vrot.slane %v9051_v48, 5  ;;  %v4955_v22 = vrot.slane %v6930_v4, 5  ;;  %v5300_v11 = vshrl.u32 %v4881_v41, 16  ;;  %v5303_v60 = vshll.u32 %v4881_v41, 16 }
 0x258   : > { %6865 = vmatmul.mubr.msk.bf16.gmra.mxu0 %vm645_vm7, %v6307_v17  ;;  %v5288_v12 = vsel %vm7732_vm13, %v5284_v43, %v5287_v50  ;;  %v5298_v18 = vsel %vm7732_vm13, %v5289_v63, %v5297_v2  ;;  %v5308_v0 = vrot.slane %v4700_v31, 5  ;;  %v4946_v52 = vsel %vm7690_vm10, %v6282_v27, %v4945_v33  ;;  %v6933_v2 = vld [vmem:[#allocation3 + $0x28] sm:$0x3] }
 0x259   : > { %v6308_v29 = vcombine.low %v5288_v12, %v5298_v18  ;;  %v4949_v15 = vsel %vm7690_vm10, %v4947_v42, %v4948_v34  ;;  %v4954_v57 = vrot.slane %v4952_v10, 4  ;;  %v5302_v5 = vrot.slane %v5300_v11, 5  ;;  %v5488_v12 = vld [vmem:[#allocation3 + $0x38] sm:$0xc] }
 0x25a   : > { %v6290_v21 = vcombine.low %v4946_v52, %v4949_v15  ;;  %v5305_v55 = vrot.slane %v5303_v60, 6  ;;  %v5309_v59 = vrot.slane %v4696_v49, 6  ;;  %v4953_v28 = vsel %vm7690_vm10, %v6283_v51, %v4952_v10 }
 0x25b   : > { %6868 = vmatprep.mubr.msk.bf16.mxu0 %vm645_vm7, %v6308_v29  ;;  %v4956_v31 = vsel %vm7690_vm10, %v4954_v57, %v4955_v22  ;;  %v5314_v25 = vshrl.u32 %v9256_v14, 16  ;;  %v5317_v44 = vshll.u32 %v9256_v14, 16  ;;  %v4959_v26 = vrot.slane %v9066_v3, 5 }
 0x25c   : > { %6847 = vmatmul.mubr.msk.bf16.gmra.mxu1 %vm645_vm7, %v6290_v21  ;;  %v6291_v6 = vcombine.low %v4953_v28, %v4956_v31  ;;  %v5306_v47 = vor.u32 %v5305_v55, %v5302_v5  ;;  %v5310_v54 = vor.u32 %v5309_v59, %v5308_v0  ;;  %v4962_v23 = vrot.slane %v6931_v58, 5 }
 0x25d   : > { %v5316_v49 = vrot.slane %v5314_v25, 5  ;;  %v5319_v38 = vrot.slane %v5317_v44, 6  ;;  %v6284_v56 = vrot.slane %v4881_v41, 9  ;;  %v4961_v30 = vrot.slane %v4959_v26, 4 }
 0x25e   : > { %6850 = vmatprep.mubr.msk.bf16.mxu1 %vm645_vm7, %v6291_v6  ;;  %v5312_v62 = vrot.slane %v5310_v54, 4  ;;  %v5307_v50 = vrot.slane %v5306_v47, 4  ;;  %v5514_v40 = vrot.slane %v8939_v13, 6  ;;  %v5517_v33 = vrot.slane %v6932_v20, 6 }
 0x25f   : > { %v5320_v7 = vor.u32 %v5319_v38, %v5316_v49  ;;  %v4963_v39 = vsel %vm7690_vm10, %v4961_v30, %v4962_v23  ;;  %v6319_v63 = vrot.slane %v5486_v32, 10  ;;  %v5521_v27 = vrot.slane %v8962_v36, 6 }
 0x260   : > { %v5311_v1 = vsel %vm7732_vm13, %v5307_v50, %v5310_v54  ;;  %v4960_v41 = vsel %vm7690_vm10, %v6284_v56, %v4959_v26  ;;  %v5516_v17 = vrot.slane %v5514_v40, 4  ;;  %v5524_v51 = vrot.slane %v6933_v2, 6 }
 0x261   : > { %v5321_v34 = vsel %vm7732_vm13, %v5312_v62, %v5320_v7  ;;  %v6292_v13 = vcombine.low %v4960_v41, %v4963_v39  ;;  %v5515_v10 = vsel %vm7109_vm8, %v6319_v63, %v5514_v40  ;;  %v5523_v4 = vrot.slane %v5521_v27, 4 }
 0x262   : > { %v6309_v43 = vcombine.low %v5311_v1, %v5321_v34  ;;  %v5518_v36 = vsel %vm7109_vm8, %v5516_v17, %v5517_v33  ;;  %v5528_v22 = vrot.slane %v8974_v61, 6  ;;  %v5531_v11 = vrot.slane %v9131_v8, 6 }
 0x263   : > { %v6327_v9 = vcombine.low %v5515_v10, %v5518_v36  ;;  %v6320_v60 = vrot.slane %v5487_v24, 10  ;;  %v5525_v0 = vsel %vm7109_vm8, %v5523_v4, %v5524_v51  ;;  %v5535_v29 = vrot.slane %v8988_v37, 6  ;;  %v5489_v37 = vld [vmem:[#allocation3 + $0x50] sm:$0xc] }
 0x264   : > { %6869 = vmatmul.mubr.msk.bf16.gmra.mxu0 %vm645_vm7, %v6309_v43  ;;  %6851 = vmatmul.mubr.msk.bf16.gmra.mxu1 %vm645_vm7, %v6292_v13  ;;  %v5530_v18 = vrot.slane %v5528_v22, 4  ;;  %v6321_v52 = vrot.slane %v5488_v12, 10  ;;  %v5542_v15 = vrot.slane %v9008_v19, 6  ;;  %v5538_v59 = vrot.slane %v9167_v16, 6  ;;  %v5490_v19 = vld [vmem:[#allocation3 + $0x68] sm:$0xc] }
 0x265   : > { %6874 = vmatprep.mubr.msk.bf16.mxu1 %vm645_vm7, %v6327_v9  ;;  %v5522_v57 = vsel %vm7109_vm8, %v6320_v60, %v5521_v27  ;;  %v5537_v55 = vrot.slane %v5535_v29, 4  ;;  %v5545_v31 = vrot.slane %v9185_v46, 6  ;;  %v6322_v25 = vrot.slane %v5489_v37, 10  ;;  %v5493_v27 = vld [vmem:[#allocation3 + $0xb0] sm:$0xc] }
 0x266   : > { %v5532_v61 = vsel %vm7109_vm8, %v5530_v18, %v5531_v11  ;;  %v6328_v8 = vcombine.low %v5522_v57, %v5525_v0  ;;  %v5529_v21 = vsel %vm7109_vm8, %v6321_v52, %v5528_v22  ;;  %v5544_v28 = vrot.slane %v5542_v15, 4 }
 0x267   : > { %v6329_v5 = vcombine.low %v5529_v21, %v5532_v61  ;;  %v5539_v44 = vsel %vm7109_vm8, %v5537_v55, %v5538_v59  ;;  %v5549_v6 = vrot.slane %v9037_v53, 6  ;;  %v6323_v47 = vrot.slane %v5490_v19, 10  ;;  %v5491_v53 = vld [vmem:[#allocation3 + $0x80] sm:$0xc] }
 0x268   : > { %v5546_v54 = vsel %vm7109_vm8, %v5544_v28, %v5545_v31  ;;  %v5556_v16 = vrot.slane %v9051_v48, 6  ;;  %v5536_v26 = vsel %vm7109_vm8, %v6322_v25, %v5535_v29  ;;  %v5552_v23 = vrot.slane %v9210_v45, 6  ;;  %v5492_v48 = vld [vmem:[#allocation3 + $0x98] sm:$0xc] }
 0x269   : > { %v6330_v49 = vcombine.low %v5536_v26, %v5539_v44  ;;  %v5543_v46 = vsel %vm7109_vm8, %v6323_v47, %v5542_v15  ;;  %v5551_v58 = vrot.slane %v5549_v6, 4  ;;  %v5559_v62 = vrot.slane %v9232_v35, 6 }
 0x26a   : > { %v6331_v38 = vcombine.low %v5543_v46, %v5546_v54  ;;  %v5558_v32 = vrot.slane %v5556_v16, 4  ;;  %v6324_v56 = vrot.slane %v5491_v53, 10  ;;  %v5563_v50 = vrot.slane %v9066_v3, 6 }
 0x26b   : > { %v5553_v30 = vsel %vm7109_vm8, %v5551_v58, %v5552_v23  ;;  %v6325_v7 = vrot.slane %v5492_v48, 10  ;;  %v5566_v63 = vrot.slane %v9256_v14, 6  ;;  %v6326_v3 = vrot.slane %v5493_v27, 10 }
 0x26c   : > { %6875 = vmatmul.mubr.msk.bf16.vlgmr.msra.gmra.mxu1 %vm645_vm7, %v6328_v8  ;;  %v5560_v40 = vsel %vm7109_vm8, %v5558_v32, %v5559_v62  ;;  %v5550_v45 = vsel %vm7109_vm8, %v6324_v56, %v5549_v6  ;;  %v5565_v39 = vrot.slane %v5563_v50, 4 }
 0x26d   : > { %6878 = vmatprep.mubr.msk.bf16.mxu1 %vm645_vm7, %v6329_v5  ;;  %v6332_v20 = vcombine.low %v5550_v45, %v5553_v30  ;;  %v5557_v35 = vsel %vm7109_vm8, %v6325_v7, %v5556_v16  ;;  %v5564_v34 = vsel %vm7109_vm8, %v6326_v3, %v5563_v50 }
 0x26e   : > { %v6333_v33 = vcombine.low %v5557_v35, %v5560_v40  ;;  %v5567_v1 = vsel %vm7109_vm8, %v5565_v39, %v5566_v63 }
 0x26f   : > { %v6334_v41 = vcombine.low %v5564_v34, %v5567_v1 }
 0x274   : > { %6879 = vmatmul.mubr.msk.bf16.gmra.mxu1 %vm645_vm7, %v6330_v49 }
 0x275   : > { %6882 = vmatprep.mubr.msk.bf16.mxu1 %vm645_vm7, %v6331_v38 }
 0x27c   : > { %6883 = vmatmul.mubr.msk.bf16.gmra.mxu1 %vm645_vm7, %v6332_v20 }
 0x27d   : > { %6886 = vmatprep.mubr.msk.bf16.mxu1 %vm645_vm7, %v6333_v33 }
 0x283   : > { %v6750_v17 = vpop.f32.mrf.mxu0 }
 0x284   : > { %6887 = vmatmul.mubr.msk.bf16.gmra.mxu1 %vm645_vm7, %v6334_v41 }
 0x285   : > { %v3699_v43 = vpop.f32.mrf.mxu0 }
 0x287   : > { %v6751_v13 = vpop.f32.mrf.mxu0 }
 0x289   : > { %v3702_v2 = vpop.f32.mrf.mxu0 }
 0x28f   : > { %v6732_v14 = vpop.f32.mrf.mxu1 }
 0x290   : > { %v3708_v51 = vadd.f32 %v6750_v17, %v6732_v14 }
 0x291   : > { %v3471_v10 = vpop.f32.mrf.mxu1 }
 0x292   : > { %v6754_v36 = vpop.f32.mrf.mxu0  ;;  %v3700_v4 = vadd.f32 %v3699_v43, %v3471_v10 }
 0x293   : > { %v6733_v22 = vpop.f32.mrf.mxu1 }
 0x294   : > { %v3715_v9 = vpop.f32.mrf.mxu0  ;;  %v3711_v24 = vadd.f32 %v6751_v13, %v6733_v22 }
 0x295   : > { %v3474_v11 = vpop.f32.mrf.mxu1 }
 0x296   : > { %v6755_v12 = vpop.f32.mrf.mxu0  ;;  %v3703_v18 = vadd.f32 %v3702_v2, %v3474_v11 }
 0x298   : > { %v3718_v42 = vpop.f32.mrf.mxu0 }
 0x29b   : > { %v6736_v60 = vpop.f32.mrf.mxu1 }
 0x29c   : > { %v3724_v0 = vadd.f32 %v6754_v36, %v6736_v60  ;;  %v6758_v29 = vpop.f32.mrf.mxu0 }
 0x29d   : > { %v3487_v52 = vpop.f32.mrf.mxu1 }
 0x29e   : > { %v3716_v61 = vadd.f32 %v3715_v9, %v3487_v52  ;;  %v3731_v15 = vpop.f32.mrf.mxu0 }
 0x29f   : > { %v6737_v57 = vpop.f32.mrf.mxu1 }
 0x2a0   : > { %v3727_v8 = vadd.f32 %v6755_v12, %v6737_v57  ;;  %v6759_v21 = vpop.f32.mrf.mxu0 }
 0x2a1   : > { %v3490_v5 = vpop.f32.mrf.mxu1 }
 0x2a2   : > { %v3719_v55 = vadd.f32 %v3718_v42, %v3490_v5  ;;  %v3734_v59 = vpop.f32.mrf.mxu0 }
 0x2a5   : > { %v6740_v37 = vpop.f32.mrf.mxu1 }
 0x2a6   : > { %v3740_v28 = vadd.f32 %v6758_v29, %v6740_v37  ;;  %v6762_v31 = vpop.f32.mrf.mxu0 }
 0x2a7   : > { %v3503_v19 = vpop.f32.mrf.mxu1 }
 0x2a8   : > { %v3732_v25 = vadd.f32 %v3731_v15, %v3503_v19  ;;  %v3747_v6 = vpop.f32.mrf.mxu0 }
 0x2a9   : > { %v6741_v44 = vpop.f32.mrf.mxu1 }
 0x2aa   : > { %v3743_v47 = vadd.f32 %v6759_v21, %v6741_v44  ;;  %v6763_v26 = vpop.f32.mrf.mxu0 }
 0x2ab   : > { %v3506_v54 = vpop.f32.mrf.mxu1 }
 0x2ac   : > { %v3735_v16 = vadd.f32 %v3734_v59, %v3506_v54  ;;  %v3750_v46 = vpop.f32.mrf.mxu0 }
 0x2b1   : > { %v6744_v49 = vpop.f32.mrf.mxu1 }
 0x2b2   : > { %v3756_v38 = vadd.f32 %v6762_v31, %v6744_v49 }
 0x2b3   : > { %v3519_v58 = vpop.f32.mrf.mxu1 }
 0x2b4   : > { %v3748_v23 = vadd.f32 %v3747_v6, %v3519_v58 }
 0x2b5   : > { %v6745_v53 = vpop.f32.mrf.mxu1 }
 0x2b6   : > { %v9340_v32 = vpop.f32.mrf.mxu0  ;;  %v3759_v62 = vadd.f32 %v6763_v26, %v6745_v53 }
 0x2b7   : > { %v3522_v48 = vpop.f32.mrf.mxu1 }
 0x2b8   : > { %v9342_v56 = vpop.f32.mrf.mxu0  ;;  %v3751_v30 = vadd.f32 %v3750_v46, %v3522_v48 }
 0x2ba   : > { %v6768_v50 = vpop.f32.mrf.mxu1  ;;  %v9344_v7 = vpop.f32.mrf.mxu0 }
 0x2bb   : > { %v9346_v40 = vadd.f32 %v6768_v50, %v3708_v51 }
 0x2bc   : > { %v3929_v45 = vpop.f32.mrf.mxu1  ;;  %v9348_v20 = vpop.f32.mrf.mxu0 }
 0x2bd   : > { %v9350_v35 = vadd.f32 %v3929_v45, %v3700_v4 }
 0x2be   : > { %v6769_v33 = vpop.f32.mrf.mxu1 }
 0x2bf   : > { %v9352_v39 = vadd.f32 %v6769_v33, %v3711_v24 }
 0x2c0   : > { %v9354_v63 = vpop.f32.mrf.mxu0  ;;  %v3932_v27 = vpop.f32.mrf.mxu1 }
 0x2c1   : > { %v9356_v3 = vadd.f32 %v3932_v27, %v3703_v18 }
 0x2c2   : > { %v9358_v1 = vpop.f32.mrf.mxu0 }
 0x2c3   : > { %v6772_v34 = vpop.f32.mrf.mxu1 }
 0x2c4   : > { %v9360_v41 = vadd.f32 %v6772_v34, %v3724_v0  ;;  %v9362_v17 = vpop.f32.mrf.mxu0 }
 0x2c5   : > { %v3945_v43 = vpop.f32.mrf.mxu1 }
 0x2c6   : > { %v9364_v13 = vadd.f32 %v3945_v43, %v3716_v61  ;;  %v9366_v2 = vpop.f32.mrf.mxu0 }
 0x2c7   : > { %v6773_v14 = vpop.f32.mrf.mxu1 }
 0x2c8   : > { %v9368_v51 = vadd.f32 %v6773_v14, %v3727_v8 }
 0x2c9   : > { %v3948_v36 = vpop.f32.mrf.mxu1 }
 0x2ca   : > { %v9370_v10 = vpop.f32.mrf.mxu0  ;;  %v9372_v4 = vadd.f32 %v3948_v36, %v3719_v55 }
 0x2cc   : > { %v9374_v22 = vpop.f32.mrf.mxu0  ;;  %v6776_v9 = vpop.f32.mrf.mxu1 }
 0x2cd   : > { %v9376_v24 = vadd.f32 %v6776_v9, %v3740_v28 }
 0x2ce   : > { %v9378_v11 = vpop.f32.mrf.mxu0  ;;  %v3961_v12 = vpop.f32.mrf.mxu1 }
 0x2cf   : > { %v9380_v18 = vadd.f32 %v3961_v12, %v3732_v25 }
 0x2d0   : > { %v9382_v42 = vpop.f32.mrf.mxu0  ;;  %v6777_v60 = vpop.f32.mrf.mxu1 }
 0x2d1   : > { %v9384_v0 = vadd.f32 %v6777_v60, %v3743_v47 }
 0x2d2   : > { %v3964_v52 = vpop.f32.mrf.mxu1 }
 0x2d3   : > { %v9386_v29 = vpop.f32.mrf.mxu0  ;;  %v9388_v61 = vadd.f32 %v3964_v52, %v3735_v16 }
 0x2d5   : > { %v9390_v15 = vpop.f32.mrf.mxu0  ;;  %v6780_v57 = vpop.f32.mrf.mxu1 }
 0x2d6   : > { %v9392_v8 = vadd.f32 %v6780_v57, %v3756_v38 }
 0x2d7   : > { %v9394_v21 = vpop.f32.mrf.mxu0  ;;  %v3977_v5 = vpop.f32.mrf.mxu1 }
 0x2d8   : > { %v9396_v55 = vadd.f32 %v3977_v5, %v3748_v23 }
 0x2d9   : > { %v9398_v59 = vpop.f32.mrf.mxu0  ;;  %v6781_v37 = vpop.f32.mrf.mxu1 }
 0x2da   : > { %v9400_v28 = vadd.f32 %v6781_v37, %v3759_v62 }
 0x2db   : > { %v3980_v31 = vpop.f32.mrf.mxu1 }
 0x2dc   : > { %v9404_v25 = vadd.f32 %v3980_v31, %v3751_v30 }
 0x2dd   : > { %v6804_v44 = vpop.f32.mrf.mxu1 }
 0x2de   : > { %v9402_v19 = vpop.f32.mrf.mxu0 }
 0x2df   : > { %v9408_v47 = vpop.f32.mrf.mxu1 }
 0x2e0   : > { %v9406_v6 = vpop.f32.mrf.mxu0 }
 0x2e1   : > { %v9412_v16 = vpop.f32.mrf.mxu1 }
 0x2e2   : > { %v9410_v54 = vpop.f32.mrf.mxu0 }
 0x2e3   : > { %v9416_v49 = vpop.f32.mrf.mxu1 }
 0x2e4   : > { %v9414_v26 = vpop.f32.mrf.mxu0 }
 0x2e5   : > { %v9420_v38 = vpop.f32.mrf.mxu1 }
 0x2e6   : > { %v9418_v46 = vpop.f32.mrf.mxu0 }
 0x2e7   : > { %9970 = vst [vmem:[#allocation25_spill] sm:$0xff] %v9418_v46  ;;  %v9424_v23 = vpop.f32.mrf.mxu1 }
 0x2e8   : > { %v9422_v58 = vpop.f32.mrf.mxu0 }
 0x2e9   : > { %9971 = vst [vmem:[#allocation28_spill] sm:$0xff] %v9422_v58  ;;  %v9428_v62 = vpop.f32.mrf.mxu1  ;;  %v4302_v58 = vadd.f32 %v9342_v56, %v9350_v35  ;;  %v4305_v35 = vadd.f32 %v9344_v7, %v9352_v39  ;;  %v4309_v39 = vadd.f32 %v9362_v17, %v9368_v51  ;;  %v4311_v17 = vadd.f32 %v9382_v42, %v9388_v61 }
 0x2ea   : > { %v9426_v53 = vpop.f32.mrf.mxu0  ;;  %v4314_v42 = vadd.f32 %v9390_v15, %v9396_v55 }
 0x2eb   : > { %9972 = vst [vmem:[#allocation30_spill] sm:$0xff] %v9426_v53  ;;  %v9432_v30 = vpop.f32.mrf.mxu1  ;;  %v9493_v53 = vld [vmem:[%s7032_s15 + $0x8] sm:$0xff]   ;;  %v4476_v56 = vadd.f32 %v9408_v47, %v4302_v58  ;;  %v4479_v7 = vadd.f32 %v9412_v16, %v4305_v35  ;;  %v4310_v58 = vadd.f32 %v9374_v22, %v9380_v18  ;;  %v4313_v16 = vadd.f32 %v9378_v11, %v9384_v0 }
 0x2ec   : > { %v9430_v48 = vpop.f32.mrf.mxu0  ;;  %v4483_v22 = vadd.f32 %v9428_v62, %v4309_v39 }
 0x2ed   : > { %9973 = vst [vmem:[#allocation29_spill] sm:$0xff] %v9430_v48  ;;  %v9436_v45 = vpop.f32.mrf.mxu1  ;;  %v4858_v51 = vadd.f32 %v9406_v6, %v4476_v56  ;;  %v4861_v61 = vadd.f32 %v9410_v54, %v4479_v7 }
 0x2ee   : > { %v9434_v50 = vpop.f32.mrf.mxu0 }
 0x2ef   : > { %9974 = vst [vmem:[#allocation33_spill] sm:$0xff] %v9434_v50  ;;  %v9440_v27 = vpop.f32.mrf.mxu1 }
 0x2f0   : > { %v9438_v33 = vpop.f32.mrf.mxu0  ;;  %v4484_v6 = vadd.f32 %v9440_v27, %v4310_v58 }
 0x2f1   : > { %9975 = vst [vmem:[#allocation31_spill] sm:$0xff] %v9438_v33  ;;  %v9444_v43 = vpop.f32.mrf.mxu1 }
 0x2f2   : > { %v9442_v34 = vpop.f32.mrf.mxu0 }
 0x2f3   : > { %9976 = vst [vmem:[#allocation32_spill] sm:$0xff] %v9442_v34  ;;  %v9446_v14 = vpop.f32.mrf.mxu1 }
 0x2f4   : > { %9977 = vst [vmem:[#allocation34_spill] sm:$0xff] %v9446_v14  ;;  %v9448_v36 = vpop.f32.mrf.mxu0  ;;  %v9518_v14 = vld [vmem:[%s7032_s15 + $0x28] sm:$0xff]  }
 0x2f5   : > { %9978 = vst [vmem:[#allocation35_spill] sm:$0xff] %v9448_v36  ;;  %v9450_v9 = vpop.f32.mrf.mxu1  ;;  %v6388_v47 = vunpack.c.h.bf16 %v9518_v14 }
 0x2f6   : > { %9979 = vst [vmem:[#allocation36_spill] sm:$0xff] %v9450_v9  ;;  %v9454_v60 = vpop.f32.mrf.mxu0 }
 0x2f7   : > { %v9452_v12 = vpop.f32.mrf.mxu1  ;;  %9981 = vst [vmem:[#allocation40_spill] sm:$0xff] %v9454_v60 }
 0x2f8   : > { %9980 = vst [vmem:[#allocation38_spill] sm:$0xff] %v9452_v12  ;;  %v9460_v5 = vpop.f32.mrf.mxu0 }
 0x2f9   : > { %v9456_v52 = vpop.f32.mrf.mxu1  ;;  %9984 = vst [vmem:[#allocation41_spill] sm:$0xff] %v9460_v5 }
 0x2fa   : > { %9982 = vst [vmem:[#allocation37_spill] sm:$0xff] %v9456_v52  ;;  %v9462_v31 = vpop.f32.mrf.mxu0 }
 0x2fb   : > { %v9458_v57 = vpop.f32.mrf.mxu1  ;;  %9985 = vst [vmem:[#allocation42_spill] sm:$0xff] %v9462_v31  ;;  %v10000_v62 = vld [vmem:[#allocation34_spill] sm:$0xff] }
 0x2fc   : > { %9983 = vst [vmem:[#allocation39_spill] sm:$0xff] %v9458_v57  ;;  %v9466_v36 = vpop.f32.mrf.mxu0 }
 0x2fd   : > { %9986 = vst [vmem:[#allocation5_spill] sm:$0xff] %v9466_v36 }
 0x2fe   : > { %v9470_v50 = vpop.f32.mrf.mxu0 }
 0x300   : > { %v9474_v57 = vpop.f32.mrf.mxu0 }
 0x301   : > { %9988 = vst [vmem:[#allocation49_spill] sm:$0xff] %v9474_v57 }
 0x302   : > { %v6840_v37 = vpop.f32.mrf.mxu1  ;;  %v9480_v31 = vpop.f32.mrf.mxu0 }
 0x303   : > { %9991 = vst [vmem:[#allocation13_spill] sm:$0xff] %v9480_v31 }
 0x304   : > { %v9464_v34 = vpop.f32.mrf.mxu1  ;;  %v9484_v9 = vpop.f32.mrf.mxu0 }
 0x305   : > { %9993 = vst [vmem:[#allocation47_spill] sm:$0xff] %v9484_v9  ;;  %v9505_v9 = vld [vmem:[%s7032_s15 + $0x18] sm:$0xff]   ;;  %v5112_v0 = vadd.f32 %v9464_v34, %v4858_v51  ;;  %v10003_v34 = vld [vmem:[#allocation30_spill] sm:$0xff] }
 0x306   : > { %v9468_v33 = vpop.f32.mrf.mxu1 }
 0x307   : > { %v5115_v15 = vadd.f32 %v9468_v33, %v4861_v61 }
 0x308   : > { %v9472_v60 = vpop.f32.mrf.mxu1 }
 0x309   : > { %9987 = vst [vmem:[#allocation45_spill] sm:$0xff] %v9472_v60 }
 0x30b   : > { %v9488_v48 = vpop.f32.mrf.mxu0 }
 0x30c   : > { %9995 = vst [vmem:[#allocation7_spill] sm:$0xff] %v9488_v48  ;;  %v6387_v48 = vunpack.c.l.bf16 %v9518_v14 }
 0x30f   : > { %v9476_v5 = vpop.f32.mrf.mxu1 }
 0x310   : > { %9989 = vst [vmem:[#allocation46_spill] sm:$0xff] %v9476_v5  ;;  %v9498_v5 = vld [vmem:[%s7032_s15] sm:$0xff]  }
 0x311   : > { %v9478_v52 = vpop.f32.mrf.mxu1 }
 0x312   : > { %9990 = vst [vmem:[#allocation43_spill] sm:$0xff] %v9478_v52  ;;  %v4304_v52 = vadd.f32 %v9340_v32, %v9346_v40  ;;  %v9521_v32 = vld [vmem:[%s7032_s15 + $0x20] sm:$0xff]  }
 0x313   : > { %v9482_v12 = vpop.f32.mrf.mxu1 }
 0x314   : > { %9992 = vst [vmem:[#allocation11_spill] sm:$0xff] %v9482_v12  ;;  %v9502_v12 = vpop.f32.mrf.mxu0 }
 0x315   : > { %v9486_v36 = vpop.f32.mrf.mxu1  ;;  %9998 = vst [vmem:[#allocation6_spill] sm:$0xff] %v9502_v12  ;;  %v4308_v12 = vadd.f32 %v9354_v63, %v9360_v41  ;;  %v4307_v63 = vadd.f32 %v9366_v2, %v9372_v4  ;;  %v4312_v41 = vadd.f32 %v9370_v10, %v9376_v24  ;;  %v4316_v24 = vadd.f32 %v9386_v29, %v9392_v8 }
 0x316   : > { %9994 = vst [vmem:[#allocation48_spill] sm:$0xff] %v9486_v36  ;;  %v9508_v36 = vld [vmem:[%s7032_s15 + $0x10] sm:$0xff]   ;;  %v9534_v46 = vpop.f32.mrf.mxu0  ;;  %v4315_v29 = vadd.f32 %v9398_v59, %v9404_v25  ;;  %v4865_v59 = vadd.f32 %v10003_v34, %v4483_v22  ;;  %v9599_v25 = vld [vmem:[%s9755_s5] ss:$0 sm:$0xff]  ;;  %v10012_v22 = vld [vmem:[#allocation13_spill] sm:$0xff] }
 0x317   : > { %v4482_v10 = vadd.f32 %v9420_v38, %v4308_v12  ;;  %v4481_v18 = vadd.f32 %v9432_v30, %v4307_v63  ;;  %v4487_v38 = vadd.f32 %v9444_v43, %v4313_v16  ;;  %v4485_v30 = vadd.f32 %v10000_v62, %v4311_v17  ;;  %v10004_v43 = vld [vmem:[#allocation45_spill] sm:$0xff]  ;;  %v9611_v16 = vld [vmem:[%s9756_s6] ss:$0 sm:$0xff]  ;;  %v10017_v34 = vld [vmem:[#allocation47_spill] sm:$0xff] }
 0x318   : > { %v9564_v2 = vpop.f32.mrf.mxu0  ;;  %v10005_v12 = vld [vmem:[#allocation29_spill] sm:$0xff] }
 0x31c   : > { %v9490_v60 = vpop.f32.mrf.mxu1 }
 0x31d   : > { %9996 = vst [vmem:[#allocation17_spill] sm:$0xff] %v9490_v60  ;;  %v4478_v60 = vadd.f32 %v6804_v44, %v4304_v52  ;;  %v4303_v52 = vadd.f32 %v9348_v20, %v9356_v3  ;;  %v6383_v44 = vunpack.c.l.bf16 %v9521_v32  ;;  %v4306_v20 = vadd.f32 %v9358_v1, %v9364_v13 }
 0x31e   : > { %v9495_v57 = vpop.f32.mrf.mxu1 }
 0x31f   : > { %9997 = vst [vmem:[#allocation44_spill] sm:$0xff] %v9495_v57  ;;  %v6376_v57 = vunpack.c.h.bf16 %v9508_v36  ;;  %v4860_v3 = vadd.f32 %v9402_v19, %v4478_v60  ;;  %v4477_v1 = vadd.f32 %v9416_v49, %v4303_v52  ;;  %v4480_v4 = vadd.f32 %v9424_v23, %v4306_v20  ;;  %v9589_v23 = vpop.f32.mrf.mxu0  ;;  %v10007_v52 = vld [vmem:[#allocation36_spill] sm:$0xff]  ;;  %v10008_v20 = vld [vmem:[#allocation38_spill] sm:$0xff] }
 0x320   : > { %v9510_v31 = vpop.f32.mrf.mxu1  ;;  %v4486_v19 = vadd.f32 %v9436_v45, %v4312_v41  ;;  %v4317_v49 = vadd.f32 %v9394_v21, %v9400_v28  ;;  %v10001_v45 = vld [vmem:[#allocation25_spill] sm:$0xff]  ;;  %v10002_v21 = vld [vmem:[#allocation28_spill] sm:$0xff]  ;;  %v4863_v60 = vadd.f32 %v10005_v12, %v4481_v18  ;;  %v4490_v7 = vadd.f32 %v10007_v52, %v4316_v24  ;;  %v10010_v41 = vld [vmem:[#allocation31_spill] sm:$0xff] }
 0x321   : > { %9999 = vst [vmem:[#allocation15_spill] sm:$0xff] %v9510_v31  ;;  %v5114_v13 = vadd.f32 %v6840_v37, %v4860_v3  ;;  %v4859_v55 = vadd.f32 %v9414_v26, %v4477_v1  ;;  %v4864_v27 = vadd.f32 %v10001_v45, %v4482_v10  ;;  %v4862_v28 = vadd.f32 %v10002_v21, %v4480_v4  ;;  %v10009_v3 = vld [vmem:[#allocation33_spill] sm:$0xff]  ;;  %v9613_v17 = vpop.f32.mrf.mxu0 }
 0x322   : > { %v9523_v40 = vpop.f32.mrf.mxu1  ;;  %v4488_v39 = vadd.f32 %v10008_v20, %v4314_v42  ;;  %v4868_v63 = vadd.f32 %v10009_v3, %v4486_v19  ;;  %v4866_v58 = vadd.f32 %v10010_v41, %v4484_v6  ;;  %v5473_v24 = vadd.f32 %v10012_v22, %v5115_v15  ;;  %v10013_v18 = vld [vmem:[#allocation37_spill] sm:$0xff]  ;;  %v10015_v19 = vld [vmem:[#allocation46_spill] sm:$0xff]  ;;  %v10019_v15 = vld [vmem:[#allocation11_spill] sm:$0xff] }
 0x323   : > { %v5472_v54 = vadd.f32 %v9470_v50, %v5114_v13  ;;  %v5113_v26 = vadd.f32 %v10004_v43, %v4859_v55  ;;  %v10006_v50 = vld [vmem:[#allocation49_spill] sm:$0xff]  ;;  %v10011_v13 = vld [vmem:[#allocation32_spill] sm:$0xff]  ;;  %v4491_v42 = vadd.f32 %v10013_v18, %v4317_v49  ;;  %v5118_v6 = vadd.f32 %v10015_v19, %v4864_v27  ;;  %v10016_v55 = vld [vmem:[#allocation35_spill] sm:$0xff]  ;;  %v6867_v52 = vpop.f32.mrf.mxu0 }
 0x324   : > { %v9539_v31 = vpop.f32.mrf.mxu1  ;;  %v5470_v56 = vadd.f32 %v10006_v50, %v5112_v0  ;;  %v4869_v51 = vadd.f32 %v10011_v13, %v4487_v38  ;;  %v10014_v0 = vld [vmem:[#allocation39_spill] sm:$0xff]  ;;  %v10020_v50 = vld [vmem:[#allocation40_spill] sm:$0xff]  ;;  %v10023_v13 = vld [vmem:[#allocation42_spill] sm:$0xff]  ;;  %v10026_v22 = vunpack.c.l.bf16 %v9493_v53 }
 0x325   : > { %v4489_v61 = vadd.f32 %v10014_v0, %v4315_v29  ;;  %v10018_v43 = vld [vmem:[#allocation43_spill] sm:$0xff]  ;;  %v4872_v49 = vadd.f32 %v10020_v50, %v4490_v7 }
 0x326   : > { %v9558_v35 = vpop.f32.mrf.mxu1  ;;  %v5116_v12 = vadd.f32 %v10018_v43, %v4862_v28  ;;  %v9636_v28 = vadd.f32 %v10023_v13, %v4491_v42  ;;  %v10025_v7 = vld [vmem:[#allocation7_spill] sm:$0xff]  ;;  %v10028_v42 = vld [vmem:[#allocation6_spill] sm:$0xff] }
 0x328   : > { %v9571_v11 = vpop.f32.mrf.mxu1 }
 0x32a   : > { %v9584_v8 = vpop.f32.mrf.mxu1 }
 0x32c   : > { %v6876_v33 = vpop.f32.mrf.mxu1 }
 0x32d   : > { %v5718_v37 = vadd.f32 %v6876_v33, %v5472_v54  ;;  %v4867_v54 = vadd.f32 %v10016_v55, %v4485_v30  ;;  %v5471_v33 = vadd.f32 %v10017_v34, %v5113_v26  ;;  %v10027_v55 = vld [vmem:[#allocation17_spill] sm:$0xff]  ;;  %v10029_v34 = vunpack.c.l.bf16 %v9498_v5 }
 0x32e   : > { %v5653_v1 = vpop.f32.mrf.mxu1 }
 0x32f   : > { %v5740_v10 = vmul.f32 %v9599_v25, %v5718_v37  ;;  %v5716_v4 = vadd.f32 %v5653_v1, %v5470_v56  ;;  %v5119_v37 = vadd.f32 %v10019_v15, %v4865_v59  ;;  %v10021_v56 = vld [vmem:[#allocation41_spill] sm:$0xff]  ;;  %v10022_v1 = vld [vmem:[#allocation48_spill] sm:$0xff] }
 0x330   : > { %v6877_v62 = vpop.f32.mrf.mxu1  ;;  %v9629_v29 = vadd.f32 %v10021_v56, %v4488_v39  ;;  %v5117_v26 = vadd.f32 %v10022_v1, %v4863_v60  ;;  %v10024_v59 = vld [vmem:[#allocation5_spill] sm:$0xff]  ;;  %v5476_v39 = vadd.f32 %v10025_v7, %v5118_v6  ;;  %v10030_v15 = vld [vmem:[#allocation44_spill] sm:$0xff]  ;;  %v10032_v1 = vld [vmem:[#allocation15_spill] sm:$0xff] }
 0x331   : > { %v5762_v45 = vadd.f32 %v9611_v16, %v5740_v10  ;;  %v5738_v21 = vmul.f32 %v9599_v25, %v5716_v4  ;;  %v5719_v38 = vadd.f32 %v6877_v62, %v5473_v24  ;;  %v9639_v10 = vadd.f32 %v10024_v59, %v4489_v61 }
 0x332   : > { %v5656_v27 = vpop.f32.mrf.mxu1  ;;  %v5122_v62 = vadd.f32 %v10027_v55, %v4868_v63  ;;  %v5474_v61 = vadd.f32 %v10028_v42, %v5116_v12  ;;  %v5120_v50 = vadd.f32 %v10030_v15, %v4866_v58  ;;  %v5475_v12 = vadd.f32 %v9564_v2, %v5117_v26 }
 0x333   : > { %v5778_v30 = vmax.f32 %v5762_v45, 0.0  ;;  %v5760_v20 = vadd.f32 %v9611_v16, %v5738_v21  ;;  %v5741_v3 = vmul.f32 %v9599_v25, %v5719_v38  ;;  %v5717_v41 = vadd.f32 %v5656_v27, %v5471_v33  ;;  %v5442_v21 = vpop.f32.mrf.mxu0 }
 0x334   : > { %v6880_v4 = vpop.f32.mrf.mxu1  ;;  %v5477_v45 = vadd.f32 %v9534_v46, %v5119_v37  ;;  %v10031_v37 = vunpack.c.h.bf16 %v9493_v53  ;;  %v5123_v13 = vadd.f32 %v10032_v1, %v4869_v51  ;;  %v10033_v26 = vunpack.c.h.bf16 %v9498_v5 }
 0x335   : > { %v5826_v24 = vadd.f32 %v10026_v22, %v5778_v30  ;;  %v5776_v18 = vmax.f32 %v5760_v20, 0.0  ;;  %v5763_v0 = vadd.f32 %v9611_v16, %v5741_v3  ;;  %v5739_v19 = vmul.f32 %v9599_v25, %v5717_v41 }
 0x336   : > { %v5722_v60 = vadd.f32 %v6880_v4, %v5476_v39  ;;  %v5669_v6 = vpop.f32.mrf.mxu1  ;;  %v5480_v39 = vadd.f32 %v9589_v23, %v5122_v62  ;;  %v6870_v4 = vpop.f32.mrf.mxu0  ;;  %v5121_v51 = vadd.f32 %v9523_v40, %v4867_v54  ;;  %v5478_v55 = vadd.f32 %v9613_v17, %v5120_v50 }
 0x337   : > { %v5842_v38 = vmax.f32 %v5826_v24, 0.0  ;;  %v5824_v33 = vadd.f32 %v10029_v34, %v5776_v18  ;;  %v5779_v43 = vmax.f32 %v5763_v0, 0.0  ;;  %v5761_v63 = vadd.f32 %v9611_v16, %v5739_v19 }
 0x338   : > { %v5744_v56 = vmul.f32 %v9599_v25, %v5722_v60  ;;  %v5720_v27 = vadd.f32 %v5669_v6, %v5474_v61  ;;  %v6881_v30 = vpop.f32.mrf.mxu1  ;;  %v5126_v42 = vadd.f32 %v9539_v31, %v4872_v49  ;;  %v10034_v61 = vunpack.c.l.bf16 %v9505_v9 }
 0x339   : > { %5858 = vst.msk [vmem:[%s9650_s13 + $0x10] sm:$0xff] %vm645_vm7, %v5842_v38  ;;  %v5840_v46 = vmax.f32 %v5824_v33, 0.0  ;;  %v5827_v20 = vadd.f32 %v10031_v37, %v5779_v43  ;;  %v5777_v3 = vmax.f32 %v5761_v63, 0.0  ;;  %v5723_v41 = vadd.f32 %v6881_v30, %v5477_v45  ;;  %v5455_v38 = vpop.f32.mrf.mxu0 }
 0x33a   : > { %v5766_v58 = vadd.f32 %v9611_v16, %v5744_v56  ;;  %v5742_v59 = vmul.f32 %v9599_v25, %v5720_v27  ;;  %v5672_v7 = vpop.f32.mrf.mxu1  ;;  %v5481_v45 = vadd.f32 %v6867_v52, %v5123_v13  ;;  %v5124_v63 = vadd.f32 %v9558_v35, %v9629_v29 }
 0x33b   : > { %5856 = vst.msk [vmem:[%s9650_s13] sm:$0xff] %vm645_vm7, %v5840_v46  ;;  %v5843_v2 = vmax.f32 %v5827_v20, 0.0  ;;  %v5825_v53 = vadd.f32 %v10033_v26, %v5777_v3  ;;  %v5745_v22 = vmul.f32 %v9599_v25, %v5723_v41  ;;  %v5721_v24 = vadd.f32 %v5672_v7, %v5475_v12 }
 0x33c   : > { %v5782_v18 = vmax.f32 %v5766_v58, 0.0  ;;  %v5764_v0 = vadd.f32 %v9611_v16, %v5742_v59  ;;  %v6884_v19 = vpop.f32.mrf.mxu1  ;;  %v10035_v49 = vunpack.c.l.bf16 %v9508_v36  ;;  %v5479_v56 = vadd.f32 %v5442_v21, %v5121_v51  ;;  %v6871_v21 = vpop.f32.mrf.mxu0 }
 0x33d   : > { %5859 = vst.msk [vmem:[%s9650_s13 + $0x18] sm:$0xff] %vm645_vm7, %v5843_v2  ;;  %v5841_v23 = vmax.f32 %v5825_v53, 0.0  ;;  %v5767_v62 = vadd.f32 %v9611_v16, %v5745_v22  ;;  %v5743_v5 = vmul.f32 %v9599_v25, %v5721_v24  ;;  %v5726_v60 = vadd.f32 %v6884_v19, %v5480_v39  ;;  %v6403_v2 = vld [vmem:[%s7032_s15 + $0x38] sm:$0xff]   ;;  %v6402_v19 = vld [vmem:[%s7032_s15 + $0x30] sm:$0xff]  }
 0x33e   : > { %v5830_v40 = vadd.f32 %v10034_v61, %v5782_v18  ;;  %v5780_v54 = vmax.f32 %v5764_v0, 0.0  ;;  %v5685_v6 = vpop.f32.mrf.mxu1  ;;  %v10036_v52 = vunpack.c.h.bf16 %v9505_v9  ;;  %v5127_v37 = vadd.f32 %v9571_v11, %v9636_v28  ;;  %v5458_v24 = vpop.f32.mrf.mxu0 }
 0x33f   : > { %5857 = vst.msk [vmem:[%s9650_s13 + $0x8] sm:$0xff] %vm645_vm7, %v5841_v23  ;;  %v5783_v17 = vmax.f32 %v5767_v62, 0.0  ;;  %v5765_v34 = vadd.f32 %v9611_v16, %v5743_v5  ;;  %v5748_v33 = vmul.f32 %v9599_v25, %v5726_v60  ;;  %v5724_v43 = vadd.f32 %v5685_v6, %v5478_v55 }
 0x340   : > { %v5846_v31 = vmax.f32 %v5830_v40, 0.0  ;;  %v5828_v15 = vadd.f32 %v10035_v49, %v5780_v54  ;;  %v6885_v50 = vpop.f32.mrf.mxu1  ;;  %v5484_v3 = vadd.f32 %v6870_v4, %v5126_v42  ;;  %v5125_v58 = vadd.f32 %v9584_v8, %v9639_v10 }
 0x341   : > { %v5831_v27 = vadd.f32 %v10036_v52, %v5783_v17  ;;  %v5781_v30 = vmax.f32 %v5765_v34, 0.0  ;;  %v5770_v12 = vadd.f32 %v9611_v16, %v5748_v33  ;;  %v5746_v46 = vmul.f32 %v9599_v25, %v5724_v43 }
 0x342   : > { %5862 = vst.msk [vmem:[%s9650_s13 + $0x30] sm:$0xff] %vm645_vm7, %v5846_v31  ;;  %v5844_v35 = vmax.f32 %v5828_v15, 0.0  ;;  %v5727_v29 = vadd.f32 %v6885_v50, %v5481_v45  ;;  %v5688_v20 = vpop.f32.mrf.mxu1  ;;  %v5482_v7 = vadd.f32 %v5455_v38, %v5124_v63  ;;  %v6384_v26 = vunpack.c.h.bf16 %v9521_v32 }
 0x343   : > { %v5847_v9 = vmax.f32 %v5831_v27, 0.0  ;;  %v5829_v41 = vadd.f32 %v6376_v57, %v5781_v30  ;;  %v5786_v1 = vmax.f32 %v5770_v12, 0.0  ;;  %v5768_v13 = vadd.f32 %v9611_v16, %v5746_v46 }
 0x344   : > { %5860 = vst.msk [vmem:[%s9650_s13 + $0x20] sm:$0xff] %vm645_vm7, %v5844_v35  ;;  %v5749_v11 = vmul.f32 %v9599_v25, %v5727_v29  ;;  %v5725_v28 = vadd.f32 %v5688_v20, %v5479_v56  ;;  %v6888_v59 = vpop.f32.mrf.mxu1  ;;  %v5485_v22 = vadd.f32 %v6871_v21, %v5127_v37  ;;  %v6395_v62 = vunpack.c.l.bf16 %v6403_v2 }
 0x345   : > { %5863 = vst.msk [vmem:[%s9650_s13 + $0x38] sm:$0xff] %vm645_vm7, %v5847_v9  ;;  %v5845_v39 = vmax.f32 %v5829_v41, 0.0  ;;  %v5834_v36 = vadd.f32 %v6387_v48, %v5786_v1  ;;  %v5784_v57 = vmax.f32 %v5768_v13, 0.0  ;;  %v5730_v4 = vadd.f32 %v6888_v59, %v5484_v3 }
 0x346   : > { %v5771_v8 = vadd.f32 %v9611_v16, %v5749_v11  ;;  %v5747_v10 = vmul.f32 %v9599_v25, %v5725_v28  ;;  %v5701_v53 = vpop.f32.mrf.mxu1  ;;  %v5483_v60 = vadd.f32 %v5458_v24, %v5125_v58  ;;  %v6391_v6 = vunpack.c.l.bf16 %v6402_v19 }
 0x347   : > { %5861 = vst.msk [vmem:[%s9650_s13 + $0x28] sm:$0xff] %vm645_vm7, %v5845_v39  ;;  %v5850_v51 = vmax.f32 %v5834_v36, 0.0  ;;  %v5832_v18 = vadd.f32 %v6383_v44, %v5784_v57  ;;  %v5752_v48 = vmul.f32 %v9599_v25, %v5730_v4  ;;  %v5728_v0 = vadd.f32 %v5701_v53, %v5482_v7 }
 0x348   : > { %v5787_v55 = vmax.f32 %v5771_v8, 0.0  ;;  %v5769_v23 = vadd.f32 %v9611_v16, %v5747_v10  ;;  %v6889_v5 = vpop.f32.mrf.mxu1  ;;  %v6396_v31 = vunpack.c.h.bf16 %v6403_v2  ;;  %v6392_v56 = vunpack.c.h.bf16 %v6402_v19 }
 0x349   : > { %5866 = vst.msk [vmem:[%s9650_s13 + $0x50] sm:$0xff] %vm645_vm7, %v5850_v51  ;;  %v5848_v42 = vmax.f32 %v5832_v18, 0.0  ;;  %v5774_v61 = vadd.f32 %v9611_v16, %v5752_v48  ;;  %v5750_v40 = vmul.f32 %v9599_v25, %v5728_v0  ;;  %v5731_v32 = vadd.f32 %v6889_v5, %v5485_v22 }
 0x34a   : > { %v5835_v44 = vadd.f32 %v6388_v47, %v5787_v55  ;;  %v5785_v54 = vmax.f32 %v5769_v23, 0.0  ;;  %v5704_v45 = vpop.f32.mrf.mxu1 }
 0x34b   : > { %5864 = vst.msk [vmem:[%s9650_s13 + $0x40] sm:$0xff] %vm645_vm7, %v5848_v42  ;;  %v5790_v38 = vmax.f32 %v5774_v61, 0.0  ;;  %v5772_v17 = vadd.f32 %v9611_v16, %v5750_v40  ;;  %v5753_v34 = vmul.f32 %v9599_v25, %v5731_v32  ;;  %v5729_v33 = vadd.f32 %v5704_v45, %v5483_v60 }
 0x34c   : > { %v5851_v43 = vmax.f32 %v5835_v44, 0.0  ;;  %v5833_v63 = vadd.f32 %v6384_v26, %v5785_v54 }
 0x34d   : > { %v5838_v49 = vadd.f32 %v6395_v62, %v5790_v38  ;;  %v5788_v14 = vmax.f32 %v5772_v17, 0.0  ;;  %v5775_v47 = vadd.f32 %v9611_v16, %v5753_v34  ;;  %v5751_v15 = vmul.f32 %v9599_v25, %v5729_v33 }
 0x34e   : > { %5867 = vst.msk [vmem:[%s9650_s13 + $0x58] sm:$0xff] %vm645_vm7, %v5851_v43  ;;  %v5849_v50 = vmax.f32 %v5833_v63, 0.0 }
 0x34f   : > { %v5854_v52 = vmax.f32 %v5838_v49, 0.0  ;;  %v5836_v27 = vadd.f32 %v6391_v6, %v5788_v14  ;;  %v5791_v30 = vmax.f32 %v5775_v47, 0.0  ;;  %v5773_v12 = vadd.f32 %v9611_v16, %v5751_v15 }
 0x350   : > { %5865 = vst.msk [vmem:[%s9650_s13 + $0x48] sm:$0xff] %vm645_vm7, %v5849_v50 }
 0x351   : > { %5870 = vst.msk [vmem:[%s9650_s13 + $0x70] sm:$0xff] %vm645_vm7, %v5854_v52  ;;  %v5852_v46 = vmax.f32 %v5836_v27, 0.0  ;;  %v5839_v37 = vadd.f32 %v6396_v31, %v5791_v30  ;;  %v5789_v35 = vmax.f32 %v5773_v12, 0.0 }
 0x353   : > { %5868 = vst.msk [vmem:[%s9650_s13 + $0x60] sm:$0xff] %vm645_vm7, %v5852_v46  ;;  %v5855_v25 = vmax.f32 %v5839_v37, 0.0  ;;  %v5837_v29 = vadd.f32 %v6392_v56, %v5789_v35 }
 0x355   : > { %5871 = vst.msk [vmem:[%s9650_s13 + $0x78] sm:$0xff] %vm645_vm7, %v5855_v25  ;;  %v5853_v20 = vmax.f32 %v5837_v29, 0.0 }
 0x357   : > { %5869 = vst.msk [vmem:[%s9650_s13 + $0x68] sm:$0xff] %vm645_vm7, %v5853_v20 }
 0x358 PF: > { %s17_s24 = sadd.s32 1, %s6940_s24  }
 0x359   : > { %p14_p4 = scmp.ge.s32.totalorder %s17_s24, 6  }
 0x35b   :  { %16 = sbr.rel (!%p14_p4) target bundleno = 1 (0x1), region = 94 }

</bundles_post_ra>
